<compile_context>
chip_gen: v7x
topology: tpu7x:2x2x1
jax: 0.10.0
libtpu: 0.0.40
codegen_flags: <defaults>
</compile_context>

<pallas_src>
import functools

import jax
import jax.numpy as jnp
from jax.experimental import pallas as pl
from jax.experimental.pallas import tpu as pltpu


def _stage4_kernel(seed_ref, x_ref, w_ref, b_ref, o_ref, *, apply_dropout):
    """Fused ReLU + dropout(p=0.5, inverted scaling) + matmul + bias (full K)."""
    tm, k = x_ref.shape

    # --- ReLU ---
    x = jnp.maximum(x_ref[...], 0.0)

    # --- Dropout p=0.5 (training mode): portable hash-based mask -------------
    if apply_dropout:
        i = pl.program_id(0)
        rows = jax.lax.broadcasted_iota(jnp.int32, (tm, k), 0) + i * tm
        cols = jax.lax.broadcasted_iota(jnp.int32, (tm, k), 1)
        gid = rows * k + cols                      # global element index
        h = gid.astype(jnp.uint32) ^ seed_ref[0].astype(jnp.uint32)
        # murmur3 fmix32 finalizer
        h = h ^ (h >> 16)
        h = h * jnp.uint32(0x85EBCA6B)
        h = h ^ (h >> 13)
        h = h * jnp.uint32(0xC2B2AE35)
        h = h ^ (h >> 16)
        keep = h.astype(jnp.int32) < 0             # high bit -> p_keep = 0.5
        # inverted dropout: keep -> x / (1 - p) = 2x, drop -> 0
        x = jnp.where(keep, x + x, 0.0)

    # --- Linear: whole 4096-wide reduction in one MXU call, lane-dense store --
    o_ref[...] = (
        jnp.dot(x, w_ref[...], preferred_element_type=jnp.float32) + b_ref[...]
    ).astype(o_ref.dtype)


@functools.partial(jax.jit, static_argnames=("tm", "training"))
def stage4_forward(x, w, b, seed, *, tm=64, training=True):
    """x: [N, K] features, w: [K, M] (torch Linear weight transposed), b: [M],
    seed: [1] int32 -> [N, M]."""
    N, K = x.shape
    Kw, M = w.shape
    assert Kw == K
    assert K % 128 == 0

    # Lane-dense output: pad out_features to a multiple of 128.
    Mp = ((M + 127) // 128) * 128
    # Pad rows to a multiple of tm (real point counts are not multiples of 128).
    Np = ((N + tm - 1) // tm) * tm

    x_p = jnp.pad(x, ((0, Np - N), (0, 0))) if Np != N else x
    w_p = jnp.pad(w, ((0, 0), (0, Mp - M))) if Mp != M else w
    b_p = jnp.pad(b, (0, Mp - M)).reshape(1, Mp)

    grid = (Np // tm,)
    kernel = functools.partial(_stage4_kernel, apply_dropout=training)

    out = pl.pallas_call(
        kernel,
        out_shape=jax.ShapeDtypeStruct((Np, Mp), x.dtype),
        grid_spec=pltpu.PrefetchScalarGridSpec(
            num_scalar_prefetch=1,                              # dropout seed in SMEM
            grid=grid,
            in_specs=[
                pl.BlockSpec((tm, K), lambda i, seed: (i, 0)),   # x row tile (full K)
                pl.BlockSpec((K, Mp), lambda i, seed: (0, 0)),   # weight, VMEM-resident
                pl.BlockSpec((1, Mp), lambda i, seed: (0, 0)),   # bias, VMEM-resident
            ],
            out_specs=pl.BlockSpec((tm, Mp), lambda i, seed: (i, 0)),
        ),
        compiler_params=pltpu.CompilerParams(
            dimension_semantics=("parallel",)
        ),
    )(seed, x_p, w_p, b_p)

    return out[:N, :M]


if __name__ == "__main__":
    # Deterministic synthetic inputs (no checkpoint load).
    IN_FEATURES = 4096   # fixed by the Linear layer
    OUT_FEATURES = 40
    N_POINTS = 128       # rows of the sparse-tensor feature matrix

    key = jax.random.PRNGKey(0)
    kx, kw, kb = jax.random.split(key, 3)

    x = jax.random.normal(kx, (N_POINTS, IN_FEATURES), dtype=jnp.float32)
    # torch.nn.Linear weight is [out, in]; we store its transpose [in, out].
    bound = 1.0 / (IN_FEATURES ** 0.5)
    w = jax.random.uniform(kw, (IN_FEATURES, OUT_FEATURES), jnp.float32,
                           minval=-bound, maxval=bound)
    b = jax.random.uniform(kb, (OUT_FEATURES,), jnp.float32,
                           minval=-bound, maxval=bound)
    seed = jnp.array([0], dtype=jnp.int32)

    # training=True matches a freshly constructed torch module (dropout active).
    # TODO(synk): in eval mode pass training=False (dropout becomes identity).
    out = stage4_forward(x, w, b, seed, training=True)
    jax.block_until_ready(out)
    assert out.shape == (N_POINTS, OUT_FEATURES)
    assert out.dtype == jnp.float32
    print("KERNEL_OK")
</pallas_src>

<mosaic_0001>
module attributes {stable_mosaic.version = 11 : i64} {
  func.func @_stage4_kernel(%arg0: i32, %arg1: memref<1xi32, #tpu.memory_space<smem>>, %arg2: memref<64x4096xf32, #tpu.memory_space<vmem>>, %arg3: memref<4096x128xf32, #tpu.memory_space<vmem>>, %arg4: memref<1x128xf32, #tpu.memory_space<vmem>>, %arg5: memref<64x128xf32, #tpu.memory_space<vmem>>) attributes {dimension_semantics = [#tpu.dimension_semantics<parallel>], iteration_bounds = array<i64: 2>, scalar_prefetch = 1 : i64, scratch_operands = 0 : i64, tpu.core_type = #tpu.core_type<tc>, window_params = [{transform_indices = @transform_0, window_bounds = array<i64: 64, 4096>}, {pipeline_mode = #tpu.pipeline_mode<synchronous>, transform_indices = @transform_1, window_bounds = array<i64: 4096, 128>}, {pipeline_mode = #tpu.pipeline_mode<synchronous>, transform_indices = @transform_2, window_bounds = array<i64: 1, 128>}, {transform_indices = @transform_3, window_bounds = array<i64: 64, 128>}]} {
    %c0 = arith.constant 0 : index
    %c0_0 = arith.constant 0 : index
    %0 = vector.load %arg2[%c0, %c0_0] : memref<64x4096xf32, #tpu.memory_space<vmem>>, vector<64x4096xf32>
    %cst = arith.constant 0.000000e+00 : f32
    %1 = vector.broadcast %cst : f32 to vector<64x4096xf32>
    %2 = arith.maximumf %0, %1 : vector<64x4096xf32>
    %3 = tpu.iota {dimensions = array<i32: 0>} : vector<64x4096xi32>
    %c64_i32 = arith.constant 64 : i32
    %4 = arith.muli %arg0, %c64_i32 : i32
    %5 = vector.broadcast %4 : i32 to vector<64x4096xi32>
    %6 = arith.addi %3, %5 : vector<64x4096xi32>
    %7 = tpu.iota {dimensions = array<i32: 1>} : vector<64x4096xi32>
    %c4096_i32 = arith.constant 4096 : i32
    %8 = vector.broadcast %c4096_i32 : i32 to vector<64x4096xi32>
    %9 = arith.muli %6, %8 : vector<64x4096xi32>
    %10 = arith.addi %9, %7 : vector<64x4096xi32>
    %c0_1 = arith.constant 0 : index
    %11 = memref.load %arg1[%c0_1] : memref<1xi32, #tpu.memory_space<smem>>
    %12 = vector.broadcast %11 : i32 to vector<64x4096xi32>
    %13 = arith.xori %10, %12 : vector<64x4096xi32>
    %c16_i32 = arith.constant 16 : i32
    %14 = vector.broadcast %c16_i32 : i32 to vector<64x4096xi32>
    %15 = arith.shrui %13, %14 : vector<64x4096xi32>
    %16 = arith.xori %13, %15 : vector<64x4096xi32>
    %c-2048144789_i32 = arith.constant -2048144789 : i32
    %17 = vector.broadcast %c-2048144789_i32 : i32 to vector<64x4096xi32>
    %18 = arith.muli %16, %17 : vector<64x4096xi32>
    %c13_i32 = arith.constant 13 : i32
    %19 = vector.broadcast %c13_i32 : i32 to vector<64x4096xi32>
    %20 = arith.shrui %18, %19 : vector<64x4096xi32>
    %21 = arith.xori %18, %20 : vector<64x4096xi32>
    %c-1028477387_i32 = arith.constant -1028477387 : i32
    %22 = vector.broadcast %c-1028477387_i32 : i32 to vector<64x4096xi32>
    %23 = arith.muli %21, %22 : vector<64x4096xi32>
    %c16_i32_2 = arith.constant 16 : i32
    %24 = vector.broadcast %c16_i32_2 : i32 to vector<64x4096xi32>
    %25 = arith.shrui %23, %24 : vector<64x4096xi32>
    %26 = arith.xori %23, %25 : vector<64x4096xi32>
    %c0_i32 = arith.constant 0 : i32
    %27 = vector.broadcast %c0_i32 : i32 to vector<64x4096xi32>
    %28 = arith.cmpi slt, %26, %27 : vector<64x4096xi32>
    %29 = arith.addf %2, %2 : vector<64x4096xf32>
    %cst_3 = arith.constant 0.000000e+00 : f32
    %30 = vector.broadcast %cst_3 : f32 to vector<64x4096xf32>
    %31 = arith.select %28, %29, %30 : vector<64x4096xi1>, vector<64x4096xf32>
    %c0_4 = arith.constant 0 : index
    %c0_5 = arith.constant 0 : index
    %32 = vector.load %arg3[%c0_4, %c0_5] : memref<4096x128xf32, #tpu.memory_space<vmem>>, vector<4096x128xf32>
    %cst_6 = arith.constant dense<0.000000e+00> : vector<64x128xf32>
    %33 = tpu.matmul %31, %32, %cst_6 {dimension_numbers = #tpu.dot_dimension_numbers<[1], [0], [0], [1], [0, 0, 1, 1], [], []>} : vector<64x4096xf32>, vector<4096x128xf32>, vector<64x128xf32> -> vector<64x128xf32>
    %c0_7 = arith.constant 0 : index
    %c0_8 = arith.constant 0 : index
    %34 = vector.load %arg4[%c0_7, %c0_8] : memref<1x128xf32, #tpu.memory_space<vmem>>, vector<1x128xf32>
    %35 = vector.broadcast %34 : vector<1x128xf32> to vector<64x128xf32>
    %36 = arith.addf %33, %35 : vector<64x128xf32>
    %c0_9 = arith.constant 0 : index
    %c0_10 = arith.constant 0 : index
    %37 = vector.load %arg5[%c0_9, %c0_10] : memref<64x128xf32, #tpu.memory_space<vmem>>, vector<64x128xf32>
    tpu.vector_store %arg5[%c0_9, %c0_10], %36 {strides = array<i32>} : memref<64x128xf32, #tpu.memory_space<vmem>>, vector<64x128xf32>,
    return
  }
  func.func @transform_0(%arg0: i32, %arg1: memref<1xi32, #tpu.memory_space<smem>>) -> (i32, i32) {
    %c0_i32 = arith.constant 0 : i32
    %c0_i32_0 = arith.constant 0 : i32
    return %arg0, %c0_i32 : i32, i32
  }
  func.func @transform_1(%arg0: i32, %arg1: memref<1xi32, #tpu.memory_space<smem>>) -> (i32, i32) {
    %c0_i32 = arith.constant 0 : i32
    %c0_i32_0 = arith.constant 0 : i32
    %c0_i32_1 = arith.constant 0 : i32
    return %c0_i32, %c0_i32_0 : i32, i32
  }
  func.func @transform_2(%arg0: i32, %arg1: memref<1xi32, #tpu.memory_space<smem>>) -> (i32, i32) {
    %c0_i32 = arith.constant 0 : i32
    %c0_i32_0 = arith.constant 0 : i32
    %c0_i32_1 = arith.constant 0 : i32
    return %c0_i32, %c0_i32_0 : i32, i32
  }
  func.func @transform_3(%arg0: i32, %arg1: memref<1xi32, #tpu.memory_space<smem>>) -> (i32, i32) {
    %c0_i32 = arith.constant 0 : i32
    %c0_i32_0 = arith.constant 0 : i32
    return %arg0, %c0_i32 : i32, i32
  }
}

</mosaic_0001>

<bundles_post_ra>
// kernel: stage4_forward.1
= control target key start
LH: loop header
LB: loop body
LE: loop exit
PB: predicated region body
PF: predicated region fallthrough
CT: control target
= control target key end

     0   :  { %s8068_s17 = smov 0   ;;  %s12565_s0 = inlined_call_operand.<no memory space> [shape: s32[1], index: 0, kind: input, shape index: {}]   ;;  %s12566_s1 = inlined_call_operand.vmem [shape: f32[128,4096], index: 1, kind: input, shape index: {}]   ;;  %s12567_s2 = inlined_call_operand.vmem [shape: f32[4096,128], index: 2, kind: input, shape index: {}]   ;;  %s12568_s3 = inlined_call_operand.vmem [shape: f32[1,128], index: 3, kind: input, shape index: {}]   ;;  %s12569_s4 = inlined_call_operand.vmem [shape: f32[128,128], index: 4, kind: output, shape index: {}]  }
   0x1   :  { %9 = sst [smem:[#allocation3]] %s12565_s0 }
   0x2 LB: > { %s6344_s18 = sadd.s32 4294967295, %s8038_s17   ;;  %p6348_p0 = scmp.ge.s32.totalorder %s8038_s17, 1  ;;  %s8038_s17 = sphi %s8068_s17, %s15_s17  }
   0x3   : > { %p141_p1 = scmp.lt.s32.totalorder %s8038_s17, 3 }
   0x5   : > { %p142_p2 = pnand %p6348_p0, %p141_p1 }
   0x7   : > { %145 = sbr.rel (%p142_p2) target bundleno = 1179 (0x49b), region = 32 }
   0xe   : > { %v4097_v0 = vld [vmem:[%s12567_s2 + $0x80] sm:$0xff]  ;;  %v4098_v1 = vld [vmem:[%s12567_s2 + $0x88] sm:$0xff]  ;;  %v691_v3 = vlaneseq  ;;  %s6354_s24 = sshll.u32 %s6344_s18, 6  ;;  %s8096_s5 = sld [smem:[#allocation3]]  ;;  %v4099_v13 = vld [vmem:[%s12567_s2 + $0x90] sm:$0xff] }
   0xf   : > { %v4081_v2 = vld [vmem:[%s12567_s2] sm:$0xff]  ;;  %v7511_v4 = vpack.c.bf16 %v4098_v1, %v4097_v0  ;;  %v4082_v5 = vld [vmem:[%s12567_s2 + $0x8] sm:$0xff]  ;;  %v8094_v8 = vstv %s6354_s24  ;;  %v4100_v17 = vld [vmem:[%s12567_s2 + $0x98] sm:$0xff]  ;;  %s8120_s20 = sshll.u32 %s6344_s18, 3 }
  0x10   : > { %v4129_v6 = vld [vmem:[%s12567_s2 + $0x180] sm:$0xff]  ;;  %v4130_v7 = vld [vmem:[%s12567_s2 + $0x188] sm:$0xff]  ;;  %v7513_v9 = vpack.c.bf16 %v4082_v5, %v4081_v2  ;;  %v8107_v14 = vshrl.u32 %v691_v3, 7  ;;  %v8109_v15 = vand.u32 127, %v691_v3  ;;  %v4083_v18 = vld [vmem:[%s12567_s2 + $0x10] sm:$0xff]  ;;  %v7515_v20 = vpack.c.bf16 %v4100_v17, %v4099_v13  ;;  %p167_p3 = scmp.lt.s32.totalorder %s8120_s20, 15 }
  0x11   : > { %v7543_v10 = vpack.c.bf16 %v4130_v7, %v4129_v6  ;;  %v4113_v11 = vld [vmem:[%s12567_s2 + $0x100] sm:$0xff]  ;;  %v4114_v12 = vld [vmem:[%s12567_s2 + $0x108] sm:$0xff]  ;;  %7512 = vmatprep.subr.bf16.mxu0 %v7511_v4  ;;  %v4084_v19 = vld [vmem:[%s12567_s2 + $0x18] sm:$0xff] }
  0x12   : > { %v7545_v16 = vpack.c.bf16 %v4114_v12, %v4113_v11  ;;  %7514 = vmatpush3.bf16.msra.mxu0 %v7513_v9  ;;  %v7517_v21 = vpack.c.bf16 %v4084_v19, %v4083_v18  ;;  %v4131_v22 = vld [vmem:[%s12567_s2 + $0x190] sm:$0xff]  ;;  %v4132_v23 = vld [vmem:[%s12567_s2 + $0x198] sm:$0xff]  ;;  %v702_v25 = vadd.s32 %v8094_v8, %v8107_v14  ;;  %v8134_v26 = vadd.s32 128, %v8109_v15  ;;  %v4101_v29 = vld [vmem:[%s12567_s2 + $0xa0] sm:$0xff]  ;;  %s12860_s20 = smov (!%p167_p3, %s8120_s20), 15 }
  0x13   : > { %7544 = vmatprep.subr.bf16.mxu1 %v7543_v10  ;;  %v4115_v24 = vld [vmem:[%s12567_s2 + $0x110] sm:$0xff]  ;;  %v7547_v27 = vpack.c.bf16 %v4132_v23, %v4131_v22  ;;  %v4116_v28 = vld [vmem:[%s12567_s2 + $0x118] sm:$0xff]  ;;  %v4102_v30 = vld [vmem:[%s12567_s2 + $0xa8] sm:$0xff]  ;;  %v8146_v31 = vadd.s32 384, %v8109_v15  ;;  %v8149_v32 = vadd.s32 256, %v8109_v15  ;;  %7516 = vmatprep.subr.bf16.mxu0 %v7515_v20  ;;  %v693_v39 = vadd.s32 8, %v8107_v14 }
  0x14   : > { %7546 = vmatpush3.bf16.msra.mxu1 %v7545_v16  ;;  %v7549_v33 = vpack.c.bf16 %v4116_v28, %v4115_v24  ;;  %v7519_v34 = vpack.c.bf16 %v4102_v30, %v4101_v29  ;;  %v4085_v35 = vld [vmem:[%s12567_s2 + $0x20] sm:$0xff]  ;;  %v4086_v36 = vld [vmem:[%s12567_s2 + $0x28] sm:$0xff]  ;;  %v8161_v38 = vmul.u32 4096, %v702_v25  ;;  %v8174_v44 = vstv %s8096_s5  ;;  %v4103_v49 = vld [vmem:[%s12567_s2 + $0xb0] sm:$0xff]  ;;  %s6614_s10 = sshll.u32 %s12860_s20, 8 }
  0x15   : > { %v4133_v37 = vld [vmem:[%s12567_s2 + $0x1a0] sm:$0xff]  ;;  %7548 = vmatprep.subr.bf16.mxu1 %v7547_v27  ;;  %v7521_v40 = vpack.c.bf16 %v4086_v36, %v4085_v35  ;;  %v4134_v41 = vld [vmem:[%s12567_s2 + $0x1a8] sm:$0xff]  ;;  %v8177_v45 = vadd.s32 16, %v8107_v14  ;;  %v8180_v46 = vadd.s32 24, %v8107_v14  ;;  %v4104_v50 = vld [vmem:[%s12567_s2 + $0xb8] sm:$0xff]  ;;  %v8209_v60 = vadd.s32 32, %v8107_v14  ;;  %s8346_s6 = scalar_lea.vmem %s12566_s1, %s6614_s10 }
  0x16   : > { %v4117_v42 = vld [vmem:[%s12567_s2 + $0x120] sm:$0xff]  ;;  %v4118_v43 = vld [vmem:[%s12567_s2 + $0x128] sm:$0xff]  ;;  %7518 = vmatpush3.bf16.msra.mxu0 %v7517_v21  ;;  %v7551_v47 = vpack.c.bf16 %v4134_v41, %v4133_v37  ;;  %v4087_v51 = vld [vmem:[%s12567_s2 + $0x30] sm:$0xff]  ;;  %v752_v52 = vadd.s32 %v8161_v38, %v8134_v26  ;;  %v751_v53 = vadd.s32 %v8161_v38, %v8109_v15  ;;  %v7523_v54 = vpack.c.bf16 %v4104_v50, %v4103_v49 }
  0x17   : > { %v7553_v48 = vpack.c.bf16 %v4118_v43, %v4117_v42  ;;  %7520 = vmatprep.subr.bf16.mxu0 %v7519_v34  ;;  %v4088_v55 = vld [vmem:[%s12567_s2 + $0x38] sm:$0xff]  ;;  %v4135_v56 = vld [vmem:[%s12567_s2 + $0x1b0] sm:$0xff]  ;;  %v754_v58 = vadd.s32 %v8161_v38, %v8146_v31  ;;  %v753_v59 = vadd.s32 %v8161_v38, %v8149_v32  ;;  %v4105_v1 = vld [vmem:[%s12567_s2 + $0xc0] sm:$0xff]  ;;  %v703_v11 = vadd.s32 %v8094_v8, %v693_v39 }
  0x18   : > { %7550 = vmatpush3.bf16.msra.mxu1 %v7549_v33  ;;  %v4136_v57 = vld [vmem:[%s12567_s2 + $0x1b8] sm:$0xff]  ;;  %v7525_v61 = vpack.c.bf16 %v4088_v55, %v4087_v51  ;;  %v4119_v63 = vld [vmem:[%s12567_s2 + $0x130] sm:$0xff]  ;;  %v1010_v2 = vxor.u32 %v8174_v44, %v752_v52  ;;  %v1009_v3 = vxor.u32 %v8174_v44, %v751_v53  ;;  %v4106_v5 = vld [vmem:[%s12567_s2 + $0xc8] sm:$0xff] }
  0x19   : > { %7552 = vmatprep.subr.bf16.mxu1 %v7551_v47  ;;  %v7555_v62 = vpack.c.bf16 %v4136_v57, %v4135_v56  ;;  %v4120_v0 = vld [vmem:[%s12567_s2 + $0x138] sm:$0xff]  ;;  %v8233_v6 = vld [vmem:[%s12567_s2 + $0x40] sm:$0xff]  ;;  %v8238_v7 = vld [vmem:[%s12567_s2 + $0x48] sm:$0xff]  ;;  %v1012_v9 = vxor.u32 %v8174_v44, %v754_v58  ;;  %v1011_v10 = vxor.u32 %v8174_v44, %v753_v59  ;;  %v7527_v12 = vpack.c.bf16 %v4106_v5, %v4105_v1 }
  0x1a   : > { %v7557_v4 = vpack.c.bf16 %v4120_v0, %v4119_v63  ;;  %7522 = vmatpush3.bf16.msra.mxu0 %v7521_v40  ;;  %v7529_v13 = vpack.c.bf16 %v8238_v7, %v8233_v6  ;;  %v4137_v16 = vld [vmem:[%s12567_s2 + $0x1c0] sm:$0xff]  ;;  %v4138_v17 = vld [vmem:[%s12567_s2 + $0x1c8] sm:$0xff]  ;;  %v1266_v19 = vshrl.u32 %v1010_v2, 16  ;;  %v1265_v20 = vshrl.u32 %v1009_v3, 16  ;;  %v8264_v23 = vld [vmem:[%s12567_s2 + $0xd0] sm:$0xff] }
  0x1b   : > { %v8254_v18 = vld [vmem:[%s12567_s2 + $0x140] sm:$0xff]  ;;  %7524 = vmatprep.subr.bf16.mxu0 %v7523_v54  ;;  %v7559_v21 = vpack.c.bf16 %v4138_v17, %v4137_v16  ;;  %v8259_v22 = vld [vmem:[%s12567_s2 + $0x148] sm:$0xff]  ;;  %v4108_v24 = vld [vmem:[%s12567_s2 + $0xd8] sm:$0xff]  ;;  %v1268_v25 = vshrl.u32 %v1012_v9, 16  ;;  %v1267_v27 = vshrl.u32 %v1011_v10, 16  ;;  %v8269_v28 = vmul.u32 4096, %v703_v11 }
  0x1c   : > { %7554 = vmatpush3.bf16.msra.mxu1 %v7553_v48  ;;  %v7561_v29 = vpack.c.bf16 %v8259_v22, %v8254_v18  ;;  %v7531_v30 = vpack.c.bf16 %v4108_v24, %v8264_v23  ;;  %v8277_v33 = vld [vmem:[%s12567_s2 + $0x50] sm:$0xff]  ;;  %v8282_v34 = vld [vmem:[%s12567_s2 + $0x58] sm:$0xff]  ;;  %v1522_v36 = vxor.u32 %v1266_v19, %v1010_v2  ;;  %v1521_v37 = vxor.u32 %v1265_v20, %v1009_v3  ;;  %v8312_v51 = vld [vmem:[%s12567_s2 + $0xe0] sm:$0xff] }
  0x1d   : > { %7556 = vmatprep.subr.bf16.mxu1 %v7555_v62  ;;  %v4139_v35 = vld [vmem:[%s12567_s2 + $0x1d0] sm:$0xff]  ;;  %v7533_v39 = vpack.c.bf16 %v8282_v34, %v8277_v33  ;;  %v4140_v40 = vld [vmem:[%s12567_s2 + $0x1d8] sm:$0xff]  ;;  %v1524_v43 = vxor.u32 %v1268_v25, %v1012_v9  ;;  %v8303_v47 = vxor.u32 %v1267_v27, %v1011_v10  ;;  %v784_v48 = vadd.s32 %v8269_v28, %v8134_v26  ;;  %v8317_v52 = vld [vmem:[%s12567_s2 + $0xe8] sm:$0xff] }
  0x1e   : > { %v8296_v41 = vld [vmem:[%s12567_s2 + $0x150] sm:$0xff]  ;;  %v8301_v42 = vld [vmem:[%s12567_s2 + $0x158] sm:$0xff]  ;;  %7526 = vmatpush3.bf16.msra.mxu0 %v7525_v61  ;;  %v7563_v49 = vpack.c.bf16 %v4140_v40, %v4139_v35  ;;  %v8322_v53 = vld [vmem:[%s12567_s2 + $0x60] sm:$0xff]  ;;  %v1778_v54 = vmul.u32 2246822507, %v1522_v36  ;;  %v783_v55 = vadd.s32 %v8269_v28, %v8109_v15  ;;  %v7535_v56 = vpack.c.bf16 %v8317_v52, %v8312_v51 }
  0x1f   : > { %v7565_v50 = vpack.c.bf16 %v8301_v42, %v8296_v41  ;;  %7528 = vmatprep.subr.bf16.mxu0 %v7527_v12  ;;  %v8331_v57 = vld [vmem:[%s12567_s2 + $0x68] sm:$0xff]  ;;  %v8336_v58 = vld [vmem:[%s12567_s2 + $0x1e0] sm:$0xff]  ;;  %v1777_v61 = vmul.u32 2246822507, %v1521_v37  ;;  %v8349_v62 = vxor.u32 %v8174_v44, %v784_v48  ;;  %v8353_v63 = vadd.s32 %v8269_v28, %v8146_v31  ;;  %v8379_v11 = vld [vmem:[%s12567_s2 + $0xf8] sm:$0xff] }
  0x20   : > { %7558 = vmatpush3.bf16.msra.mxu1 %v7557_v4  ;;  %v8341_v59 = vld [vmem:[%s12567_s2 + $0x1e8] sm:$0xff]  ;;  %v7537_v0 = vpack.c.bf16 %v8331_v57, %v8322_v53  ;;  %v8362_v2 = vld [vmem:[%s12567_s2 + $0x160] sm:$0xff]  ;;  %v8372_v4 = vld [vmem:[%s12567_s2 + $0xf0] sm:$0xff]  ;;  %v2034_v5 = vshrl.u32 %v1778_v54, 13  ;;  %v1780_v9 = vmul.u32 2246822507, %v1524_v43  ;;  %v8393_v19 = vxor.u32 %v8174_v44, %v783_v55 }
  0x21   : > { %7560 = vmatprep.subr.bf16.mxu1 %v7559_v21  ;;  %v7567_v1 = vpack.c.bf16 %v8341_v59, %v8336_v58  ;;  %v8367_v3 = vld [vmem:[%s12567_s2 + $0x168] sm:$0xff]  ;;  %v8384_v12 = vld [vmem:[%s12567_s2 + $0x70] sm:$0xff]  ;;  %v8389_v16 = vld [vmem:[%s12567_s2 + $0x78] sm:$0xff]  ;;  %v2033_v17 = vshrl.u32 %v1777_v61, 13  ;;  %v1779_v18 = vmul.u32 2246822507, %v8303_v47  ;;  %v7539_v20 = vpack.c.bf16 %v8379_v11, %v8372_v4 }
  0x22   : > { %v7569_v10 = vpack.c.bf16 %v8367_v3, %v8362_v2  ;;  %7530 = vmatpush3.bf16.msra.mxu0 %v7529_v13  ;;  %v7541_v21 = vpack.c.bf16 %v8389_v16, %v8384_v12  ;;  %v8405_v22 = vld [vmem:[%s12567_s2 + $0x1f0] sm:$0xff]  ;;  %v8410_v23 = vld [vmem:[%s12567_s2 + $0x1f8] sm:$0xff]  ;;  %v180_v24 = vld [vmem:[%s8346_s6 + $0x8] sm:$0xff]  ;;  %v2290_v25 = vxor.u32 %v2034_v5, %v1778_v54  ;;  %v2036_v6 = vshrl.u32 %v1780_v9, 13 }
  0x23   : > { %7532 = vmatprep.subr.bf16.mxu0 %v7531_v30  ;;  %v7571_v7 = vpack.c.bf16 %v8410_v23, %v8405_v22  ;;  %v436_v13 = vmax.f32 %v180_v24, 0.0  ;;  %v8418_v27 = vld [vmem:[%s12567_s2 + $0x170] sm:$0xff]  ;;  %v8423_v35 = vld [vmem:[%s12567_s2 + $0x178] sm:$0xff]  ;;  %v179_v36 = vld [vmem:[%s8346_s6] sm:$0xff]  ;;  %v2289_v37 = vxor.u32 %v2033_v17, %v1777_v61  ;;  %v2035_v40 = vshrl.u32 %v1779_v18, 13 }
  0x24   : > { %7562 = vmatpush3.bf16.msra.mxu1 %v7561_v29  ;;  %v2546_v29 = vmul.u32 3266489909, %v2290_v25  ;;  %v7573_v30 = vpack.c.bf16 %v8423_v35, %v8418_v27  ;;  %v435_v43 = vmax.f32 %v179_v36, 0.0  ;;  %v8431_v47 = vld [vmem:[%s12567_s2 + $0x280] sm:$0xff]  ;;  %v8436_v48 = vld [vmem:[%s12567_s2 + $0x288] sm:$0xff]  ;;  %v182_v54 = vld [vmem:[%s8346_s6 + $0x18] sm:$0xff]  ;;  %v2292_v55 = vxor.u32 %v2036_v6, %v1780_v9 }
  0x25   : > { %7564 = vmatprep.subr.bf16.mxu1 %v7563_v49  ;;  %v3570_v58 = vadd.f32 %v436_v13, %v436_v13  ;;  %v2545_v49 = vmul.u32 3266489909, %v2289_v37  ;;  %v7575_v59 = vpack.c.bf16 %v8436_v48, %v8431_v47  ;;  %v438_v61 = vmax.f32 %v182_v54, 0.0  ;;  %v8444_v5 = vld [vmem:[%s12567_s2 + $0x200] sm:$0xff]  ;;  %v8449_v17 = vld [vmem:[%s12567_s2 + $0x208] sm:$0xff]  ;;  %v181_v24 = vld [vmem:[%s8346_s6 + $0x10] sm:$0xff] }
  0x26   : > { %7534 = vmatpush3.bf16.msra.mxu0 %v7533_v39  ;;  %v2802_v9 = vshrl.u32 %v2546_v29, 16  ;;  %v8455_v25 = vadd.f32 %v435_v43, %v435_v43  ;;  %v2548_v6 = vmul.u32 3266489909, %v2292_v55  ;;  %v8462_v36 = vld [vmem:[%s12567_s2 + $0x380] sm:$0xff]  ;;  %v8467_v37 = vld [vmem:[%s12567_s2 + $0x388] sm:$0xff]  ;;  %v437_v43 = vmax.f32 %v181_v24, 0.0 }
  0x27   : > { %v212_v33 = vld [vmem:[%s8346_s6 + $0x108] sm:$0xff]  ;;  %7536 = vmatprep.subr.bf16.mxu0 %v7535_v56  ;;  %v2801_v34 = vshrl.u32 %v2545_v49, 16  ;;  %v3572_v39 = vadd.f32 %v438_v61, %v438_v61  ;;  %v2291_v54 = vxor.u32 %v2035_v40, %v1779_v18  ;;  %v8479_v55 = vld [vmem:[%s12567_s2 + $0x300] sm:$0xff]  ;;  %v1298_v61 = vshrl.u32 %v8349_v62, 16  ;;  %v8493_v24 = vld [vmem:[%s12567_s2 + $0x290] sm:$0xff] }
  0x28   : > { %7566 = vmatpush3.bf16.msra.mxu1 %v7565_v50  ;;  %v8484_v13 = vld [vmem:[%s12567_s2 + $0x308] sm:$0xff]  ;;  %v3058_v41 = vxor.u32 %v2802_v9, %v2546_v29  ;;  %v2804_v42 = vshrl.u32 %v2548_v6, 16  ;;  %v7607_v50 = vpack.c.bf16 %v8467_v37, %v8462_v36  ;;  %v468_v51 = vmax.f32 %v212_v33, 0.0  ;;  %v211_v52 = vld [vmem:[%s8346_s6 + $0x100] sm:$0xff]  ;;  %v214_v29 = vld [vmem:[%s8346_s6 + $0x118] sm:$0xff] }
  0x29   : > { %7568 = vmatprep.subr.bf16.mxu1 %v7567_v1  ;;  %v3057_v56 = vxor.u32 %v2801_v34, %v2545_v49  ;;  %v2547_v18 = vmul.u32 3266489909, %v2291_v54  ;;  %v3571_v40 = vadd.f32 %v437_v43, %v437_v43  ;;  %v8498_v1 = vld [vmem:[%s12567_s2 + $0x298] sm:$0xff]  ;;  %v7609_v36 = vpack.c.bf16 %v8484_v13, %v8479_v55  ;;  %v213_v3 = vld [vmem:[%s8346_s6 + $0x110] sm:$0xff]  ;;  %v243_v27 = vld [vmem:[%s8346_s6 + $0x200] sm:$0xff] }
  0x2a   : > { %7538 = vmatpush3.bf16.msra.mxu0 %v7537_v0  ;;  %vm3314_vm0 = vcmp.lt.s32.totalorder %v3058_v41, 0  ;;  %v3060_v49 = vxor.u32 %v2804_v42, %v2548_v6  ;;  %v8504_v9 = vadd.f32 %v468_v51, %v468_v51  ;;  %v1554_v53 = vxor.u32 %v1298_v61, %v8349_v62  ;;  %v8518_v0 = vld [vmem:[%s12567_s2 + $0x210] sm:$0xff]  ;;  %v8523_v2 = vld [vmem:[%s12567_s2 + $0x218] sm:$0xff]  ;;  %v4166_v43 = vld [vmem:[%s12567_s2 + $0x2a8] sm:$0xff] }
  0x2b   : > { %7540 = vmatprep.subr.bf16.mxu0 %v7539_v20  ;;  %vm3313_vm1 = vcmp.lt.s32.totalorder %v3057_v56, 0  ;;  %v2803_v37 = vshrl.u32 %v2547_v18, 16  ;;  %v467_v57 = vmax.f32 %v211_v52, 0.0  ;;  %6356 = vmatprep.mubr.msk.f32.mxu0 %vm3314_vm0, %v3570_v58  ;;  %v1297_v62 = vshrl.u32 %v8393_v19, 16  ;;  %v4195_v22 = vld [vmem:[%s12567_s2 + $0x390] sm:$0xff]  ;;  %v4196_v23 = vld [vmem:[%s12567_s2 + $0x398] sm:$0xff] }
  0x2c   : > { %7570 = vmatpush3.bf16.msra.mxu1 %v7569_v10  ;;  %vm3316_vm2 = vcmp.lt.s32.totalorder %v3060_v49, 0  ;;  %v7579_v4 = vpack.c.bf16 %v8498_v1, %v8493_v24  ;;  %v470_v10 = vmax.f32 %v214_v29, 0.0  ;;  %v1810_v20 = vmul.u32 2246822507, %v1554_v53 }
  0x2d   : > { %7572 = vmatprep.subr.bf16.mxu1 %v7571_v7  ;;  %6372 = vmatprep.mubr.msk.f32.mxu1 %vm3316_vm2, %v3572_v39  ;;  %v3059_v11 = vxor.u32 %v2803_v37, %v2547_v18  ;;  %v8532_v6 = vadd.f32 %v467_v57, %v467_v57  ;;  %v1044_v13 = vxor.u32 %v8174_v44, %v8353_v63  ;;  %v244_v7 = vld [vmem:[%s8346_s6 + $0x208] sm:$0xff]  ;;  %v469_v34 = vmax.f32 %v213_v3, 0.0 }
  0x2e   : > { %7542 = vmatpush3.bf16.msra.mxu0 %v7541_v21  ;;  %v1553_v58 = vxor.u32 %v1297_v62, %v8393_v19  ;;  %v8547_v33 = vadd.f32 %v470_v10, %v470_v10  ;;  %v7581_v63 = vpack.c.bf16 %v8523_v2, %v8518_v0  ;;  %v2066_v39 = vshrl.u32 %v1810_v20, 13  ;;  %v4179_v19 = vld [vmem:[%s12567_s2 + $0x310] sm:$0xff]  ;;  %v4180_v21 = vld [vmem:[%s12567_s2 + $0x318] sm:$0xff] }
  0x2f   : > { %7576 = vmatprep.subr.bf16.mxu0 %v7575_v59  ;;  %vm3315_vm3 = vcmp.lt.s32.totalorder %v3059_v11, 0  ;;  %v1300_v12 = vshrl.u32 %v1044_v13, 16  ;;  %v785_v16 = vadd.s32 %v8269_v28, %v8149_v32  ;;  %v7611_v47 = vpack.c.bf16 %v4196_v23, %v4195_v22  ;;  %v4165_v59 = vld [vmem:[%s12567_s2 + $0x2a0] sm:$0xff]  ;;  %v245_v10 = vld [vmem:[%s8346_s6 + $0x210] sm:$0xff] }
  0x30   : > { %7574 = vmatpush3.bf16.msra.mxu1 %v7573_v30  ;;  %v1809_v35 = vmul.u32 2246822507, %v1553_v58  ;;  %v8566_v30 = vadd.f32 %v469_v34, %v469_v34  ;;  %v500_v48 = vmax.f32 %v244_v7, 0.0  ;;  %v2322_v54 = vxor.u32 %v2066_v39, %v1810_v20 }
  0x31   : > { %7608 = vmatprep.subr.bf16.mxu1 %v7607_v50  ;;  %6357 = vmatmul.mubr.msk.f32.vlgmr.msra.gmra.mrb[0].mxu0 %vm3313_vm1, %v8455_v25  ;;  %v1556_v55 = vxor.u32 %v1300_v12, %v1044_v13  ;;  %v1043_v41 = vxor.u32 %v8174_v44, %v785_v16  ;;  %v704_v42 = vadd.s32 %v8094_v8, %v8177_v45  ;;  %v246_v50 = vld [vmem:[%s8346_s6 + $0x218] sm:$0xff]  ;;  %v499_v56 = vmax.f32 %v243_v27, 0.0  ;;  %v4149_v25 = vld [vmem:[%s12567_s2 + $0x220] sm:$0xff]  ;;  %v4150_v45 = vld [vmem:[%s12567_s2 + $0x228] sm:$0xff] }
  0x32   : > { %v12570_v51 = vpack.c.bf16 %v8449_v17, %v8444_v5  ;;  %v2065_v52 = vshrl.u32 %v1809_v35, 13  ;;  %v8584_v18 = vadd.f32 %v500_v48, %v500_v48  ;;  %v7613_v61 = vpack.c.bf16 %v4180_v21, %v4179_v19 }
  0x33   : > { %6373 = vmatmul.mubr.msk.f32.vlgmr.msra.gmra.mrb[0].mxu1 %vm3315_vm3, %v3571_v40  ;;  %v2578_v24 = vmul.u32 3266489909, %v2322_v54  ;;  %v1812_v5 = vmul.u32 2246822507, %v1556_v55  ;;  %v1299_v17 = vshrl.u32 %v1043_v41, 16  ;;  %v7583_v40 = vpack.c.bf16 %v4166_v43, %v4165_v59 }
  0x34   : > { %7578 = vmatpush3.bf16.msra.mxu0 %v12570_v51  ;;  %7610 = vmatpush3.bf16.msra.mxu1 %v7609_v36  ;;  %v2321_v1 = vxor.u32 %v2065_v52, %v1809_v35  ;;  %v8592_v29 = vmul.u32 4096, %v704_v42  ;;  %v8594_v49 = vadd.f32 %v499_v56, %v499_v56  ;;  %v502_v37 = vmax.f32 %v246_v50, 0.0  ;;  %v4197_v35 = vld [vmem:[%s12567_s2 + $0x3a0] sm:$0xff] }
  0x35   : > { %7580 = vmatprep.subr.bf16.mxu0 %v7579_v4  ;;  %7612 = vmatprep.subr.bf16.mxu1 %v7611_v47  ;;  %v2834_v53 = vshrl.u32 %v2578_v24, 16  ;;  %v2068_v57 = vshrl.u32 %v1812_v5, 13  ;;  %v1555_v0 = vxor.u32 %v1299_v17, %v1043_v41  ;;  %v7585_v2 = vpack.c.bf16 %v4150_v45, %v4149_v25  ;;  %v4198_v47 = vld [vmem:[%s12567_s2 + $0x3a8] sm:$0xff]  ;;  %v4181_v56 = vld [vmem:[%s12567_s2 + $0x320] sm:$0xff] }
  0x36   : > { %v2577_v3 = vmul.u32 3266489909, %v2321_v1  ;;  %v816_v36 = vadd.s32 %v8592_v29, %v8134_v26  ;;  %v815_v62 = vadd.s32 %v8592_v29, %v8109_v15  ;;  %v818_v4 = vadd.s32 %v8592_v29, %v8146_v31 }
  0x37   : > { %v3090_v11 = vxor.u32 %v2834_v53, %v2578_v24  ;;  %v2324_v20 = vxor.u32 %v2068_v57, %v1812_v5  ;;  %v1811_v13 = vmul.u32 2246822507, %v1555_v0  ;;  %v8603_v22 = vadd.f32 %v502_v37, %v502_v37  ;;  %v275_v37 = vld [vmem:[%s8346_s6 + $0x300] sm:$0xff] }
  0x38   : > { %7582 = vmatpush3.bf16.msra.mxu0 %v7581_v63  ;;  %7614 = vmatpush3.bf16.msra.mxu1 %v7613_v61  ;;  %v2833_v23 = vshrl.u32 %v2577_v3, 16  ;;  %v1074_v7 = vxor.u32 %v8174_v44, %v816_v36  ;;  %v1073_v58 = vxor.u32 %v8174_v44, %v815_v62  ;;  %v1076_v63 = vxor.u32 %v8174_v44, %v818_v4 }
  0x39   : > { %7584 = vmatprep.subr.bf16.mxu0 %v7583_v40  ;;  %vm3346_vm4 = vcmp.lt.s32.totalorder %v3090_v11, 0  ;;  %v2580_v34 = vmul.u32 3266489909, %v2324_v20  ;;  %v2067_v39 = vshrl.u32 %v1811_v13, 13  ;;  %v501_v12 = vmax.f32 %v245_v10, 0.0 }
  0x3a   : > { %6358 = vmatprep.mubr.msk.f32.mxu0 %vm3346_vm4, %v8504_v9  ;;  %v3089_v16 = vxor.u32 %v2833_v23, %v2577_v3  ;;  %v1330_v19 = vshrl.u32 %v1074_v7, 16  ;;  %v1329_v21 = vshrl.u32 %v1073_v58, 16  ;;  %v1332_v27 = vshrl.u32 %v1076_v63, 16  ;;  %v276_v9 = vld [vmem:[%s8346_s6 + $0x308] sm:$0xff] }
  0x3b   : > { %v2836_v48 = vshrl.u32 %v2580_v34, 16  ;;  %v2323_v59 = vxor.u32 %v2067_v39, %v1811_v13  ;;  %v817_v43 = vadd.s32 %v8592_v29, %v8149_v32  ;;  %v8617_v54 = vadd.f32 %v501_v12, %v501_v12  ;;  %v4168_v13 = vld [vmem:[%s12567_s2 + $0x2b8] sm:$0xff] }
  0x3c   : > { %7586 = vmatpush3.bf16.msra.mxu0 %v7585_v2  ;;  %vm3345_vm5 = vcmp.lt.s32.totalorder %v3089_v16, 0  ;;  %v1586_v55 = vxor.u32 %v1330_v19, %v1074_v7  ;;  %v1585_v41 = vxor.u32 %v1329_v21, %v1073_v58  ;;  %v1588_v42 = vxor.u32 %v1332_v27, %v1076_v63  ;;  %v278_v63 = vld [vmem:[%s8346_s6 + $0x318] sm:$0xff] }
  0x3d   : > { %6359 = vmatmul.mubr.msk.f32.gmra.mrb[2].mxu0 %vm3345_vm5, %v8532_v6  ;;  %v3092_v50 = vxor.u32 %v2836_v48, %v2580_v34  ;;  %v2579_v51 = vmul.u32 3266489909, %v2323_v59  ;;  %v1075_v52 = vxor.u32 %v8174_v44, %v817_v43  ;;  %v7615_v61 = vpack.c.bf16 %v4198_v47, %v4197_v35  ;;  %v4182_v6 = vld [vmem:[%s12567_s2 + $0x328] sm:$0xff] }
  0x3e   : > { %v1842_v25 = vmul.u32 2246822507, %v1586_v55  ;;  %v1841_v45 = vmul.u32 2246822507, %v1585_v41  ;;  %v532_v24 = vmax.f32 %v276_v9, 0.0  ;;  %v705_v5 = vadd.s32 %v8094_v8, %v8180_v46 }
  0x3f   : > { %vm3348_vm6 = vcmp.lt.s32.totalorder %v3092_v50, 0  ;;  %v2835_v17 = vshrl.u32 %v2579_v51, 16  ;;  %v1844_v40 = vmul.u32 2246822507, %v1588_v42  ;;  %v1331_v1 = vshrl.u32 %v1075_v52, 16  ;;  %7616 = vmatprep.subr.bf16.mxu1 %v7615_v61  ;;  %v4151_v42 = vld [vmem:[%s12567_s2 + $0x230] sm:$0xff] }
  0x40   : > { %6374 = vmatprep.mubr.msk.f32.mxu1 %vm3348_vm6, %v8547_v33  ;;  %v2098_v53 = vshrl.u32 %v1842_v25, 13  ;;  %v2097_v57 = vshrl.u32 %v1841_v45, 13  ;;  %v8632_v0 = vmul.u32 4096, %v705_v5  ;;  %v8634_v2 = vadd.f32 %v532_v24, %v532_v24  ;;  %v4167_v33 = vld [vmem:[%s12567_s2 + $0x2b0] sm:$0xff]  ;;  %v4152_v50 = vld [vmem:[%s12567_s2 + $0x238] sm:$0xff] }
  0x41   : > { %v3091_v46 = vxor.u32 %v2835_v17, %v2579_v51  ;;  %v2100_v3 = vshrl.u32 %v1844_v40, 13  ;;  %v1587_v36 = vxor.u32 %v1331_v1, %v1075_v52  ;;  %v7617_v62 = vpack.c.bf16 %v4182_v6, %v4181_v56  ;;  %v277_v6 = vld [vmem:[%s8346_s6 + $0x310] sm:$0xff] }
  0x42   : > { %v2354_v4 = vxor.u32 %v2098_v53, %v1842_v25  ;;  %v2353_v10 = vxor.u32 %v2097_v57, %v1841_v45  ;;  %v848_v11 = vadd.s32 %v8632_v0, %v8134_v26  ;;  %v531_v20 = vmax.f32 %v275_v37, 0.0  ;;  %v4199_v17 = vld [vmem:[%s12567_s2 + $0x3b0] sm:$0xff]  ;;  %v308_v53 = vld [vmem:[%s8346_s6 + $0x408] sm:$0xff] }
  0x43   : > { %vm3347_vm7 = vcmp.lt.s32.totalorder %v3091_v46, 0  ;;  %v2356_v23 = vxor.u32 %v2100_v3, %v1844_v40  ;;  %v1843_v7 = vmul.u32 2246822507, %v1587_v36  ;;  %7618 = vmatpush3.bf16.msra.mxu1 %v7617_v62  ;;  %v847_v58 = vadd.s32 %v8632_v0, %v8109_v15  ;;  %v4200_v40 = vld [vmem:[%s12567_s2 + $0x3b8] sm:$0xff] }
  0x44   : > { %6375 = vmatmul.mubr.msk.f32.gmra.mrb[2].mxu1 %vm3347_vm7, %v8566_v30  ;;  %v2610_v34 = vmul.u32 3266489909, %v2354_v4  ;;  %v2609_v39 = vmul.u32 3266489909, %v2353_v10  ;;  %v1106_v12 = vxor.u32 %v8174_v44, %v848_v11  ;;  %v8649_v16 = vadd.f32 %v531_v20, %v531_v20 }
  0x45   : > { %v2612_v19 = vmul.u32 3266489909, %v2356_v23  ;;  %v2099_v21 = vshrl.u32 %v1843_v7, 13  ;;  %v1105_v27 = vxor.u32 %v8174_v44, %v847_v58  ;;  %v7587_v35 = vpack.c.bf16 %v4168_v13, %v4167_v33  ;;  %v4183_v13 = vld [vmem:[%s12567_s2 + $0x330] sm:$0xff] }
  0x46   : > { %v2866_v47 = vshrl.u32 %v2610_v34, 16  ;;  %v2865_v48 = vshrl.u32 %v2609_v39, 16  ;;  %v1362_v59 = vshrl.u32 %v1106_v12, 16  ;;  %v534_v43 = vmax.f32 %v278_v63, 0.0  ;;  %v307_v63 = vld [vmem:[%s8346_s6 + $0x400] sm:$0xff] }
  0x47   : > { %v2868_v9 = vshrl.u32 %v2612_v19, 16  ;;  %v2355_v55 = vxor.u32 %v2099_v21, %v1843_v7  ;;  %v1361_v41 = vshrl.u32 %v1105_v27, 16  ;;  %7588 = vmatprep.subr.bf16.mxu0 %v7587_v35  ;;  %v850_v30 = vadd.s32 %v8632_v0, %v8146_v31 }
  0x48   : > { %v3122_v51 = vxor.u32 %v2866_v47, %v2610_v34  ;;  %v3121_v52 = vxor.u32 %v2865_v48, %v2609_v39  ;;  %v1618_v61 = vxor.u32 %v1362_v59, %v1106_v12  ;;  %v8660_v56 = vadd.f32 %v534_v43, %v534_v43  ;;  %v4169_v34 = vld [vmem:[%s12567_s2 + $0x2c0] sm:$0xff]  ;;  %v4170_v39 = vld [vmem:[%s12567_s2 + $0x2c8] sm:$0xff]  ;;  %v310_v48 = vld [vmem:[%s8346_s6 + $0x418] sm:$0xff] }
  0x49   : > { %v3124_v25 = vxor.u32 %v2868_v9, %v2612_v19  ;;  %v2611_v45 = vmul.u32 3266489909, %v2355_v55  ;;  %v1617_v24 = vxor.u32 %v1361_v41, %v1105_v27  ;;  %v1108_v5 = vxor.u32 %v8174_v44, %v850_v30 }
  0x4a   : > { %vm3378_vm8 = vcmp.lt.s32.totalorder %v3122_v51, 0  ;;  %vm3377_vm9 = vcmp.lt.s32.totalorder %v3121_v52, 0  ;;  %v1874_v1 = vmul.u32 2246822507, %v1618_v61  ;;  %v7589_v37 = vpack.c.bf16 %v4152_v50, %v4151_v42 }
  0x4b   : > { %6360 = vmatprep.mubr.msk.f32.mxu0 %vm3378_vm8, %v8584_v18  ;;  %vm3380_vm10 = vcmp.lt.s32.totalorder %v3124_v25, 0  ;;  %v2867_v57 = vshrl.u32 %v2611_v45, 16  ;;  %v1873_v46 = vmul.u32 2246822507, %v1617_v24  ;;  %v1364_v3 = vshrl.u32 %v1108_v5, 16 }
  0x4c   : > { %6361 = vmatmul.mubr.msk.f32.gmra.mrb[4].mxu0 %vm3377_vm9, %v8594_v49  ;;  %6376 = vmatprep.mubr.msk.f32.mxu1 %vm3380_vm10, %v8603_v22  ;;  %v2130_v36 = vshrl.u32 %v1874_v1, 13  ;;  %v533_v62 = vmax.f32 %v277_v6, 0.0  ;;  %v849_v4 = vadd.s32 %v8632_v0, %v8149_v32  ;;  %v7619_v10 = vpack.c.bf16 %v4200_v40, %v4199_v17  ;;  %v4184_v49 = vld [vmem:[%s12567_s2 + $0x338] sm:$0xff]  ;;  %v4153_v6 = vld [vmem:[%s12567_s2 + $0x240] sm:$0xff]  ;;  %v4154_v17 = vld [vmem:[%s12567_s2 + $0x248] sm:$0xff] }
  0x4d   : > { %v3123_v11 = vxor.u32 %v2867_v57, %v2611_v45  ;;  %v2129_v20 = vshrl.u32 %v1873_v46, 13  ;;  %v1620_v33 = vxor.u32 %v1364_v3, %v1108_v5  ;;  %7590 = vmatpush3.bf16.msra.mxu0 %v7589_v37  ;;  %v564_v18 = vmax.f32 %v308_v53, 0.0  ;;  %v309_v57 = vld [vmem:[%s8346_s6 + $0x410] sm:$0xff] }
  0x4e   : > { %v2386_v22 = vxor.u32 %v2130_v36, %v1874_v1  ;;  %v1107_v23 = vxor.u32 %v8174_v44, %v849_v4  ;;  %v8683_v7 = vadd.f32 %v533_v62, %v533_v62  ;;  %7620 = vmatprep.subr.bf16.mxu1 %v7619_v10  ;;  %v706_v58 = vadd.s32 %v8094_v8, %v8209_v60  ;;  %v4201_v62 = vld [vmem:[%s12567_s2 + $0x3c0] sm:$0xff]  ;;  %v4202_v4 = vld [vmem:[%s12567_s2 + $0x3c8] sm:$0xff] }
  0x4f   : > { %vm3379_vm11 = vcmp.lt.s32.totalorder %v3123_v11, 0  ;;  %v2385_v12 = vxor.u32 %v2129_v20, %v1873_v46  ;;  %v1876_v19 = vmul.u32 2246822507, %v1620_v33  ;;  %v8694_v21 = vadd.f32 %v564_v18, %v564_v18  ;;  %v340_v33 = vld [vmem:[%s8346_s6 + $0x508] sm:$0xff] }
  0x50   : > { %6377 = vmatmul.mubr.msk.f32.gmra.mrb[4].mxu1 %vm3379_vm11, %v8617_v54  ;;  %v2642_v27 = vmul.u32 3266489909, %v2386_v22  ;;  %v1363_v35 = vshrl.u32 %v1107_v23, 16  ;;  %v8697_v47 = vmul.u32 4096, %v706_v58  ;;  %v7621_v60 = vpack.c.bf16 %v4184_v49, %v4183_v13 }
  0x51   : > { %v2641_v59 = vmul.u32 3266489909, %v2385_v12  ;;  %v2132_v43 = vshrl.u32 %v1876_v19, 13  ;;  %v563_v9 = vmax.f32 %v307_v63, 0.0  ;;  %v7591_v55 = vpack.c.bf16 %v4170_v39, %v4169_v34  ;;  %v4185_v34 = vld [vmem:[%s12567_s2 + $0x340] sm:$0xff] }
  0x52   : > { %v2898_v41 = vshrl.u32 %v2642_v27, 16  ;;  %v1619_v30 = vxor.u32 %v1363_v35, %v1107_v23  ;;  %v880_v42 = vadd.s32 %v8697_v47, %v8134_v26  ;;  %7622 = vmatpush3.bf16.msra.mxu1 %v7621_v60  ;;  %v879_v50 = vadd.s32 %v8697_v47, %v8109_v15 }
  0x53   : > { %v2897_v54 = vshrl.u32 %v2641_v59, 16  ;;  %v2388_v51 = vxor.u32 %v2132_v43, %v1876_v19  ;;  %v8704_v52 = vadd.f32 %v563_v9, %v563_v9  ;;  %7592 = vmatprep.subr.bf16.mxu0 %v7591_v55  ;;  %v566_v61 = vmax.f32 %v310_v48, 0.0 }
  0x54   : > { %v3154_v25 = vxor.u32 %v2898_v41, %v2642_v27  ;;  %v1875_v45 = vmul.u32 2246822507, %v1619_v30  ;;  %v1138_v24 = vxor.u32 %v8174_v44, %v880_v42  ;;  %v1137_v5 = vxor.u32 %v8174_v44, %v879_v50  ;;  %v4186_v27 = vld [vmem:[%s12567_s2 + $0x348] sm:$0xff]  ;;  %v4171_v30 = vld [vmem:[%s12567_s2 + $0x2d0] sm:$0xff]  ;;  %v4172_v42 = vld [vmem:[%s12567_s2 + $0x2d8] sm:$0xff] }
  0x55   : > { %v3153_v40 = vxor.u32 %v2897_v54, %v2641_v59  ;;  %v2644_v1 = vmul.u32 3266489909, %v2388_v51  ;;  %v882_v37 = vadd.s32 %v8697_v47, %v8146_v31  ;;  %v8716_v53 = vadd.f32 %v566_v61, %v566_v61  ;;  %v339_v59 = vld [vmem:[%s8346_s6 + $0x500] sm:$0xff] }
  0x56   : > { %vm3410_vm12 = vcmp.lt.s32.totalorder %v3154_v25, 0  ;;  %v2131_v46 = vshrl.u32 %v1875_v45, 13  ;;  %v1394_v3 = vshrl.u32 %v1138_v24, 16  ;;  %v1393_v36 = vshrl.u32 %v1137_v5, 16 }
  0x57   : > { %6362 = vmatprep.mubr.msk.f32.mxu0 %vm3410_vm12, %v8634_v2  ;;  %vm3409_vm13 = vcmp.lt.s32.totalorder %v3153_v40, 0  ;;  %v2900_v10 = vshrl.u32 %v2644_v1, 16  ;;  %v1140_v11 = vxor.u32 %v8174_v44, %v882_v37  ;;  %v7593_v20 = vpack.c.bf16 %v4154_v17, %v4153_v6 }
  0x58   : > { %6363 = vmatmul.mubr.msk.f32.gmra.mrb[6].mxu0 %vm3409_vm13, %v8649_v16  ;;  %v2387_v18 = vxor.u32 %v2131_v46, %v1875_v45  ;;  %v1650_v13 = vxor.u32 %v1394_v3, %v1138_v24  ;;  %v1649_v49 = vxor.u32 %v1393_v36, %v1137_v5  ;;  %v565_v22 = vmax.f32 %v309_v57, 0.0  ;;  %v342_v5 = vld [vmem:[%s8346_s6 + $0x518] sm:$0xff] }
  0x59   : > { %v3156_v23 = vxor.u32 %v2900_v10, %v2644_v1  ;;  %v1396_v58 = vshrl.u32 %v1140_v11, 16  ;;  %7594 = vmatpush3.bf16.msra.mxu0 %v7593_v20  ;;  %v881_v63 = vadd.s32 %v8697_v47, %v8149_v32  ;;  %v7623_v2 = vpack.c.bf16 %v4202_v4, %v4201_v62 }
  0x5a   : > { %v2643_v39 = vmul.u32 3266489909, %v2387_v18  ;;  %v1906_v12 = vmul.u32 2246822507, %v1650_v13  ;;  %v8734_v19 = vadd.f32 %v565_v22, %v565_v22  ;;  %v596_v16 = vmax.f32 %v340_v33, 0.0  ;;  %v4156_v18 = vld [vmem:[%s12567_s2 + $0x258] sm:$0xff] }
  0x5b   : > { %vm3412_vm14 = vcmp.lt.s32.totalorder %v3156_v23, 0  ;;  %v1905_v35 = vmul.u32 2246822507, %v1649_v49  ;;  %v1652_v60 = vxor.u32 %v1396_v58, %v1140_v11  ;;  %v1139_v48 = vxor.u32 %v8174_v44, %v881_v63  ;;  %7624 = vmatprep.subr.bf16.mxu1 %v7623_v2 }
  0x5c   : > { %6378 = vmatprep.mubr.msk.f32.mxu1 %vm3412_vm14, %v8660_v56  ;;  %v2899_v43 = vshrl.u32 %v2643_v39, 16  ;;  %v2162_v9 = vshrl.u32 %v1906_v12, 13  ;;  %v697_v55 = vadd.s32 40, %v8107_v14  ;;  %v8743_v41 = vadd.f32 %v596_v16, %v596_v16 }
  0x5d   : > { %v2161_v50 = vshrl.u32 %v1905_v35, 13  ;;  %v1908_v54 = vmul.u32 2246822507, %v1652_v60  ;;  %v1395_v51 = vshrl.u32 %v1139_v48, 16  ;;  %v7625_v61 = vpack.c.bf16 %v4186_v27, %v4185_v34 }
  0x5e   : > { %v3155_v25 = vxor.u32 %v2899_v43, %v2643_v39  ;;  %v2418_v56 = vxor.u32 %v2162_v9, %v1906_v12  ;;  %v707_v45 = vadd.s32 %v8094_v8, %v697_v55  ;;  %v595_v24 = vmax.f32 %v339_v59, 0.0  ;;  %v341_v39 = vld [vmem:[%s8346_s6 + $0x510] sm:$0xff]  ;;  %v4204_v9 = vld [vmem:[%s12567_s2 + $0x3d8] sm:$0xff] }
  0x5f   : > { %v2417_v6 = vxor.u32 %v2161_v50, %v1905_v35  ;;  %v2164_v17 = vshrl.u32 %v1908_v54, 13  ;;  %v1651_v40 = vxor.u32 %v1395_v51, %v1139_v48  ;;  %7626 = vmatpush3.bf16.msra.mxu1 %v7625_v61  ;;  %v7595_v1 = vpack.c.bf16 %v4172_v42, %v4171_v30  ;;  %v4203_v43 = vld [vmem:[%s12567_s2 + $0x3d0] sm:$0xff]  ;;  %v372_v50 = vld [vmem:[%s8346_s6 + $0x608] sm:$0xff] }
  0x60   : > { %vm3411_vm15 = vcmp.lt.s32.totalorder %v3155_v25, 0  ;;  %v2674_v37 = vmul.u32 3266489909, %v2418_v56  ;;  %v8753_v57 = vmul.u32 4096, %v707_v45  ;;  %v8755_v46 = vadd.f32 %v595_v24, %v595_v24  ;;  %v4187_v56 = vld [vmem:[%s12567_s2 + $0x350] sm:$0xff] }
  0x61   : > { %6379 = vmatmul.mubr.msk.f32.gmra.mrb[6].mxu1 %vm3411_vm15, %v8683_v7  ;;  %v2673_v3 = vmul.u32 3266489909, %v2417_v6  ;;  %v2420_v36 = vxor.u32 %v2164_v17, %v1908_v54  ;;  %v1907_v62 = vmul.u32 2246822507, %v1651_v40  ;;  %7596 = vmatprep.subr.bf16.mxu0 %v7595_v1  ;;  %v598_v4 = vmax.f32 %v342_v5, 0.0  ;;  %v4155_v7 = vld [vmem:[%s12567_s2 + $0x250] sm:$0xff] }
  0x62   : > { %v2930_v10 = vshrl.u32 %v2674_v37, 16  ;;  %v912_v11 = vadd.s32 %v8753_v57, %v8134_v26  ;;  %v911_v20 = vadd.s32 %v8753_v57, %v8109_v15  ;;  %v914_v33 = vadd.s32 %v8753_v57, %v8146_v31  ;;  %v371_v1 = vld [vmem:[%s8346_s6 + $0x600] sm:$0xff] }
  0x63   : > { %v2929_v13 = vshrl.u32 %v2673_v3, 16  ;;  %v2676_v49 = vmul.u32 3266489909, %v2420_v36  ;;  %v2163_v22 = vshrl.u32 %v1907_v62, 13  ;;  %v8770_v23 = vadd.f32 %v598_v4, %v598_v4  ;;  %v4173_v4 = vld [vmem:[%s12567_s2 + $0x2e0] sm:$0xff] }
  0x64   : > { %v3186_v58 = vxor.u32 %v2930_v10, %v2674_v37  ;;  %v1170_v63 = vxor.u32 %v8174_v44, %v912_v11  ;;  %v1169_v2 = vxor.u32 %v8174_v44, %v911_v20  ;;  %v1172_v34 = vxor.u32 %v8174_v44, %v914_v33 }
  0x65   : > { %v3185_v12 = vxor.u32 %v2929_v13, %v2673_v3  ;;  %v2932_v16 = vshrl.u32 %v2676_v49, 16  ;;  %v2419_v27 = vxor.u32 %v2163_v22, %v1907_v62  ;;  %v7597_v35 = vpack.c.bf16 %v4156_v18, %v4155_v7  ;;  %v374_v7 = vld [vmem:[%s8346_s6 + $0x618] sm:$0xff]  ;;  %v4157_v22 = vld [vmem:[%s12567_s2 + $0x260] sm:$0xff] }
  0x66   : > { %vm3442_vm0 = vcmp.lt.s32.totalorder %v3186_v58, 0  ;;  %v1426_v60 = vshrl.u32 %v1170_v63, 16  ;;  %v1425_v48 = vshrl.u32 %v1169_v2, 16  ;;  %v1428_v59 = vshrl.u32 %v1172_v34, 16  ;;  %v4158_v58 = vld [vmem:[%s12567_s2 + $0x268] sm:$0xff] }
  0x67   : > { %6364 = vmatprep.mubr.msk.f32.mxu0 %vm3442_vm0, %v8694_v21  ;;  %vm3441_vm1 = vcmp.lt.s32.totalorder %v3185_v12, 0  ;;  %v3188_v55 = vxor.u32 %v2932_v16, %v2676_v49  ;;  %v2675_v30 = vmul.u32 3266489909, %v2419_v27  ;;  %7598 = vmatpush3.bf16.msra.mxu0 %v7597_v35  ;;  %v597_v42 = vmax.f32 %v341_v39, 0.0  ;;  %v4188_v21 = vld [vmem:[%s12567_s2 + $0x358] sm:$0xff] }
  0x68   : > { %6365 = vmatmul.mubr.msk.f32.gmra.mrb[8].mxu0 %vm3441_vm1, %v8704_v52  ;;  %v1682_v54 = vxor.u32 %v1426_v60, %v1170_v63  ;;  %v1681_v51 = vxor.u32 %v1425_v48, %v1169_v2  ;;  %v1684_v61 = vxor.u32 %v1428_v59, %v1172_v34  ;;  %v913_v25 = vadd.s32 %v8753_v57, %v8149_v32  ;;  %v373_v63 = vld [vmem:[%s8346_s6 + $0x610] sm:$0xff] }
  0x69   : > { %vm3444_vm2 = vcmp.lt.s32.totalorder %v3188_v55, 0  ;;  %v2931_v45 = vshrl.u32 %v2675_v30, 16  ;;  %v8793_v24 = vadd.f32 %v597_v42, %v597_v42  ;;  %v7627_v52 = vpack.c.bf16 %v4204_v9, %v4203_v43 }
  0x6a   : > { %6380 = vmatprep.mubr.msk.f32.mxu1 %vm3444_vm2, %v8716_v53  ;;  %v1938_v5 = vmul.u32 2246822507, %v1682_v54  ;;  %v1937_v6 = vmul.u32 2246822507, %v1681_v51  ;;  %v1171_v17 = vxor.u32 %v8174_v44, %v913_v25  ;;  %v628_v40 = vmax.f32 %v372_v50, 0.0  ;;  %v4174_v53 = vld [vmem:[%s12567_s2 + $0x2e8] sm:$0xff] }
  0x6b   : > { %v3187_v37 = vxor.u32 %v2931_v45, %v2675_v30  ;;  %v1940_v3 = vmul.u32 2246822507, %v1684_v61  ;;  %7628 = vmatprep.subr.bf16.mxu1 %v7627_v52  ;;  %v698_v36 = vadd.s32 48, %v8107_v14  ;;  %v7629_v62 = vpack.c.bf16 %v4188_v21, %v4187_v56 }
  0x6c   : > { %v2194_v10 = vshrl.u32 %v1938_v5, 13  ;;  %v2193_v11 = vshrl.u32 %v1937_v6, 13  ;;  %v1427_v20 = vshrl.u32 %v1171_v17, 16  ;;  %v8805_v33 = vadd.f32 %v628_v40, %v628_v40 }
  0x6d   : > { %vm3443_vm3 = vcmp.lt.s32.totalorder %v3187_v37, 0  ;;  %v2196_v18 = vshrl.u32 %v1940_v3, 13  ;;  %v708_v13 = vadd.s32 %v8094_v8, %v698_v36  ;;  %7630 = vmatpush3.bf16.msra.mxu1 %v7629_v62  ;;  %v627_v49 = vmax.f32 %v371_v1, 0.0  ;;  %v4205_v36 = vld [vmem:[%s12567_s2 + $0x3e0] sm:$0xff]  ;;  %v4206_v62 = vld [vmem:[%s12567_s2 + $0x3e8] sm:$0xff] }
  0x6e   : > { %6381 = vmatmul.mubr.msk.f32.gmra.mrb[8].mxu1 %vm3443_vm3, %v8734_v19  ;;  %v2450_v2 = vxor.u32 %v2194_v10, %v1938_v5  ;;  %v2449_v34 = vxor.u32 %v2193_v11, %v1937_v6  ;;  %v1683_v39 = vxor.u32 %v1427_v20, %v1171_v17  ;;  %v7599_v12 = vpack.c.bf16 %v4174_v53, %v4173_v4  ;;  %v404_v10 = vld [vmem:[%s8346_s6 + $0x708] sm:$0xff] }
  0x6f   : > { %v2452_v16 = vxor.u32 %v2196_v18, %v1940_v3  ;;  %v8817_v27 = vmul.u32 4096, %v708_v13  ;;  %v8819_v35 = vadd.f32 %v627_v49, %v627_v49  ;;  %v630_v60 = vmax.f32 %v374_v7, 0.0  ;;  %v4189_v18 = vld [vmem:[%s12567_s2 + $0x360] sm:$0xff]  ;;  %v4190_v13 = vld [vmem:[%s12567_s2 + $0x368] sm:$0xff] }
  0x70   : > { %v2706_v48 = vmul.u32 3266489909, %v2450_v2  ;;  %v2705_v59 = vmul.u32 3266489909, %v2449_v34  ;;  %7600 = vmatprep.subr.bf16.mxu0 %v7599_v12  ;;  %v7601_v43 = vpack.c.bf16 %v4158_v58, %v4157_v22  ;;  %v629_v9 = vmax.f32 %v373_v63, 0.0  ;;  %v403_v63 = vld [vmem:[%s8346_s6 + $0x700] sm:$0xff] }
  0x71   : > { %v2708_v55 = vmul.u32 3266489909, %v2452_v16  ;;  %v1939_v30 = vmul.u32 2246822507, %v1683_v39  ;;  %v944_v19 = vadd.s32 %v8817_v27, %v8134_v26  ;;  %v943_v42 = vadd.s32 %v8817_v27, %v8109_v15 }
  0x72   : > { %v2962_v50 = vshrl.u32 %v2706_v48, 16  ;;  %v2961_v54 = vshrl.u32 %v2705_v59, 16  ;;  %v946_v51 = vadd.s32 %v8817_v27, %v8146_v31  ;;  %v8827_v61 = vadd.f32 %v630_v60, %v630_v60  ;;  %7602 = vmatpush3.bf16.msra.mxu0 %v7601_v43 }
  0x73   : > { %v2964_v25 = vshrl.u32 %v2708_v55, 16  ;;  %v2195_v56 = vshrl.u32 %v1939_v30, 13  ;;  %v1202_v21 = vxor.u32 %v8174_v44, %v944_v19  ;;  %v1201_v45 = vxor.u32 %v8174_v44, %v943_v42  ;;  %v406_v19 = vld [vmem:[%s8346_s6 + $0x718] sm:$0xff] }
  0x74   : > { %v3218_v52 = vxor.u32 %v2962_v50, %v2706_v48  ;;  %v3217_v5 = vxor.u32 %v2961_v54, %v2705_v59  ;;  %v1204_v6 = vxor.u32 %v8174_v44, %v946_v51  ;;  %v945_v17 = vadd.s32 %v8817_v27, %v8149_v32  ;;  %v4159_v51 = vld [vmem:[%s12567_s2 + $0x270] sm:$0xff] }
  0x75   : > { %v3220_v40 = vxor.u32 %v2964_v25, %v2708_v55  ;;  %v2451_v1 = vxor.u32 %v2195_v56, %v1939_v30  ;;  %v1458_v37 = vshrl.u32 %v1202_v21, 16  ;;  %v1457_v3 = vshrl.u32 %v1201_v45, 16  ;;  %v4160_v25 = vld [vmem:[%s12567_s2 + $0x278] sm:$0xff] }
  0x76   : > { %vm3474_vm4 = vcmp.lt.s32.totalorder %v3218_v52, 0  ;;  %vm3473_vm5 = vcmp.lt.s32.totalorder %v3217_v5, 0  ;;  %v1460_v4 = vshrl.u32 %v1204_v6, 16  ;;  %v1203_v53 = vxor.u32 %v8174_v44, %v945_v17 }
  0x77   : > { %6366 = vmatprep.mubr.msk.f32.mxu0 %vm3474_vm4, %v8743_v41  ;;  %vm3476_vm6 = vcmp.lt.s32.totalorder %v3220_v40, 0  ;;  %v2707_v11 = vmul.u32 3266489909, %v2451_v1  ;;  %v1714_v20 = vxor.u32 %v1458_v37, %v1202_v21  ;;  %v1713_v7 = vxor.u32 %v1457_v3, %v1201_v45 }
  0x78   : > { %6367 = vmatmul.mubr.msk.f32.gmra.mrb[10].mxu0 %vm3473_vm5, %v8755_v46  ;;  %6382 = vmatprep.mubr.msk.f32.mxu1 %vm3476_vm6, %v8770_v23  ;;  %v1716_v49 = vxor.u32 %v1460_v4, %v1204_v6  ;;  %v1459_v22 = vshrl.u32 %v1203_v53, 16  ;;  %v8851_v58 = vadd.f32 %v629_v9, %v629_v9  ;;  %v7631_v41 = vpack.c.bf16 %v4206_v62, %v4205_v36  ;;  %v4175_v46 = vld [vmem:[%s12567_s2 + $0x2f0] sm:$0xff]  ;;  %v4176_v23 = vld [vmem:[%s12567_s2 + $0x2f8] sm:$0xff] }
  0x79   : > { %v2963_v2 = vshrl.u32 %v2707_v11, 16  ;;  %v1970_v34 = vmul.u32 2246822507, %v1714_v20  ;;  %v1969_v39 = vmul.u32 2246822507, %v1713_v7  ;;  %v660_v12 = vmax.f32 %v404_v10, 0.0 }
  0x7a   : > { %v1972_v16 = vmul.u32 2246822507, %v1716_v49  ;;  %v1715_v60 = vxor.u32 %v1459_v22, %v1203_v53  ;;  %7632 = vmatprep.subr.bf16.mxu1 %v7631_v41  ;;  %v699_v48 = vadd.s32 56, %v8107_v14  ;;  %v7633_v59 = vpack.c.bf16 %v4190_v13, %v4189_v18 }
  0x7b   : > { %v3219_v43 = vxor.u32 %v2963_v2, %v2707_v11  ;;  %v2226_v9 = vshrl.u32 %v1970_v34, 13  ;;  %v2225_v55 = vshrl.u32 %v1969_v39, 13  ;;  %v8861_v30 = vadd.f32 %v660_v12, %v660_v12 }
  0x7c   : > { %v2228_v42 = vshrl.u32 %v1972_v16, 13  ;;  %v1971_v50 = vmul.u32 2246822507, %v1715_v60  ;;  %v709_v54 = vadd.s32 %v8094_v8, %v699_v48  ;;  %7634 = vmatpush3.bf16.msra.mxu1 %v7633_v59  ;;  %v659_v14 = vmax.f32 %v403_v63, 0.0  ;;  %v4207_v48 = vld [vmem:[%s12567_s2 + $0x3f0] sm:$0xff]  ;;  %v4208_v59 = vld [vmem:[%s12567_s2 + $0x3f8] sm:$0xff] }
  0x7d   : > { %vm3475_vm7 = vcmp.lt.s32.totalorder %v3219_v43, 0  ;;  %v2482_v56 = vxor.u32 %v2226_v9, %v1970_v34  ;;  %v2481_v21 = vxor.u32 %v2225_v55, %v1969_v39  ;;  %v7603_v45 = vpack.c.bf16 %v4176_v23, %v4175_v46 }
  0x7e   : > { %6383 = vmatmul.mubr.msk.f32.gmra.mrb[10].mxu1 %vm3475_vm7, %v8793_v24  ;;  %v2484_v52 = vxor.u32 %v2228_v42, %v1972_v16  ;;  %v2227_v5 = vshrl.u32 %v1971_v50, 13  ;;  %v8872_v8 = vmul.u32 4096, %v709_v54  ;;  %v8874_v6 = vadd.f32 %v659_v14, %v659_v14  ;;  %v405_v24 = vld [vmem:[%s8346_s6 + $0x710] sm:$0xff]  ;;  %v184_v16 = vld [vmem:[%s8346_s6 + $0x28] sm:$0xff] }
  0x7f   : > { %v2738_v17 = vmul.u32 3266489909, %v2482_v56  ;;  %v2737_v40 = vmul.u32 3266489909, %v2481_v21  ;;  %7604 = vmatprep.subr.bf16.mxu0 %v7603_v45  ;;  %v662_v1 = vmax.f32 %v406_v19, 0.0  ;;  %v7605_v37 = vpack.c.bf16 %v4160_v25, %v4159_v51  ;;  %v4191_v42 = vld [vmem:[%s12567_s2 + $0x370] sm:$0xff] }
  0x80   : > { %v2740_v3 = vmul.u32 3266489909, %v2484_v52  ;;  %v2483_v36 = vxor.u32 %v2227_v5, %v1971_v50  ;;  %v976_v62 = vadd.s32 %v8872_v8, %v8134_v26  ;;  %v975_v4 = vadd.s32 %v8872_v8, %v8109_v15  ;;  %v183_v50 = vld [vmem:[%s8346_s6 + $0x20] sm:$0xff]  ;;  %v4226_v45 = vld [vmem:[%s12567_s2 + $0x488] sm:$0xff] }
  0x81   : > { %v2994_v53 = vshrl.u32 %v2738_v17, 16  ;;  %v2993_v10 = vshrl.u32 %v2737_v40, 16  ;;  %v978_v11 = vadd.s32 %v8872_v8, %v8146_v31  ;;  %v8883_v20 = vadd.f32 %v662_v1, %v662_v1  ;;  %7606 = vmatpush3.bf16.msra.mxu0 %v7605_v37  ;;  %v4225_v21 = vld [vmem:[%s12567_s2 + $0x480] sm:$0xff] }
  0x82   : > { %v2996_v7 = vshrl.u32 %v2740_v3, 16  ;;  %v2739_v18 = vmul.u32 3266489909, %v2483_v36  ;;  %v1234_v13 = vxor.u32 %v8174_v44, %v976_v62  ;;  %v1233_v49 = vxor.u32 %v8174_v44, %v975_v4  ;;  %v186_v36 = vld [vmem:[%s8346_s6 + $0x38] sm:$0xff] }
  0x83   : > { %v3250_v26 = vxor.u32 %v2994_v53, %v2738_v17  ;;  %v3249_v22 = vxor.u32 %v2993_v10, %v2737_v40  ;;  %v1236_v41 = vxor.u32 %v8174_v44, %v978_v11  ;;  %v661_v63 = vmax.f32 %v405_v24, 0.0 }
  0x84   : > { %v3252_v2 = vxor.u32 %v2996_v7, %v2740_v3  ;;  %v2995_v34 = vshrl.u32 %v2739_v18, 16  ;;  %v1490_v39 = vshrl.u32 %v1234_v13, 16  ;;  %v1489_v12 = vshrl.u32 %v1233_v49, 16 }
  0x85   : > { %vm3506_vm8 = vcmp.lt.s32.totalorder %v3250_v26, 0  ;;  %vm3505_vm9 = vcmp.lt.s32.totalorder %v3249_v22, 0  ;;  %v1492_v31 = vshrl.u32 %v1236_v41, 16  ;;  %v977_v60 = vadd.s32 %v8872_v8, %v8149_v32 }
  0x86   : > { %6368 = vmatprep.mubr.msk.f32.mxu0 %vm3506_vm8, %v8805_v33  ;;  %vm3508_vm10 = vcmp.lt.s32.totalorder %v3252_v2, 0  ;;  %v3251_v46 = vxor.u32 %v2995_v34, %v2739_v18  ;;  %v1746_v23 = vxor.u32 %v1490_v39, %v1234_v13  ;;  %v1745_v43 = vxor.u32 %v1489_v12, %v1233_v49  ;;  %v4192_v33 = vld [vmem:[%s12567_s2 + $0x378] sm:$0xff]  ;;  %v8940_v39 = vld [vmem:[%s12567_s2 + $0x400] sm:$0xff]  ;;  %v8945_v12 = vld [vmem:[%s12567_s2 + $0x408] sm:$0xff] }
  0x87   : > { %6369 = vmatmul.mubr.msk.f32.gmra.mrb[12].mxu0 %vm3505_vm9, %v8819_v35  ;;  %6384 = vmatprep.mubr.msk.f32.mxu1 %vm3508_vm10, %v8827_v61  ;;  %v1748_v32 = vxor.u32 %v1492_v31, %v1236_v41  ;;  %v1235_v9 = vxor.u32 %v8174_v44, %v977_v60  ;;  %v8901_v55 = vadd.f32 %v661_v63, %v661_v63  ;;  %v440_v19 = vmax.f32 %v184_v16, 0.0 }
  0x88   : > { %vm3507_vm11 = vcmp.lt.s32.totalorder %v3251_v46, 0  ;;  %v2002_v54 = vmul.u32 2246822507, %v1746_v23  ;;  %v2001_v35 = vmul.u32 2246822507, %v1745_v43  ;;  %v7635_v14 = vpack.c.bf16 %v4208_v59, %v4207_v48 }
  0x89   : > { %6385 = vmatmul.mubr.msk.f32.gmra.mrb[12].mxu1 %vm3507_vm11, %v8851_v58  ;;  %v2004_v61 = vmul.u32 2246822507, %v1748_v32  ;;  %v1491_v51 = vshrl.u32 %v1235_v9, 16  ;;  %v8912_v25 = vadd.s32 640, %v8109_v15  ;;  %v8914_v56 = vadd.f32 %v440_v19, %v440_v19  ;;  %v185_v32 = vld [vmem:[%s8346_s6 + $0x30] sm:$0xff] }
  0x8a   : > { %v2258_v52 = vshrl.u32 %v2002_v54, 13  ;;  %v2257_v5 = vshrl.u32 %v2001_v35, 13  ;;  %7636 = vmatprep.subr.bf16.mxu1 %v7635_v14  ;;  %v7637_v58 = vpack.c.bf16 %v4192_v33, %v4191_v42  ;;  %v439_v17 = vmax.f32 %v183_v50, 0.0 }
  0x8b   : > { %v2260_v40 = vshrl.u32 %v2004_v61, 13  ;;  %v1747_v1 = vxor.u32 %v1491_v51, %v1235_v9  ;;  %v756_v37 = vadd.s32 %v8161_v38, %v8912_v25  ;;  %v8925_v3 = vadd.s32 512, %v8109_v15  ;;  %v4258_v51 = vld [vmem:[%s12567_s2 + $0x588] sm:$0xff] }
  0x8c   : > { %v2514_v62 = vxor.u32 %v2258_v52, %v2002_v54  ;;  %v2513_v4 = vxor.u32 %v2257_v5, %v2001_v35  ;;  %7638 = vmatpush3.bf16.msra.mxu1 %v7637_v58  ;;  %v8928_v24 = vadd.f32 %v439_v17, %v439_v17  ;;  %v7639_v53 = vpack.c.bf16 %v4226_v45, %v4225_v21  ;;  %v216_v52 = vld [vmem:[%s8346_s6 + $0x128] sm:$0xff]  ;;  %v8965_v5 = vld [vmem:[%s12567_s2 + $0x500] sm:$0xff] }
  0x8d   : > { %v2516_v10 = vxor.u32 %v2260_v40, %v2004_v61  ;;  %v2003_v11 = vmul.u32 2246822507, %v1747_v1  ;;  %v1014_v7 = vxor.u32 %v8174_v44, %v756_v37  ;;  %v755_v18 = vadd.s32 %v8161_v38, %v8925_v3  ;;  %v4257_v61 = vld [vmem:[%s12567_s2 + $0x580] sm:$0xff]  ;;  %v8971_v1 = vld [vmem:[%s12567_s2 + $0x508] sm:$0xff] }
  0x8e   : > { %v2770_v13 = vmul.u32 3266489909, %v2514_v62  ;;  %v2769_v49 = vmul.u32 3266489909, %v2513_v4  ;;  %7640 = vmatprep.subr.bf16.mxu0 %v7639_v53  ;;  %v442_v26 = vmax.f32 %v186_v36, 0.0  ;;  %v8934_v22 = vadd.s32 896, %v8109_v15 }
  0x8f   : > { %v2772_v41 = vmul.u32 3266489909, %v2516_v10  ;;  %v2259_v63 = vshrl.u32 %v2003_v11, 13  ;;  %v1270_v2 = vshrl.u32 %v1014_v7, 16  ;;  %v1013_v34 = vxor.u32 %v8174_v44, %v755_v18 }
  0x90   : > { %v3026_v16 = vshrl.u32 %v2770_v13, 16  ;;  %v3025_v31 = vshrl.u32 %v2769_v49, 16  ;;  %v758_v60 = vadd.s32 %v8161_v38, %v8934_v22  ;;  %v8949_v48 = vadd.f32 %v442_v26, %v442_v26  ;;  %v4228_v26 = vld [vmem:[%s12567_s2 + $0x498] sm:$0xff] }
  0x91   : > { %v3028_v59 = vshrl.u32 %v2772_v41, 16  ;;  %v2515_v46 = vxor.u32 %v2259_v63, %v2003_v11  ;;  %v1526_v23 = vxor.u32 %v1270_v2, %v1014_v7  ;;  %v1269_v43 = vshrl.u32 %v1013_v34, 16  ;;  %v215_v7 = vld [vmem:[%s8346_s6 + $0x120] sm:$0xff] }
  0x92   : > { %v3282_v9 = vxor.u32 %v3026_v16, %v2770_v13  ;;  %v3281_v19 = vxor.u32 %v3025_v31, %v2769_v49  ;;  %v1016_v42 = vxor.u32 %v8174_v44, %v758_v60  ;;  %v7641_v33 = vpack.c.bf16 %v8945_v12, %v8940_v39  ;;  %v8990_v49 = vld [vmem:[%s12567_s2 + $0x490] sm:$0xff]  ;;  %v247_v39 = vld [vmem:[%s8346_s6 + $0x220] sm:$0xff] }
  0x93   : > { %v3284_v50 = vxor.u32 %v3028_v59, %v2772_v41  ;;  %v2771_v54 = vmul.u32 3266489909, %v2515_v46  ;;  %v1782_v35 = vmul.u32 2246822507, %v1526_v23  ;;  %v1525_v14 = vxor.u32 %v1269_v43, %v1013_v34  ;;  %v218_v59 = vld [vmem:[%s8346_s6 + $0x138] sm:$0xff] }
  0x94   : > { %vm3538_vm12 = vcmp.lt.s32.totalorder %v3282_v9, 0  ;;  %vm3537_vm13 = vcmp.lt.s32.totalorder %v3281_v19, 0  ;;  %v1272_v21 = vshrl.u32 %v1016_v42, 16  ;;  %v441_v45 = vmax.f32 %v185_v32, 0.0 }
  0x95   : > { %6370 = vmatprep.mubr.msk.f32.mxu0 %vm3538_vm12, %v8861_v30  ;;  %vm3540_vm14 = vcmp.lt.s32.totalorder %v3284_v50, 0  ;;  %v3027_v58 = vshrl.u32 %v2771_v54, 16  ;;  %v2038_v17 = vshrl.u32 %v1782_v35, 13  ;;  %v1781_v40 = vmul.u32 2246822507, %v1525_v14 }
  0x96   : > { %6371 = vmatmul.mubr.msk.f32.gmra.mrb[14].mxu0 %vm3537_vm13, %v8874_v6  ;;  %6386 = vmatprep.mubr.msk.f32.mxu1 %vm3540_vm14, %v8883_v20  ;;  %v1528_v37 = vxor.u32 %v1272_v21, %v1016_v42  ;;  %v8976_v36 = vadd.s32 768, %v8109_v15  ;;  %v8978_v62 = vadd.f32 %v441_v45, %v441_v45  ;;  %v7671_v30 = vpack.c.bf16 %v4258_v51, %v4257_v61 }
  0x97   : > { %v3283_v4 = vxor.u32 %v3027_v58, %v2771_v54  ;;  %v2294_v53 = vxor.u32 %v2038_v17, %v1782_v35  ;;  %v2037_v10 = vshrl.u32 %v1781_v40, 13  ;;  %v472_v11 = vmax.f32 %v216_v52, 0.0  ;;  %v4211_v52 = vld [vmem:[%s12567_s2 + $0x410] sm:$0xff]  ;;  %v4212_v58 = vld [vmem:[%s12567_s2 + $0x418] sm:$0xff] }
  0x98   : > { %v1784_v18 = vmul.u32 2246822507, %v1528_v37  ;;  %v757_v13 = vadd.s32 %v8161_v38, %v8976_v36  ;;  %7672 = vmatprep.subr.bf16.mxu1 %v7671_v30  ;;  %v788_v6 = vadd.s32 %v8269_v28, %v8912_v25  ;;  %v7673_v20 = vpack.c.bf16 %v8971_v1, %v8965_v5  ;;  %v217_v17 = vld [vmem:[%s8346_s6 + $0x130] sm:$0xff]  ;;  %v4261_v5 = vld [vmem:[%s12567_s2 + $0x5a0] sm:$0xff]  ;;  %v4262_v1 = vld [vmem:[%s12567_s2 + $0x5a8] sm:$0xff] }
  0x99   : > { %vm3539_vm15 = vcmp.lt.s32.totalorder %v3283_v4, 0  ;;  %v2550_v41 = vmul.u32 3266489909, %v2294_v53  ;;  %v2293_v63 = vxor.u32 %v2037_v10, %v1781_v40  ;;  %v8995_v2 = vadd.f32 %v472_v11, %v472_v11  ;;  %v9021_v4 = vld [vmem:[%s12567_s2 + $0x590] sm:$0xff] }
  0x9a   : > { %6387 = vmatmul.mubr.msk.f32.gmra.mrb[14].mxu1 %vm3539_vm15, %v8901_v55  ;;  %v2040_v34 = vshrl.u32 %v1784_v18, 13  ;;  %v1015_v16 = vxor.u32 %v8174_v44, %v757_v13  ;;  %v1046_v31 = vxor.u32 %v8174_v44, %v788_v6  ;;  %v471_v60 = vmax.f32 %v215_v7, 0.0 }
  0x9b   : > { %v2806_v46 = vshrl.u32 %v2550_v41, 16  ;;  %v2549_v23 = vmul.u32 3266489909, %v2293_v63  ;;  %v787_v43 = vadd.s32 %v8269_v28, %v8925_v3  ;;  %v7643_v32 = vpack.c.bf16 %v4228_v26, %v8990_v49 }
  0x9c   : > { %v2296_v9 = vxor.u32 %v2040_v34, %v1784_v18  ;;  %v1271_v19 = vshrl.u32 %v1015_v16, 16  ;;  %v1302_v42 = vshrl.u32 %v1046_v31, 16  ;;  %v9004_v50 = vadd.f32 %v471_v60, %v471_v60  ;;  %v9028_v18 = vld [vmem:[%s12567_s2 + $0x598] sm:$0xff]  ;;  %v248_v34 = vld [vmem:[%s8346_s6 + $0x228] sm:$0xff] }
  0x9d   : > { %v3062_v55 = vxor.u32 %v2806_v46, %v2550_v41  ;;  %v2805_v54 = vshrl.u32 %v2549_v23, 16  ;;  %v1045_v35 = vxor.u32 %v8174_v44, %v787_v43  ;;  %v474_v14 = vmax.f32 %v218_v59, 0.0  ;;  %v9049_v46 = vld [vmem:[%s12567_s2 + $0x518] sm:$0xff] }
  0x9e   : > { %v2552_v61 = vmul.u32 3266489909, %v2296_v9  ;;  %v1527_v51 = vxor.u32 %v1271_v19, %v1015_v16  ;;  %v1558_v21 = vxor.u32 %v1302_v42, %v1046_v31  ;;  %v790_v45 = vadd.s32 %v8269_v28, %v8934_v22 }
  0x9f   : > { %vm3318_vm0 = vcmp.lt.s32.totalorder %v3062_v55, 0  ;;  %v3061_v40 = vxor.u32 %v2805_v54, %v2549_v23  ;;  %v1301_v37 = vshrl.u32 %v1045_v35, 16  ;;  %v9016_v30 = vadd.f32 %v474_v14, %v474_v14 }
  0xa0   : > { %6388 = vmatprep.mubr.msk.f32.mxu0 %vm3318_vm0, %v8914_v56  ;;  %v2808_v53 = vshrl.u32 %v2552_v61, 16  ;;  %v1783_v10 = vmul.u32 2246822507, %v1527_v51  ;;  %v1814_v11 = vmul.u32 2246822507, %v1558_v21  ;;  %v1048_v7 = vxor.u32 %v8174_v44, %v790_v45 }
  0xa1   : > { %vm3317_vm1 = vcmp.lt.s32.totalorder %v3061_v40, 0  ;;  %v1557_v13 = vxor.u32 %v1301_v37, %v1045_v35  ;;  %v7645_v6 = vpack.c.bf16 %v4212_v58, %v4211_v52  ;;  %v473_v49 = vmax.f32 %v217_v17, 0.0 }
  0xa2   : > { %6389 = vmatmul.mubr.msk.f32.vlgmr.msra.gmra.mrb[16].mxu0 %vm3317_vm1, %v8928_v24  ;;  %v3064_v26 = vxor.u32 %v2808_v53, %v2552_v61  ;;  %v2039_v41 = vshrl.u32 %v1783_v10, 13  ;;  %v2070_v56 = vshrl.u32 %v1814_v11, 13  ;;  %v1304_v63 = vshrl.u32 %v1048_v7, 16  ;;  %v9044_v24 = vld [vmem:[%s12567_s2 + $0x510] sm:$0xff] }
  0xa3   : > { %7642 = vmatpush3.bf16.msra.mxu0 %v7641_v33  ;;  %v1813_v16 = vmul.u32 2246822507, %v1557_v13  ;;  %v789_v31 = vadd.s32 %v8269_v28, %v8976_v36  ;;  %v9037_v60 = vadd.f32 %v473_v49, %v473_v49  ;;  %v7675_v59 = vpack.c.bf16 %v9028_v18, %v9021_v4 }
  0xa4   : > { %vm3320_vm2 = vcmp.lt.s32.totalorder %v3064_v26, 0  ;;  %v2295_v12 = vxor.u32 %v2039_v41, %v1783_v10  ;;  %v2326_v33 = vxor.u32 %v2070_v56, %v1814_v11  ;;  %7644 = vmatprep.subr.bf16.mxu0 %v7643_v32  ;;  %v1560_v23 = vxor.u32 %v1304_v63, %v1048_v7  ;;  %v4229_v10 = vld [vmem:[%s12567_s2 + $0x4a0] sm:$0xff]  ;;  %v4230_v11 = vld [vmem:[%s12567_s2 + $0x4a8] sm:$0xff] }
  0xa5   : > { %6404 = vmatprep.mubr.msk.f32.mxu1 %vm3320_vm2, %v8949_v48  ;;  %v2069_v43 = vshrl.u32 %v1813_v16, 13  ;;  %v1047_v9 = vxor.u32 %v8174_v44, %v789_v31  ;;  %v504_v19 = vmax.f32 %v248_v34, 0.0  ;;  %v820_v42 = vadd.s32 %v8592_v29, %v8912_v25  ;;  %v250_v34 = vld [vmem:[%s8346_s6 + $0x238] sm:$0xff]  ;;  %v4214_v31 = vld [vmem:[%s12567_s2 + $0x428] sm:$0xff] }
  0xa6   : > { %v2551_v55 = vmul.u32 3266489909, %v2295_v12  ;;  %v2582_v54 = vmul.u32 3266489909, %v2326_v33  ;;  %v7677_v35 = vpack.c.bf16 %v9049_v46, %v9044_v24  ;;  %v503_v14 = vmax.f32 %v247_v39, 0.0 }
  0xa7   : > { %v2325_v61 = vxor.u32 %v2069_v43, %v1813_v16  ;;  %v1816_v51 = vmul.u32 2246822507, %v1560_v23  ;;  %7646 = vmatpush3.bf16.msra.mxu0 %v7645_v6  ;;  %v1303_v32 = vshrl.u32 %v1047_v9, 16  ;;  %v1078_v21 = vxor.u32 %v8174_v44, %v820_v42  ;;  %v4213_v16 = vld [vmem:[%s12567_s2 + $0x420] sm:$0xff]  ;;  %v249_v43 = vld [vmem:[%s8346_s6 + $0x230] sm:$0xff] }
  0xa8   : > { %v2807_v48 = vshrl.u32 %v2551_v55, 16  ;;  %v2838_v45 = vshrl.u32 %v2582_v54, 16  ;;  %v9059_v52 = vadd.f32 %v504_v19, %v504_v19  ;;  %v819_v58 = vadd.s32 %v8592_v29, %v8925_v3 }
  0xa9   : > { %v2581_v17 = vmul.u32 3266489909, %v2325_v61  ;;  %v2072_v40 = vshrl.u32 %v1816_v51, 13  ;;  %v1559_v37 = vxor.u32 %v1303_v32, %v1047_v9  ;;  %v1334_v53 = vshrl.u32 %v1078_v21, 16 }
  0xaa   : > { %v3063_v7 = vxor.u32 %v2807_v48, %v2551_v55  ;;  %v3094_v13 = vxor.u32 %v2838_v45, %v2582_v54  ;;  %v1077_v6 = vxor.u32 %v8174_v44, %v819_v58  ;;  %v9070_v49 = vadd.f32 %v503_v14, %v503_v14 }
  0xab   : > { %v2837_v26 = vshrl.u32 %v2581_v17, 16  ;;  %v2328_v41 = vxor.u32 %v2072_v40, %v1816_v51  ;;  %v1815_v56 = vmul.u32 2246822507, %v1559_v37  ;;  %v1590_v63 = vxor.u32 %v1334_v53, %v1078_v21  ;;  %v280_v21 = vld [vmem:[%s8346_s6 + $0x328] sm:$0xff] }
  0xac   : > { %vm3319_vm3 = vcmp.lt.s32.totalorder %v3063_v7, 0  ;;  %vm3350_vm4 = vcmp.lt.s32.totalorder %v3094_v13, 0  ;;  %v1333_v24 = vshrl.u32 %v1077_v6, 16  ;;  %v7647_v46 = vpack.c.bf16 %v4230_v11, %v4229_v10  ;;  %v4246_v40 = vld [vmem:[%s12567_s2 + $0x528] sm:$0xff] }
  0xad   : > { %6405 = vmatmul.mubr.msk.f32.vlgmr.msra.gmra.mrb[16].mxu1 %vm3319_vm3, %v8978_v62  ;;  %6390 = vmatprep.mubr.msk.f32.mxu0 %vm3350_vm4, %v8995_v2  ;;  %v3093_v39 = vxor.u32 %v2837_v26, %v2581_v17  ;;  %v2584_v12 = vmul.u32 3266489909, %v2328_v41  ;;  %v2071_v33 = vshrl.u32 %v1815_v56, 13  ;;  %v1846_v23 = vmul.u32 2246822507, %v1590_v63  ;;  %v4245_v17 = vld [vmem:[%s12567_s2 + $0x520] sm:$0xff] }
  0xae   : > { %7674 = vmatpush3.bf16.msra.mxu1 %v7673_v20  ;;  %v1589_v9 = vxor.u32 %v1333_v24, %v1077_v6  ;;  %7648 = vmatprep.subr.bf16.mxu0 %v7647_v46  ;;  %v506_v19 = vmax.f32 %v250_v34, 0.0  ;;  %v822_v42 = vadd.s32 %v8592_v29, %v8934_v22  ;;  %v7649_v55 = vpack.c.bf16 %v4214_v31, %v4213_v16  ;;  %v279_v6 = vld [vmem:[%s8346_s6 + $0x320] sm:$0xff]  ;;  %v4232_v46 = vld [vmem:[%s12567_s2 + $0x4b8] sm:$0xff] }
  0xaf   : > { %vm3349_vm5 = vcmp.lt.s32.totalorder %v3093_v39, 0  ;;  %v2840_v62 = vshrl.u32 %v2584_v12, 16  ;;  %v2327_v2 = vxor.u32 %v2071_v33, %v1815_v56  ;;  %7676 = vmatprep.subr.bf16.mxu1 %v7675_v59  ;;  %v2102_v54 = vshrl.u32 %v1846_v23, 13 }
  0xb0   : > { %6391 = vmatmul.mubr.msk.f32.gmra.mrb[18].mxu0 %vm3349_vm5, %v9004_v50  ;;  %v1845_v20 = vmul.u32 2246822507, %v1589_v9  ;;  %v1080_v14 = vxor.u32 %v8174_v44, %v822_v42  ;;  %v9098_v61 = vadd.f32 %v506_v19, %v506_v19  ;;  %v505_v51 = vmax.f32 %v249_v43, 0.0  ;;  %v282_v42 = vld [vmem:[%s8346_s6 + $0x338] sm:$0xff] }
  0xb1   : > { %v3096_v32 = vxor.u32 %v2840_v62, %v2584_v12  ;;  %v2583_v4 = vmul.u32 3266489909, %v2327_v2  ;;  %v2358_v18 = vxor.u32 %v2102_v54, %v1846_v23  ;;  %7650 = vmatpush3.bf16.msra.mxu0 %v7649_v55  ;;  %v821_v59 = vadd.s32 %v8592_v29, %v8976_v36  ;;  %v4215_v55 = vld [vmem:[%s12567_s2 + $0x430] sm:$0xff]  ;;  %v4216_v62 = vld [vmem:[%s12567_s2 + $0x438] sm:$0xff] }
  0xb2   : > { %7678 = vmatpush3.bf16.msra.mxu1 %v7677_v35  ;;  %v2101_v48 = vshrl.u32 %v1845_v20, 13  ;;  %v1336_v45 = vshrl.u32 %v1080_v14, 16  ;;  %v9103_v58 = vadd.f32 %v505_v51, %v505_v51  ;;  %v7679_v50 = vpack.c.bf16 %v4262_v1, %v4261_v5  ;;  %v281_v51 = vld [vmem:[%s8346_s6 + $0x330] sm:$0xff] }
  0xb3   : > { %vm3352_vm6 = vcmp.lt.s32.totalorder %v3096_v32, 0  ;;  %v2839_v37 = vshrl.u32 %v2583_v4, 16  ;;  %v2614_v53 = vmul.u32 3266489909, %v2358_v18  ;;  %v1079_v10 = vxor.u32 %v8174_v44, %v821_v59 }
  0xb4   : > { %6406 = vmatprep.mubr.msk.f32.mxu1 %vm3352_vm6, %v9016_v30  ;;  %v2357_v35 = vxor.u32 %v2101_v48, %v1845_v20  ;;  %v1592_v11 = vxor.u32 %v1336_v45, %v1080_v14  ;;  %7680 = vmatprep.subr.bf16.mxu1 %v7679_v50  ;;  %v536_v7 = vmax.f32 %v280_v21, 0.0  ;;  %v852_v13 = vadd.s32 %v8632_v0, %v8912_v25  ;;  %v4231_v30 = vld [vmem:[%s12567_s2 + $0x4b0] sm:$0xff] }
  0xb5   : > { %v3095_v26 = vxor.u32 %v2839_v37, %v2583_v4  ;;  %v2870_v41 = vshrl.u32 %v2614_v53, 16  ;;  %v1335_v56 = vshrl.u32 %v1079_v10, 16  ;;  %v7681_v63 = vpack.c.bf16 %v4246_v40, %v4245_v17  ;;  %v4263_v21 = vld [vmem:[%s12567_s2 + $0x5b0] sm:$0xff] }
  0xb6   : > { %v2613_v34 = vmul.u32 3266489909, %v2357_v35  ;;  %v1848_v16 = vmul.u32 2246822507, %v1592_v11  ;;  %v1110_v31 = vxor.u32 %v8174_v44, %v852_v13  ;;  %v9117_v24 = vadd.f32 %v536_v7, %v536_v7  ;;  %v312_v13 = vld [vmem:[%s8346_s6 + $0x428] sm:$0xff] }
  0xb7   : > { %vm3351_vm7 = vcmp.lt.s32.totalorder %v3095_v26, 0  ;;  %v3126_v39 = vxor.u32 %v2870_v41, %v2614_v53  ;;  %v1591_v12 = vxor.u32 %v1335_v56, %v1079_v10  ;;  %7682 = vmatpush3.bf16.msra.mxu1 %v7681_v63  ;;  %v535_v33 = vmax.f32 %v279_v6, 0.0 }
  0xb8   : > { %6407 = vmatmul.mubr.msk.f32.gmra.mrb[18].mxu1 %vm3351_vm7, %v9037_v60  ;;  %v2869_v23 = vshrl.u32 %v2613_v34, 16  ;;  %v2104_v43 = vshrl.u32 %v1848_v16, 13  ;;  %v1366_v9 = vshrl.u32 %v1110_v31, 16  ;;  %v851_v19 = vadd.s32 %v8632_v0, %v8925_v3 }
  0xb9   : > { %vm3382_vm8 = vcmp.lt.s32.totalorder %v3126_v39, 0  ;;  %v1847_v2 = vmul.u32 2246822507, %v1591_v12  ;;  %v9135_v54 = vadd.f32 %v535_v33, %v535_v33  ;;  %v7651_v60 = vpack.c.bf16 %v4232_v46, %v4231_v30  ;;  %v4247_v12 = vld [vmem:[%s12567_s2 + $0x530] sm:$0xff]  ;;  %v4248_v33 = vld [vmem:[%s12567_s2 + $0x538] sm:$0xff] }
  0xba   : > { %6392 = vmatprep.mubr.msk.f32.mxu0 %vm3382_vm8, %v9059_v52  ;;  %v3125_v5 = vxor.u32 %v2869_v23, %v2613_v34  ;;  %v2360_v1 = vxor.u32 %v2104_v43, %v1848_v16  ;;  %v1622_v20 = vxor.u32 %v1366_v9, %v1110_v31  ;;  %v1109_v14 = vxor.u32 %v8174_v44, %v851_v19  ;;  %v4264_v52 = vld [vmem:[%s12567_s2 + $0x5b8] sm:$0xff]  ;;  %v311_v19 = vld [vmem:[%s8346_s6 + $0x420] sm:$0xff] }
  0xbb   : > { %v2103_v32 = vshrl.u32 %v1847_v2, 13  ;;  %7652 = vmatprep.subr.bf16.mxu0 %v7651_v60  ;;  %v538_v4 = vmax.f32 %v282_v42, 0.0  ;;  %v854_v18 = vadd.s32 %v8632_v0, %v8934_v22  ;;  %v7653_v59 = vpack.c.bf16 %v4216_v62, %v4215_v55 }
  0xbc   : > { %vm3381_vm9 = vcmp.lt.s32.totalorder %v3125_v5, 0  ;;  %v2616_v48 = vmul.u32 3266489909, %v2360_v1  ;;  %v1878_v45 = vmul.u32 2246822507, %v1622_v20  ;;  %v1365_v50 = vshrl.u32 %v1109_v14, 16 }
  0xbd   : > { %6393 = vmatmul.mubr.msk.f32.gmra.mrb[20].mxu0 %vm3381_vm9, %v9070_v49  ;;  %v2359_v17 = vxor.u32 %v2103_v32, %v1847_v2  ;;  %v1112_v40 = vxor.u32 %v8174_v44, %v854_v18  ;;  %v9150_v37 = vadd.f32 %v538_v4, %v538_v4  ;;  %v537_v53 = vmax.f32 %v281_v51, 0.0  ;;  %v4234_v51 = vld [vmem:[%s12567_s2 + $0x4c8] sm:$0xff] }
  0xbe   : > { %v2872_v10 = vshrl.u32 %v2616_v48, 16  ;;  %v2134_v35 = vshrl.u32 %v1878_v45, 13  ;;  %v1621_v11 = vxor.u32 %v1365_v50, %v1109_v14  ;;  %7654 = vmatpush3.bf16.msra.mxu0 %v7653_v59  ;;  %v853_v7 = vadd.s32 %v8632_v0, %v8976_v36  ;;  %v4233_v14 = vld [vmem:[%s12567_s2 + $0x4c0] sm:$0xff] }
  0xbf   : > { %v2615_v6 = vmul.u32 3266489909, %v2359_v17  ;;  %v1368_v26 = vshrl.u32 %v1112_v40, 16  ;;  %v9155_v41 = vadd.f32 %v537_v53, %v537_v53  ;;  %v7683_v56 = vpack.c.bf16 %v4264_v52, %v4263_v21  ;;  %v4217_v53 = vld [vmem:[%s12567_s2 + $0x440] sm:$0xff] }
  0xc0   : > { %v3128_v49 = vxor.u32 %v2872_v10, %v2616_v48  ;;  %v2390_v63 = vxor.u32 %v2134_v35, %v1878_v45  ;;  %v1877_v34 = vmul.u32 2246822507, %v1621_v11  ;;  %v1111_v16 = vxor.u32 %v8174_v44, %v853_v7  ;;  %v314_v48 = vld [vmem:[%s8346_s6 + $0x438] sm:$0xff] }
  0xc1   : > { %v2871_v31 = vshrl.u32 %v2615_v6, 16  ;;  %v1624_v30 = vxor.u32 %v1368_v26, %v1112_v40  ;;  %7684 = vmatprep.subr.bf16.mxu1 %v7683_v56  ;;  %v568_v46 = vmax.f32 %v312_v13, 0.0  ;;  %v884_v39 = vadd.s32 %v8697_v47, %v8912_v25  ;;  %v313_v56 = vld [vmem:[%s8346_s6 + $0x430] sm:$0xff] }
  0xc2   : > { %vm3384_vm10 = vcmp.lt.s32.totalorder %v3128_v49, 0  ;;  %v2646_v23 = vmul.u32 3266489909, %v2390_v63  ;;  %v2133_v43 = vshrl.u32 %v1877_v34, 13  ;;  %v1367_v9 = vshrl.u32 %v1111_v16, 16 }
  0xc3   : > { %6408 = vmatprep.mubr.msk.f32.mxu1 %vm3384_vm10, %v9098_v61  ;;  %v3127_v42 = vxor.u32 %v2871_v31, %v2615_v6  ;;  %v1880_v55 = vmul.u32 2246822507, %v1624_v30  ;;  %v1142_v62 = vxor.u32 %v8174_v44, %v884_v39  ;;  %v9169_v2 = vadd.f32 %v568_v46, %v568_v46 }
  0xc4   : > { %v2902_v60 = vshrl.u32 %v2646_v23, 16  ;;  %v2389_v5 = vxor.u32 %v2133_v43, %v1877_v34  ;;  %v1623_v1 = vxor.u32 %v1367_v9, %v1111_v16  ;;  %v7685_v20 = vpack.c.bf16 %v4248_v33, %v4247_v12  ;;  %v4266_v12 = vld [vmem:[%s12567_s2 + $0x5c8] sm:$0xff] }
  0xc5   : > { %vm3383_vm11 = vcmp.lt.s32.totalorder %v3127_v42, 0  ;;  %v2136_v61 = vshrl.u32 %v1880_v55, 13  ;;  %v1398_v32 = vshrl.u32 %v1142_v62, 16  ;;  %v567_v4 = vmax.f32 %v311_v19, 0.0 }
  0xc6   : > { %6409 = vmatmul.mubr.msk.f32.gmra.mrb[20].mxu1 %vm3383_vm11, %v9103_v58  ;;  %v3158_v18 = vxor.u32 %v2902_v60, %v2646_v23  ;;  %v2645_v59 = vmul.u32 3266489909, %v2389_v5  ;;  %v1879_v21 = vmul.u32 2246822507, %v1623_v1  ;;  %v883_v52 = vadd.s32 %v8697_v47, %v8925_v3  ;;  %v4218_v58 = vld [vmem:[%s12567_s2 + $0x448] sm:$0xff] }
  0xc7   : > { %v2392_v45 = vxor.u32 %v2136_v61, %v1880_v55  ;;  %v1654_v50 = vxor.u32 %v1398_v32, %v1142_v62  ;;  %7686 = vmatpush3.bf16.msra.mxu1 %v7685_v20  ;;  %v9181_v17 = vadd.f32 %v567_v4, %v567_v4  ;;  %v7655_v40 = vpack.c.bf16 %v4234_v51, %v4233_v14  ;;  %v344_v62 = vld [vmem:[%s8346_s6 + $0x528] sm:$0xff]  ;;  %v4249_v14 = vld [vmem:[%s12567_s2 + $0x540] sm:$0xff] }
  0xc8   : > { %vm3414_vm12 = vcmp.lt.s32.totalorder %v3158_v18, 0  ;;  %v2901_v10 = vshrl.u32 %v2645_v59, 16  ;;  %v2135_v35 = vshrl.u32 %v1879_v21, 13  ;;  %v1141_v11 = vxor.u32 %v8174_v44, %v883_v52  ;;  %v343_v52 = vld [vmem:[%s8346_s6 + $0x520] sm:$0xff] }
  0xc9   : > { %6394 = vmatprep.mubr.msk.f32.mxu0 %vm3414_vm12, %v9117_v24  ;;  %v2648_v7 = vmul.u32 3266489909, %v2392_v45  ;;  %v1910_v13 = vmul.u32 2246822507, %v1654_v50  ;;  %7656 = vmatprep.subr.bf16.mxu0 %v7655_v40  ;;  %v570_v6 = vmax.f32 %v314_v48, 0.0  ;;  %v886_v26 = vadd.s32 %v8697_v47, %v8934_v22  ;;  %v4265_v24 = vld [vmem:[%s12567_s2 + $0x5c0] sm:$0xff] }
  0xca   : > { %v3157_v49 = vxor.u32 %v2901_v10, %v2645_v59  ;;  %v2391_v63 = vxor.u32 %v2135_v35, %v1879_v21  ;;  %v1397_v34 = vshrl.u32 %v1141_v11, 16  ;;  %v7657_v16 = vpack.c.bf16 %v4218_v58, %v4217_v53  ;;  %v4235_v53 = vld [vmem:[%s12567_s2 + $0x4d0] sm:$0xff] }
  0xcb   : > { %v2904_v31 = vshrl.u32 %v2648_v7, 16  ;;  %v2166_v30 = vshrl.u32 %v1910_v13, 13  ;;  %v1144_v46 = vxor.u32 %v8174_v44, %v886_v26  ;;  %v9195_v39 = vadd.f32 %v570_v6, %v570_v6  ;;  %v346_v26 = vld [vmem:[%s8346_s6 + $0x538] sm:$0xff] }
  0xcc   : > { %vm3413_vm13 = vcmp.lt.s32.totalorder %v3157_v49, 0  ;;  %v2647_v33 = vmul.u32 3266489909, %v2391_v63  ;;  %v1653_v23 = vxor.u32 %v1397_v34, %v1141_v11  ;;  %7658 = vmatpush3.bf16.msra.mxu0 %v7657_v16  ;;  %v569_v43 = vmax.f32 %v313_v56, 0.0  ;;  %v4219_v16 = vld [vmem:[%s12567_s2 + $0x450] sm:$0xff] }
  0xcd   : > { %6395 = vmatmul.mubr.msk.f32.gmra.mrb[22].mxu0 %vm3413_vm13, %v9135_v54  ;;  %v3160_v9 = vxor.u32 %v2904_v31, %v2648_v7  ;;  %v2422_v19 = vxor.u32 %v2166_v30, %v1910_v13  ;;  %v1400_v42 = vshrl.u32 %v1144_v46, 16  ;;  %v885_v55 = vadd.s32 %v8697_v47, %v8976_v36  ;;  %v4250_v54 = vld [vmem:[%s12567_s2 + $0x548] sm:$0xff] }
  0xce   : > { %v2903_v60 = vshrl.u32 %v2647_v33, 16  ;;  %v1909_v5 = vmul.u32 2246822507, %v1653_v23  ;;  %v9207_v1 = vadd.f32 %v569_v43, %v569_v43  ;;  %v7687_v20 = vpack.c.bf16 %v4266_v12, %v4265_v24  ;;  %v345_v43 = vld [vmem:[%s8346_s6 + $0x530] sm:$0xff] }
  0xcf   : > { %vm3416_vm14 = vcmp.lt.s32.totalorder %v3160_v9, 0  ;;  %v2678_v51 = vmul.u32 3266489909, %v2422_v19  ;;  %v1656_v61 = vxor.u32 %v1400_v42, %v1144_v46  ;;  %v1143_v32 = vxor.u32 %v8174_v44, %v885_v55 }
  0xd0   : > { %6410 = vmatprep.mubr.msk.f32.mxu1 %vm3416_vm14, %v9150_v37  ;;  %v3159_v4 = vxor.u32 %v2903_v60, %v2647_v33  ;;  %v2165_v18 = vshrl.u32 %v1909_v5, 13  ;;  %7688 = vmatprep.subr.bf16.mxu1 %v7687_v20  ;;  %v600_v59 = vmax.f32 %v344_v62, 0.0  ;;  %v916_v21 = vadd.s32 %v8753_v57, %v8912_v25  ;;  %v4236_v37 = vld [vmem:[%s12567_s2 + $0x4d8] sm:$0xff] }
  0xd1   : > { %v2934_v48 = vshrl.u32 %v2678_v51, 16  ;;  %v1912_v45 = vmul.u32 2246822507, %v1656_v61  ;;  %v1399_v50 = vshrl.u32 %v1143_v32, 16  ;;  %v7689_v40 = vpack.c.bf16 %v4250_v54, %v4249_v14  ;;  %v4267_v61 = vld [vmem:[%s12567_s2 + $0x5d0] sm:$0xff] }
  0xd2   : > { %vm3415_vm15 = vcmp.lt.s32.totalorder %v3159_v4, 0  ;;  %v2421_v58 = vxor.u32 %v2165_v18, %v1909_v5  ;;  %v1174_v10 = vxor.u32 %v8174_v44, %v916_v21  ;;  %v9227_v35 = vadd.f32 %v600_v59, %v600_v59  ;;  %v376_v21 = vld [vmem:[%s8346_s6 + $0x628] sm:$0xff] }
  0xd3   : > { %6411 = vmatmul.mubr.msk.f32.gmra.mrb[22].mxu1 %vm3415_vm15, %v9155_v41  ;;  %v3190_v11 = vxor.u32 %v2934_v48, %v2678_v51  ;;  %v2168_v7 = vshrl.u32 %v1912_v45, 13  ;;  %v1655_v13 = vxor.u32 %v1399_v50, %v1143_v32  ;;  %v599_v6 = vmax.f32 %v343_v52, 0.0  ;;  %v4220_v41 = vld [vmem:[%s12567_s2 + $0x458] sm:$0xff] }
  0xd4   : > { %v2677_v56 = vmul.u32 3266489909, %v2421_v58  ;;  %v1430_v49 = vshrl.u32 %v1174_v10, 16  ;;  %7690 = vmatpush3.bf16.msra.mxu1 %v7689_v40  ;;  %v915_v63 = vadd.s32 %v8753_v57, %v8925_v3  ;;  %v7659_v34 = vpack.c.bf16 %v4236_v37, %v4235_v53  ;;  %v4268_v32 = vld [vmem:[%s12567_s2 + $0x5d8] sm:$0xff] }
  0xd5   : > { %vm3446_vm0 = vcmp.lt.s32.totalorder %v3190_v11, 0  ;;  %v2424_v31 = vxor.u32 %v2168_v7, %v1912_v45  ;;  %v1911_v30 = vmul.u32 2246822507, %v1655_v13  ;;  %v9239_v46 = vadd.f32 %v599_v6, %v599_v6  ;;  %v4252_v11 = vld [vmem:[%s12567_s2 + $0x558] sm:$0xff] }
  0xd6   : > { %6396 = vmatprep.mubr.msk.f32.mxu0 %vm3446_vm0, %v9169_v2  ;;  %v2933_v24 = vshrl.u32 %v2677_v56, 16  ;;  %v1686_v12 = vxor.u32 %v1430_v49, %v1174_v10  ;;  %v1173_v33 = vxor.u32 %v8174_v44, %v915_v63  ;;  %7660 = vmatprep.subr.bf16.mxu0 %v7659_v34  ;;  %v602_v23 = vmax.f32 %v346_v26, 0.0  ;;  %v4251_v10 = vld [vmem:[%s12567_s2 + $0x550] sm:$0xff]  ;;  %v375_v63 = vld [vmem:[%s8346_s6 + $0x620] sm:$0xff] }
  0xd7   : > { %v2680_v9 = vmul.u32 3266489909, %v2424_v31  ;;  %v2167_v19 = vshrl.u32 %v1911_v30, 13  ;;  %v918_v42 = vadd.s32 %v8753_v57, %v8934_v22  ;;  %v7661_v55 = vpack.c.bf16 %v4220_v41, %v4219_v16 }
  0xd8   : > { %v3189_v62 = vxor.u32 %v2933_v24, %v2677_v56  ;;  %v1942_v60 = vmul.u32 2246822507, %v1686_v12  ;;  %v1429_v5 = vshrl.u32 %v1173_v33, 16  ;;  %v9246_v20 = vadd.f32 %v602_v23, %v602_v23  ;;  %v4238_v23 = vld [vmem:[%s12567_s2 + $0x4e8] sm:$0xff] }
  0xd9   : > { %v2936_v2 = vshrl.u32 %v2680_v9, 16  ;;  %v2423_v14 = vxor.u32 %v2167_v19, %v1911_v30  ;;  %v1176_v54 = vxor.u32 %v8174_v44, %v918_v42  ;;  %7662 = vmatpush3.bf16.msra.mxu0 %v7661_v55  ;;  %v601_v51 = vmax.f32 %v345_v43, 0.0 }
  0xda   : > { %vm3445_vm1 = vcmp.lt.s32.totalorder %v3189_v62, 0  ;;  %v2198_v4 = vshrl.u32 %v1942_v60, 13  ;;  %v1685_v18 = vxor.u32 %v1429_v5, %v1173_v33  ;;  %v917_v59 = vadd.s32 %v8753_v57, %v8976_v36  ;;  %v378_v5 = vld [vmem:[%s8346_s6 + $0x638] sm:$0xff] }
  0xdb   : > { %6397 = vmatmul.mubr.msk.f32.gmra.mrb[24].mxu0 %vm3445_vm1, %v9181_v17  ;;  %v3192_v52 = vxor.u32 %v2936_v2, %v2680_v9  ;;  %v2679_v48 = vmul.u32 3266489909, %v2423_v14  ;;  %v1432_v45 = vshrl.u32 %v1176_v54, 16  ;;  %v9259_v50 = vadd.f32 %v601_v51, %v601_v51 }
  0xdc   : > { %v2454_v40 = vxor.u32 %v2198_v4, %v1942_v60  ;;  %v1941_v53 = vmul.u32 2246822507, %v1685_v18  ;;  %v1175_v37 = vxor.u32 %v8174_v44, %v917_v59  ;;  %v7691_v58 = vpack.c.bf16 %v4268_v32, %v4267_v61  ;;  %v4221_v61 = vld [vmem:[%s12567_s2 + $0x460] sm:$0xff] }
  0xdd   : > { %vm3448_vm2 = vcmp.lt.s32.totalorder %v3192_v52, 0  ;;  %v2935_v17 = vshrl.u32 %v2679_v48, 16  ;;  %v1688_v7 = vxor.u32 %v1432_v45, %v1176_v54  ;;  %v632_v13 = vmax.f32 %v376_v21, 0.0  ;;  %v377_v45 = vld [vmem:[%s8346_s6 + $0x630] sm:$0xff] }
  0xde   : > { %6412 = vmatprep.mubr.msk.f32.mxu1 %vm3448_vm2, %v9195_v39  ;;  %v2710_v6 = vmul.u32 3266489909, %v2454_v40  ;;  %v2197_v26 = vshrl.u32 %v1941_v53, 13  ;;  %v1431_v56 = vshrl.u32 %v1175_v37, 16  ;;  %7692 = vmatprep.subr.bf16.mxu1 %v7691_v58  ;;  %v948_v49 = vadd.s32 %v8817_v27, %v8912_v25  ;;  %v4237_v39 = vld [vmem:[%s12567_s2 + $0x4e0] sm:$0xff] }
  0xdf   : > { %v3191_v34 = vxor.u32 %v2935_v17, %v2679_v48  ;;  %v1944_v16 = vmul.u32 2246822507, %v1688_v7  ;;  %v9272_v41 = vadd.f32 %v632_v13, %v632_v13  ;;  %v7693_v31 = vpack.c.bf16 %v4252_v11, %v4251_v10  ;;  %v4270_v13 = vld [vmem:[%s12567_s2 + $0x5e8] sm:$0xff] }
  0xe0   : > { %v2966_v30 = vshrl.u32 %v2710_v6, 16  ;;  %v2453_v24 = vxor.u32 %v2197_v26, %v1941_v53  ;;  %v1687_v12 = vxor.u32 %v1431_v56, %v1175_v37  ;;  %v1206_v33 = vxor.u32 %v8174_v44, %v948_v49 }
  0xe1   : > { %vm3447_vm3 = vcmp.lt.s32.totalorder %v3191_v34, 0  ;;  %v2200_v43 = vshrl.u32 %v1944_v16, 13  ;;  %7694 = vmatpush3.bf16.msra.mxu1 %v7693_v31  ;;  %v631_v9 = vmax.f32 %v375_v63, 0.0  ;;  %v947_v19 = vadd.s32 %v8817_v27, %v8925_v3  ;;  %v408_v31 = vld [vmem:[%s8346_s6 + $0x728] sm:$0xff] }
  0xe2   : > { %6413 = vmatmul.mubr.msk.f32.gmra.mrb[24].mxu1 %vm3447_vm3, %v9207_v1  ;;  %v3222_v42 = vxor.u32 %v2966_v30, %v2710_v6  ;;  %v2709_v55 = vmul.u32 3266489909, %v2453_v24  ;;  %v1943_v62 = vmul.u32 2246822507, %v1687_v12  ;;  %v1462_v60 = vshrl.u32 %v1206_v33, 16  ;;  %v4222_v1 = vld [vmem:[%s12567_s2 + $0x468] sm:$0xff] }
  0xe3   : > { %v2456_v2 = vxor.u32 %v2200_v43, %v1944_v16  ;;  %v1205_v14 = vxor.u32 %v8174_v44, %v947_v19  ;;  %v9286_v54 = vadd.f32 %v631_v9, %v631_v9  ;;  %v7663_v51 = vpack.c.bf16 %v4238_v23, %v4237_v39  ;;  %v4253_v39 = vld [vmem:[%s12567_s2 + $0x560] sm:$0xff] }
  0xe4   : > { %vm3478_vm4 = vcmp.lt.s32.totalorder %v3222_v42, 0  ;;  %v2965_v32 = vshrl.u32 %v2709_v55, 16  ;;  %v2199_v4 = vshrl.u32 %v1943_v62, 13  ;;  %v1718_v18 = vxor.u32 %v1462_v60, %v1206_v33  ;;  %v407_v60 = vld [vmem:[%s8346_s6 + $0x720] sm:$0xff] }
  0xe5   : > { %6398 = vmatprep.mubr.msk.f32.mxu0 %vm3478_vm4, %v9227_v35  ;;  %v2712_v59 = vmul.u32 3266489909, %v2456_v2  ;;  %v1461_v21 = vshrl.u32 %v1205_v14, 16  ;;  %7664 = vmatprep.subr.bf16.mxu0 %v7663_v51  ;;  %v634_v52 = vmax.f32 %v378_v5, 0.0  ;;  %v950_v48 = vadd.s32 %v8817_v27, %v8934_v22  ;;  %v4269_v35 = vld [vmem:[%s12567_s2 + $0x5e0] sm:$0xff] }
  0xe6   : > { %v3221_v40 = vxor.u32 %v2965_v32, %v2709_v55  ;;  %v2455_v53 = vxor.u32 %v2199_v4, %v1943_v62  ;;  %v1974_v37 = vmul.u32 2246822507, %v1718_v18  ;;  %v7665_v58 = vpack.c.bf16 %v4222_v1, %v4221_v61  ;;  %v4239_v61 = vld [vmem:[%s12567_s2 + $0x4f0] sm:$0xff] }
  0xe7   : > { %v2968_v10 = vshrl.u32 %v2712_v59, 16  ;;  %v1717_v11 = vxor.u32 %v1461_v21, %v1205_v14  ;;  %v1208_v17 = vxor.u32 %v8174_v44, %v950_v48  ;;  %v9299_v7 = vadd.f32 %v634_v52, %v634_v52  ;;  %v410_v52 = vld [vmem:[%s8346_s6 + $0x738] sm:$0xff] }
  0xe8   : > { %vm3477_vm5 = vcmp.lt.s32.totalorder %v3221_v40, 0  ;;  %v2711_v6 = vmul.u32 3266489909, %v2455_v53  ;;  %v2230_v26 = vshrl.u32 %v1974_v37, 13  ;;  %7666 = vmatpush3.bf16.msra.mxu0 %v7665_v58  ;;  %v633_v56 = vmax.f32 %v377_v45, 0.0 }
  0xe9   : > { %6399 = vmatmul.mubr.msk.f32.gmra.mrb[26].mxu0 %vm3477_vm5, %v9239_v46  ;;  %v3224_v49 = vxor.u32 %v2968_v10, %v2712_v59  ;;  %v1973_v63 = vmul.u32 2246822507, %v1717_v11  ;;  %v1464_v34 = vshrl.u32 %v1208_v17, 16  ;;  %v949_v16 = vadd.s32 %v8817_v27, %v8976_v36  ;;  %v4254_v46 = vld [vmem:[%s12567_s2 + $0x568] sm:$0xff] }
  0xea   : > { %v2967_v30 = vshrl.u32 %v2711_v6, 16  ;;  %v2486_v24 = vxor.u32 %v2230_v26, %v1974_v37  ;;  %v9311_v12 = vadd.f32 %v633_v56, %v633_v56  ;;  %v7695_v33 = vpack.c.bf16 %v4270_v13, %v4269_v35 }
  0xeb   : > { %vm3480_vm6 = vcmp.lt.s32.totalorder %v3224_v49, 0  ;;  %v2229_v23 = vshrl.u32 %v1973_v63, 13  ;;  %v1720_v43 = vxor.u32 %v1464_v34, %v1208_v17  ;;  %v1207_v9 = vxor.u32 %v8174_v44, %v949_v16  ;;  %v4224_v17 = vld [vmem:[%s12567_s2 + $0x478] sm:$0xff] }
  0xec   : > { %6414 = vmatprep.mubr.msk.f32.mxu1 %vm3480_vm6, %v9246_v20  ;;  %v3223_v19 = vxor.u32 %v2967_v30, %v2711_v6  ;;  %v2742_v42 = vmul.u32 3266489909, %v2486_v24  ;;  %7696 = vmatprep.subr.bf16.mxu1 %v7695_v33  ;;  %v664_v55 = vmax.f32 %v408_v31, 0.0  ;;  %v980_v62 = vadd.s32 %v8872_v8, %v8912_v25  ;;  %v4240_v20 = vld [vmem:[%s12567_s2 + $0x4f8] sm:$0xff]  ;;  %v4271_v24 = vld [vmem:[%s12567_s2 + $0x5f0] sm:$0xff] }
  0xed   : > { %v2485_v5 = vxor.u32 %v2229_v23, %v1973_v63  ;;  %v1976_v2 = vmul.u32 2246822507, %v1720_v43  ;;  %v1463_v14 = vshrl.u32 %v1207_v9, 16  ;;  %v7697_v51 = vpack.c.bf16 %v4254_v46, %v4253_v39  ;;  %v409_v63 = vld [vmem:[%s8346_s6 + $0x730] sm:$0xff] }
  0xee   : > { %vm3479_vm7 = vcmp.lt.s32.totalorder %v3223_v19, 0  ;;  %v2998_v1 = vshrl.u32 %v2742_v42, 16  ;;  %v1238_v32 = vxor.u32 %v8174_v44, %v980_v62  ;;  %v9331_v4 = vadd.f32 %v664_v55, %v664_v55  ;;  %v188_v19 = vld [vmem:[%s8346_s6 + $0x48] sm:$0xff] }
  0xef   : > { %6415 = vmatmul.mubr.msk.f32.gmra.mrb[26].mxu1 %vm3479_vm7, %v9259_v50  ;;  %v2741_v25 = vmul.u32 3266489909, %v2485_v5  ;;  %v2232_v18 = vshrl.u32 %v1976_v2, 13  ;;  %v1719_v59 = vxor.u32 %v1463_v14, %v1207_v9  ;;  %v663_v21 = vmax.f32 %v407_v60, 0.0  ;;  %v4223_v50 = vld [vmem:[%s12567_s2 + $0x470] sm:$0xff] }
  0xf0   : > { %v3254_v48 = vxor.u32 %v2998_v1, %v2742_v42  ;;  %v1494_v45 = vshrl.u32 %v1238_v32, 16  ;;  %7698 = vmatpush3.bf16.msra.mxu1 %v7697_v51  ;;  %v979_v40 = vadd.s32 %v8872_v8, %v8925_v3  ;;  %v7667_v53 = vpack.c.bf16 %v4240_v20, %v4239_v61 }
  0xf1   : > { %v2997_v37 = vshrl.u32 %v2741_v25, 16  ;;  %v2488_v58 = vxor.u32 %v2232_v18, %v1976_v2  ;;  %v1975_v10 = vmul.u32 2246822507, %v1719_v59  ;;  %v9337_v11 = vadd.f32 %v663_v21, %v663_v21  ;;  %v187_v21 = vld [vmem:[%s8346_s6 + $0x40] sm:$0xff] }
  0xf2   : > { %vm3510_vm8 = vcmp.lt.s32.totalorder %v3254_v48, 0  ;;  %v1750_v35 = vxor.u32 %v1494_v45, %v1238_v32  ;;  %v1237_v13 = vxor.u32 %v8174_v44, %v979_v40  ;;  %7668 = vmatprep.subr.bf16.mxu0 %v7667_v53  ;;  %v666_v3 = vmax.f32 %v410_v52, 0.0 }
  0xf3   : > { %6400 = vmatprep.mubr.msk.f32.mxu0 %vm3510_vm8, %v9272_v41  ;;  %v3253_v6 = vxor.u32 %v2997_v37, %v2741_v25  ;;  %v2744_v26 = vmul.u32 3266489909, %v2488_v58  ;;  %v2231_v56 = vshrl.u32 %v1975_v10, 13  ;;  %v982_v49 = vadd.s32 %v8872_v8, %v8934_v22  ;;  %v4272_v41 = vld [vmem:[%s12567_s2 + $0x5f8] sm:$0xff] }
  0xf4   : > { %v2006_v34 = vmul.u32 2246822507, %v1750_v35  ;;  %v1493_v16 = vshrl.u32 %v1237_v13, 16  ;;  %v9350_v31 = vadd.f32 %v666_v3, %v666_v3  ;;  %v7669_v30 = vpack.c.bf16 %v4224_v17, %v4223_v50  ;;  %v4290_v50 = vld [vmem:[%s12567_s2 + $0x688] sm:$0xff] }
  0xf5   : > { %vm3509_vm9 = vcmp.lt.s32.totalorder %v3253_v6, 0  ;;  %v3000_v33 = vshrl.u32 %v2744_v26, 16  ;;  %v2487_v39 = vxor.u32 %v2231_v56, %v1975_v10  ;;  %v1240_v22 = vxor.u32 %v8174_v44, %v982_v49  ;;  %v190_v49 = vld [vmem:[%s8346_s6 + $0x58] sm:$0xff] }
  0xf6   : > { %6401 = vmatmul.mubr.msk.f32.gmra.mrb[28].mxu0 %vm3509_vm9, %v9286_v54  ;;  %v2262_v46 = vshrl.u32 %v2006_v34, 13  ;;  %v1749_v23 = vxor.u32 %v1493_v16, %v1237_v13  ;;  %v665_v43 = vmax.f32 %v409_v63, 0.0  ;;  %v981_v9 = vadd.s32 %v8872_v8, %v8976_v36  ;;  %v4255_v54 = vld [vmem:[%s12567_s2 + $0x570] sm:$0xff]  ;;  %v4256_v36 = vld [vmem:[%s12567_s2 + $0x578] sm:$0xff] }
  0xf7   : > { %v3256_v42 = vxor.u32 %v3000_v33, %v2744_v26  ;;  %v2743_v55 = vmul.u32 3266489909, %v2487_v39  ;;  %v1496_v62 = vshrl.u32 %v1240_v22, 16  ;;  %7670 = vmatpush3.bf16.msra.mxu0 %v7669_v30  ;;  %v7699_v60 = vpack.c.bf16 %v4272_v41, %v4271_v24  ;;  %v9400_v24 = vld [vmem:[%s12567_s2 + $0x600] sm:$0xff] }
  0xf8   : > { %v2518_v5 = vxor.u32 %v2262_v46, %v2006_v34  ;;  %v2005_v2 = vmul.u32 2246822507, %v1749_v23  ;;  %v1239_v14 = vxor.u32 %v8174_v44, %v981_v9  ;;  %v9364_v51 = vadd.f32 %v665_v43, %v665_v43  ;;  %v189_v9 = vld [vmem:[%s8346_s6 + $0x50] sm:$0xff] }
  0xf9   : > { %vm3512_vm10 = vcmp.lt.s32.totalorder %v3256_v42, 0  ;;  %v2999_v61 = vshrl.u32 %v2743_v55, 16  ;;  %v1752_v20 = vxor.u32 %v1496_v62, %v1240_v22  ;;  %7700 = vmatprep.subr.bf16.mxu1 %v7699_v60  ;;  %v444_v1 = vmax.f32 %v188_v19, 0.0 }
  0xfa   : > { %6416 = vmatprep.mubr.msk.f32.mxu1 %vm3512_vm10, %v9299_v7  ;;  %v2774_v32 = vmul.u32 3266489909, %v2518_v5  ;;  %v2261_v25 = vshrl.u32 %v2005_v2, 13  ;;  %v1495_v18 = vshrl.u32 %v1239_v14, 16  ;;  %v9374_v59 = vadd.s32 1152, %v8109_v15  ;;  %v4289_v7 = vld [vmem:[%s12567_s2 + $0x680] sm:$0xff] }
  0xfb   : > { %v3255_v52 = vxor.u32 %v2999_v61, %v2743_v55  ;;  %v2008_v48 = vmul.u32 2246822507, %v1752_v20  ;;  %v9377_v45 = vadd.f32 %v444_v1, %v444_v1  ;;  %v7701_v40 = vpack.c.bf16 %v4256_v36, %v4255_v54  ;;  %v4322_v54 = vld [vmem:[%s12567_s2 + $0x788] sm:$0xff] }
  0xfc   : > { %v3030_v53 = vshrl.u32 %v2774_v32, 16  ;;  %v2517_v37 = vxor.u32 %v2261_v25, %v2005_v2  ;;  %v1751_v58 = vxor.u32 %v1495_v18, %v1239_v14  ;;  %v760_v10 = vadd.s32 %v8161_v38, %v9374_v59  ;;  %v4321_v14 = vld [vmem:[%s12567_s2 + $0x780] sm:$0xff] }
  0xfd   : > { %vm3511_vm11 = vcmp.lt.s32.totalorder %v3255_v52, 0  ;;  %v2264_v17 = vshrl.u32 %v2008_v48, 13  ;;  %7702 = vmatpush3.bf16.msra.mxu1 %v7701_v40  ;;  %v443_v35 = vmax.f32 %v187_v21, 0.0  ;;  %v9388_v13 = vadd.s32 1024, %v8109_v15  ;;  %v220_v21 = vld [vmem:[%s8346_s6 + $0x148] sm:$0xff] }
  0xfe   : > { %6417 = vmatmul.mubr.msk.f32.gmra.mrb[28].mxu1 %vm3511_vm11, %v9311_v12  ;;  %v3286_v3 = vxor.u32 %v3030_v53, %v2774_v32  ;;  %v2773_v6 = vmul.u32 3266489909, %v2517_v37  ;;  %v2007_v26 = vmul.u32 2246822507, %v1751_v58  ;;  %v1018_v56 = vxor.u32 %v8174_v44, %v760_v10  ;;  %v9405_v12 = vld [vmem:[%s12567_s2 + $0x608] sm:$0xff]  ;;  %v9436_v37 = vld [vmem:[%s12567_s2 + $0x700] sm:$0xff] }
  0xff   : > { %v2520_v63 = vxor.u32 %v2264_v17, %v2008_v48  ;;  %v759_v34 = vadd.s32 %v8161_v38, %v9388_v13  ;;  %v9395_v16 = vadd.f32 %v443_v35, %v443_v35  ;;  %v7703_v30 = vpack.c.bf16 %v4290_v50, %v4289_v7 }
 0x100   : > { %vm3542_vm12 = vcmp.lt.s32.totalorder %v3286_v3, 0  ;;  %v3029_v41 = vshrl.u32 %v2773_v6, 16  ;;  %v2263_v33 = vshrl.u32 %v2007_v26, 13  ;;  %v1274_v39 = vshrl.u32 %v1018_v56, 16 }
 0x101   : > { %6402 = vmatprep.mubr.msk.f32.mxu0 %vm3542_vm12, %v9331_v4  ;;  %v2776_v22 = vmul.u32 3266489909, %v2520_v63  ;;  %v1017_v46 = vxor.u32 %v8174_v44, %v759_v34  ;;  %7704 = vmatprep.subr.bf16.mxu0 %v7703_v30  ;;  %v446_v23 = vmax.f32 %v190_v49, 0.0  ;;  %v9410_v43 = vadd.s32 1408, %v8109_v15  ;;  %v4292_v34 = vld [vmem:[%s12567_s2 + $0x698] sm:$0xff] }
 0x102   : > { %v3285_v19 = vxor.u32 %v3029_v41, %v2773_v6  ;;  %v2519_v42 = vxor.u32 %v2263_v33, %v2007_v26  ;;  %v1530_v55 = vxor.u32 %v1274_v39, %v1018_v56  ;;  %v7705_v62 = vpack.c.bf16 %v9405_v12, %v9400_v24  ;;  %v219_v6 = vld [vmem:[%s8346_s6 + $0x140] sm:$0xff]  ;;  %v4308_v24 = vld [vmem:[%s12567_s2 + $0x718] sm:$0xff] }
 0x103   : > { %v3032_v60 = vshrl.u32 %v2776_v22, 16  ;;  %v1273_v5 = vshrl.u32 %v1017_v46, 16  ;;  %v762_v4 = vadd.s32 %v8161_v38, %v9410_v43  ;;  %v9417_v2 = vadd.f32 %v446_v23, %v446_v23 }
 0x104   : > { %vm3541_vm13 = vcmp.lt.s32.totalorder %v3285_v19, 0  ;;  %v2775_v36 = vmul.u32 3266489909, %v2519_v42  ;;  %v1786_v61 = vmul.u32 2246822507, %v1530_v55  ;;  %v445_v20 = vmax.f32 %v189_v9, 0.0 }
 0x105   : > { %6403 = vmatmul.mubr.msk.f32.gmra.mrb[30].mxu0 %vm3541_vm13, %v9337_v11  ;;  %v3288_v1 = vxor.u32 %v3032_v60, %v2776_v22  ;;  %v1529_v32 = vxor.u32 %v1273_v5, %v1017_v46  ;;  %v1020_v25 = vxor.u32 %v8174_v44, %v762_v4  ;;  %v9428_v18 = vadd.s32 1280, %v8109_v15  ;;  %v9441_v11 = vld [vmem:[%s12567_s2 + $0x708] sm:$0xff]  ;;  %v222_v9 = vld [vmem:[%s8346_s6 + $0x158] sm:$0xff] }
 0x106   : > { %v3031_v52 = vshrl.u32 %v2775_v36, 16  ;;  %v2042_v48 = vshrl.u32 %v1786_v61, 13  ;;  %v9431_v40 = vadd.f32 %v445_v20, %v445_v20  ;;  %v7735_v53 = vpack.c.bf16 %v4322_v54, %v4321_v14 }
 0x107   : > { %vm3544_vm14 = vcmp.lt.s32.totalorder %v3288_v1, 0  ;;  %v1785_v58 = vmul.u32 2246822507, %v1529_v32  ;;  %v1276_v10 = vshrl.u32 %v1020_v25, 16  ;;  %v761_v7 = vadd.s32 %v8161_v38, %v9428_v18 }
 0x108   : > { %6418 = vmatprep.mubr.msk.f32.mxu1 %vm3544_vm14, %v9350_v31  ;;  %v3287_v50 = vxor.u32 %v3031_v52, %v2775_v36  ;;  %v2298_v17 = vxor.u32 %v2042_v48, %v1786_v61  ;;  %7736 = vmatprep.subr.bf16.mxu1 %v7735_v53  ;;  %v476_v35 = vmax.f32 %v220_v21, 0.0  ;;  %v792_v3 = vadd.s32 %v8269_v28, %v9374_v59  ;;  %v9455_v31 = vld [vmem:[%s12567_s2 + $0x690] sm:$0xff]  ;;  %v4276_v48 = vld [vmem:[%s12567_s2 + $0x618] sm:$0xff] }
 0x109   : > { %v2041_v26 = vshrl.u32 %v1785_v58, 13  ;;  %v1532_v56 = vxor.u32 %v1276_v10, %v1020_v25  ;;  %v1019_v49 = vxor.u32 %v8174_v44, %v761_v7  ;;  %v7737_v63 = vpack.c.bf16 %v9441_v11, %v9436_v37  ;;  %v4275_v52 = vld [vmem:[%s12567_s2 + $0x610] sm:$0xff]  ;;  %v4325_v11 = vld [vmem:[%s12567_s2 + $0x7a0] sm:$0xff] }
 0x10a   : > { %vm3543_vm15 = vcmp.lt.s32.totalorder %v3287_v50, 0  ;;  %v2554_v30 = vmul.u32 3266489909, %v2298_v17  ;;  %v1050_v41 = vxor.u32 %v8174_v44, %v792_v3  ;;  %v9461_v33 = vadd.f32 %v476_v35, %v476_v35  ;;  %v221_v53 = vld [vmem:[%s8346_s6 + $0x150] sm:$0xff] }
 0x10b   : > { %6419 = vmatmul.mubr.msk.f32.gmra.mrb[30].mxu1 %vm3543_vm15, %v9364_v51  ;;  %v2297_v39 = vxor.u32 %v2041_v26, %v1785_v58  ;;  %v1788_v22 = vmul.u32 2246822507, %v1532_v56  ;;  %v1275_v46 = vshrl.u32 %v1019_v49, 16  ;;  %v475_v23 = vmax.f32 %v219_v6, 0.0 }
 0x10c   : > { %v2810_v19 = vshrl.u32 %v2554_v30, 16  ;;  %v1306_v42 = vshrl.u32 %v1050_v41, 16  ;;  %v791_v55 = vadd.s32 %v8269_v28, %v9388_v13  ;;  %v7707_v60 = vpack.c.bf16 %v4292_v34, %v9455_v31  ;;  %v9487_v31 = vld [vmem:[%s12567_s2 + $0x790] sm:$0xff]  ;;  %v9492_v34 = vld [vmem:[%s12567_s2 + $0x798] sm:$0xff] }
 0x10d   : > { %v2553_v5 = vmul.u32 3266489909, %v2297_v39  ;;  %v2044_v4 = vshrl.u32 %v1788_v22, 13  ;;  %v1531_v14 = vxor.u32 %v1275_v46, %v1019_v49  ;;  %v9468_v54 = vadd.f32 %v475_v23, %v475_v23  ;;  %v252_v39 = vld [vmem:[%s8346_s6 + $0x248] sm:$0xff] }
 0x10e   : > { %v3066_v36 = vxor.u32 %v2810_v19, %v2554_v30  ;;  %v1562_v51 = vxor.u32 %v1306_v42, %v1050_v41  ;;  %v1049_v61 = vxor.u32 %v8174_v44, %v791_v55  ;;  %v478_v20 = vmax.f32 %v222_v9, 0.0 }
 0x10f   : > { %v2809_v1 = vshrl.u32 %v2553_v5, 16  ;;  %v2300_v32 = vxor.u32 %v2044_v4, %v1788_v22  ;;  %v1787_v25 = vmul.u32 2246822507, %v1531_v14  ;;  %v794_v21 = vadd.s32 %v8269_v28, %v9410_v43 }
 0x110   : > { %vm3322_vm0 = vcmp.lt.s32.totalorder %v3066_v36, 0  ;;  %v1818_v58 = vmul.u32 2246822507, %v1562_v51  ;;  %v1305_v10 = vshrl.u32 %v1049_v61, 16  ;;  %v9480_v7 = vadd.f32 %v478_v20, %v478_v20  ;;  %v4307_v51 = vld [vmem:[%s12567_s2 + $0x710] sm:$0xff]  ;;  %v251_v20 = vld [vmem:[%s8346_s6 + $0x240] sm:$0xff] }
 0x111   : > { %6420 = vmatprep.mubr.msk.f32.mxu0 %vm3322_vm0, %v9377_v45  ;;  %v3065_v50 = vxor.u32 %v2809_v1, %v2553_v5  ;;  %v2556_v17 = vmul.u32 3266489909, %v2300_v32  ;;  %v2043_v35 = vshrl.u32 %v1787_v25, 13  ;;  %v1052_v3 = vxor.u32 %v8174_v44, %v794_v21 }
 0x112   : > { %v2074_v6 = vshrl.u32 %v1818_v58, 13  ;;  %v1561_v26 = vxor.u32 %v1305_v10, %v1049_v61  ;;  %v7709_v56 = vpack.c.bf16 %v4276_v48, %v4275_v52  ;;  %v477_v49 = vmax.f32 %v221_v53, 0.0 }
 0x113   : > { %vm3321_vm1 = vcmp.lt.s32.totalorder %v3065_v50, 0  ;;  %v2812_v45 = vshrl.u32 %v2556_v17, 16  ;;  %v2299_v30 = vxor.u32 %v2043_v35, %v1787_v25  ;;  %v1308_v41 = vshrl.u32 %v1052_v3, 16  ;;  %v4294_v35 = vld [vmem:[%s12567_s2 + $0x6a8] sm:$0xff] }
 0x114   : > { %6421 = vmatmul.mubr.msk.f32.vlgmr.msra.gmra.mrb[32].mxu0 %vm3321_vm1, %v9395_v16  ;;  %v2330_v22 = vxor.u32 %v2074_v6, %v1818_v58  ;;  %v1817_v46 = vmul.u32 2246822507, %v1561_v26  ;;  %v793_v23 = vadd.s32 %v8269_v28, %v9428_v18  ;;  %v9498_v9 = vadd.f32 %v477_v49, %v477_v49 }
 0x115   : > { %v3068_v19 = vxor.u32 %v2812_v45, %v2556_v17  ;;  %7706 = vmatpush3.bf16.msra.mxu0 %v7705_v62  ;;  %v2555_v42 = vmul.u32 3266489909, %v2299_v30  ;;  %v1564_v55 = vxor.u32 %v1308_v41, %v1052_v3  ;;  %v7739_v5 = vpack.c.bf16 %v9492_v34, %v9487_v31  ;;  %v4277_v45 = vld [vmem:[%s12567_s2 + $0x620] sm:$0xff]  ;;  %v4278_v30 = vld [vmem:[%s12567_s2 + $0x628] sm:$0xff] }
 0x116   : > { %v2586_v4 = vmul.u32 3266489909, %v2330_v22  ;;  %v2073_v16 = vshrl.u32 %v1817_v46, 13  ;;  %7708 = vmatprep.subr.bf16.mxu0 %v7707_v60  ;;  %v1051_v14 = vxor.u32 %v8174_v44, %v793_v23  ;;  %v508_v36 = vmax.f32 %v252_v39, 0.0 }
 0x117   : > { %vm3324_vm2 = vcmp.lt.s32.totalorder %v3068_v19, 0  ;;  %v2811_v12 = vshrl.u32 %v2555_v42, 16  ;;  %v1820_v62 = vmul.u32 2246822507, %v1564_v55  ;;  %v824_v61 = vadd.s32 %v8592_v29, %v9374_v59  ;;  %v253_v55 = vld [vmem:[%s8346_s6 + $0x250] sm:$0xff] }
 0x118   : > { %6436 = vmatprep.mubr.msk.f32.mxu1 %vm3324_vm2, %v9417_v2  ;;  %v2842_v60 = vshrl.u32 %v2586_v4, 16  ;;  %v2329_v1 = vxor.u32 %v2073_v16, %v1817_v46  ;;  %v1307_v32 = vshrl.u32 %v1051_v14, 16  ;;  %v9516_v25 = vadd.f32 %v508_v36, %v508_v36  ;;  %v4293_v2 = vld [vmem:[%s12567_s2 + $0x6a0] sm:$0xff] }
 0x119   : > { %v3067_v21 = vxor.u32 %v2811_v12, %v2555_v42  ;;  %v2076_v52 = vshrl.u32 %v1820_v62, 13  ;;  %7710 = vmatpush3.bf16.msra.mxu0 %v7709_v56  ;;  %v1082_v48 = vxor.u32 %v8174_v44, %v824_v61  ;;  %v7741_v53 = vpack.c.bf16 %v4308_v24, %v4307_v51  ;;  %v254_v56 = vld [vmem:[%s8346_s6 + $0x258] sm:$0xff]  ;;  %v284_v61 = vld [vmem:[%s8346_s6 + $0x348] sm:$0xff] }
 0x11a   : > { %v3098_v58 = vxor.u32 %v2842_v60, %v2586_v4  ;;  %v2585_v10 = vmul.u32 3266489909, %v2329_v1  ;;  %v1563_v50 = vxor.u32 %v1307_v32, %v1051_v14  ;;  %v507_v17 = vmax.f32 %v251_v20, 0.0 }
 0x11b   : > { %vm3323_vm3 = vcmp.lt.s32.totalorder %v3067_v21, 0  ;;  %v2332_v3 = vxor.u32 %v2076_v52, %v1820_v62  ;;  %v1338_v6 = vshrl.u32 %v1082_v48, 16  ;;  %v823_v26 = vadd.s32 %v8592_v29, %v9388_v13  ;;  %v4309_v21 = vld [vmem:[%s12567_s2 + $0x720] sm:$0xff] }
 0x11c   : > { %6437 = vmatmul.mubr.msk.f32.vlgmr.msra.gmra.mrb[32].mxu1 %vm3323_vm3, %v9431_v40  ;;  %vm3354_vm4 = vcmp.lt.s32.totalorder %v3098_v58, 0  ;;  %v2841_v49 = vshrl.u32 %v2585_v10, 16  ;;  %v1819_v31 = vmul.u32 2246822507, %v1563_v50  ;;  %v9529_v34 = vadd.f32 %v507_v17, %v507_v17 }
 0x11d   : > { %6422 = vmatprep.mubr.msk.f32.mxu0 %vm3354_vm4, %v9461_v33  ;;  %7738 = vmatpush3.bf16.msra.mxu1 %v7737_v63  ;;  %v2588_v40 = vmul.u32 3266489909, %v2332_v3  ;;  %v1594_v41 = vxor.u32 %v1338_v6, %v1082_v48  ;;  %v1081_v39 = vxor.u32 %v8174_v44, %v823_v26  ;;  %v7711_v22 = vpack.c.bf16 %v4294_v35, %v4293_v2  ;;  %v4326_v63 = vld [vmem:[%s12567_s2 + $0x7a8] sm:$0xff]  ;;  %v283_v2 = vld [vmem:[%s8346_s6 + $0x340] sm:$0xff] }
 0x11e   : > { %v3097_v46 = vxor.u32 %v2841_v49, %v2585_v10  ;;  %v2075_v23 = vshrl.u32 %v1819_v31, 13  ;;  %7740 = vmatprep.subr.bf16.mxu1 %v7739_v5  ;;  %v510_v19 = vmax.f32 %v254_v56, 0.0  ;;  %v826_v42 = vadd.s32 %v8592_v29, %v9410_v43 }
 0x11f   : > { %v2844_v4 = vshrl.u32 %v2588_v40, 16  ;;  %v1850_v16 = vmul.u32 2246822507, %v1594_v41  ;;  %v1337_v33 = vshrl.u32 %v1081_v39, 16  ;;  %7712 = vmatprep.subr.bf16.mxu0 %v7711_v22  ;;  %v7713_v37 = vpack.c.bf16 %v4278_v30, %v4277_v45  ;;  %v4296_v22 = vld [vmem:[%s12567_s2 + $0x6b8] sm:$0xff] }
 0x120   : > { %vm3353_vm5 = vcmp.lt.s32.totalorder %v3097_v46, 0  ;;  %v2331_v5 = vxor.u32 %v2075_v23, %v1819_v31  ;;  %v1084_v14 = vxor.u32 %v8174_v44, %v826_v42  ;;  %v9552_v36 = vadd.f32 %v510_v19, %v510_v19  ;;  %v286_v42 = vld [vmem:[%s8346_s6 + $0x358] sm:$0xff] }
 0x121   : > { %6423 = vmatmul.mubr.msk.f32.gmra.mrb[34].mxu0 %vm3353_vm5, %v9468_v54  ;;  %v3100_v51 = vxor.u32 %v2844_v4, %v2588_v40  ;;  %v2106_v24 = vshrl.u32 %v1850_v16, 13  ;;  %7742 = vmatpush3.bf16.msra.mxu1 %v7741_v53  ;;  %v1593_v12 = vxor.u32 %v1337_v33, %v1081_v39  ;;  %v509_v62 = vmax.f32 %v253_v55, 0.0  ;;  %v4310_v54 = vld [vmem:[%s12567_s2 + $0x728] sm:$0xff]  ;;  %v4295_v39 = vld [vmem:[%s12567_s2 + $0x6b0] sm:$0xff] }
 0x122   : > { %v2587_v20 = vmul.u32 3266489909, %v2331_v5  ;;  %v1340_v60 = vshrl.u32 %v1084_v14, 16  ;;  %7714 = vmatpush3.bf16.msra.mxu0 %v7713_v37  ;;  %v825_v1 = vadd.s32 %v8592_v29, %v9428_v18  ;;  %v7743_v32 = vpack.c.bf16 %v4326_v63, %v4325_v11 }
 0x123   : > { %vm3356_vm6 = vcmp.lt.s32.totalorder %v3100_v51, 0  ;;  %v2362_v52 = vxor.u32 %v2106_v24, %v1850_v16  ;;  %v1849_v48 = vmul.u32 2246822507, %v1593_v12  ;;  %v9564_v53 = vadd.f32 %v509_v62, %v509_v62  ;;  %v4280_v51 = vld [vmem:[%s12567_s2 + $0x638] sm:$0xff] }
 0x124   : > { %6438 = vmatprep.mubr.msk.f32.mxu1 %vm3356_vm6, %v9480_v7  ;;  %v2843_v58 = vshrl.u32 %v2587_v20, 16  ;;  %v1596_v10 = vxor.u32 %v1340_v60, %v1084_v14  ;;  %v1083_v50 = vxor.u32 %v8174_v44, %v825_v1  ;;  %7744 = vmatprep.subr.bf16.mxu1 %v7743_v32  ;;  %v540_v17 = vmax.f32 %v284_v61, 0.0  ;;  %v4279_v14 = vld [vmem:[%s12567_s2 + $0x630] sm:$0xff] }
 0x125   : > { %v2618_v35 = vmul.u32 3266489909, %v2362_v52  ;;  %v2105_v3 = vshrl.u32 %v1849_v48, 13  ;;  %v856_v6 = vadd.s32 %v8632_v0, %v9374_v59  ;;  %v7745_v26 = vpack.c.bf16 %v4310_v54, %v4309_v21  ;;  %v285_v1 = vld [vmem:[%s8346_s6 + $0x350] sm:$0xff] }
 0x126   : > { %v3099_v56 = vxor.u32 %v2843_v58, %v2587_v20  ;;  %v1852_v49 = vmul.u32 2246822507, %v1596_v10  ;;  %v1339_v31 = vshrl.u32 %v1083_v50, 16  ;;  %v9571_v45 = vadd.f32 %v540_v17, %v540_v17  ;;  %v4328_v17 = vld [vmem:[%s12567_s2 + $0x7b8] sm:$0xff] }
 0x127   : > { %v2874_v7 = vshrl.u32 %v2618_v35, 16  ;;  %v2361_v30 = vxor.u32 %v2105_v3, %v1849_v48  ;;  %v1114_v40 = vxor.u32 %v8174_v44, %v856_v6  ;;  %7746 = vmatpush3.bf16.msra.mxu1 %v7745_v26  ;;  %v539_v41 = vmax.f32 %v283_v2, 0.0 }
 0x128   : > { %vm3355_vm7 = vcmp.lt.s32.totalorder %v3099_v56, 0  ;;  %v2108_v46 = vshrl.u32 %v1852_v49, 13  ;;  %v1595_v23 = vxor.u32 %v1339_v31, %v1083_v50  ;;  %v855_v19 = vadd.s32 %v8632_v0, %v9388_v13  ;;  %v316_v31 = vld [vmem:[%s8346_s6 + $0x448] sm:$0xff] }
 0x129   : > { %6439 = vmatmul.mubr.msk.f32.gmra.mrb[34].mxu1 %vm3355_vm7, %v9498_v9  ;;  %v3130_v55 = vxor.u32 %v2874_v7, %v2618_v35  ;;  %v2617_v4 = vmul.u32 3266489909, %v2361_v30  ;;  %v1370_v16 = vshrl.u32 %v1114_v40, 16  ;;  %v9584_v33 = vadd.f32 %v539_v41, %v539_v41 }
 0x12a   : > { %v2364_v37 = vxor.u32 %v2108_v46, %v1852_v49  ;;  %v1851_v11 = vmul.u32 2246822507, %v1595_v23  ;;  %v1113_v63 = vxor.u32 %v8174_v44, %v855_v19  ;;  %v7715_v5 = vpack.c.bf16 %v4296_v22, %v4295_v39  ;;  %v4311_v39 = vld [vmem:[%s12567_s2 + $0x730] sm:$0xff] }
 0x12b   : > { %vm3386_vm8 = vcmp.lt.s32.totalorder %v3130_v55, 0  ;;  %v2873_v9 = vshrl.u32 %v2617_v4, 16  ;;  %v1626_v24 = vxor.u32 %v1370_v16, %v1114_v40  ;;  %v542_v12 = vmax.f32 %v286_v42, 0.0  ;;  %v315_v16 = vld [vmem:[%s8346_s6 + $0x440] sm:$0xff] }
 0x12c   : > { %6424 = vmatprep.mubr.msk.f32.mxu0 %vm3386_vm8, %v9516_v25  ;;  %v2620_v62 = vmul.u32 3266489909, %v2364_v37  ;;  %v2107_v61 = vshrl.u32 %v1851_v11, 13  ;;  %v1369_v20 = vshrl.u32 %v1113_v63, 16  ;;  %7716 = vmatprep.subr.bf16.mxu0 %v7715_v5  ;;  %v858_v60 = vadd.s32 %v8632_v0, %v9410_v43  ;;  %v4327_v25 = vld [vmem:[%s12567_s2 + $0x7b0] sm:$0xff] }
 0x12d   : > { %v3129_v32 = vxor.u32 %v2873_v9, %v2617_v4  ;;  %v1882_v21 = vmul.u32 2246822507, %v1626_v24  ;;  %v9597_v54 = vadd.f32 %v542_v12, %v542_v12  ;;  %v7717_v52 = vpack.c.bf16 %v4280_v51, %v4279_v14  ;;  %v4298_v12 = vld [vmem:[%s12567_s2 + $0x6c8] sm:$0xff] }
 0x12e   : > { %v2876_v48 = vshrl.u32 %v2620_v62, 16  ;;  %v2363_v58 = vxor.u32 %v2107_v61, %v1851_v11  ;;  %v1625_v10 = vxor.u32 %v1369_v20, %v1113_v63  ;;  %v1116_v50 = vxor.u32 %v8174_v44, %v858_v60 }
 0x12f   : > { %vm3385_vm9 = vcmp.lt.s32.totalorder %v3129_v32, 0  ;;  %v2138_v2 = vshrl.u32 %v1882_v21, 13  ;;  %7718 = vmatpush3.bf16.msra.mxu0 %v7717_v52  ;;  %v541_v35 = vmax.f32 %v285_v1, 0.0  ;;  %v857_v3 = vadd.s32 %v8632_v0, %v9428_v18  ;;  %v318_v52 = vld [vmem:[%s8346_s6 + $0x458] sm:$0xff] }
 0x130   : > { %6425 = vmatmul.mubr.msk.f32.gmra.mrb[36].mxu0 %vm3385_vm9, %v9529_v34  ;;  %v3132_v6 = vxor.u32 %v2876_v48, %v2620_v62  ;;  %v2619_v26 = vmul.u32 3266489909, %v2363_v58  ;;  %v1881_v56 = vmul.u32 2246822507, %v1625_v10  ;;  %v1372_v49 = vshrl.u32 %v1116_v50, 16  ;;  %v4312_v34 = vld [vmem:[%s12567_s2 + $0x738] sm:$0xff] }
 0x131   : > { %v2394_v7 = vxor.u32 %v2138_v2, %v1882_v21  ;;  %v1115_v30 = vxor.u32 %v8174_v44, %v857_v3  ;;  %v9611_v40 = vadd.f32 %v541_v35, %v541_v35  ;;  %v7747_v41 = vpack.c.bf16 %v4328_v17, %v4327_v25  ;;  %v4281_v25 = vld [vmem:[%s12567_s2 + $0x640] sm:$0xff] }
 0x132   : > { %vm3388_vm10 = vcmp.lt.s32.totalorder %v3132_v6, 0  ;;  %v2875_v22 = vshrl.u32 %v2619_v26, 16  ;;  %v2137_v46 = vshrl.u32 %v1881_v56, 13  ;;  %v1628_v23 = vxor.u32 %v1372_v49, %v1116_v50  ;;  %v317_v49 = vld [vmem:[%s8346_s6 + $0x450] sm:$0xff] }
 0x133   : > { %6440 = vmatprep.mubr.msk.f32.mxu1 %vm3388_vm10, %v9552_v36  ;;  %v2650_v19 = vmul.u32 3266489909, %v2394_v7  ;;  %v1371_v42 = vshrl.u32 %v1115_v30, 16  ;;  %7748 = vmatprep.subr.bf16.mxu1 %v7747_v41  ;;  %v572_v55 = vmax.f32 %v316_v31, 0.0  ;;  %v888_v4 = vadd.s32 %v8697_v47, %v9374_v59  ;;  %v4297_v36 = vld [vmem:[%s12567_s2 + $0x6c0] sm:$0xff] }
 0x134   : > { %v3131_v37 = vxor.u32 %v2875_v22, %v2619_v26  ;;  %v2393_v11 = vxor.u32 %v2137_v46, %v1881_v56  ;;  %v1884_v63 = vmul.u32 2246822507, %v1628_v23  ;;  %v7749_v5 = vpack.c.bf16 %v4312_v34, %v4311_v39  ;;  %v4329_v39 = vld [vmem:[%s12567_s2 + $0x7c0] sm:$0xff] }
 0x135   : > { %v2906_v14 = vshrl.u32 %v2650_v19, 16  ;;  %v1627_v51 = vxor.u32 %v1371_v42, %v1115_v30  ;;  %v1146_v9 = vxor.u32 %v8174_v44, %v888_v4  ;;  %v9624_v24 = vadd.f32 %v572_v55, %v572_v55  ;;  %v348_v4 = vld [vmem:[%s8346_s6 + $0x548] sm:$0xff] }
 0x136   : > { %vm3387_vm11 = vcmp.lt.s32.totalorder %v3131_v37, 0  ;;  %v2649_v62 = vmul.u32 3266489909, %v2393_v11  ;;  %v2140_v61 = vshrl.u32 %v1884_v63, 13  ;;  %7750 = vmatpush3.bf16.msra.mxu1 %v7749_v5  ;;  %v571_v20 = vmax.f32 %v315_v16, 0.0 }
 0x137   : > { %6441 = vmatmul.mubr.msk.f32.gmra.mrb[36].mxu1 %vm3387_vm11, %v9564_v53  ;;  %v3162_v60 = vxor.u32 %v2906_v14, %v2650_v19  ;;  %v1883_v1 = vmul.u32 2246822507, %v1627_v51  ;;  %v1402_v32 = vshrl.u32 %v1146_v9, 16  ;;  %v887_v21 = vadd.s32 %v8697_v47, %v9388_v13  ;;  %v4282_v53 = vld [vmem:[%s12567_s2 + $0x648] sm:$0xff] }
 0x138   : > { %v2905_v48 = vshrl.u32 %v2649_v62, 16  ;;  %v2396_v58 = vxor.u32 %v2140_v61, %v1884_v63  ;;  %v9636_v10 = vadd.f32 %v571_v20, %v571_v20  ;;  %v7719_v50 = vpack.c.bf16 %v4298_v12, %v4297_v36  ;;  %v4314_v36 = vld [vmem:[%s12567_s2 + $0x748] sm:$0xff] }
 0x139   : > { %vm3418_vm12 = vcmp.lt.s32.totalorder %v3162_v60, 0  ;;  %v2139_v17 = vshrl.u32 %v1883_v1, 13  ;;  %v1658_v2 = vxor.u32 %v1402_v32, %v1146_v9  ;;  %v1145_v35 = vxor.u32 %v8174_v44, %v887_v21  ;;  %v347_v21 = vld [vmem:[%s8346_s6 + $0x540] sm:$0xff] }
 0x13a   : > { %6426 = vmatprep.mubr.msk.f32.mxu0 %vm3418_vm12, %v9571_v45  ;;  %v3161_v3 = vxor.u32 %v2905_v48, %v2649_v62  ;;  %v2652_v6 = vmul.u32 3266489909, %v2396_v58  ;;  %7720 = vmatprep.subr.bf16.mxu0 %v7719_v50  ;;  %v574_v26 = vmax.f32 %v318_v52, 0.0  ;;  %v890_v56 = vadd.s32 %v8697_v47, %v9410_v43  ;;  %v4330_v45 = vld [vmem:[%s12567_s2 + $0x7c8] sm:$0xff] }
 0x13b   : > { %v2395_v31 = vxor.u32 %v2139_v17, %v1883_v1  ;;  %v1914_v7 = vmul.u32 2246822507, %v1658_v2  ;;  %v1401_v30 = vshrl.u32 %v1145_v35, 16  ;;  %v7721_v41 = vpack.c.bf16 %v4282_v53, %v4281_v25  ;;  %v4299_v25 = vld [vmem:[%s12567_s2 + $0x6d0] sm:$0xff] }
 0x13c   : > { %vm3417_vm13 = vcmp.lt.s32.totalorder %v3161_v3, 0  ;;  %v2908_v34 = vshrl.u32 %v2652_v6, 16  ;;  %v1148_v22 = vxor.u32 %v8174_v44, %v890_v56  ;;  %v9656_v46 = vadd.f32 %v574_v26, %v574_v26  ;;  %v350_v56 = vld [vmem:[%s8346_s6 + $0x558] sm:$0xff] }
 0x13d   : > { %6427 = vmatmul.mubr.msk.f32.gmra.mrb[38].mxu0 %vm3417_vm13, %v9584_v33  ;;  %v2651_v23 = vmul.u32 3266489909, %v2395_v31  ;;  %v2170_v19 = vshrl.u32 %v1914_v7, 13  ;;  %v1657_v42 = vxor.u32 %v1401_v30, %v1145_v35  ;;  %v573_v55 = vmax.f32 %v317_v49, 0.0  ;;  %v4313_v33 = vld [vmem:[%s12567_s2 + $0x740] sm:$0xff] }
 0x13e   : > { %v3164_v16 = vxor.u32 %v2908_v34, %v2652_v6  ;;  %v1404_v37 = vshrl.u32 %v1148_v22, 16  ;;  %7722 = vmatpush3.bf16.msra.mxu0 %v7721_v41  ;;  %v889_v11 = vadd.s32 %v8697_v47, %v9428_v18  ;;  %v7751_v63 = vpack.c.bf16 %v4330_v45, %v4329_v39 }
 0x13f   : > { %v2907_v5 = vshrl.u32 %v2651_v23, 16  ;;  %v2426_v14 = vxor.u32 %v2170_v19, %v1914_v7  ;;  %v1913_v51 = vmul.u32 2246822507, %v1657_v42  ;;  %v9662_v9 = vadd.f32 %v573_v55, %v573_v55 }
 0x140   : > { %vm3420_vm14 = vcmp.lt.s32.totalorder %v3164_v16, 0  ;;  %v1660_v12 = vxor.u32 %v1404_v37, %v1148_v22  ;;  %v1147_v62 = vxor.u32 %v8174_v44, %v889_v11  ;;  %7752 = vmatprep.subr.bf16.mxu1 %v7751_v63  ;;  %v604_v61 = vmax.f32 %v348_v4, 0.0  ;;  %v4284_v22 = vld [vmem:[%s12567_s2 + $0x658] sm:$0xff]  ;;  %v349_v11 = vld [vmem:[%s8346_s6 + $0x550] sm:$0xff] }
 0x141   : > { %6442 = vmatprep.mubr.msk.f32.mxu1 %vm3420_vm14, %v9597_v54  ;;  %v3163_v20 = vxor.u32 %v2907_v5, %v2651_v23  ;;  %v2682_v60 = vmul.u32 3266489909, %v2426_v14  ;;  %v2169_v1 = vshrl.u32 %v1913_v51, 13  ;;  %v920_v32 = vadd.s32 %v8753_v57, %v9374_v59  ;;  %v4300_v54 = vld [vmem:[%s12567_s2 + $0x6d8] sm:$0xff] }
 0x142   : > { %v1916_v52 = vmul.u32 2246822507, %v1660_v12  ;;  %v1403_v48 = vshrl.u32 %v1147_v62, 16  ;;  %v9675_v58 = vadd.f32 %v604_v61, %v604_v61  ;;  %v7753_v50 = vpack.c.bf16 %v4314_v36, %v4313_v33  ;;  %v4332_v61 = vld [vmem:[%s12567_s2 + $0x7d8] sm:$0xff] }
 0x143   : > { %vm3419_vm15 = vcmp.lt.s32.totalorder %v3163_v20, 0  ;;  %v2938_v53 = vshrl.u32 %v2682_v60, 16  ;;  %v2425_v17 = vxor.u32 %v2169_v1, %v1913_v51  ;;  %v1178_v2 = vxor.u32 %v8174_v44, %v920_v32 }
 0x144   : > { %6443 = vmatmul.mubr.msk.f32.gmra.mrb[38].mxu1 %vm3419_vm15, %v9611_v40  ;;  %v2172_v35 = vshrl.u32 %v1916_v52, 13  ;;  %v1659_v3 = vxor.u32 %v1403_v48, %v1147_v62  ;;  %v603_v6 = vmax.f32 %v347_v21, 0.0  ;;  %v919_v26 = vadd.s32 %v8753_v57, %v9388_v13  ;;  %v4283_v40 = vld [vmem:[%s12567_s2 + $0x650] sm:$0xff] }
 0x145   : > { %v3194_v49 = vxor.u32 %v2938_v53, %v2682_v60  ;;  %v2681_v31 = vmul.u32 3266489909, %v2425_v17  ;;  %v1434_v7 = vshrl.u32 %v1178_v2, 16  ;;  %7754 = vmatpush3.bf16.msra.mxu1 %v7753_v50  ;;  %v7723_v30 = vpack.c.bf16 %v4300_v54, %v4299_v25  ;;  %v380_v50 = vld [vmem:[%s8346_s6 + $0x648] sm:$0xff] }
 0x146   : > { %v2428_v41 = vxor.u32 %v2172_v35, %v1916_v52  ;;  %v1915_v39 = vmul.u32 2246822507, %v1659_v3  ;;  %v1177_v45 = vxor.u32 %v8174_v44, %v919_v26  ;;  %v9689_v34 = vadd.f32 %v603_v6, %v603_v6 }
 0x147   : > { %vm3450_vm0 = vcmp.lt.s32.totalorder %v3194_v49, 0  ;;  %v2937_v23 = vshrl.u32 %v2681_v31, 16  ;;  %v1690_v19 = vxor.u32 %v1434_v7, %v1178_v2  ;;  %7724 = vmatprep.subr.bf16.mxu0 %v7723_v30  ;;  %v606_v42 = vmax.f32 %v350_v56, 0.0  ;;  %v4315_v2 = vld [vmem:[%s12567_s2 + $0x750] sm:$0xff]  ;;  %v379_v7 = vld [vmem:[%s8346_s6 + $0x640] sm:$0xff] }
 0x148   : > { %6428 = vmatprep.mubr.msk.f32.mxu0 %vm3450_vm0, %v9624_v24  ;;  %v2684_v55 = vmul.u32 3266489909, %v2428_v41  ;;  %v2171_v4 = vshrl.u32 %v1915_v39, 13  ;;  %v1433_v16 = vshrl.u32 %v1177_v45, 16  ;;  %v922_v37 = vadd.s32 %v8753_v57, %v9410_v43  ;;  %v4331_v24 = vld [vmem:[%s12567_s2 + $0x7d0] sm:$0xff] }
 0x149   : > { %v3193_v63 = vxor.u32 %v2937_v23, %v2681_v31  ;;  %v1946_v5 = vmul.u32 2246822507, %v1690_v19  ;;  %v9701_v14 = vadd.f32 %v606_v42, %v606_v42  ;;  %v7725_v51 = vpack.c.bf16 %v4284_v22, %v4283_v40  ;;  %v4302_v42 = vld [vmem:[%s12567_s2 + $0x6e8] sm:$0xff] }
 0x14a   : > { %v2940_v33 = vshrl.u32 %v2684_v55, 16  ;;  %v2427_v36 = vxor.u32 %v2171_v4, %v1915_v39  ;;  %v1689_v12 = vxor.u32 %v1433_v16, %v1177_v45  ;;  %v1180_v62 = vxor.u32 %v8174_v44, %v922_v37 }
 0x14b   : > { %vm3449_vm1 = vcmp.lt.s32.totalorder %v3193_v63, 0  ;;  %v2202_v20 = vshrl.u32 %v1946_v5, 13  ;;  %7726 = vmatpush3.bf16.msra.mxu0 %v7725_v51  ;;  %v605_v60 = vmax.f32 %v349_v11, 0.0  ;;  %v921_v1 = vadd.s32 %v8753_v57, %v9428_v18  ;;  %v382_v51 = vld [vmem:[%s8346_s6 + $0x658] sm:$0xff] }
 0x14c   : > { %6429 = vmatmul.mubr.msk.f32.gmra.mrb[40].mxu0 %vm3449_vm1, %v9636_v10  ;;  %v3196_v32 = vxor.u32 %v2940_v33, %v2684_v55  ;;  %v2683_v21 = vmul.u32 3266489909, %v2427_v36  ;;  %v1945_v52 = vmul.u32 2246822507, %v1689_v12  ;;  %v1436_v48 = vshrl.u32 %v1180_v62, 16  ;;  %v4316_v10 = vld [vmem:[%s12567_s2 + $0x758] sm:$0xff] }
 0x14d   : > { %v2458_v25 = vxor.u32 %v2202_v20, %v1946_v5  ;;  %v1179_v54 = vxor.u32 %v8174_v44, %v921_v1  ;;  %v9715_v53 = vadd.f32 %v605_v60, %v605_v60  ;;  %v7755_v17 = vpack.c.bf16 %v4332_v61, %v4331_v24  ;;  %v4285_v24 = vld [vmem:[%s12567_s2 + $0x660] sm:$0xff] }
 0x14e   : > { %vm3452_vm2 = vcmp.lt.s32.totalorder %v3196_v32, 0  ;;  %v2939_v35 = vshrl.u32 %v2683_v21, 16  ;;  %v2201_v3 = vshrl.u32 %v1945_v52, 13  ;;  %v1692_v6 = vxor.u32 %v1436_v48, %v1180_v62  ;;  %v381_v48 = vld [vmem:[%s8346_s6 + $0x650] sm:$0xff] }
 0x14f   : > { %6444 = vmatprep.mubr.msk.f32.mxu1 %vm3452_vm2, %v9656_v46  ;;  %v2714_v26 = vmul.u32 3266489909, %v2458_v25  ;;  %v1435_v56 = vshrl.u32 %v1179_v54, 16  ;;  %7756 = vmatprep.subr.bf16.mxu1 %v7755_v17  ;;  %v636_v49 = vmax.f32 %v380_v50, 0.0  ;;  %v952_v31 = vadd.s32 %v8817_v27, %v9374_v59  ;;  %v4301_v46 = vld [vmem:[%s12567_s2 + $0x6e0] sm:$0xff] }
 0x150   : > { %v3195_v30 = vxor.u32 %v2939_v35, %v2683_v21  ;;  %v2457_v41 = vxor.u32 %v2201_v3, %v1945_v52  ;;  %v1948_v39 = vmul.u32 2246822507, %v1692_v6  ;;  %v7757_v45 = vpack.c.bf16 %v4316_v10, %v4315_v2  ;;  %v4333_v2 = vld [vmem:[%s12567_s2 + $0x7e0] sm:$0xff] }
 0x151   : > { %v2970_v40 = vshrl.u32 %v2714_v26, 16  ;;  %v1691_v22 = vxor.u32 %v1435_v56, %v1179_v54  ;;  %v1210_v23 = vxor.u32 %v8174_v44, %v952_v31  ;;  %v9728_v19 = vadd.f32 %v636_v49, %v636_v49  ;;  %v412_v31 = vld [vmem:[%s8346_s6 + $0x748] sm:$0xff] }
 0x152   : > { %vm3451_vm3 = vcmp.lt.s32.totalorder %v3195_v30, 0  ;;  %v2713_v55 = vmul.u32 3266489909, %v2457_v41  ;;  %v2204_v4 = vshrl.u32 %v1948_v39, 13  ;;  %7758 = vmatpush3.bf16.msra.mxu1 %v7757_v45  ;;  %v635_v16 = vmax.f32 %v379_v7, 0.0 }
 0x153   : > { %6445 = vmatmul.mubr.msk.f32.gmra.mrb[40].mxu1 %vm3451_vm3, %v9662_v9  ;;  %v3226_v37 = vxor.u32 %v2970_v40, %v2714_v26  ;;  %v1947_v11 = vmul.u32 2246822507, %v1691_v22  ;;  %v1466_v63 = vshrl.u32 %v1210_v23, 16  ;;  %v951_v5 = vadd.s32 %v8817_v27, %v9388_v13  ;;  %v4286_v9 = vld [vmem:[%s12567_s2 + $0x668] sm:$0xff] }
 0x154   : > { %v2969_v33 = vshrl.u32 %v2713_v55, 16  ;;  %v2460_v36 = vxor.u32 %v2204_v4, %v1948_v39  ;;  %v9740_v12 = vadd.f32 %v635_v16, %v635_v16  ;;  %v7727_v62 = vpack.c.bf16 %v4302_v42, %v4301_v46  ;;  %v4318_v46 = vld [vmem:[%s12567_s2 + $0x768] sm:$0xff] }
 0x155   : > { %vm3482_vm4 = vcmp.lt.s32.totalorder %v3226_v37, 0  ;;  %v2203_v61 = vshrl.u32 %v1947_v11, 13  ;;  %v1722_v20 = vxor.u32 %v1466_v63, %v1210_v23  ;;  %v1209_v60 = vxor.u32 %v8174_v44, %v951_v5  ;;  %v411_v5 = vld [vmem:[%s8346_s6 + $0x740] sm:$0xff] }
 0x156   : > { %6430 = vmatprep.mubr.msk.f32.mxu0 %vm3482_vm4, %v9675_v58  ;;  %v3225_v1 = vxor.u32 %v2969_v33, %v2713_v55  ;;  %v2716_v32 = vmul.u32 3266489909, %v2460_v36  ;;  %7728 = vmatprep.subr.bf16.mxu0 %v7727_v62  ;;  %v638_v21 = vmax.f32 %v382_v51, 0.0  ;;  %v954_v52 = vadd.s32 %v8817_v27, %v9410_v43  ;;  %v4334_v58 = vld [vmem:[%s12567_s2 + $0x7e8] sm:$0xff] }
 0x157   : > { %v2459_v50 = vxor.u32 %v2203_v61, %v1947_v11  ;;  %v1978_v25 = vmul.u32 2246822507, %v1722_v20  ;;  %v1465_v54 = vshrl.u32 %v1209_v60, 16  ;;  %v7729_v17 = vpack.c.bf16 %v4286_v9, %v4285_v24  ;;  %v4303_v24 = vld [vmem:[%s12567_s2 + $0x6f0] sm:$0xff] }
 0x158   : > { %vm3481_vm5 = vcmp.lt.s32.totalorder %v3225_v1, 0  ;;  %v2972_v10 = vshrl.u32 %v2716_v32, 16  ;;  %v1212_v35 = vxor.u32 %v8174_v44, %v954_v52  ;;  %v9760_v3 = vadd.f32 %v638_v21, %v638_v21  ;;  %v414_v21 = vld [vmem:[%s8346_s6 + $0x758] sm:$0xff] }
 0x159   : > { %6431 = vmatmul.mubr.msk.f32.gmra.mrb[42].mxu0 %vm3481_vm5, %v9689_v34  ;;  %v2715_v6 = vmul.u32 3266489909, %v2459_v50  ;;  %v2234_v26 = vshrl.u32 %v1978_v25, 13  ;;  %v1721_v56 = vxor.u32 %v1465_v54, %v1209_v60  ;;  %v637_v49 = vmax.f32 %v381_v48, 0.0  ;;  %v4317_v34 = vld [vmem:[%s12567_s2 + $0x760] sm:$0xff] }
 0x15a   : > { %v3228_v7 = vxor.u32 %v2972_v10, %v2716_v32  ;;  %v1468_v30 = vshrl.u32 %v1212_v35, 16  ;;  %7730 = vmatpush3.bf16.msra.mxu0 %v7729_v17  ;;  %v953_v41 = vadd.s32 %v8817_v27, %v9428_v18  ;;  %v7759_v39 = vpack.c.bf16 %v4334_v58, %v4333_v2 }
 0x15b   : > { %v2971_v45 = vshrl.u32 %v2715_v6, 16  ;;  %v2490_v40 = vxor.u32 %v2234_v26, %v1978_v25  ;;  %v1977_v22 = vmul.u32 2246822507, %v1721_v56  ;;  %v9766_v23 = vadd.f32 %v637_v49, %v637_v49 }
 0x15c   : > { %vm3484_vm6 = vcmp.lt.s32.totalorder %v3228_v7, 0  ;;  %v1724_v42 = vxor.u32 %v1468_v30, %v1212_v35  ;;  %v1211_v55 = vxor.u32 %v8174_v44, %v953_v41  ;;  %7760 = vmatprep.subr.bf16.mxu1 %v7759_v39  ;;  %v668_v4 = vmax.f32 %v412_v31, 0.0  ;;  %v413_v7 = vld [vmem:[%s8346_s6 + $0x750] sm:$0xff] }
 0x15d   : > { %6446 = vmatprep.mubr.msk.f32.mxu1 %vm3484_vm6, %v9701_v14  ;;  %v3227_v16 = vxor.u32 %v2971_v45, %v2715_v6  ;;  %v2746_v37 = vmul.u32 3266489909, %v2490_v40  ;;  %v2233_v11 = vshrl.u32 %v1977_v22, 13  ;;  %v984_v63 = vadd.s32 %v8872_v8, %v9374_v59  ;;  %v4304_v14 = vld [vmem:[%s12567_s2 + $0x6f8] sm:$0xff] }
 0x15e   : > { %v1980_v51 = vmul.u32 2246822507, %v1724_v42  ;;  %v1467_v33 = vshrl.u32 %v1211_v55, 16  ;;  %v9779_v36 = vadd.f32 %v668_v4, %v668_v4  ;;  %v7761_v62 = vpack.c.bf16 %v4318_v46, %v4317_v34 }
 0x15f   : > { %vm3483_vm7 = vcmp.lt.s32.totalorder %v3227_v16, 0  ;;  %v3002_v9 = vshrl.u32 %v2746_v37, 16  ;;  %v2489_v61 = vxor.u32 %v2233_v11, %v1977_v22  ;;  %v1242_v59 = vxor.u32 %v8174_v44, %v984_v63 }
 0x160   : > { %6447 = vmatmul.mubr.msk.f32.gmra.mrb[42].mxu1 %vm3483_vm7, %v9715_v53  ;;  %v2236_v20 = vshrl.u32 %v1980_v51, 13  ;;  %v1723_v60 = vxor.u32 %v1467_v33, %v1211_v55  ;;  %v667_v1 = vmax.f32 %v411_v5, 0.0  ;;  %v983_v32 = vadd.s32 %v8872_v8, %v9388_v13  ;;  %v4287_v53 = vld [vmem:[%s12567_s2 + $0x670] sm:$0xff]  ;;  %v4288_v13 = vld [vmem:[%s12567_s2 + $0x678] sm:$0xff]  ;;  %v192_v5 = vld [vmem:[%s8346_s6 + $0x68] sm:$0xff] }
 0x161   : > { %v3258_v52 = vxor.u32 %v3002_v9, %v2746_v37  ;;  %v2745_v48 = vmul.u32 3266489909, %v2489_v61  ;;  %v1498_v50 = vshrl.u32 %v1242_v59, 16  ;;  %7762 = vmatpush3.bf16.msra.mxu1 %v7761_v62  ;;  %v7731_v25 = vpack.c.bf16 %v4304_v14, %v4303_v24  ;;  %v4319_v14 = vld [vmem:[%s12567_s2 + $0x770] sm:$0xff] }
 0x162   : > { %v2492_v54 = vxor.u32 %v2236_v20, %v1980_v51  ;;  %v1979_v17 = vmul.u32 2246822507, %v1723_v60  ;;  %v1241_v2 = vxor.u32 %v8174_v44, %v983_v32  ;;  %v9793_v58 = vadd.f32 %v667_v1, %v667_v1  ;;  %v191_v32 = vld [vmem:[%s8346_s6 + $0x60] sm:$0xff] }
 0x163   : > { %vm3514_vm8 = vcmp.lt.s32.totalorder %v3258_v52, 0  ;;  %v3001_v10 = vshrl.u32 %v2745_v48, 16  ;;  %v1754_v35 = vxor.u32 %v1498_v50, %v1242_v59  ;;  %7732 = vmatprep.subr.bf16.mxu0 %v7731_v25  ;;  %v670_v6 = vmax.f32 %v414_v21, 0.0 }
 0x164   : > { %6432 = vmatprep.mubr.msk.f32.mxu0 %vm3514_vm8, %v9728_v19  ;;  %v2748_v26 = vmul.u32 3266489909, %v2492_v54  ;;  %v2235_v56 = vshrl.u32 %v1979_v17, 13  ;;  %v1497_v49 = vshrl.u32 %v1241_v2, 16  ;;  %v986_v31 = vadd.s32 %v8872_v8, %v9410_v43  ;;  %v4335_v19 = vld [vmem:[%s12567_s2 + $0x7f0] sm:$0xff]  ;;  %v4336_v43 = vld [vmem:[%s12567_s2 + $0x7f8] sm:$0xff] }
 0x165   : > { %v3257_v30 = vxor.u32 %v3001_v10, %v2745_v48  ;;  %v2010_v41 = vmul.u32 2246822507, %v1754_v35  ;;  %v9805_v39 = vadd.f32 %v670_v6, %v670_v6  ;;  %v7733_v45 = vpack.c.bf16 %v4288_v13, %v4287_v53  ;;  %v4354_v53 = vld [vmem:[%s12567_s2 + $0x888] sm:$0xff] }
 0x166   : > { %v3004_v40 = vshrl.u32 %v2748_v26, 16  ;;  %v2491_v22 = vxor.u32 %v2235_v56, %v1979_v17  ;;  %v1753_v34 = vxor.u32 %v1497_v49, %v1241_v2  ;;  %v1244_v46 = vxor.u32 %v8174_v44, %v986_v31  ;;  %v194_v31 = vld [vmem:[%s8346_s6 + $0x78] sm:$0xff] }
 0x167   : > { %vm3513_vm9 = vcmp.lt.s32.totalorder %v3257_v30, 0  ;;  %v2266_v42 = vshrl.u32 %v2010_v41, 13  ;;  %7734 = vmatpush3.bf16.msra.mxu0 %v7733_v45  ;;  %v669_v55 = vmax.f32 %v413_v7, 0.0  ;;  %v985_v4 = vadd.s32 %v8872_v8, %v9428_v18  ;;  %v4320_v18 = vld [vmem:[%s12567_s2 + $0x778] sm:$0xff] }
 0x168   : > { %6433 = vmatmul.mubr.msk.f32.gmra.mrb[44].mxu0 %vm3513_vm9, %v9740_v12  ;;  %v3260_v16 = vxor.u32 %v3004_v40, %v2748_v26  ;;  %v2747_v37 = vmul.u32 3266489909, %v2491_v22  ;;  %v2009_v11 = vmul.u32 2246822507, %v1753_v34  ;;  %v1500_v63 = vshrl.u32 %v1244_v46, 16  ;;  %v9853_v40 = vld [vmem:[%s12567_s2 + $0x800] sm:$0xff] }
 0x169   : > { %v2522_v51 = vxor.u32 %v2266_v42, %v2010_v41  ;;  %v1243_v33 = vxor.u32 %v8174_v44, %v985_v4  ;;  %v9819_v62 = vadd.f32 %v669_v55, %v669_v55  ;;  %v7763_v24 = vpack.c.bf16 %v4336_v43, %v4335_v19  ;;  %v193_v4 = vld [vmem:[%s8346_s6 + $0x70] sm:$0xff] }
 0x16a   : > { %vm3516_vm10 = vcmp.lt.s32.totalorder %v3260_v16, 0  ;;  %v3003_v12 = vshrl.u32 %v2747_v37, 16  ;;  %v2265_v9 = vshrl.u32 %v2009_v11, 13  ;;  %v1756_v61 = vxor.u32 %v1500_v63, %v1244_v46 }
 0x16b   : > { %6448 = vmatprep.mubr.msk.f32.mxu1 %vm3516_vm10, %v9760_v3  ;;  %v2778_v59 = vmul.u32 3266489909, %v2522_v51  ;;  %v1499_v20 = vshrl.u32 %v1243_v33, 16  ;;  %7764 = vmatprep.subr.bf16.mxu1 %v7763_v24  ;;  %v448_v60 = vmax.f32 %v192_v5, 0.0  ;;  %v9829_v1 = vadd.s32 1664, %v8109_v15  ;;  %v4353_v3 = vld [vmem:[%s12567_s2 + $0x880] sm:$0xff] }
 0x16c   : > { %v3259_v21 = vxor.u32 %v3003_v12, %v2747_v37  ;;  %v2521_v52 = vxor.u32 %v2265_v9, %v2009_v11  ;;  %v2012_v48 = vmul.u32 2246822507, %v1756_v61  ;;  %v7765_v50 = vpack.c.bf16 %v4320_v18, %v4319_v14  ;;  %v4386_v5 = vld [vmem:[%s12567_s2 + $0x988] sm:$0xff] }
 0x16d   : > { %v3034_v25 = vshrl.u32 %v2778_v59, 16  ;;  %v1755_v54 = vxor.u32 %v1499_v20, %v1243_v33  ;;  %v764_v17 = vadd.s32 %v8161_v38, %v9829_v1  ;;  %v9834_v2 = vadd.f32 %v448_v60, %v448_v60  ;;  %v224_v14 = vld [vmem:[%s8346_s6 + $0x168] sm:$0xff] }
 0x16e   : > { %vm3515_vm11 = vcmp.lt.s32.totalorder %v3259_v21, 0  ;;  %v2777_v13 = vmul.u32 3266489909, %v2521_v52  ;;  %v2268_v10 = vshrl.u32 %v2012_v48, 13  ;;  %7766 = vmatpush3.bf16.msra.mxu1 %v7765_v50  ;;  %v447_v35 = vmax.f32 %v191_v32, 0.0 }
 0x16f   : > { %6449 = vmatmul.mubr.msk.f32.gmra.mrb[44].mxu1 %vm3515_vm11, %v9766_v23  ;;  %v3290_v6 = vxor.u32 %v3034_v25, %v2778_v59  ;;  %v2011_v26 = vmul.u32 2246822507, %v1755_v54  ;;  %v1022_v56 = vxor.u32 %v8174_v44, %v764_v17  ;;  %v9845_v49 = vadd.s32 1536, %v8109_v15  ;;  %v9858_v23 = vld [vmem:[%s12567_s2 + $0x808] sm:$0xff] }
 0x170   : > { %v3033_v7 = vshrl.u32 %v2777_v13, 16  ;;  %v2524_v30 = vxor.u32 %v2268_v10, %v2012_v48  ;;  %v9848_v41 = vadd.f32 %v447_v35, %v447_v35  ;;  %v7767_v45 = vpack.c.bf16 %v4354_v53, %v4353_v3  ;;  %v9896_v25 = vld [vmem:[%s12567_s2 + $0x908] sm:$0xff] }
 0x171   : > { %vm3546_vm12 = vcmp.lt.s32.totalorder %v3290_v6, 0  ;;  %v2267_v22 = vshrl.u32 %v2011_v26, 13  ;;  %v1278_v34 = vshrl.u32 %v1022_v56, 16  ;;  %v763_v46 = vadd.s32 %v8161_v38, %v9845_v49  ;;  %v223_v6 = vld [vmem:[%s8346_s6 + $0x160] sm:$0xff] }
 0x172   : > { %6434 = vmatprep.mubr.msk.f32.mxu0 %vm3546_vm12, %v9779_v36  ;;  %v3289_v19 = vxor.u32 %v3033_v7, %v2777_v13  ;;  %v2780_v43 = vmul.u32 3266489909, %v2524_v30  ;;  %7768 = vmatprep.subr.bf16.mxu0 %v7767_v45  ;;  %v450_v42 = vmax.f32 %v194_v31, 0.0  ;;  %v9864_v55 = vadd.s32 1920, %v8109_v15  ;;  %v4385_v36 = vld [vmem:[%s12567_s2 + $0x980] sm:$0xff]  ;;  %v9917_v30 = vld [vmem:[%s12567_s2 + $0x898] sm:$0xff] }
 0x173   : > { %v2523_v16 = vxor.u32 %v2267_v22, %v2011_v26  ;;  %v1534_v37 = vxor.u32 %v1278_v34, %v1022_v56  ;;  %v1021_v11 = vxor.u32 %v8174_v44, %v763_v46  ;;  %v7769_v63 = vpack.c.bf16 %v9858_v23, %v9853_v40  ;;  %v255_v23 = vld [vmem:[%s8346_s6 + $0x260] sm:$0xff] }
 0x174   : > { %vm3545_vm13 = vcmp.lt.s32.totalorder %v3289_v19, 0  ;;  %v3036_v51 = vshrl.u32 %v2780_v43, 16  ;;  %v766_v33 = vadd.s32 %v8161_v38, %v9864_v55  ;;  %v9878_v24 = vadd.f32 %v450_v42, %v450_v42 }
 0x175   : > { %6435 = vmatmul.mubr.msk.f32.gmra.mrb[46].mxu0 %vm3545_vm13, %v9793_v58  ;;  %v2779_v18 = vmul.u32 3266489909, %v2523_v16  ;;  %v1790_v12 = vmul.u32 2246822507, %v1534_v37  ;;  %v1277_v9 = vshrl.u32 %v1021_v11, 16  ;;  %v449_v61 = vmax.f32 %v193_v4, 0.0 }
 0x176   : > { %v3292_v59 = vxor.u32 %v3036_v51, %v2780_v43  ;;  %v1024_v20 = vxor.u32 %v8174_v44, %v766_v33  ;;  %v9884_v60 = vadd.s32 1792, %v8109_v15  ;;  %v7799_v32 = vpack.c.bf16 %v4386_v5, %v4385_v36  ;;  %v9891_v58 = vld [vmem:[%s12567_s2 + $0x900] sm:$0xff]  ;;  %v226_v4 = vld [vmem:[%s8346_s6 + $0x178] sm:$0xff] }
 0x177   : > { %v3035_v21 = vshrl.u32 %v2779_v18, 16  ;;  %v2046_v52 = vshrl.u32 %v1790_v12, 13  ;;  %v1533_v48 = vxor.u32 %v1277_v9, %v1021_v11  ;;  %v9886_v50 = vadd.f32 %v449_v61, %v449_v61 }
 0x178   : > { %vm3548_vm14 = vcmp.lt.s32.totalorder %v3292_v59, 0  ;;  %v1280_v54 = vshrl.u32 %v1024_v20, 16  ;;  %v765_v17 = vadd.s32 %v8161_v38, %v9884_v60  ;;  %7800 = vmatprep.subr.bf16.mxu1 %v7799_v32  ;;  %v480_v3 = vmax.f32 %v224_v14, 0.0 }
 0x179   : > { %6450 = vmatprep.mubr.msk.f32.mxu1 %vm3548_vm14, %v9805_v39  ;;  %v3291_v53 = vxor.u32 %v3035_v21, %v2779_v18  ;;  %v2302_v13 = vxor.u32 %v2046_v52, %v1790_v12  ;;  %v1789_v10 = vmul.u32 2246822507, %v1533_v48  ;;  %v796_v35 = vadd.s32 %v8269_v28, %v9829_v1  ;;  %v9912_v39 = vld [vmem:[%s12567_s2 + $0x890] sm:$0xff]  ;;  %v4340_v52 = vld [vmem:[%s12567_s2 + $0x818] sm:$0xff] }
 0x17a   : > { %v1536_v26 = vxor.u32 %v1280_v54, %v1024_v20  ;;  %v1023_v56 = vxor.u32 %v8174_v44, %v765_v17  ;;  %v9905_v31 = vadd.f32 %v480_v3, %v480_v3  ;;  %v7801_v7 = vpack.c.bf16 %v9896_v25, %v9891_v58  ;;  %v4339_v21 = vld [vmem:[%s12567_s2 + $0x810] sm:$0xff]  ;;  %v4389_v25 = vld [vmem:[%s12567_s2 + $0x9a0] sm:$0xff] }
 0x17b   : > { %vm3547_vm15 = vcmp.lt.s32.totalorder %v3291_v53, 0  ;;  %v2558_v45 = vmul.u32 3266489909, %v2302_v13  ;;  %v2045_v22 = vshrl.u32 %v1789_v10, 13  ;;  %v1054_v34 = vxor.u32 %v8174_v44, %v796_v35  ;;  %v225_v48 = vld [vmem:[%s8346_s6 + $0x170] sm:$0xff] }
 0x17c   : > { %6451 = vmatmul.mubr.msk.f32.gmra.mrb[46].mxu1 %vm3547_vm15, %v9819_v62  ;;  %v1792_v46 = vmul.u32 2246822507, %v1536_v26  ;;  %v1279_v19 = vshrl.u32 %v1023_v56, 16  ;;  %v479_v43 = vmax.f32 %v223_v6, 0.0  ;;  %v795_v42 = vadd.s32 %v8269_v28, %v9845_v49 }
 0x17d   : > { %v2814_v16 = vshrl.u32 %v2558_v45, 16  ;;  %v2301_v37 = vxor.u32 %v2045_v22, %v1789_v10  ;;  %v1310_v11 = vshrl.u32 %v1054_v34, 16  ;;  %v7771_v36 = vpack.c.bf16 %v9917_v30, %v9912_v39  ;;  %v9945_v30 = vld [vmem:[%s12567_s2 + $0x990] sm:$0xff] }
 0x17e   : > { %v2048_v5 = vshrl.u32 %v1792_v46, 13  ;;  %v1535_v51 = vxor.u32 %v1279_v19, %v1023_v56  ;;  %v1053_v33 = vxor.u32 %v8174_v44, %v795_v42  ;;  %v9927_v14 = vadd.f32 %v479_v43, %v479_v43  ;;  %v256_v19 = vld [vmem:[%s8346_s6 + $0x268] sm:$0xff] }
 0x17f   : > { %v3070_v62 = vxor.u32 %v2814_v16, %v2558_v45  ;;  %v2557_v18 = vmul.u32 3266489909, %v2301_v37  ;;  %v1566_v12 = vxor.u32 %v1310_v11, %v1054_v34  ;;  %v482_v9 = vmax.f32 %v226_v4, 0.0 }
 0x180   : > { %v2304_v61 = vxor.u32 %v2048_v5, %v1792_v46  ;;  %v1791_v59 = vmul.u32 2246822507, %v1535_v51  ;;  %v1309_v20 = vshrl.u32 %v1053_v33, 16  ;;  %v798_v32 = vadd.s32 %v8269_v28, %v9864_v55 }
 0x181   : > { %vm3326_vm0 = vcmp.lt.s32.totalorder %v3070_v62, 0  ;;  %v2813_v54 = vshrl.u32 %v2557_v18, 16  ;;  %v1822_v17 = vmul.u32 2246822507, %v1566_v12  ;;  %v9938_v3 = vadd.f32 %v482_v9, %v482_v9  ;;  %v4371_v12 = vld [vmem:[%s12567_s2 + $0x910] sm:$0xff] }
 0x182   : > { %6452 = vmatprep.mubr.msk.f32.mxu0 %vm3326_vm0, %v9834_v2  ;;  %v2560_v53 = vmul.u32 3266489909, %v2304_v61  ;;  %v2047_v13 = vshrl.u32 %v1791_v59, 13  ;;  %v1565_v10 = vxor.u32 %v1309_v20, %v1053_v33  ;;  %v1056_v35 = vxor.u32 %v8174_v44, %v798_v32  ;;  %v4388_v2 = vld [vmem:[%s12567_s2 + $0x998] sm:$0xff] }
 0x183   : > { %v3069_v6 = vxor.u32 %v2813_v54, %v2557_v18  ;;  %v2078_v26 = vshrl.u32 %v1822_v17, 13  ;;  %v7773_v56 = vpack.c.bf16 %v4340_v52, %v4339_v21  ;;  %v481_v39 = vmax.f32 %v225_v48, 0.0 }
 0x184   : > { %v2816_v45 = vshrl.u32 %v2560_v53, 16  ;;  %v2303_v22 = vxor.u32 %v2047_v13, %v1791_v59  ;;  %v1821_v34 = vmul.u32 2246822507, %v1565_v10  ;;  %v1312_v46 = vshrl.u32 %v1056_v35, 16  ;;  %v4358_v10 = vld [vmem:[%s12567_s2 + $0x8a8] sm:$0xff] }
 0x185   : > { %vm3325_vm1 = vcmp.lt.s32.totalorder %v3069_v6, 0  ;;  %v2334_v43 = vxor.u32 %v2078_v26, %v1822_v17  ;;  %v797_v42 = vadd.s32 %v8269_v28, %v9884_v60  ;;  %v9953_v4 = vadd.f32 %v481_v39, %v481_v39  ;;  %v258_v39 = vld [vmem:[%s8346_s6 + $0x278] sm:$0xff] }
 0x186   : > { %6453 = vmatmul.mubr.msk.f32.vlgmr.msra.gmra.mrb[48].mxu0 %vm3325_vm1, %v9848_v41  ;;  %v3072_v16 = vxor.u32 %v2816_v45, %v2560_v53  ;;  %v2559_v37 = vmul.u32 3266489909, %v2303_v22  ;;  %v2077_v11 = vshrl.u32 %v1821_v34, 13  ;;  %v1568_v5 = vxor.u32 %v1312_v46, %v1056_v35  ;;  %v4372_v41 = vld [vmem:[%s12567_s2 + $0x918] sm:$0xff]  ;;  %v4341_v22 = vld [vmem:[%s12567_s2 + $0x820] sm:$0xff] }
 0x187   : > { %7770 = vmatpush3.bf16.msra.mxu0 %v7769_v63  ;;  %v2590_v51 = vmul.u32 3266489909, %v2334_v43  ;;  %v1055_v33 = vxor.u32 %v8174_v44, %v797_v42  ;;  %v7803_v62 = vpack.c.bf16 %v4388_v2, %v9945_v30  ;;  %v512_v18 = vmax.f32 %v256_v19, 0.0 }
 0x188   : > { %vm3328_vm2 = vcmp.lt.s32.totalorder %v3072_v16, 0  ;;  %v2815_v9 = vshrl.u32 %v2559_v37, 16  ;;  %v2333_v61 = vxor.u32 %v2077_v11, %v1821_v34  ;;  %7772 = vmatprep.subr.bf16.mxu0 %v7771_v36  ;;  %v1824_v40 = vmul.u32 2246822507, %v1568_v5  ;;  %v4342_v34 = vld [vmem:[%s12567_s2 + $0x828] sm:$0xff]  ;;  %v257_v11 = vld [vmem:[%s8346_s6 + $0x270] sm:$0xff] }
 0x189   : > { %6468 = vmatprep.mubr.msk.f32.mxu1 %vm3328_vm2, %v9878_v24  ;;  %v2846_v63 = vshrl.u32 %v2590_v51, 16  ;;  %v1311_v59 = vshrl.u32 %v1055_v33, 16  ;;  %v828_v20 = vadd.s32 %v8592_v29, %v9829_v1  ;;  %v9971_v32 = vadd.f32 %v512_v18, %v512_v18  ;;  %v4357_v24 = vld [vmem:[%s12567_s2 + $0x8a0] sm:$0xff] }
 0x18a   : > { %v3071_v21 = vxor.u32 %v2815_v9, %v2559_v37  ;;  %v2589_v52 = vmul.u32 3266489909, %v2333_v61  ;;  %v2080_v48 = vshrl.u32 %v1824_v40, 13  ;;  %v7805_v54 = vpack.c.bf16 %v4372_v41, %v4371_v12 }
 0x18b   : > { %v3102_v17 = vxor.u32 %v2846_v63, %v2590_v51  ;;  %7774 = vmatpush3.bf16.msra.mxu0 %v7773_v56  ;;  %v1567_v53 = vxor.u32 %v1311_v59, %v1055_v33  ;;  %v1086_v36 = vxor.u32 %v8174_v44, %v828_v20  ;;  %v511_v13 = vmax.f32 %v255_v23, 0.0  ;;  %v4373_v20 = vld [vmem:[%s12567_s2 + $0x920] sm:$0xff] }
 0x18c   : > { %vm3327_vm3 = vcmp.lt.s32.totalorder %v3071_v21, 0  ;;  %v2845_v35 = vshrl.u32 %v2589_v52, 16  ;;  %v2336_v6 = vxor.u32 %v2080_v48, %v1824_v40  ;;  %v827_v26 = vadd.s32 %v8592_v29, %v9845_v49  ;;  %v288_v40 = vld [vmem:[%s8346_s6 + $0x368] sm:$0xff] }
 0x18d   : > { %6469 = vmatmul.mubr.msk.f32.vlgmr.msra.gmra.mrb[48].mxu1 %vm3327_vm3, %v9886_v50  ;;  %vm3358_vm4 = vcmp.lt.s32.totalorder %v3102_v17, 0  ;;  %v1823_v56 = vmul.u32 2246822507, %v1567_v53  ;;  %v1342_v30 = vshrl.u32 %v1086_v36, 16  ;;  %v9984_v45 = vadd.f32 %v511_v13, %v511_v13  ;;  %v4374_v21 = vld [vmem:[%s12567_s2 + $0x928] sm:$0xff] }
 0x18e   : > { %6454 = vmatprep.mubr.msk.f32.mxu0 %vm3358_vm4, %v9905_v31  ;;  %7802 = vmatpush3.bf16.msra.mxu1 %v7801_v7  ;;  %v3101_v50 = vxor.u32 %v2845_v35, %v2589_v52  ;;  %v2592_v46 = vmul.u32 3266489909, %v2336_v6  ;;  %v1085_v2 = vxor.u32 %v8174_v44, %v827_v26  ;;  %v7775_v19 = vpack.c.bf16 %v4358_v10, %v4357_v24  ;;  %v4390_v7 = vld [vmem:[%s12567_s2 + $0x9a8] sm:$0xff]  ;;  %v287_v24 = vld [vmem:[%s8346_s6 + $0x360] sm:$0xff] }
 0x18f   : > { %v2079_v43 = vshrl.u32 %v1823_v56, 13  ;;  %7804 = vmatprep.subr.bf16.mxu1 %v7803_v62  ;;  %v1598_v42 = vxor.u32 %v1342_v30, %v1086_v36  ;;  %v514_v16 = vmax.f32 %v258_v39, 0.0  ;;  %v830_v37 = vadd.s32 %v8592_v29, %v9864_v55 }
 0x190   : > { %vm3357_vm5 = vcmp.lt.s32.totalorder %v3101_v50, 0  ;;  %v2848_v5 = vshrl.u32 %v2592_v46, 16  ;;  %v1341_v31 = vshrl.u32 %v1085_v2, 16  ;;  %7776 = vmatprep.subr.bf16.mxu0 %v7775_v19  ;;  %v7777_v58 = vpack.c.bf16 %v4342_v34, %v4341_v22  ;;  %v4360_v19 = vld [vmem:[%s12567_s2 + $0x8b8] sm:$0xff] }
 0x191   : > { %6455 = vmatmul.mubr.msk.f32.gmra.mrb[50].mxu0 %vm3357_vm5, %v9927_v14  ;;  %v2335_v51 = vxor.u32 %v2079_v43, %v1823_v56  ;;  %v1854_v33 = vmul.u32 2246822507, %v1598_v42  ;;  %v1088_v62 = vxor.u32 %v8174_v44, %v830_v37  ;;  %v10008_v18 = vadd.f32 %v514_v16, %v514_v16  ;;  %v290_v37 = vld [vmem:[%s8346_s6 + $0x378] sm:$0xff] }
 0x192   : > { %v3104_v12 = vxor.u32 %v2848_v5, %v2592_v46  ;;  %7806 = vmatpush3.bf16.msra.mxu1 %v7805_v54  ;;  %v1597_v41 = vxor.u32 %v1341_v31, %v1085_v2  ;;  %7778 = vmatpush3.bf16.msra.mxu0 %v7777_v58  ;;  %v513_v9 = vmax.f32 %v257_v11, 0.0  ;;  %v829_v61 = vadd.s32 %v8592_v29, %v9884_v60  ;;  %v4359_v2 = vld [vmem:[%s12567_s2 + $0x8b0] sm:$0xff] }
 0x193   : > { %v2591_v23 = vmul.u32 3266489909, %v2335_v51  ;;  %v2110_v63 = vshrl.u32 %v1854_v33, 13  ;;  %v1344_v59 = vshrl.u32 %v1088_v62, 16  ;;  %v7807_v14 = vpack.c.bf16 %v4390_v7, %v4389_v25 }
 0x194   : > { %vm3360_vm6 = vcmp.lt.s32.totalorder %v3104_v12, 0  ;;  %v1853_v52 = vmul.u32 2246822507, %v1597_v41  ;;  %v1087_v48 = vxor.u32 %v8174_v44, %v829_v61  ;;  %v10020_v54 = vadd.f32 %v513_v9, %v513_v9  ;;  %v4343_v61 = vld [vmem:[%s12567_s2 + $0x830] sm:$0xff] }
 0x195   : > { %6470 = vmatprep.mubr.msk.f32.mxu1 %vm3360_vm6, %v9938_v3  ;;  %v2847_v17 = vshrl.u32 %v2591_v23, 16  ;;  %v2366_v53 = vxor.u32 %v2110_v63, %v1854_v33  ;;  %v1600_v36 = vxor.u32 %v1344_v59, %v1088_v62  ;;  %7808 = vmatprep.subr.bf16.mxu1 %v7807_v14  ;;  %v544_v13 = vmax.f32 %v288_v40, 0.0  ;;  %v289_v59 = vld [vmem:[%s8346_s6 + $0x370] sm:$0xff] }
 0x196   : > { %v2109_v10 = vshrl.u32 %v1853_v52, 13  ;;  %v1343_v35 = vshrl.u32 %v1087_v48, 16  ;;  %v860_v6 = vadd.s32 %v8632_v0, %v9829_v1  ;;  %v7809_v26 = vpack.c.bf16 %v4374_v21, %v4373_v20 }
 0x197   : > { %v3103_v39 = vxor.u32 %v2847_v17, %v2591_v23  ;;  %v2622_v56 = vmul.u32 3266489909, %v2366_v53  ;;  %v1856_v30 = vmul.u32 2246822507, %v1600_v36  ;;  %v10026_v22 = vadd.f32 %v544_v13, %v544_v13  ;;  %v4391_v13 = vld [vmem:[%s12567_s2 + $0x9b0] sm:$0xff] }
 0x198   : > { %v2365_v34 = vxor.u32 %v2109_v10, %v1853_v52  ;;  %v1599_v3 = vxor.u32 %v1343_v35, %v1087_v48  ;;  %v1118_v50 = vxor.u32 %v8174_v44, %v860_v6  ;;  %7810 = vmatpush3.bf16.msra.mxu1 %v7809_v26  ;;  %v543_v46 = vmax.f32 %v287_v24, 0.0  ;;  %v4392_v24 = vld [vmem:[%s12567_s2 + $0x9b8] sm:$0xff] }
 0x199   : > { %vm3359_vm7 = vcmp.lt.s32.totalorder %v3103_v39, 0  ;;  %v2878_v43 = vshrl.u32 %v2622_v56, 16  ;;  %v2112_v42 = vshrl.u32 %v1856_v30, 13  ;;  %v859_v16 = vadd.s32 %v8632_v0, %v9845_v49 }
 0x19a   : > { %6471 = vmatmul.mubr.msk.f32.gmra.mrb[50].mxu1 %vm3359_vm7, %v9953_v4  ;;  %v2621_v11 = vmul.u32 3266489909, %v2365_v34  ;;  %v1855_v5 = vmul.u32 2246822507, %v1599_v3  ;;  %v1374_v31 = vshrl.u32 %v1118_v50, 16  ;;  %v10039_v58 = vadd.f32 %v543_v46, %v543_v46  ;;  %v4344_v4 = vld [vmem:[%s12567_s2 + $0x838] sm:$0xff] }
 0x19b   : > { %v3134_v25 = vxor.u32 %v2878_v43, %v2622_v56  ;;  %v2368_v7 = vxor.u32 %v2112_v42, %v1856_v30  ;;  %v1117_v51 = vxor.u32 %v8174_v44, %v859_v16  ;;  %v7779_v33 = vpack.c.bf16 %v4360_v19, %v4359_v2  ;;  %v320_v30 = vld [vmem:[%s8346_s6 + $0x468] sm:$0xff]  ;;  %v4375_v2 = vld [vmem:[%s12567_s2 + $0x930] sm:$0xff] }
 0x19c   : > { %v2877_v62 = vshrl.u32 %v2621_v11, 16  ;;  %v2111_v12 = vshrl.u32 %v1855_v5, 13  ;;  %v1630_v41 = vxor.u32 %v1374_v31, %v1118_v50  ;;  %v546_v9 = vmax.f32 %v290_v37, 0.0  ;;  %v319_v31 = vld [vmem:[%s8346_s6 + $0x460] sm:$0xff] }
 0x19d   : > { %vm3390_vm8 = vcmp.lt.s32.totalorder %v3134_v25, 0  ;;  %v2624_v40 = vmul.u32 3266489909, %v2368_v7  ;;  %v1373_v23 = vshrl.u32 %v1117_v51, 16  ;;  %7780 = vmatprep.subr.bf16.mxu0 %v7779_v33  ;;  %v862_v63 = vadd.s32 %v8632_v0, %v9864_v55 }
 0x19e   : > { %6456 = vmatprep.mubr.msk.f32.mxu0 %vm3390_vm8, %v9971_v32  ;;  %v3133_v14 = vxor.u32 %v2877_v62, %v2621_v11  ;;  %v2367_v20 = vxor.u32 %v2111_v12, %v1855_v5  ;;  %v1886_v21 = vmul.u32 2246822507, %v1630_v41  ;;  %v10052_v52 = vadd.f32 %v546_v9, %v546_v9  ;;  %v4361_v62 = vld [vmem:[%s12567_s2 + $0x8c0] sm:$0xff] }
 0x19f   : > { %v2880_v48 = vshrl.u32 %v2624_v40, 16  ;;  %v1629_v17 = vxor.u32 %v1373_v23, %v1117_v51  ;;  %v1120_v53 = vxor.u32 %v8174_v44, %v862_v63  ;;  %v7781_v36 = vpack.c.bf16 %v4344_v4, %v4343_v61  ;;  %v322_v63 = vld [vmem:[%s8346_s6 + $0x478] sm:$0xff] }
 0x1a0   : > { %vm3389_vm9 = vcmp.lt.s32.totalorder %v3133_v14, 0  ;;  %v2623_v32 = vmul.u32 3266489909, %v2367_v20  ;;  %v2142_v10 = vshrl.u32 %v1886_v21, 13  ;;  %v545_v35 = vmax.f32 %v289_v59, 0.0 }
 0x1a1   : > { %6457 = vmatmul.mubr.msk.f32.gmra.mrb[52].mxu0 %vm3389_vm9, %v9984_v45  ;;  %v3136_v6 = vxor.u32 %v2880_v48, %v2624_v40  ;;  %v1885_v26 = vmul.u32 2246822507, %v1629_v17  ;;  %v1376_v39 = vshrl.u32 %v1120_v53, 16  ;;  %v861_v56 = vadd.s32 %v8632_v0, %v9884_v60  ;;  %v4376_v45 = vld [vmem:[%s12567_s2 + $0x938] sm:$0xff] }
 0x1a2   : > { %v2879_v34 = vshrl.u32 %v2623_v32, 16  ;;  %v2398_v3 = vxor.u32 %v2142_v10, %v1886_v21  ;;  %7782 = vmatpush3.bf16.msra.mxu0 %v7781_v36  ;;  %v10065_v50 = vadd.f32 %v545_v35, %v545_v35  ;;  %v7811_v46 = vpack.c.bf16 %v4392_v24, %v4391_v13  ;;  %v4346_v13 = vld [vmem:[%s12567_s2 + $0x848] sm:$0xff] }
 0x1a3   : > { %vm3392_vm10 = vcmp.lt.s32.totalorder %v3136_v6, 0  ;;  %v2141_v19 = vshrl.u32 %v1885_v26, 13  ;;  %v1632_v43 = vxor.u32 %v1376_v39, %v1120_v53  ;;  %v1119_v42 = vxor.u32 %v8174_v44, %v861_v56  ;;  %v321_v56 = vld [vmem:[%s8346_s6 + $0x470] sm:$0xff] }
 0x1a4   : > { %6472 = vmatprep.mubr.msk.f32.mxu1 %vm3392_vm10, %v10008_v18  ;;  %v3135_v16 = vxor.u32 %v2879_v34, %v2623_v32  ;;  %v2654_v37 = vmul.u32 3266489909, %v2398_v3  ;;  %7812 = vmatprep.subr.bf16.mxu1 %v7811_v46  ;;  %v576_v11 = vmax.f32 %v320_v30, 0.0  ;;  %v892_v5 = vadd.s32 %v8697_v47, %v9829_v1  ;;  %v4362_v18 = vld [vmem:[%s12567_s2 + $0x8c8] sm:$0xff] }
 0x1a5   : > { %v2397_v25 = vxor.u32 %v2141_v19, %v1885_v26  ;;  %v1888_v7 = vmul.u32 2246822507, %v1632_v43  ;;  %v1375_v51 = vshrl.u32 %v1119_v42, 16  ;;  %v7813_v33 = vpack.c.bf16 %v4376_v45, %v4375_v2  ;;  %v4393_v2 = vld [vmem:[%s12567_s2 + $0x9c0] sm:$0xff] }
 0x1a6   : > { %vm3391_vm11 = vcmp.lt.s32.totalorder %v3135_v16, 0  ;;  %v2910_v12 = vshrl.u32 %v2654_v37, 16  ;;  %v1150_v41 = vxor.u32 %v8174_v44, %v892_v5  ;;  %v10085_v9 = vadd.f32 %v576_v11, %v576_v11  ;;  %v352_v5 = vld [vmem:[%s8346_s6 + $0x568] sm:$0xff] }
 0x1a7   : > { %6473 = vmatmul.mubr.msk.f32.gmra.mrb[52].mxu1 %vm3391_vm11, %v10020_v54  ;;  %v2653_v61 = vmul.u32 3266489909, %v2397_v25  ;;  %v2144_v4 = vshrl.u32 %v1888_v7, 13  ;;  %v1631_v40 = vxor.u32 %v1375_v51, %v1119_v42  ;;  %v575_v23 = vmax.f32 %v319_v31, 0.0  ;;  %v4345_v54 = vld [vmem:[%s12567_s2 + $0x840] sm:$0xff] }
 0x1a8   : > { %v3166_v59 = vxor.u32 %v2910_v12, %v2654_v37  ;;  %v1406_v14 = vshrl.u32 %v1150_v41, 16  ;;  %7814 = vmatpush3.bf16.msra.mxu1 %v7813_v33  ;;  %v891_v20 = vadd.s32 %v8697_v47, %v9845_v49  ;;  %v7783_v21 = vpack.c.bf16 %v4362_v18, %v4361_v62 }
 0x1a9   : > { %v2909_v48 = vshrl.u32 %v2653_v61, 16  ;;  %v2400_v17 = vxor.u32 %v2144_v4, %v1888_v7  ;;  %v1887_v53 = vmul.u32 2246822507, %v1631_v40  ;;  %v10091_v36 = vadd.f32 %v575_v23, %v575_v23 }
 0x1aa   : > { %vm3422_vm12 = vcmp.lt.s32.totalorder %v3166_v59, 0  ;;  %v1662_v24 = vxor.u32 %v1406_v14, %v1150_v41  ;;  %v1149_v32 = vxor.u32 %v8174_v44, %v891_v20  ;;  %7784 = vmatprep.subr.bf16.mxu0 %v7783_v21  ;;  %v578_v10 = vmax.f32 %v322_v63, 0.0  ;;  %v4378_v41 = vld [vmem:[%s12567_s2 + $0x948] sm:$0xff]  ;;  %v351_v20 = vld [vmem:[%s8346_s6 + $0x560] sm:$0xff] }
 0x1ab   : > { %6458 = vmatprep.mubr.msk.f32.mxu0 %vm3422_vm12, %v10026_v22  ;;  %v3165_v35 = vxor.u32 %v2909_v48, %v2653_v61  ;;  %v2656_v6 = vmul.u32 3266489909, %v2400_v17  ;;  %v2143_v26 = vshrl.u32 %v1887_v53, 13  ;;  %v894_v39 = vadd.s32 %v8697_v47, %v9864_v55  ;;  %v4394_v22 = vld [vmem:[%s12567_s2 + $0x9c8] sm:$0xff] }
 0x1ac   : > { %v1918_v30 = vmul.u32 2246822507, %v1662_v24  ;;  %v1405_v34 = vshrl.u32 %v1149_v32, 16  ;;  %v10104_v3 = vadd.f32 %v578_v10, %v578_v10  ;;  %v7785_v46 = vpack.c.bf16 %v4346_v13, %v4345_v54  ;;  %v4364_v10 = vld [vmem:[%s12567_s2 + $0x8d8] sm:$0xff] }
 0x1ad   : > { %vm3421_vm13 = vcmp.lt.s32.totalorder %v3165_v35, 0  ;;  %v2912_v45 = vshrl.u32 %v2656_v6, 16  ;;  %v2399_v19 = vxor.u32 %v2143_v26, %v1887_v53  ;;  %v1152_v43 = vxor.u32 %v8174_v44, %v894_v39 }
 0x1ae   : > { %6459 = vmatmul.mubr.msk.f32.gmra.mrb[54].mxu0 %vm3421_vm13, %v10039_v58  ;;  %v2174_v42 = vshrl.u32 %v1918_v30, 13  ;;  %v1661_v16 = vxor.u32 %v1405_v34, %v1149_v32  ;;  %v577_v37 = vmax.f32 %v321_v56, 0.0  ;;  %v893_v11 = vadd.s32 %v8697_v47, %v9884_v60  ;;  %v4377_v58 = vld [vmem:[%s12567_s2 + $0x940] sm:$0xff] }
 0x1af   : > { %v3168_v31 = vxor.u32 %v2912_v45, %v2656_v6  ;;  %v2655_v25 = vmul.u32 3266489909, %v2399_v19  ;;  %v1408_v7 = vshrl.u32 %v1152_v43, 16  ;;  %7786 = vmatpush3.bf16.msra.mxu0 %v7785_v46  ;;  %v7815_v51 = vpack.c.bf16 %v4394_v22, %v4393_v2  ;;  %v354_v46 = vld [vmem:[%s8346_s6 + $0x578] sm:$0xff] }
 0x1b0   : > { %v2430_v33 = vxor.u32 %v2174_v42, %v1918_v30  ;;  %v1917_v62 = vmul.u32 2246822507, %v1661_v16  ;;  %v1151_v18 = vxor.u32 %v8174_v44, %v893_v11  ;;  %v10118_v12 = vadd.f32 %v577_v37, %v577_v37 }
 0x1b1   : > { %vm3424_vm14 = vcmp.lt.s32.totalorder %v3168_v31, 0  ;;  %v2911_v61 = vshrl.u32 %v2655_v25, 16  ;;  %v1664_v4 = vxor.u32 %v1408_v7, %v1152_v43  ;;  %7816 = vmatprep.subr.bf16.mxu1 %v7815_v51  ;;  %v608_v40 = vmax.f32 %v352_v5, 0.0  ;;  %v4347_v43 = vld [vmem:[%s12567_s2 + $0x850] sm:$0xff] }
 0x1b2   : > { %6474 = vmatprep.mubr.msk.f32.mxu1 %vm3424_vm14, %v10052_v52  ;;  %v2686_v23 = vmul.u32 3266489909, %v2430_v33  ;;  %v2173_v63 = vshrl.u32 %v1917_v62, 13  ;;  %v1407_v59 = vshrl.u32 %v1151_v18, 16  ;;  %v924_v14 = vadd.s32 %v8753_v57, %v9829_v1  ;;  %v4363_v52 = vld [vmem:[%s12567_s2 + $0x8d0] sm:$0xff] }
 0x1b3   : > { %v3167_v21 = vxor.u32 %v2911_v61, %v2655_v25  ;;  %v1920_v48 = vmul.u32 2246822507, %v1664_v4  ;;  %v10130_v17 = vadd.f32 %v608_v40, %v608_v40  ;;  %v7817_v53 = vpack.c.bf16 %v4378_v41, %v4377_v58  ;;  %v353_v7 = vld [vmem:[%s8346_s6 + $0x570] sm:$0xff]  ;;  %v4396_v40 = vld [vmem:[%s12567_s2 + $0x9d8] sm:$0xff] }
 0x1b4   : > { %v2942_v54 = vshrl.u32 %v2686_v23, 16  ;;  %v2429_v13 = vxor.u32 %v2173_v63, %v1917_v62  ;;  %v1663_v24 = vxor.u32 %v1407_v59, %v1151_v18  ;;  %v1182_v32 = vxor.u32 %v8174_v44, %v924_v14 }
 0x1b5   : > { %vm3423_vm15 = vcmp.lt.s32.totalorder %v3167_v21, 0  ;;  %v2176_v35 = vshrl.u32 %v1920_v48, 13  ;;  %7818 = vmatpush3.bf16.msra.mxu1 %v7817_v53  ;;  %v607_v6 = vmax.f32 %v351_v20, 0.0  ;;  %v923_v26 = vadd.s32 %v8753_v57, %v9845_v49  ;;  %v384_v53 = vld [vmem:[%s8346_s6 + $0x668] sm:$0xff] }
 0x1b6   : > { %6475 = vmatmul.mubr.msk.f32.gmra.mrb[54].mxu1 %vm3423_vm15, %v10065_v50  ;;  %v3198_v39 = vxor.u32 %v2942_v54, %v2686_v23  ;;  %v2685_v56 = vmul.u32 3266489909, %v2429_v13  ;;  %v1919_v30 = vmul.u32 2246822507, %v1663_v24  ;;  %v1438_v34 = vshrl.u32 %v1182_v32, 16  ;;  %v4348_v50 = vld [vmem:[%s12567_s2 + $0x858] sm:$0xff] }
 0x1b7   : > { %v2432_v2 = vxor.u32 %v2176_v35, %v1920_v48  ;;  %v1181_v22 = vxor.u32 %v8174_v44, %v923_v26  ;;  %v10144_v45 = vadd.f32 %v607_v6, %v607_v6  ;;  %v7787_v19 = vpack.c.bf16 %v4364_v10, %v4363_v52  ;;  %v4379_v52 = vld [vmem:[%s12567_s2 + $0x950] sm:$0xff] }
 0x1b8   : > { %vm3454_vm0 = vcmp.lt.s32.totalorder %v3198_v39, 0  ;;  %v2941_v42 = vshrl.u32 %v2685_v56, 16  ;;  %v2175_v16 = vshrl.u32 %v1919_v30, 13  ;;  %v1694_v37 = vxor.u32 %v1438_v34, %v1182_v32  ;;  %v383_v34 = vld [vmem:[%s8346_s6 + $0x660] sm:$0xff] }
 0x1b9   : > { %6460 = vmatprep.mubr.msk.f32.mxu0 %vm3454_vm0, %v10085_v9  ;;  %v2688_v11 = vmul.u32 3266489909, %v2432_v2  ;;  %v1437_v5 = vshrl.u32 %v1181_v22, 16  ;;  %7788 = vmatprep.subr.bf16.mxu0 %v7787_v19  ;;  %v610_v31 = vmax.f32 %v354_v46, 0.0  ;;  %v926_v25 = vadd.s32 %v8753_v57, %v9864_v55  ;;  %v4395_v9 = vld [vmem:[%s12567_s2 + $0x9d0] sm:$0xff] }
 0x1ba   : > { %v3197_v51 = vxor.u32 %v2941_v42, %v2685_v56  ;;  %v2431_v33 = vxor.u32 %v2175_v16, %v1919_v30  ;;  %v1950_v62 = vmul.u32 2246822507, %v1694_v37  ;;  %v7789_v18 = vpack.c.bf16 %v4348_v50, %v4347_v43  ;;  %v4365_v43 = vld [vmem:[%s12567_s2 + $0x8e0] sm:$0xff] }
 0x1bb   : > { %v2944_v58 = vshrl.u32 %v2688_v11, 16  ;;  %v1693_v41 = vxor.u32 %v1437_v5, %v1181_v22  ;;  %v1184_v61 = vxor.u32 %v8174_v44, %v926_v25  ;;  %v10157_v4 = vadd.f32 %v610_v31, %v610_v31  ;;  %v386_v25 = vld [vmem:[%s8346_s6 + $0x678] sm:$0xff] }
 0x1bc   : > { %vm3453_vm1 = vcmp.lt.s32.totalorder %v3197_v51, 0  ;;  %v2687_v23 = vmul.u32 3266489909, %v2431_v33  ;;  %v2206_v63 = vshrl.u32 %v1950_v62, 13  ;;  %7790 = vmatpush3.bf16.msra.mxu0 %v7789_v18  ;;  %v609_v59 = vmax.f32 %v353_v7, 0.0 }
 0x1bd   : > { %6461 = vmatmul.mubr.msk.f32.gmra.mrb[56].mxu0 %vm3453_vm1, %v10091_v36  ;;  %v3200_v14 = vxor.u32 %v2944_v58, %v2688_v11  ;;  %v1949_v20 = vmul.u32 2246822507, %v1693_v41  ;;  %v1440_v21 = vshrl.u32 %v1184_v61, 16  ;;  %v925_v48 = vadd.s32 %v8753_v57, %v9884_v60  ;;  %v4380_v36 = vld [vmem:[%s12567_s2 + $0x958] sm:$0xff] }
 0x1be   : > { %v2943_v54 = vshrl.u32 %v2687_v23, 16  ;;  %v2462_v13 = vxor.u32 %v2206_v63, %v1950_v62  ;;  %v10169_v24 = vadd.f32 %v609_v59, %v609_v59  ;;  %v7819_v32 = vpack.c.bf16 %v4396_v40, %v4395_v9  ;;  %v4350_v9 = vld [vmem:[%s12567_s2 + $0x868] sm:$0xff] }
 0x1bf   : > { %vm3456_vm2 = vcmp.lt.s32.totalorder %v3200_v14, 0  ;;  %v2205_v10 = vshrl.u32 %v1949_v20, 13  ;;  %v1696_v35 = vxor.u32 %v1440_v21, %v1184_v61  ;;  %v1183_v6 = vxor.u32 %v8174_v44, %v925_v48  ;;  %v385_v48 = vld [vmem:[%s8346_s6 + $0x670] sm:$0xff] }
 0x1c0   : > { %6476 = vmatprep.mubr.msk.f32.mxu1 %vm3456_vm2, %v10104_v3  ;;  %v3199_v26 = vxor.u32 %v2943_v54, %v2687_v23  ;;  %v2718_v39 = vmul.u32 3266489909, %v2462_v13  ;;  %7820 = vmatprep.subr.bf16.mxu1 %v7819_v32  ;;  %v640_v56 = vmax.f32 %v384_v53, 0.0  ;;  %v956_v30 = vadd.s32 %v8817_v27, %v9829_v1  ;;  %v4366_v3 = vld [vmem:[%s12567_s2 + $0x8e8] sm:$0xff] }
 0x1c1   : > { %v2461_v46 = vxor.u32 %v2205_v10, %v1949_v20  ;;  %v1952_v2 = vmul.u32 2246822507, %v1696_v35  ;;  %v1439_v22 = vshrl.u32 %v1183_v6, 16  ;;  %v7821_v19 = vpack.c.bf16 %v4380_v36, %v4379_v52  ;;  %v4397_v52 = vld [vmem:[%s12567_s2 + $0x9e0] sm:$0xff] }
 0x1c2   : > { %vm3455_vm3 = vcmp.lt.s32.totalorder %v3199_v26, 0  ;;  %v2974_v50 = vshrl.u32 %v2718_v39, 16  ;;  %v1214_v42 = vxor.u32 %v8174_v44, %v956_v30  ;;  %v10189_v16 = vadd.f32 %v640_v56, %v640_v56  ;;  %v416_v30 = vld [vmem:[%s8346_s6 + $0x768] sm:$0xff] }
 0x1c3   : > { %6477 = vmatmul.mubr.msk.f32.gmra.mrb[56].mxu1 %vm3455_vm3, %v10118_v12  ;;  %v2717_v37 = vmul.u32 3266489909, %v2461_v46  ;;  %v2208_v11 = vshrl.u32 %v1952_v2, 13  ;;  %v1695_v5 = vxor.u32 %v1439_v22, %v1183_v6  ;;  %v639_v31 = vmax.f32 %v383_v34, 0.0  ;;  %v4349_v12 = vld [vmem:[%s12567_s2 + $0x860] sm:$0xff] }
 0x1c4   : > { %v3230_v7 = vxor.u32 %v2974_v50, %v2718_v39  ;;  %v1470_v51 = vshrl.u32 %v1214_v42, 16  ;;  %7822 = vmatpush3.bf16.msra.mxu1 %v7821_v19  ;;  %v955_v33 = vadd.s32 %v8817_v27, %v9845_v49  ;;  %v7791_v62 = vpack.c.bf16 %v4366_v3, %v4365_v43 }
 0x1c5   : > { %v2973_v18 = vshrl.u32 %v2717_v37, 16  ;;  %v2464_v58 = vxor.u32 %v2208_v11, %v1952_v2  ;;  %v1951_v41 = vmul.u32 2246822507, %v1695_v5  ;;  %v10195_v61 = vadd.f32 %v639_v31, %v639_v31 }
 0x1c6   : > { %vm3486_vm4 = vcmp.lt.s32.totalorder %v3230_v7, 0  ;;  %v1726_v40 = vxor.u32 %v1470_v51, %v1214_v42  ;;  %v1213_v23 = vxor.u32 %v8174_v44, %v955_v33  ;;  %7792 = vmatprep.subr.bf16.mxu0 %v7791_v62  ;;  %v642_v63 = vmax.f32 %v386_v25, 0.0  ;;  %v4382_v42 = vld [vmem:[%s12567_s2 + $0x968] sm:$0xff]  ;;  %v415_v33 = vld [vmem:[%s8346_s6 + $0x760] sm:$0xff] }
 0x1c7   : > { %6462 = vmatprep.mubr.msk.f32.mxu0 %vm3486_vm4, %v10130_v17  ;;  %v3229_v59 = vxor.u32 %v2973_v18, %v2717_v37  ;;  %v2720_v14 = vmul.u32 3266489909, %v2464_v58  ;;  %v2207_v20 = vshrl.u32 %v1951_v41, 13  ;;  %v958_v21 = vadd.s32 %v8817_v27, %v9864_v55  ;;  %v4398_v17 = vld [vmem:[%s12567_s2 + $0x9e8] sm:$0xff] }
 0x1c8   : > { %v1982_v53 = vmul.u32 2246822507, %v1726_v40  ;;  %v1469_v54 = vshrl.u32 %v1213_v23, 16  ;;  %v10208_v13 = vadd.f32 %v642_v63, %v642_v63  ;;  %v7793_v32 = vpack.c.bf16 %v4350_v9, %v4349_v12 }
 0x1c9   : > { %vm3485_vm5 = vcmp.lt.s32.totalorder %v3229_v59, 0  ;;  %v2976_v36 = vshrl.u32 %v2720_v14, 16  ;;  %v2463_v10 = vxor.u32 %v2207_v20, %v1951_v41  ;;  %v1216_v35 = vxor.u32 %v8174_v44, %v958_v21 }
 0x1ca   : > { %6463 = vmatmul.mubr.msk.f32.gmra.mrb[58].mxu0 %vm3485_vm5, %v10144_v45  ;;  %v2238_v6 = vshrl.u32 %v1982_v53, 13  ;;  %v1725_v26 = vxor.u32 %v1469_v54, %v1213_v23  ;;  %v641_v39 = vmax.f32 %v385_v48, 0.0  ;;  %v957_v56 = vadd.s32 %v8817_v27, %v9884_v60  ;;  %v4381_v45 = vld [vmem:[%s12567_s2 + $0x960] sm:$0xff]  ;;  %v418_v54 = vld [vmem:[%s8346_s6 + $0x778] sm:$0xff] }
 0x1cb   : > { %v3232_v34 = vxor.u32 %v2976_v36, %v2720_v14  ;;  %v2719_v46 = vmul.u32 3266489909, %v2463_v10  ;;  %v1472_v2 = vshrl.u32 %v1216_v35, 16  ;;  %7794 = vmatpush3.bf16.msra.mxu0 %v7793_v32  ;;  %v7823_v22 = vpack.c.bf16 %v4398_v17, %v4397_v52  ;;  %v4351_v10 = vld [vmem:[%s12567_s2 + $0x870] sm:$0xff] }
 0x1cc   : > { %v2494_v19 = vxor.u32 %v2238_v6, %v1982_v53  ;;  %v1981_v43 = vmul.u32 2246822507, %v1725_v26  ;;  %v1215_v3 = vxor.u32 %v8174_v44, %v957_v56  ;;  %v10222_v50 = vadd.f32 %v641_v39, %v641_v39 }
 0x1cd   : > { %vm3488_vm6 = vcmp.lt.s32.totalorder %v3232_v34, 0  ;;  %v2975_v37 = vshrl.u32 %v2719_v46, 16  ;;  %v1728_v11 = vxor.u32 %v1472_v2, %v1216_v35  ;;  %7824 = vmatprep.subr.bf16.mxu1 %v7823_v22  ;;  %v672_v5 = vmax.f32 %v416_v30, 0.0  ;;  %v417_v34 = vld [vmem:[%s8346_s6 + $0x770] sm:$0xff] }
 0x1ce   : > { %6478 = vmatprep.mubr.msk.f32.mxu1 %vm3488_vm6, %v10157_v4  ;;  %v2750_v31 = vmul.u32 3266489909, %v2494_v19  ;;  %v2237_v25 = vshrl.u32 %v1981_v43, 13  ;;  %v1471_v7 = vshrl.u32 %v1215_v3, 16  ;;  %v988_v51 = vadd.s32 %v8872_v8, %v9829_v1  ;;  %v4367_v4 = vld [vmem:[%s12567_s2 + $0x8f0] sm:$0xff]  ;;  %v4368_v1 = vld [vmem:[%s12567_s2 + $0x8f8] sm:$0xff] }
 0x1cf   : > { %v3231_v62 = vxor.u32 %v2975_v37, %v2719_v46  ;;  %v1984_v18 = vmul.u32 2246822507, %v1728_v11  ;;  %v10234_v58 = vadd.f32 %v672_v5, %v672_v5  ;;  %v7825_v41 = vpack.c.bf16 %v4382_v42, %v4381_v45 }
 0x1d0   : > { %v3006_v12 = vshrl.u32 %v2750_v31, 16  ;;  %v2493_v9 = vxor.u32 %v2237_v25, %v1981_v43  ;;  %v1727_v40 = vxor.u32 %v1471_v7, %v1215_v3  ;;  %v1246_v23 = vxor.u32 %v8174_v44, %v988_v51 }
 0x1d1   : > { %vm3487_vm7 = vcmp.lt.s32.totalorder %v3231_v62, 0  ;;  %v2240_v63 = vshrl.u32 %v1984_v18, 13  ;;  %7826 = vmatpush3.bf16.msra.mxu1 %v7825_v41  ;;  %v671_v59 = vmax.f32 %v415_v33, 0.0  ;;  %v987_v14 = vadd.s32 %v8872_v8, %v9845_v49  ;;  %v4352_v49 = vld [vmem:[%s12567_s2 + $0x878] sm:$0xff]  ;;  %v196_v33 = vld [vmem:[%s8346_s6 + $0x88] sm:$0xff] }
 0x1d2   : > { %6479 = vmatmul.mubr.msk.f32.gmra.mrb[58].mxu1 %vm3487_vm7, %v10169_v24  ;;  %v3262_v20 = vxor.u32 %v3006_v12, %v2750_v31  ;;  %v2749_v21 = vmul.u32 3266489909, %v2493_v9  ;;  %v1983_v48 = vmul.u32 2246822507, %v1727_v40  ;;  %v1502_v53 = vshrl.u32 %v1246_v23, 16  ;;  %v4383_v9 = vld [vmem:[%s12567_s2 + $0x970] sm:$0xff] }
 0x1d3   : > { %v2496_v32 = vxor.u32 %v2240_v63, %v1984_v18  ;;  %v1245_v52 = vxor.u32 %v8174_v44, %v987_v14  ;;  %v10248_v17 = vadd.f32 %v671_v59, %v671_v59  ;;  %v7795_v36 = vpack.c.bf16 %v4368_v1, %v4367_v4  ;;  %v195_v14 = vld [vmem:[%s8346_s6 + $0x80] sm:$0xff] }
 0x1d4   : > { %vm3518_vm8 = vcmp.lt.s32.totalorder %v3262_v20, 0  ;;  %v3005_v24 = vshrl.u32 %v2749_v21, 16  ;;  %v2239_v35 = vshrl.u32 %v1983_v48, 13  ;;  %v1758_v6 = vxor.u32 %v1502_v53, %v1246_v23 }
 0x1d5   : > { %6464 = vmatprep.mubr.msk.f32.mxu0 %vm3518_vm8, %v10189_v16  ;;  %v2752_v26 = vmul.u32 3266489909, %v2496_v32  ;;  %v1501_v39 = vshrl.u32 %v1245_v52, 16  ;;  %7796 = vmatprep.subr.bf16.mxu0 %v7795_v36  ;;  %v674_v56 = vmax.f32 %v418_v54, 0.0  ;;  %v990_v30 = vadd.s32 %v8872_v8, %v9864_v55  ;;  %v4399_v16 = vld [vmem:[%s12567_s2 + $0x9f0] sm:$0xff]  ;;  %v4400_v55 = vld [vmem:[%s12567_s2 + $0x9f8] sm:$0xff] }
 0x1d6   : > { %v3261_v46 = vxor.u32 %v3005_v24, %v2749_v21  ;;  %v2495_v2 = vxor.u32 %v2239_v35, %v1983_v48  ;;  %v2014_v22 = vmul.u32 2246822507, %v1758_v6  ;;  %v7797_v19 = vpack.c.bf16 %v4352_v49, %v4351_v10  ;;  %v4417_v54 = vld [vmem:[%s12567_s2 + $0xa80] sm:$0xff]  ;;  %v198_v6 = vld [vmem:[%s8346_s6 + $0x98] sm:$0xff] }
 0x1d7   : > { %v3008_v43 = vshrl.u32 %v2752_v26, 16  ;;  %v1757_v3 = vxor.u32 %v1501_v39, %v1245_v52  ;;  %v1248_v45 = vxor.u32 %v8174_v44, %v990_v30  ;;  %v10261_v42 = vadd.f32 %v674_v56, %v674_v56 }
 0x1d8   : > { %vm3517_vm9 = vcmp.lt.s32.totalorder %v3261_v46, 0  ;;  %v2751_v37 = vmul.u32 3266489909, %v2495_v2  ;;  %v2270_v11 = vshrl.u32 %v2014_v22, 13  ;;  %7798 = vmatpush3.bf16.msra.mxu0 %v7797_v19  ;;  %v673_v5 = vmax.f32 %v417_v34, 0.0  ;;  %v10313_v19 = vld [vmem:[%s12567_s2 + $0xa08] sm:$0xff] }
 0x1d9   : > { %6465 = vmatmul.mubr.msk.f32.gmra.mrb[60].mxu0 %vm3517_vm9, %v10195_v61  ;;  %v3264_v31 = vxor.u32 %v3008_v43, %v2752_v26  ;;  %v2013_v25 = vmul.u32 2246822507, %v1757_v3  ;;  %v1504_v7 = vshrl.u32 %v1248_v45, 16  ;;  %v989_v51 = vadd.s32 %v8872_v8, %v9884_v60  ;;  %v4384_v61 = vld [vmem:[%s12567_s2 + $0x978] sm:$0xff] }
 0x1da   : > { %v3007_v62 = vshrl.u32 %v2751_v37, 16  ;;  %v2526_v18 = vxor.u32 %v2270_v11, %v2014_v22  ;;  %v10273_v41 = vadd.f32 %v673_v5, %v673_v5  ;;  %v7827_v12 = vpack.c.bf16 %v4400_v55, %v4399_v16  ;;  %v197_v5 = vld [vmem:[%s8346_s6 + $0x90] sm:$0xff] }
 0x1db   : > { %vm3520_vm10 = vcmp.lt.s32.totalorder %v3264_v31, 0  ;;  %v2269_v40 = vshrl.u32 %v2013_v25, 13  ;;  %v1760_v23 = vxor.u32 %v1504_v7, %v1248_v45  ;;  %v1247_v60 = vxor.u32 %v8174_v44, %v989_v51 }
 0x1dc   : > { %6480 = vmatprep.mubr.msk.f32.mxu1 %vm3520_vm10, %v10208_v13  ;;  %v3263_v4 = vxor.u32 %v3007_v62, %v2751_v37  ;;  %v2782_v1 = vmul.u32 3266489909, %v2526_v18  ;;  %7828 = vmatprep.subr.bf16.mxu1 %v7827_v12  ;;  %v452_v63 = vmax.f32 %v196_v33, 0.0  ;;  %v10284_v59 = vadd.s32 2176, %v8109_v15  ;;  %v4418_v13 = vld [vmem:[%s12567_s2 + $0xa88] sm:$0xff] }
 0x1dd   : > { %v2525_v20 = vxor.u32 %v2269_v40, %v2013_v25  ;;  %v2016_v21 = vmul.u32 2246822507, %v1760_v23  ;;  %v1503_v48 = vshrl.u32 %v1247_v60, 16  ;;  %v7829_v53 = vpack.c.bf16 %v4384_v61, %v4383_v9  ;;  %v4450_v33 = vld [vmem:[%s12567_s2 + $0xb88] sm:$0xff] }
 0x1de   : > { %vm3519_vm11 = vcmp.lt.s32.totalorder %v3263_v4, 0  ;;  %v3038_v32 = vshrl.u32 %v2782_v1, 16  ;;  %v768_v52 = vadd.s32 %v8161_v38, %v10284_v59  ;;  %v10295_v36 = vadd.f32 %v452_v63, %v452_v63 }
 0x1df   : > { %6481 = vmatmul.mubr.msk.f32.gmra.mrb[60].mxu1 %vm3519_vm11, %v10222_v50  ;;  %v2781_v10 = vmul.u32 3266489909, %v2525_v20  ;;  %v2272_v49 = vshrl.u32 %v2016_v21, 13  ;;  %v1759_v24 = vxor.u32 %v1503_v48, %v1247_v60  ;;  %v451_v35 = vmax.f32 %v195_v14, 0.0  ;;  %v10308_v50 = vld [vmem:[%s12567_s2 + $0xa00] sm:$0xff]  ;;  %v228_v60 = vld [vmem:[%s8346_s6 + $0x188] sm:$0xff] }
 0x1e0   : > { %v3294_v26 = vxor.u32 %v3038_v32, %v2782_v1  ;;  %v1026_v39 = vxor.u32 %v8174_v44, %v768_v52  ;;  %7830 = vmatpush3.bf16.msra.mxu1 %v7829_v53  ;;  %v10301_v56 = vadd.s32 2048, %v8109_v15  ;;  %v7831_v30 = vpack.c.bf16 %v4418_v13, %v4417_v54  ;;  %v10353_v54 = vld [vmem:[%s12567_s2 + $0xb08] sm:$0xff] }
 0x1e1   : > { %v3037_v34 = vshrl.u32 %v2781_v10, 16  ;;  %v2528_v46 = vxor.u32 %v2272_v49, %v2016_v21  ;;  %v2015_v2 = vmul.u32 2246822507, %v1759_v24  ;;  %v10303_v22 = vadd.f32 %v451_v35, %v451_v35 }
 0x1e2   : > { %vm3550_vm12 = vcmp.lt.s32.totalorder %v3294_v26, 0  ;;  %v1282_v43 = vshrl.u32 %v1026_v39, 16  ;;  %v767_v3 = vadd.s32 %v8161_v38, %v10301_v56  ;;  %7832 = vmatprep.subr.bf16.mxu0 %v7831_v30  ;;  %v454_v45 = vmax.f32 %v198_v6, 0.0  ;;  %v227_v6 = vld [vmem:[%s8346_s6 + $0x180] sm:$0xff] }
 0x1e3   : > { %6466 = vmatprep.mubr.msk.f32.mxu0 %vm3550_vm12, %v10234_v58  ;;  %v3293_v16 = vxor.u32 %v3037_v34, %v2781_v10  ;;  %v2784_v55 = vmul.u32 3266489909, %v2528_v46  ;;  %v2271_v37 = vshrl.u32 %v2015_v2, 13  ;;  %v10319_v11 = vadd.s32 2432, %v8109_v15  ;;  %v4449_v58 = vld [vmem:[%s12567_s2 + $0xb80] sm:$0xff] }
 0x1e4   : > { %v1538_v31 = vxor.u32 %v1282_v43, %v1026_v39  ;;  %v1025_v25 = vxor.u32 %v8174_v44, %v767_v3  ;;  %v10323_v7 = vadd.f32 %v454_v45, %v454_v45  ;;  %v7833_v51 = vpack.c.bf16 %v10313_v19, %v10308_v50  ;;  %v10368_v3 = vld [vmem:[%s12567_s2 + $0xa90] sm:$0xff]  ;;  %v10373_v45 = vld [vmem:[%s12567_s2 + $0xa98] sm:$0xff] }
 0x1e5   : > { %vm3549_vm13 = vcmp.lt.s32.totalorder %v3293_v16, 0  ;;  %v3040_v62 = vshrl.u32 %v2784_v55, 16  ;;  %v2527_v18 = vxor.u32 %v2271_v37, %v2015_v2  ;;  %v770_v12 = vadd.s32 %v8161_v38, %v10319_v11 }
 0x1e6   : > { %6467 = vmatmul.mubr.msk.f32.gmra.mrb[62].mxu0 %vm3549_vm13, %v10248_v17  ;;  %v1794_v9 = vmul.u32 2246822507, %v1538_v31  ;;  %v1281_v61 = vshrl.u32 %v1025_v25, 16  ;;  %v453_v40 = vmax.f32 %v197_v5, 0.0  ;;  %v10337_v23 = vadd.s32 2304, %v8109_v15  ;;  %v10348_v17 = vld [vmem:[%s12567_s2 + $0xb00] sm:$0xff] }
 0x1e7   : > { %v3296_v4 = vxor.u32 %v3040_v62, %v2784_v55  ;;  %v2783_v1 = vmul.u32 3266489909, %v2527_v18  ;;  %v1028_v63 = vxor.u32 %v8174_v44, %v770_v12  ;;  %v7863_v14 = vpack.c.bf16 %v4450_v33, %v4449_v58  ;;  %v230_v33 = vld [vmem:[%s8346_s6 + $0x198] sm:$0xff] }
 0x1e8   : > { %v2050_v20 = vshrl.u32 %v1794_v9, 13  ;;  %v1537_v21 = vxor.u32 %v1281_v61, %v1025_v25  ;;  %v769_v48 = vadd.s32 %v8161_v38, %v10337_v23  ;;  %v10343_v53 = vadd.f32 %v453_v40, %v453_v40 }
 0x1e9   : > { %vm3552_vm14 = vcmp.lt.s32.totalorder %v3296_v4, 0  ;;  %v3039_v13 = vshrl.u32 %v2783_v1, 16  ;;  %v1284_v32 = vshrl.u32 %v1028_v63, 16  ;;  %7864 = vmatprep.subr.bf16.mxu1 %v7863_v14  ;;  %v484_v52 = vmax.f32 %v228_v60, 0.0 }
 0x1ea   : > { %6482 = vmatprep.mubr.msk.f32.mxu1 %vm3552_vm14, %v10261_v42  ;;  %v2306_v10 = vxor.u32 %v2050_v20, %v1794_v9  ;;  %v1793_v49 = vmul.u32 2246822507, %v1537_v21  ;;  %v1027_v24 = vxor.u32 %v8174_v44, %v769_v48  ;;  %v800_v35 = vadd.s32 %v8269_v28, %v10284_v59  ;;  %v4403_v20 = vld [vmem:[%s12567_s2 + $0xa10] sm:$0xff]  ;;  %v4404_v21 = vld [vmem:[%s12567_s2 + $0xa18] sm:$0xff] }
 0x1eb   : > { %v3295_v26 = vxor.u32 %v3039_v13, %v2783_v1  ;;  %v1540_v39 = vxor.u32 %v1284_v32, %v1028_v63  ;;  %v10360_v30 = vadd.f32 %v484_v52, %v484_v52  ;;  %v7865_v34 = vpack.c.bf16 %v10353_v54, %v10348_v17  ;;  %v229_v52 = vld [vmem:[%s8346_s6 + $0x190] sm:$0xff] }
 0x1ec   : > { %v2562_v46 = vmul.u32 3266489909, %v2306_v10  ;;  %v2049_v2 = vshrl.u32 %v1793_v49, 13  ;;  %v1283_v43 = vshrl.u32 %v1027_v24, 16  ;;  %v1058_v42 = vxor.u32 %v8174_v44, %v800_v35 }
 0x1ed   : > { %vm3551_vm15 = vcmp.lt.s32.totalorder %v3295_v26, 0  ;;  %v1796_v16 = vmul.u32 2246822507, %v1540_v39  ;;  %v483_v55 = vmax.f32 %v227_v6, 0.0  ;;  %v799_v37 = vadd.s32 %v8269_v28, %v10301_v56 }
 0x1ee   : > { %6483 = vmatmul.mubr.msk.f32.gmra.mrb[62].mxu1 %vm3551_vm15, %v10273_v41  ;;  %v2818_v5 = vshrl.u32 %v2562_v46, 16  ;;  %v2305_v31 = vxor.u32 %v2049_v2, %v1793_v49  ;;  %v1539_v25 = vxor.u32 %v1283_v43, %v1027_v24  ;;  %v1314_v58 = vshrl.u32 %v1058_v42, 16  ;;  %v4451_v2 = vld [vmem:[%s12567_s2 + $0xb90] sm:$0xff] }
 0x1ef   : > { %v2052_v62 = vshrl.u32 %v1796_v16, 13  ;;  %v1057_v18 = vxor.u32 %v8174_v44, %v799_v37  ;;  %v10380_v12 = vadd.f32 %v483_v55, %v483_v55  ;;  %v7835_v9 = vpack.c.bf16 %v10373_v45, %v10368_v3 }
 0x1f0   : > { %v3074_v61 = vxor.u32 %v2818_v5, %v2562_v46  ;;  %v2561_v40 = vmul.u32 3266489909, %v2305_v31  ;;  %v1795_v60 = vmul.u32 2246822507, %v1539_v25  ;;  %v1570_v4 = vxor.u32 %v1314_v58, %v1058_v42  ;;  %v260_v5 = vld [vmem:[%s8346_s6 + $0x288] sm:$0xff] }
 0x1f1   : > { %v2308_v1 = vxor.u32 %v2052_v62, %v1796_v16  ;;  %v1313_v41 = vshrl.u32 %v1057_v18, 16  ;;  %v486_v63 = vmax.f32 %v230_v33, 0.0  ;;  %v802_v14 = vadd.s32 %v8269_v28, %v10319_v11 }
 0x1f2   : > { %vm3330_vm0 = vcmp.lt.s32.totalorder %v3074_v61, 0  ;;  %v2817_v48 = vshrl.u32 %v2561_v40, 16  ;;  %v2051_v13 = vshrl.u32 %v1795_v60, 13  ;;  %v1826_v32 = vmul.u32 2246822507, %v1570_v4 }
 0x1f3   : > { %6484 = vmatprep.mubr.msk.f32.mxu0 %vm3330_vm0, %v10295_v36  ;;  %v2564_v10 = vmul.u32 3266489909, %v2308_v1  ;;  %v1569_v49 = vxor.u32 %v1313_v41, %v1057_v18  ;;  %v1060_v24 = vxor.u32 %v8174_v44, %v802_v14  ;;  %v10395_v35 = vadd.f32 %v486_v63, %v486_v63  ;;  %v4452_v36 = vld [vmem:[%s12567_s2 + $0xb98] sm:$0xff]  ;;  %v259_v14 = vld [vmem:[%s8346_s6 + $0x280] sm:$0xff] }
 0x1f4   : > { %v3073_v6 = vxor.u32 %v2817_v48, %v2561_v40  ;;  %v2307_v26 = vxor.u32 %v2051_v13, %v1795_v60  ;;  %v2082_v39 = vshrl.u32 %v1826_v32, 13  ;;  %v7837_v46 = vpack.c.bf16 %v4404_v21, %v4403_v20  ;;  %v4435_v60 = vld [vmem:[%s12567_s2 + $0xb10] sm:$0xff] }
 0x1f5   : > { %v2820_v43 = vshrl.u32 %v2564_v10, 16  ;;  %v1825_v42 = vmul.u32 2246822507, %v1569_v49  ;;  %v1316_v3 = vshrl.u32 %v1060_v24, 16  ;;  %v485_v45 = vmax.f32 %v229_v52, 0.0 }
 0x1f6   : > { %vm3329_vm1 = vcmp.lt.s32.totalorder %v3073_v6, 0  ;;  %v2563_v16 = vmul.u32 3266489909, %v2307_v26  ;;  %v2338_v55 = vxor.u32 %v2082_v39, %v1826_v32  ;;  %v801_v37 = vadd.s32 %v8269_v28, %v10337_v23  ;;  %v262_v39 = vld [vmem:[%s8346_s6 + $0x298] sm:$0xff] }
 0x1f7   : > { %6485 = vmatmul.mubr.msk.f32.vlgmr.msra.gmra.mrb[64].mxu0 %vm3329_vm1, %v10303_v22  ;;  %v3076_v31 = vxor.u32 %v2820_v43, %v2564_v10  ;;  %v2081_v25 = vshrl.u32 %v1825_v42, 13  ;;  %v1572_v58 = vxor.u32 %v1316_v3, %v1060_v24  ;;  %v10407_v33 = vadd.f32 %v485_v45, %v485_v45  ;;  %v4436_v22 = vld [vmem:[%s12567_s2 + $0xb18] sm:$0xff] }
 0x1f8   : > { %7834 = vmatpush3.bf16.msra.mxu0 %v7833_v51  ;;  %v2819_v62 = vshrl.u32 %v2563_v16, 16  ;;  %v2594_v18 = vmul.u32 3266489909, %v2338_v55  ;;  %v1059_v61 = vxor.u32 %v8174_v44, %v801_v37  ;;  %v7867_v40 = vpack.c.bf16 %v4452_v36, %v4451_v2  ;;  %v261_v37 = vld [vmem:[%s8346_s6 + $0x290] sm:$0xff] }
 0x1f9   : > { %vm3332_vm2 = vcmp.lt.s32.totalorder %v3076_v31, 0  ;;  %v2337_v4 = vxor.u32 %v2081_v25, %v1825_v42  ;;  %7836 = vmatprep.subr.bf16.mxu0 %v7835_v9  ;;  %v1828_v1 = vmul.u32 2246822507, %v1572_v58  ;;  %v516_v50 = vmax.f32 %v260_v5, 0.0  ;;  %v4421_v9 = vld [vmem:[%s12567_s2 + $0xaa0] sm:$0xff]  ;;  %v4406_v42 = vld [vmem:[%s12567_s2 + $0xa28] sm:$0xff] }
 0x1fa   : > { %6500 = vmatprep.mubr.msk.f32.mxu1 %vm3332_vm2, %v10323_v7  ;;  %v3075_v19 = vxor.u32 %v2819_v62, %v2563_v16  ;;  %v2850_v51 = vshrl.u32 %v2594_v18, 16  ;;  %v1315_v41 = vshrl.u32 %v1059_v61, 16  ;;  %v832_v63 = vadd.s32 %v8592_v29, %v10284_v59  ;;  %v4422_v7 = vld [vmem:[%s12567_s2 + $0xaa8] sm:$0xff]  ;;  %v4453_v25 = vld [vmem:[%s12567_s2 + $0xba0] sm:$0xff] }
 0x1fb   : > { %v2593_v20 = vmul.u32 3266489909, %v2337_v4  ;;  %v2084_v21 = vshrl.u32 %v1828_v1, 13  ;;  %v10423_v48 = vadd.f32 %v516_v50, %v516_v50  ;;  %v7869_v13 = vpack.c.bf16 %v4436_v22, %v4435_v60  ;;  %v4454_v58 = vld [vmem:[%s12567_s2 + $0xba8] sm:$0xff] }
 0x1fc   : > { %vm3331_vm3 = vcmp.lt.s32.totalorder %v3075_v19, 0  ;;  %v3106_v32 = vxor.u32 %v2850_v51, %v2594_v18  ;;  %7838 = vmatpush3.bf16.msra.mxu0 %v7837_v46  ;;  %v1571_v52 = vxor.u32 %v1315_v41, %v1059_v61  ;;  %v1090_v10 = vxor.u32 %v8174_v44, %v832_v63  ;;  %v292_v50 = vld [vmem:[%s8346_s6 + $0x388] sm:$0xff]  ;;  %v4437_v63 = vld [vmem:[%s12567_s2 + $0xb20] sm:$0xff] }
 0x1fd   : > { %6501 = vmatmul.mubr.msk.f32.vlgmr.msra.gmra.mrb[64].mxu1 %vm3331_vm3, %v10343_v53  ;;  %v2849_v49 = vshrl.u32 %v2593_v20, 16  ;;  %v2340_v24 = vxor.u32 %v2084_v21, %v1828_v1  ;;  %v515_v6 = vmax.f32 %v259_v14, 0.0  ;;  %v831_v26 = vadd.s32 %v8592_v29, %v10301_v56  ;;  %v4405_v53 = vld [vmem:[%s12567_s2 + $0xa20] sm:$0xff]  ;;  %v4438_v14 = vld [vmem:[%s12567_s2 + $0xb28] sm:$0xff] }
 0x1fe   : > { %vm3362_vm4 = vcmp.lt.s32.totalorder %v3106_v32, 0  ;;  %7866 = vmatpush3.bf16.msra.mxu1 %v7865_v34  ;;  %v1827_v2 = vmul.u32 2246822507, %v1571_v52  ;;  %v1346_v46 = vshrl.u32 %v1090_v10, 16  ;;  %v7839_v43 = vpack.c.bf16 %v4422_v7, %v4421_v9 }
 0x1ff   : > { %6486 = vmatprep.mubr.msk.f32.mxu0 %vm3362_vm4, %v10360_v30  ;;  %v3105_v3 = vxor.u32 %v2849_v49, %v2593_v20  ;;  %v2596_v45 = vmul.u32 3266489909, %v2340_v24  ;;  %7868 = vmatprep.subr.bf16.mxu1 %v7867_v40  ;;  %v1089_v17 = vxor.u32 %v8174_v44, %v831_v26  ;;  %v10447_v54 = vadd.f32 %v515_v6, %v515_v6 }
 0x200   : > { %v2083_v34 = vshrl.u32 %v1827_v2, 13  ;;  %v1602_v36 = vxor.u32 %v1346_v46, %v1090_v10  ;;  %7840 = vmatprep.subr.bf16.mxu0 %v7839_v43  ;;  %v518_v16 = vmax.f32 %v262_v39, 0.0  ;;  %v834_v55 = vadd.s32 %v8592_v29, %v10319_v11  ;;  %v291_v10 = vld [vmem:[%s8346_s6 + $0x380] sm:$0xff] }
 0x201   : > { %vm3361_vm5 = vcmp.lt.s32.totalorder %v3105_v3, 0  ;;  %v2852_v5 = vshrl.u32 %v2596_v45, 16  ;;  %v1345_v31 = vshrl.u32 %v1089_v17, 16  ;;  %v7841_v30 = vpack.c.bf16 %v4406_v42, %v4405_v53 }
 0x202   : > { %6487 = vmatmul.mubr.msk.f32.gmra.mrb[66].mxu0 %vm3361_vm5, %v10380_v12  ;;  %v2339_v62 = vxor.u32 %v2083_v34, %v1827_v2  ;;  %v1858_v18 = vmul.u32 2246822507, %v1602_v36  ;;  %7870 = vmatpush3.bf16.msra.mxu1 %v7869_v13  ;;  %v1092_v61 = vxor.u32 %v8174_v44, %v834_v55  ;;  %v10460_v40 = vadd.f32 %v518_v16, %v518_v16  ;;  %v294_v55 = vld [vmem:[%s8346_s6 + $0x398] sm:$0xff] }
 0x203   : > { %v3108_v60 = vxor.u32 %v2852_v5, %v2596_v45  ;;  %v1601_v22 = vxor.u32 %v1345_v31, %v1089_v17  ;;  %7842 = vmatpush3.bf16.msra.mxu0 %v7841_v30  ;;  %v517_v4 = vmax.f32 %v261_v37, 0.0  ;;  %v833_v1 = vadd.s32 %v8592_v29, %v10337_v23  ;;  %v4423_v45 = vld [vmem:[%s12567_s2 + $0xab0] sm:$0xff]  ;;  %v4424_v17 = vld [vmem:[%s12567_s2 + $0xab8] sm:$0xff] }
 0x204   : > { %v2595_v19 = vmul.u32 3266489909, %v2339_v62  ;;  %v2114_v51 = vshrl.u32 %v1858_v18, 13  ;;  %v1348_v41 = vshrl.u32 %v1092_v61, 16  ;;  %v7871_v12 = vpack.c.bf16 %v4454_v58, %v4453_v25 }
 0x205   : > { %vm3364_vm6 = vcmp.lt.s32.totalorder %v3108_v60, 0  ;;  %v1857_v20 = vmul.u32 2246822507, %v1601_v22  ;;  %v1091_v21 = vxor.u32 %v8174_v44, %v833_v1  ;;  %v10472_v13 = vadd.f32 %v517_v4, %v517_v4  ;;  %v4407_v1 = vld [vmem:[%s12567_s2 + $0xa30] sm:$0xff] }
 0x206   : > { %6502 = vmatprep.mubr.msk.f32.mxu1 %vm3364_vm6, %v10395_v35  ;;  %v2851_v9 = vshrl.u32 %v2595_v19, 16  ;;  %v2370_v7 = vxor.u32 %v2114_v51, %v1858_v18  ;;  %v1604_v32 = vxor.u32 %v1348_v41, %v1092_v61  ;;  %7872 = vmatprep.subr.bf16.mxu1 %v7871_v12  ;;  %v548_v52 = vmax.f32 %v292_v50, 0.0  ;;  %v293_v41 = vld [vmem:[%s8346_s6 + $0x390] sm:$0xff] }
 0x207   : > { %v2113_v49 = vshrl.u32 %v1857_v20, 13  ;;  %v1347_v24 = vshrl.u32 %v1091_v21, 16  ;;  %v864_v6 = vadd.s32 %v8632_v0, %v10284_v59  ;;  %v7873_v26 = vpack.c.bf16 %v4438_v14, %v4437_v63 }
 0x208   : > { %v3107_v39 = vxor.u32 %v2851_v9, %v2595_v19  ;;  %v2626_v2 = vmul.u32 3266489909, %v2370_v7  ;;  %v1860_v46 = vmul.u32 2246822507, %v1604_v32  ;;  %v10478_v43 = vadd.f32 %v548_v52, %v548_v52  ;;  %v4455_v52 = vld [vmem:[%s12567_s2 + $0xbb0] sm:$0xff] }
 0x209   : > { %v2369_v53 = vxor.u32 %v2113_v49, %v1857_v20  ;;  %v1603_v35 = vxor.u32 %v1347_v24, %v1091_v21  ;;  %v1122_v42 = vxor.u32 %v8174_v44, %v864_v6  ;;  %7874 = vmatpush3.bf16.msra.mxu1 %v7873_v26  ;;  %v547_v3 = vmax.f32 %v291_v10, 0.0  ;;  %v4456_v10 = vld [vmem:[%s12567_s2 + $0xbb8] sm:$0xff] }
 0x20a   : > { %vm3363_vm7 = vcmp.lt.s32.totalorder %v3107_v39, 0  ;;  %v2882_v34 = vshrl.u32 %v2626_v2, 16  ;;  %v2116_v36 = vshrl.u32 %v1860_v46, 13  ;;  %v863_v16 = vadd.s32 %v8632_v0, %v10301_v56 }
 0x20b   : > { %6503 = vmatmul.mubr.msk.f32.gmra.mrb[66].mxu1 %vm3363_vm7, %v10407_v33  ;;  %v2625_v37 = vmul.u32 3266489909, %v2369_v53  ;;  %v1859_v5 = vmul.u32 2246822507, %v1603_v35  ;;  %v1378_v31 = vshrl.u32 %v1122_v42, 16  ;;  %v10491_v30 = vadd.f32 %v547_v3, %v547_v3  ;;  %v4408_v33 = vld [vmem:[%s12567_s2 + $0xa38] sm:$0xff] }
 0x20c   : > { %v3138_v25 = vxor.u32 %v2882_v34, %v2626_v2  ;;  %v2372_v58 = vxor.u32 %v2116_v36, %v1860_v46  ;;  %v1121_v62 = vxor.u32 %v8174_v44, %v863_v16  ;;  %v7843_v18 = vpack.c.bf16 %v4424_v17, %v4423_v45  ;;  %v324_v46 = vld [vmem:[%s8346_s6 + $0x488] sm:$0xff]  ;;  %v4439_v45 = vld [vmem:[%s12567_s2 + $0xb30] sm:$0xff] }
 0x20d   : > { %v2881_v61 = vshrl.u32 %v2625_v37, 16  ;;  %v2115_v60 = vshrl.u32 %v1859_v5, 13  ;;  %v1634_v22 = vxor.u32 %v1378_v31, %v1122_v42  ;;  %v550_v4 = vmax.f32 %v294_v55, 0.0  ;;  %v323_v31 = vld [vmem:[%s8346_s6 + $0x480] sm:$0xff] }
 0x20e   : > { %vm3394_vm8 = vcmp.lt.s32.totalorder %v3138_v25, 0  ;;  %v2628_v50 = vmul.u32 3266489909, %v2372_v58  ;;  %v1377_v19 = vshrl.u32 %v1121_v62, 16  ;;  %7844 = vmatprep.subr.bf16.mxu0 %v7843_v18  ;;  %v866_v51 = vadd.s32 %v8632_v0, %v10319_v11 }
 0x20f   : > { %6488 = vmatprep.mubr.msk.f32.mxu0 %vm3394_vm8, %v10423_v48  ;;  %v3137_v12 = vxor.u32 %v2881_v61, %v2625_v37  ;;  %v2371_v63 = vxor.u32 %v2115_v60, %v1859_v5  ;;  %v1890_v14 = vmul.u32 2246822507, %v1634_v22  ;;  %v10504_v20 = vadd.f32 %v550_v4, %v550_v4  ;;  %v4425_v61 = vld [vmem:[%s12567_s2 + $0xac0] sm:$0xff] }
 0x210   : > { %v2884_v21 = vshrl.u32 %v2628_v50, 16  ;;  %v1633_v9 = vxor.u32 %v1377_v19, %v1121_v62  ;;  %v1124_v7 = vxor.u32 %v8174_v44, %v866_v51  ;;  %v7845_v32 = vpack.c.bf16 %v4408_v33, %v4407_v1  ;;  %v326_v51 = vld [vmem:[%s8346_s6 + $0x498] sm:$0xff] }
 0x211   : > { %vm3393_vm9 = vcmp.lt.s32.totalorder %v3137_v12, 0  ;;  %v2627_v48 = vmul.u32 3266489909, %v2371_v63  ;;  %v2146_v49 = vshrl.u32 %v1890_v14, 13  ;;  %v549_v24 = vmax.f32 %v293_v41, 0.0 }
 0x212   : > { %6489 = vmatmul.mubr.msk.f32.gmra.mrb[68].mxu0 %vm3393_vm9, %v10447_v54  ;;  %v3140_v6 = vxor.u32 %v2884_v21, %v2628_v50  ;;  %v1889_v26 = vmul.u32 2246822507, %v1633_v9  ;;  %v1380_v39 = vshrl.u32 %v1124_v7, 16  ;;  %v865_v2 = vadd.s32 %v8632_v0, %v10337_v23  ;;  %v4440_v54 = vld [vmem:[%s12567_s2 + $0xb38] sm:$0xff] }
 0x213   : > { %v2883_v53 = vshrl.u32 %v2627_v48, 16  ;;  %v2402_v35 = vxor.u32 %v2146_v49, %v1890_v14  ;;  %7846 = vmatpush3.bf16.msra.mxu0 %v7845_v32  ;;  %v10517_v42 = vadd.f32 %v549_v24, %v549_v24  ;;  %v7875_v3 = vpack.c.bf16 %v4456_v10, %v4455_v52  ;;  %v4410_v52 = vld [vmem:[%s12567_s2 + $0xa48] sm:$0xff] }
 0x214   : > { %vm3396_vm10 = vcmp.lt.s32.totalorder %v3140_v6, 0  ;;  %v2145_v17 = vshrl.u32 %v1889_v26, 13  ;;  %v1636_v34 = vxor.u32 %v1380_v39, %v1124_v7  ;;  %v1123_v36 = vxor.u32 %v8174_v44, %v865_v2  ;;  %v325_v2 = vld [vmem:[%s8346_s6 + $0x490] sm:$0xff] }
 0x215   : > { %6504 = vmatprep.mubr.msk.f32.mxu1 %vm3396_vm10, %v10460_v40  ;;  %v3139_v16 = vxor.u32 %v2883_v53, %v2627_v48  ;;  %v2658_v55 = vmul.u32 3266489909, %v2402_v35  ;;  %7876 = vmatprep.subr.bf16.mxu1 %v7875_v3  ;;  %v580_v37 = vmax.f32 %v324_v46, 0.0  ;;  %v896_v5 = vadd.s32 %v8697_v47, %v10284_v59  ;;  %v4426_v40 = vld [vmem:[%s12567_s2 + $0xac8] sm:$0xff] }
 0x216   : > { %v2401_v25 = vxor.u32 %v2145_v17, %v1889_v26  ;;  %v1892_v58 = vmul.u32 2246822507, %v1636_v34  ;;  %v1379_v62 = vshrl.u32 %v1123_v36, 16  ;;  %v7877_v18 = vpack.c.bf16 %v4440_v54, %v4439_v45  ;;  %v4457_v45 = vld [vmem:[%s12567_s2 + $0xbc0] sm:$0xff] }
 0x217   : > { %vm3395_vm11 = vcmp.lt.s32.totalorder %v3139_v16, 0  ;;  %v2914_v60 = vshrl.u32 %v2658_v55, 16  ;;  %v1154_v22 = vxor.u32 %v8174_v44, %v896_v5  ;;  %v10537_v4 = vadd.f32 %v580_v37, %v580_v37  ;;  %v356_v5 = vld [vmem:[%s8346_s6 + $0x588] sm:$0xff] }
 0x218   : > { %6505 = vmatmul.mubr.msk.f32.gmra.mrb[68].mxu1 %vm3395_vm11, %v10472_v13  ;;  %v2657_v1 = vmul.u32 3266489909, %v2401_v25  ;;  %v2148_v33 = vshrl.u32 %v1892_v58, 13  ;;  %v1635_v50 = vxor.u32 %v1379_v62, %v1123_v36  ;;  %v579_v19 = vmax.f32 %v323_v31, 0.0  ;;  %v4409_v13 = vld [vmem:[%s12567_s2 + $0xa40] sm:$0xff] }
 0x219   : > { %v3170_v41 = vxor.u32 %v2914_v60, %v2658_v55  ;;  %v1410_v12 = vshrl.u32 %v1154_v22, 16  ;;  %7878 = vmatpush3.bf16.msra.mxu1 %v7877_v18  ;;  %v895_v63 = vadd.s32 %v8697_v47, %v10301_v56  ;;  %v7847_v14 = vpack.c.bf16 %v4426_v40, %v4425_v61 }
 0x21a   : > { %v2913_v21 = vshrl.u32 %v2657_v1, 16  ;;  %v2404_v9 = vxor.u32 %v2148_v33, %v1892_v58  ;;  %v1891_v7 = vmul.u32 2246822507, %v1635_v50  ;;  %v10543_v32 = vadd.f32 %v579_v19, %v579_v19 }
 0x21b   : > { %vm3426_vm12 = vcmp.lt.s32.totalorder %v3170_v41, 0  ;;  %v1666_v10 = vxor.u32 %v1410_v12, %v1154_v22  ;;  %v1153_v48 = vxor.u32 %v8174_v44, %v895_v63  ;;  %7848 = vmatprep.subr.bf16.mxu0 %v7847_v14  ;;  %v582_v49 = vmax.f32 %v326_v51, 0.0  ;;  %v4442_v22 = vld [vmem:[%s12567_s2 + $0xb48] sm:$0xff]  ;;  %v355_v63 = vld [vmem:[%s8346_s6 + $0x580] sm:$0xff] }
 0x21c   : > { %6490 = vmatprep.mubr.msk.f32.mxu0 %vm3426_vm12, %v10478_v43  ;;  %v3169_v24 = vxor.u32 %v2913_v21, %v2657_v1  ;;  %v2660_v6 = vmul.u32 3266489909, %v2404_v9  ;;  %v2147_v26 = vshrl.u32 %v1891_v7, 13  ;;  %v898_v39 = vadd.s32 %v8697_v47, %v10319_v11  ;;  %v4458_v43 = vld [vmem:[%s12567_s2 + $0xbc8] sm:$0xff] }
 0x21d   : > { %v1922_v46 = vmul.u32 2246822507, %v1666_v10  ;;  %v1409_v53 = vshrl.u32 %v1153_v48, 16  ;;  %v10556_v35 = vadd.f32 %v582_v49, %v582_v49  ;;  %v7849_v3 = vpack.c.bf16 %v4410_v52, %v4409_v13  ;;  %v4428_v49 = vld [vmem:[%s12567_s2 + $0xad8] sm:$0xff] }
 0x21e   : > { %vm3425_vm13 = vcmp.lt.s32.totalorder %v3169_v24, 0  ;;  %v2916_v54 = vshrl.u32 %v2660_v6, 16  ;;  %v2403_v17 = vxor.u32 %v2147_v26, %v1891_v7  ;;  %v1156_v34 = vxor.u32 %v8174_v44, %v898_v39 }
 0x21f   : > { %6491 = vmatmul.mubr.msk.f32.gmra.mrb[70].mxu0 %vm3425_vm13, %v10491_v30  ;;  %v2178_v36 = vshrl.u32 %v1922_v46, 13  ;;  %v1665_v16 = vxor.u32 %v1409_v53, %v1153_v48  ;;  %v581_v55 = vmax.f32 %v325_v2, 0.0  ;;  %v897_v37 = vadd.s32 %v8697_v47, %v10337_v23  ;;  %v4441_v30 = vld [vmem:[%s12567_s2 + $0xb40] sm:$0xff] }
 0x220   : > { %v3172_v31 = vxor.u32 %v2916_v54, %v2660_v6  ;;  %v2659_v25 = vmul.u32 3266489909, %v2403_v17  ;;  %v1412_v58 = vshrl.u32 %v1156_v34, 16  ;;  %7850 = vmatpush3.bf16.msra.mxu0 %v7849_v3  ;;  %v7879_v62 = vpack.c.bf16 %v4458_v43, %v4457_v45  ;;  %v358_v3 = vld [vmem:[%s8346_s6 + $0x598] sm:$0xff] }
 0x221   : > { %v2434_v18 = vxor.u32 %v2178_v36, %v1922_v46  ;;  %v1921_v61 = vmul.u32 2246822507, %v1665_v16  ;;  %v1155_v40 = vxor.u32 %v8174_v44, %v897_v37  ;;  %v10570_v60 = vadd.f32 %v581_v55, %v581_v55 }
 0x222   : > { %vm3428_vm14 = vcmp.lt.s32.totalorder %v3172_v31, 0  ;;  %v2915_v1 = vshrl.u32 %v2659_v25, 16  ;;  %v1668_v33 = vxor.u32 %v1412_v58, %v1156_v34  ;;  %7880 = vmatprep.subr.bf16.mxu1 %v7879_v62  ;;  %v612_v50 = vmax.f32 %v356_v5, 0.0  ;;  %v4411_v34 = vld [vmem:[%s12567_s2 + $0xa50] sm:$0xff] }
 0x223   : > { %6506 = vmatprep.mubr.msk.f32.mxu1 %vm3428_vm14, %v10504_v20  ;;  %v2690_v19 = vmul.u32 3266489909, %v2434_v18  ;;  %v2177_v51 = vshrl.u32 %v1921_v61, 13  ;;  %v1411_v41 = vshrl.u32 %v1155_v40, 16  ;;  %v928_v12 = vadd.s32 %v8753_v57, %v10284_v59  ;;  %v4427_v20 = vld [vmem:[%s12567_s2 + $0xad0] sm:$0xff] }
 0x224   : > { %v3171_v14 = vxor.u32 %v2915_v1, %v2659_v25  ;;  %v1924_v21 = vmul.u32 2246822507, %v1668_v33  ;;  %v10582_v9 = vadd.f32 %v612_v50, %v612_v50  ;;  %v7881_v7 = vpack.c.bf16 %v4442_v22, %v4441_v30  ;;  %v357_v58 = vld [vmem:[%s8346_s6 + $0x590] sm:$0xff]  ;;  %v4460_v50 = vld [vmem:[%s12567_s2 + $0xbd8] sm:$0xff] }
 0x225   : > { %v2946_v13 = vshrl.u32 %v2690_v19, 16  ;;  %v2433_v52 = vxor.u32 %v2177_v51, %v1921_v61  ;;  %v1667_v10 = vxor.u32 %v1411_v41, %v1155_v40  ;;  %v1186_v48 = vxor.u32 %v8174_v44, %v928_v12 }
 0x226   : > { %vm3427_vm15 = vcmp.lt.s32.totalorder %v3171_v14, 0  ;;  %v2180_v24 = vshrl.u32 %v1924_v21, 13  ;;  %7882 = vmatpush3.bf16.msra.mxu1 %v7881_v7  ;;  %v611_v6 = vmax.f32 %v355_v63, 0.0  ;;  %v927_v26 = vadd.s32 %v8753_v57, %v10301_v56  ;;  %v388_v7 = vld [vmem:[%s8346_s6 + $0x688] sm:$0xff] }
 0x227   : > { %6507 = vmatmul.mubr.msk.f32.gmra.mrb[70].mxu1 %vm3427_vm15, %v10517_v42  ;;  %v3202_v39 = vxor.u32 %v2946_v13, %v2690_v19  ;;  %v2689_v2 = vmul.u32 3266489909, %v2433_v52  ;;  %v1923_v46 = vmul.u32 2246822507, %v1667_v10  ;;  %v1442_v53 = vshrl.u32 %v1186_v48, 16  ;;  %v4412_v42 = vld [vmem:[%s12567_s2 + $0xa58] sm:$0xff] }
 0x228   : > { %v2436_v45 = vxor.u32 %v2180_v24, %v1924_v21  ;;  %v1185_v43 = vxor.u32 %v8174_v44, %v927_v26  ;;  %v10596_v54 = vadd.f32 %v611_v6, %v611_v6  ;;  %v7851_v17 = vpack.c.bf16 %v4428_v49, %v4427_v20  ;;  %v4443_v20 = vld [vmem:[%s12567_s2 + $0xb50] sm:$0xff] }
 0x229   : > { %vm3458_vm0 = vcmp.lt.s32.totalorder %v3202_v39, 0  ;;  %v2945_v36 = vshrl.u32 %v2689_v2, 16  ;;  %v2179_v16 = vshrl.u32 %v1923_v46, 13  ;;  %v1698_v55 = vxor.u32 %v1442_v53, %v1186_v48  ;;  %v387_v53 = vld [vmem:[%s8346_s6 + $0x680] sm:$0xff] }
 0x22a   : > { %6492 = vmatprep.mubr.msk.f32.mxu0 %vm3458_vm0, %v10537_v4  ;;  %v2692_v37 = vmul.u32 3266489909, %v2436_v45  ;;  %v1441_v5 = vshrl.u32 %v1185_v43, 16  ;;  %7852 = vmatprep.subr.bf16.mxu0 %v7851_v17  ;;  %v614_v31 = vmax.f32 %v358_v3, 0.0  ;;  %v930_v25 = vadd.s32 %v8753_v57, %v10319_v11  ;;  %v4459_v4 = vld [vmem:[%s12567_s2 + $0xbd0] sm:$0xff] }
 0x22b   : > { %v3201_v62 = vxor.u32 %v2945_v36, %v2689_v2  ;;  %v2435_v18 = vxor.u32 %v2179_v16, %v1923_v46  ;;  %v1954_v61 = vmul.u32 2246822507, %v1698_v55  ;;  %v7853_v40 = vpack.c.bf16 %v4412_v42, %v4411_v34  ;;  %v4429_v34 = vld [vmem:[%s12567_s2 + $0xae0] sm:$0xff] }
 0x22c   : > { %v2948_v30 = vshrl.u32 %v2692_v37, 16  ;;  %v1697_v22 = vxor.u32 %v1441_v5, %v1185_v43  ;;  %v1188_v1 = vxor.u32 %v8174_v44, %v930_v25  ;;  %v10609_v33 = vadd.f32 %v614_v31, %v614_v31  ;;  %v390_v25 = vld [vmem:[%s8346_s6 + $0x698] sm:$0xff] }
 0x22d   : > { %vm3457_vm1 = vcmp.lt.s32.totalorder %v3201_v62, 0  ;;  %v2691_v19 = vmul.u32 3266489909, %v2435_v18  ;;  %v2210_v51 = vshrl.u32 %v1954_v61, 13  ;;  %7854 = vmatpush3.bf16.msra.mxu0 %v7853_v40  ;;  %v613_v41 = vmax.f32 %v357_v58, 0.0 }
 0x22e   : > { %6493 = vmatmul.mubr.msk.f32.gmra.mrb[72].mxu0 %vm3457_vm1, %v10543_v32  ;;  %v3204_v12 = vxor.u32 %v2948_v30, %v2692_v37  ;;  %v1953_v63 = vmul.u32 2246822507, %v1697_v22  ;;  %v1444_v14 = vshrl.u32 %v1188_v1, 16  ;;  %v929_v21 = vadd.s32 %v8753_v57, %v10337_v23  ;;  %v4444_v32 = vld [vmem:[%s12567_s2 + $0xb58] sm:$0xff] }
 0x22f   : > { %v2947_v13 = vshrl.u32 %v2691_v19, 16  ;;  %v2466_v52 = vxor.u32 %v2210_v51, %v1954_v61  ;;  %v10621_v10 = vadd.f32 %v613_v41, %v613_v41  ;;  %v7883_v48 = vpack.c.bf16 %v4460_v50, %v4459_v4  ;;  %v4414_v4 = vld [vmem:[%s12567_s2 + $0xa68] sm:$0xff] }
 0x230   : > { %vm3460_vm2 = vcmp.lt.s32.totalorder %v3204_v12, 0  ;;  %v2209_v49 = vshrl.u32 %v1953_v63, 13  ;;  %v1700_v24 = vxor.u32 %v1444_v14, %v1188_v1  ;;  %v1187_v6 = vxor.u32 %v8174_v44, %v929_v21  ;;  %v389_v21 = vld [vmem:[%s8346_s6 + $0x690] sm:$0xff] }
 0x231   : > { %6508 = vmatprep.mubr.msk.f32.mxu1 %vm3460_vm2, %v10556_v35  ;;  %v3203_v26 = vxor.u32 %v2947_v13, %v2691_v19  ;;  %v2722_v39 = vmul.u32 3266489909, %v2466_v52  ;;  %7884 = vmatprep.subr.bf16.mxu1 %v7883_v48  ;;  %v644_v2 = vmax.f32 %v388_v7, 0.0  ;;  %v960_v46 = vadd.s32 %v8817_v27, %v10284_v59  ;;  %v4430_v35 = vld [vmem:[%s12567_s2 + $0xae8] sm:$0xff] }
 0x232   : > { %v2465_v3 = vxor.u32 %v2209_v49, %v1953_v63  ;;  %v1956_v45 = vmul.u32 2246822507, %v1700_v24  ;;  %v1443_v43 = vshrl.u32 %v1187_v6, 16  ;;  %v7885_v17 = vpack.c.bf16 %v4444_v32, %v4443_v20  ;;  %v4461_v20 = vld [vmem:[%s12567_s2 + $0xbe0] sm:$0xff] }
 0x233   : > { %vm3459_vm3 = vcmp.lt.s32.totalorder %v3203_v26, 0  ;;  %v2978_v42 = vshrl.u32 %v2722_v39, 16  ;;  %v1218_v36 = vxor.u32 %v8174_v44, %v960_v46  ;;  %v10641_v16 = vadd.f32 %v644_v2, %v644_v2  ;;  %v420_v46 = vld [vmem:[%s8346_s6 + $0x788] sm:$0xff] }
 0x234   : > { %6509 = vmatmul.mubr.msk.f32.gmra.mrb[72].mxu1 %vm3459_vm3, %v10570_v60  ;;  %v2721_v55 = vmul.u32 3266489909, %v2465_v3  ;;  %v2212_v37 = vshrl.u32 %v1956_v45, 13  ;;  %v1699_v5 = vxor.u32 %v1443_v43, %v1187_v6  ;;  %v643_v31 = vmax.f32 %v387_v53, 0.0  ;;  %v4413_v60 = vld [vmem:[%s12567_s2 + $0xa60] sm:$0xff] }
 0x235   : > { %v3234_v58 = vxor.u32 %v2978_v42, %v2722_v39  ;;  %v1474_v62 = vshrl.u32 %v1218_v36, 16  ;;  %7886 = vmatpush3.bf16.msra.mxu1 %v7885_v17  ;;  %v959_v18 = vadd.s32 %v8817_v27, %v10301_v56  ;;  %v7855_v61 = vpack.c.bf16 %v4430_v35, %v4429_v34 }
 0x236   : > { %v2977_v40 = vshrl.u32 %v2721_v55, 16  ;;  %v2468_v30 = vxor.u32 %v2212_v37, %v1956_v45  ;;  %v1955_v22 = vmul.u32 2246822507, %v1699_v5  ;;  %v10647_v1 = vadd.f32 %v643_v31, %v643_v31 }
 0x237   : > { %vm3490_vm4 = vcmp.lt.s32.totalorder %v3234_v58, 0  ;;  %v1730_v50 = vxor.u32 %v1474_v62, %v1218_v36  ;;  %v1217_v19 = vxor.u32 %v8174_v44, %v959_v18  ;;  %7856 = vmatprep.subr.bf16.mxu0 %v7855_v61  ;;  %v646_v51 = vmax.f32 %v390_v25, 0.0  ;;  %v4446_v36 = vld [vmem:[%s12567_s2 + $0xb68] sm:$0xff]  ;;  %v419_v18 = vld [vmem:[%s8346_s6 + $0x780] sm:$0xff] }
 0x238   : > { %6494 = vmatprep.mubr.msk.f32.mxu0 %vm3490_vm4, %v10582_v9  ;;  %v3233_v41 = vxor.u32 %v2977_v40, %v2721_v55  ;;  %v2724_v12 = vmul.u32 3266489909, %v2468_v30  ;;  %v2211_v63 = vshrl.u32 %v1955_v22, 13  ;;  %v962_v14 = vadd.s32 %v8817_v27, %v10319_v11  ;;  %v4462_v9 = vld [vmem:[%s12567_s2 + $0xbe8] sm:$0xff] }
 0x239   : > { %v1986_v7 = vmul.u32 2246822507, %v1730_v50  ;;  %v1473_v13 = vshrl.u32 %v1217_v19, 16  ;;  %v10660_v52 = vadd.f32 %v646_v51, %v646_v51  ;;  %v7857_v48 = vpack.c.bf16 %v4414_v4, %v4413_v60 }
 0x23a   : > { %vm3489_vm5 = vcmp.lt.s32.totalorder %v3233_v41, 0  ;;  %v2980_v32 = vshrl.u32 %v2724_v12, 16  ;;  %v2467_v49 = vxor.u32 %v2211_v63, %v1955_v22  ;;  %v1220_v24 = vxor.u32 %v8174_v44, %v962_v14 }
 0x23b   : > { %6495 = vmatmul.mubr.msk.f32.gmra.mrb[74].mxu0 %vm3489_vm5, %v10596_v54  ;;  %v2242_v6 = vshrl.u32 %v1986_v7, 13  ;;  %v1729_v26 = vxor.u32 %v1473_v13, %v1217_v19  ;;  %v645_v39 = vmax.f32 %v389_v21, 0.0  ;;  %v961_v2 = vadd.s32 %v8817_v27, %v10337_v23  ;;  %v4445_v54 = vld [vmem:[%s12567_s2 + $0xb60] sm:$0xff]  ;;  %v422_v13 = vld [vmem:[%s8346_s6 + $0x798] sm:$0xff] }
 0x23c   : > { %v3236_v53 = vxor.u32 %v2980_v32, %v2724_v12  ;;  %v2723_v3 = vmul.u32 3266489909, %v2467_v49  ;;  %v1476_v45 = vshrl.u32 %v1220_v24, 16  ;;  %7858 = vmatpush3.bf16.msra.mxu0 %v7857_v48  ;;  %v7887_v43 = vpack.c.bf16 %v4462_v9, %v4461_v20  ;;  %v4415_v49 = vld [vmem:[%s12567_s2 + $0xa70] sm:$0xff] }
 0x23d   : > { %v2498_v17 = vxor.u32 %v2242_v6, %v1986_v7  ;;  %v1985_v34 = vmul.u32 2246822507, %v1729_v26  ;;  %v1219_v35 = vxor.u32 %v8174_v44, %v961_v2  ;;  %v10674_v42 = vadd.f32 %v645_v39, %v645_v39 }
 0x23e   : > { %vm3492_vm6 = vcmp.lt.s32.totalorder %v3236_v53, 0  ;;  %v2979_v55 = vshrl.u32 %v2723_v3, 16  ;;  %v1732_v37 = vxor.u32 %v1476_v45, %v1220_v24  ;;  %7888 = vmatprep.subr.bf16.mxu1 %v7887_v43  ;;  %v676_v5 = vmax.f32 %v420_v46, 0.0  ;;  %v421_v53 = vld [vmem:[%s8346_s6 + $0x790] sm:$0xff] }
 0x23f   : > { %6510 = vmatprep.mubr.msk.f32.mxu1 %vm3492_vm6, %v10609_v33  ;;  %v2754_v31 = vmul.u32 3266489909, %v2498_v17  ;;  %v2241_v25 = vshrl.u32 %v1985_v34, 13  ;;  %v1475_v58 = vshrl.u32 %v1219_v35, 16  ;;  %v992_v62 = vadd.s32 %v8872_v8, %v10284_v59  ;;  %v4431_v33 = vld [vmem:[%s12567_s2 + $0xaf0] sm:$0xff]  ;;  %v4432_v59 = vld [vmem:[%s12567_s2 + $0xaf8] sm:$0xff] }
 0x240   : > { %v3235_v61 = vxor.u32 %v2979_v55, %v2723_v3  ;;  %v1988_v40 = vmul.u32 2246822507, %v1732_v37  ;;  %v10686_v30 = vadd.f32 %v676_v5, %v676_v5  ;;  %v7889_v22 = vpack.c.bf16 %v4446_v36, %v4445_v54 }
 0x241   : > { %v3010_v60 = vshrl.u32 %v2754_v31, 16  ;;  %v2497_v4 = vxor.u32 %v2241_v25, %v1985_v34  ;;  %v1731_v50 = vxor.u32 %v1475_v58, %v1219_v35  ;;  %v1250_v19 = vxor.u32 %v8174_v44, %v992_v62 }
 0x242   : > { %vm3491_vm7 = vcmp.lt.s32.totalorder %v3235_v61, 0  ;;  %v2244_v51 = vshrl.u32 %v1988_v40, 13  ;;  %7890 = vmatpush3.bf16.msra.mxu1 %v7889_v22  ;;  %v675_v41 = vmax.f32 %v419_v18, 0.0  ;;  %v991_v12 = vadd.s32 %v8872_v8, %v10301_v56  ;;  %v4416_v56 = vld [vmem:[%s12567_s2 + $0xa78] sm:$0xff]  ;;  %v200_v18 = vld [vmem:[%s8346_s6 + $0xa8] sm:$0xff] }
 0x243   : > { %6511 = vmatmul.mubr.msk.f32.gmra.mrb[74].mxu1 %vm3491_vm7, %v10621_v10  ;;  %v3266_v63 = vxor.u32 %v3010_v60, %v2754_v31  ;;  %v2753_v14 = vmul.u32 3266489909, %v2497_v4  ;;  %v1987_v21 = vmul.u32 2246822507, %v1731_v50  ;;  %v1506_v7 = vshrl.u32 %v1250_v19, 16  ;;  %v4447_v4 = vld [vmem:[%s12567_s2 + $0xb70] sm:$0xff] }
 0x244   : > { %v2500_v48 = vxor.u32 %v2244_v51, %v1988_v40  ;;  %v1249_v20 = vxor.u32 %v8174_v44, %v991_v12  ;;  %v10700_v9 = vadd.f32 %v675_v41, %v675_v41  ;;  %v7859_v32 = vpack.c.bf16 %v4432_v59, %v4431_v33  ;;  %v199_v12 = vld [vmem:[%s8346_s6 + $0xa0] sm:$0xff] }
 0x245   : > { %vm3522_vm8 = vcmp.lt.s32.totalorder %v3266_v63, 0  ;;  %v3009_v10 = vshrl.u32 %v2753_v14, 16  ;;  %v2243_v24 = vshrl.u32 %v1987_v21, 13  ;;  %v1762_v6 = vxor.u32 %v1506_v7, %v1250_v19 }
 0x246   : > { %6496 = vmatprep.mubr.msk.f32.mxu0 %vm3522_vm8, %v10641_v16  ;;  %v2756_v26 = vmul.u32 3266489909, %v2500_v48  ;;  %v1505_v39 = vshrl.u32 %v1249_v20, 16  ;;  %7860 = vmatprep.subr.bf16.mxu0 %v7859_v32  ;;  %v678_v2 = vmax.f32 %v422_v13, 0.0  ;;  %v994_v46 = vadd.s32 %v8872_v8, %v10319_v11  ;;  %v4463_v16 = vld [vmem:[%s12567_s2 + $0xbf0] sm:$0xff]  ;;  %v4464_v11 = vld [vmem:[%s12567_s2 + $0xbf8] sm:$0xff] }
 0x247   : > { %v3265_v3 = vxor.u32 %v3009_v10, %v2753_v14  ;;  %v2499_v45 = vxor.u32 %v2243_v24, %v1987_v21  ;;  %v2018_v43 = vmul.u32 2246822507, %v1762_v6  ;;  %v7861_v17 = vpack.c.bf16 %v4416_v56, %v4415_v49  ;;  %v4481_v13 = vld [vmem:[%s12567_s2 + $0xc80] sm:$0xff]  ;;  %v202_v6 = vld [vmem:[%s8346_s6 + $0xb8] sm:$0xff] }
 0x248   : > { %v3012_v34 = vshrl.u32 %v2756_v26, 16  ;;  %v1761_v35 = vxor.u32 %v1505_v39, %v1249_v20  ;;  %v1252_v54 = vxor.u32 %v8174_v44, %v994_v46  ;;  %v10713_v36 = vadd.f32 %v678_v2, %v678_v2 }
 0x249   : > { %vm3521_vm9 = vcmp.lt.s32.totalorder %v3265_v3, 0  ;;  %v2755_v55 = vmul.u32 3266489909, %v2499_v45  ;;  %v2274_v37 = vshrl.u32 %v2018_v43, 13  ;;  %7862 = vmatpush3.bf16.msra.mxu0 %v7861_v17  ;;  %v677_v5 = vmax.f32 %v421_v53, 0.0  ;;  %v10765_v17 = vld [vmem:[%s12567_s2 + $0xc08] sm:$0xff] }
 0x24a   : > { %6497 = vmatmul.mubr.msk.f32.gmra.mrb[76].mxu0 %vm3521_vm9, %v10647_v1  ;;  %v3268_v31 = vxor.u32 %v3012_v34, %v2756_v26  ;;  %v2017_v25 = vmul.u32 2246822507, %v1761_v35  ;;  %v1508_v58 = vshrl.u32 %v1252_v54, 16  ;;  %v993_v62 = vadd.s32 %v8872_v8, %v10337_v23  ;;  %v4448_v1 = vld [vmem:[%s12567_s2 + $0xb78] sm:$0xff] }
 0x24b   : > { %v3011_v61 = vshrl.u32 %v2755_v55, 16  ;;  %v2530_v40 = vxor.u32 %v2274_v37, %v2018_v43  ;;  %v10725_v22 = vadd.f32 %v677_v5, %v677_v5  ;;  %v7891_v60 = vpack.c.bf16 %v4464_v11, %v4463_v16  ;;  %v201_v5 = vld [vmem:[%s8346_s6 + $0xb0] sm:$0xff] }
 0x24c   : > { %vm3524_vm10 = vcmp.lt.s32.totalorder %v3268_v31, 0  ;;  %v2273_v50 = vshrl.u32 %v2017_v25, 13  ;;  %v1764_v19 = vxor.u32 %v1508_v58, %v1252_v54  ;;  %v1251_v23 = vxor.u32 %v8174_v44, %v993_v62 }
 0x24d   : > { %6512 = vmatprep.mubr.msk.f32.mxu1 %vm3524_vm10, %v10660_v52  ;;  %v3267_v33 = vxor.u32 %v3011_v61, %v2755_v55  ;;  %v2786_v59 = vmul.u32 3266489909, %v2530_v40  ;;  %7892 = vmatprep.subr.bf16.mxu1 %v7891_v60  ;;  %v456_v51 = vmax.f32 %v200_v18, 0.0  ;;  %v10736_v41 = vadd.s32 2688, %v8109_v15  ;;  %v4482_v52 = vld [vmem:[%s12567_s2 + $0xc88] sm:$0xff] }
 0x24e   : > { %v2529_v63 = vxor.u32 %v2273_v50, %v2017_v25  ;;  %v2020_v14 = vmul.u32 2246822507, %v1764_v19  ;;  %v1507_v21 = vshrl.u32 %v1251_v23, 16  ;;  %v7893_v7 = vpack.c.bf16 %v4448_v1, %v4447_v4  ;;  %v4514_v18 = vld [vmem:[%s12567_s2 + $0xd88] sm:$0xff] }
 0x24f   : > { %vm3523_vm11 = vcmp.lt.s32.totalorder %v3267_v33, 0  ;;  %v3042_v48 = vshrl.u32 %v2786_v59, 16  ;;  %v772_v20 = vadd.s32 %v8161_v38, %v10736_v41  ;;  %v10747_v32 = vadd.f32 %v456_v51, %v456_v51 }
 0x250   : > { %6513 = vmatmul.mubr.msk.f32.gmra.mrb[76].mxu1 %vm3523_vm11, %v10674_v42  ;;  %v2785_v49 = vmul.u32 3266489909, %v2529_v63  ;;  %v2276_v56 = vshrl.u32 %v2020_v14, 13  ;;  %v1763_v10 = vxor.u32 %v1507_v21, %v1251_v23  ;;  %v455_v24 = vmax.f32 %v199_v12, 0.0  ;;  %v10760_v42 = vld [vmem:[%s12567_s2 + $0xc00] sm:$0xff]  ;;  %v232_v23 = vld [vmem:[%s8346_s6 + $0x1a8] sm:$0xff] }
 0x251   : > { %v3298_v26 = vxor.u32 %v3042_v48, %v2786_v59  ;;  %v1030_v39 = vxor.u32 %v8174_v44, %v772_v20  ;;  %7894 = vmatpush3.bf16.msra.mxu1 %v7893_v7  ;;  %v10753_v2 = vadd.s32 2560, %v8109_v15  ;;  %v7895_v46 = vpack.c.bf16 %v4482_v52, %v4481_v13  ;;  %v10805_v13 = vld [vmem:[%s12567_s2 + $0xd08] sm:$0xff] }
 0x252   : > { %v3041_v53 = vshrl.u32 %v2785_v49, 16  ;;  %v2532_v3 = vxor.u32 %v2276_v56, %v2020_v14  ;;  %v2019_v45 = vmul.u32 2246822507, %v1763_v10  ;;  %v10755_v43 = vadd.f32 %v455_v24, %v455_v24 }
 0x253   : > { %vm3554_vm12 = vcmp.lt.s32.totalorder %v3298_v26, 0  ;;  %v1286_v34 = vshrl.u32 %v1030_v39, 16  ;;  %v771_v35 = vadd.s32 %v8161_v38, %v10753_v2  ;;  %7896 = vmatprep.subr.bf16.mxu0 %v7895_v46  ;;  %v458_v54 = vmax.f32 %v202_v6, 0.0  ;;  %v231_v6 = vld [vmem:[%s8346_s6 + $0x1a0] sm:$0xff] }
 0x254   : > { %6498 = vmatprep.mubr.msk.f32.mxu0 %vm3554_vm12, %v10686_v30  ;;  %v3297_v16 = vxor.u32 %v3041_v53, %v2785_v49  ;;  %v2788_v11 = vmul.u32 3266489909, %v2532_v3  ;;  %v2275_v55 = vshrl.u32 %v2019_v45, 13  ;;  %v10771_v37 = vadd.s32 2944, %v8109_v15  ;;  %v4513_v30 = vld [vmem:[%s12567_s2 + $0xd80] sm:$0xff] }
 0x255   : > { %v1542_v31 = vxor.u32 %v1286_v34, %v1030_v39  ;;  %v1029_v25 = vxor.u32 %v8174_v44, %v771_v35  ;;  %v10775_v58 = vadd.f32 %v458_v54, %v458_v54  ;;  %v7897_v62 = vpack.c.bf16 %v10765_v17, %v10760_v42  ;;  %v10820_v35 = vld [vmem:[%s12567_s2 + $0xc90] sm:$0xff]  ;;  %v10825_v54 = vld [vmem:[%s12567_s2 + $0xc98] sm:$0xff] }
 0x256   : > { %vm3553_vm13 = vcmp.lt.s32.totalorder %v3297_v16, 0  ;;  %v3044_v61 = vshrl.u32 %v2788_v11, 16  ;;  %v2531_v40 = vxor.u32 %v2275_v55, %v2019_v45  ;;  %v774_v60 = vadd.s32 %v8161_v38, %v10771_v37 }
 0x257   : > { %6499 = vmatmul.mubr.msk.f32.gmra.mrb[78].mxu0 %vm3553_vm13, %v10700_v9  ;;  %v1798_v4 = vmul.u32 2246822507, %v1542_v31  ;;  %v1285_v1 = vshrl.u32 %v1029_v25, 16  ;;  %v457_v50 = vmax.f32 %v201_v5, 0.0  ;;  %v10789_v19 = vadd.s32 2816, %v8109_v15  ;;  %v10800_v9 = vld [vmem:[%s12567_s2 + $0xd00] sm:$0xff] }
 0x258   : > { %v3300_v33 = vxor.u32 %v3044_v61, %v2788_v11  ;;  %v2787_v59 = vmul.u32 3266489909, %v2531_v40  ;;  %v1032_v51 = vxor.u32 %v8174_v44, %v774_v60  ;;  %v7927_v12 = vpack.c.bf16 %v4514_v18, %v4513_v30  ;;  %v234_v18 = vld [vmem:[%s8346_s6 + $0x1b8] sm:$0xff] }
 0x259   : > { %v2054_v63 = vshrl.u32 %v1798_v4, 13  ;;  %v1541_v14 = vxor.u32 %v1285_v1, %v1029_v25  ;;  %v773_v21 = vadd.s32 %v8161_v38, %v10789_v19  ;;  %v10795_v7 = vadd.f32 %v457_v50, %v457_v50 }
 0x25a   : > { %vm3556_vm14 = vcmp.lt.s32.totalorder %v3300_v33, 0  ;;  %v3043_v52 = vshrl.u32 %v2787_v59, 16  ;;  %v1288_v48 = vshrl.u32 %v1032_v51, 16  ;;  %7928 = vmatprep.subr.bf16.mxu1 %v7927_v12  ;;  %v488_v20 = vmax.f32 %v232_v23, 0.0 }
 0x25b   : > { %6514 = vmatprep.mubr.msk.f32.mxu1 %vm3556_vm14, %v10713_v36  ;;  %v2310_v49 = vxor.u32 %v2054_v63, %v1798_v4  ;;  %v1797_v56 = vmul.u32 2246822507, %v1541_v14  ;;  %v1031_v10 = vxor.u32 %v8174_v44, %v773_v21  ;;  %v804_v24 = vadd.s32 %v8269_v28, %v10736_v41  ;;  %v4467_v63 = vld [vmem:[%s12567_s2 + $0xc10] sm:$0xff]  ;;  %v4468_v14 = vld [vmem:[%s12567_s2 + $0xc18] sm:$0xff] }
 0x25c   : > { %v3299_v26 = vxor.u32 %v3043_v52, %v2787_v59  ;;  %v1544_v39 = vxor.u32 %v1288_v48, %v1032_v51  ;;  %v10812_v46 = vadd.f32 %v488_v20, %v488_v20  ;;  %v7929_v53 = vpack.c.bf16 %v10805_v13, %v10800_v9  ;;  %v233_v20 = vld [vmem:[%s8346_s6 + $0x1b0] sm:$0xff] }
 0x25d   : > { %v2566_v3 = vmul.u32 3266489909, %v2310_v49  ;;  %v2053_v45 = vshrl.u32 %v1797_v56, 13  ;;  %v1287_v34 = vshrl.u32 %v1031_v10, 16  ;;  %v1062_v36 = vxor.u32 %v8174_v44, %v804_v24 }
 0x25e   : > { %vm3555_vm15 = vcmp.lt.s32.totalorder %v3299_v26, 0  ;;  %v1800_v16 = vmul.u32 2246822507, %v1544_v39  ;;  %v487_v11 = vmax.f32 %v231_v6, 0.0  ;;  %v803_v55 = vadd.s32 %v8269_v28, %v10753_v2 }
 0x25f   : > { %6515 = vmatmul.mubr.msk.f32.gmra.mrb[78].mxu1 %vm3555_vm15, %v10725_v22  ;;  %v2822_v5 = vshrl.u32 %v2566_v3, 16  ;;  %v2309_v31 = vxor.u32 %v2053_v45, %v1797_v56  ;;  %v1543_v25 = vxor.u32 %v1287_v34, %v1031_v10  ;;  %v1318_v30 = vshrl.u32 %v1062_v36, 16  ;;  %v4515_v45 = vld [vmem:[%s12567_s2 + $0xd90] sm:$0xff] }
 0x260   : > { %v2056_v61 = vshrl.u32 %v1800_v16, 13  ;;  %v1061_v40 = vxor.u32 %v8174_v44, %v803_v55  ;;  %v10832_v60 = vadd.f32 %v487_v11, %v487_v11  ;;  %v7899_v4 = vpack.c.bf16 %v10825_v54, %v10820_v35 }
 0x261   : > { %v3078_v1 = vxor.u32 %v2822_v5, %v2566_v3  ;;  %v2565_v50 = vmul.u32 3266489909, %v2309_v31  ;;  %v1799_v23 = vmul.u32 2246822507, %v1543_v25  ;;  %v1574_v33 = vxor.u32 %v1318_v30, %v1062_v36  ;;  %v264_v5 = vld [vmem:[%s8346_s6 + $0x2a8] sm:$0xff] }
 0x262   : > { %v2312_v59 = vxor.u32 %v2056_v61, %v1800_v16  ;;  %v1317_v22 = vshrl.u32 %v1061_v40, 16  ;;  %v490_v51 = vmax.f32 %v234_v18, 0.0  ;;  %v806_v12 = vadd.s32 %v8269_v28, %v10771_v37 }
 0x263   : > { %vm3334_vm0 = vcmp.lt.s32.totalorder %v3078_v1, 0  ;;  %v2821_v21 = vshrl.u32 %v2565_v50, 16  ;;  %v2055_v52 = vshrl.u32 %v1799_v23, 13  ;;  %v1830_v48 = vmul.u32 2246822507, %v1574_v33 }
 0x264   : > { %6516 = vmatprep.mubr.msk.f32.mxu0 %vm3334_vm0, %v10747_v32  ;;  %v2568_v49 = vmul.u32 3266489909, %v2312_v59  ;;  %v1573_v56 = vxor.u32 %v1317_v22, %v1061_v40  ;;  %v1064_v10 = vxor.u32 %v8174_v44, %v806_v12  ;;  %v10847_v24 = vadd.f32 %v490_v51, %v490_v51  ;;  %v4516_v32 = vld [vmem:[%s12567_s2 + $0xd98] sm:$0xff]  ;;  %v263_v12 = vld [vmem:[%s8346_s6 + $0x2a0] sm:$0xff] }
 0x265   : > { %v3077_v6 = vxor.u32 %v2821_v21, %v2565_v50  ;;  %v2311_v26 = vxor.u32 %v2055_v52, %v1799_v23  ;;  %v2086_v39 = vshrl.u32 %v1830_v48, 13  ;;  %v7901_v3 = vpack.c.bf16 %v4468_v14, %v4467_v63  ;;  %v4499_v23 = vld [vmem:[%s12567_s2 + $0xd10] sm:$0xff] }
 0x266   : > { %v2824_v34 = vshrl.u32 %v2568_v49, 16  ;;  %v1829_v36 = vmul.u32 2246822507, %v1573_v56  ;;  %v1320_v35 = vshrl.u32 %v1064_v10, 16  ;;  %v489_v54 = vmax.f32 %v233_v20, 0.0 }
 0x267   : > { %vm3333_vm1 = vcmp.lt.s32.totalorder %v3077_v6, 0  ;;  %v2567_v16 = vmul.u32 3266489909, %v2311_v26  ;;  %v2342_v11 = vxor.u32 %v2086_v39, %v1830_v48  ;;  %v805_v55 = vadd.s32 %v8269_v28, %v10789_v19  ;;  %v266_v39 = vld [vmem:[%s8346_s6 + $0x2b8] sm:$0xff] }
 0x268   : > { %6517 = vmatmul.mubr.msk.f32.vlgmr.msra.gmra.mrb[80].mxu0 %vm3333_vm1, %v10755_v43  ;;  %v3080_v31 = vxor.u32 %v2824_v34, %v2568_v49  ;;  %v2085_v25 = vshrl.u32 %v1829_v36, 13  ;;  %v1576_v30 = vxor.u32 %v1320_v35, %v1064_v10  ;;  %v10859_v18 = vadd.f32 %v489_v54, %v489_v54  ;;  %v4500_v43 = vld [vmem:[%s12567_s2 + $0xd18] sm:$0xff] }
 0x269   : > { %7898 = vmatpush3.bf16.msra.mxu0 %v7897_v62  ;;  %v2823_v61 = vshrl.u32 %v2567_v16, 16  ;;  %v2598_v40 = vmul.u32 3266489909, %v2342_v11  ;;  %v1063_v1 = vxor.u32 %v8174_v44, %v805_v55  ;;  %v7931_v50 = vpack.c.bf16 %v4516_v32, %v4515_v45  ;;  %v265_v55 = vld [vmem:[%s8346_s6 + $0x2b0] sm:$0xff] }
 0x26a   : > { %vm3336_vm2 = vcmp.lt.s32.totalorder %v3080_v31, 0  ;;  %v2341_v33 = vxor.u32 %v2085_v25, %v1829_v36  ;;  %7900 = vmatprep.subr.bf16.mxu0 %v7899_v4  ;;  %v1832_v59 = vmul.u32 2246822507, %v1576_v30  ;;  %v520_v42 = vmax.f32 %v264_v5, 0.0  ;;  %v4485_v4 = vld [vmem:[%s12567_s2 + $0xca0] sm:$0xff]  ;;  %v4470_v36 = vld [vmem:[%s12567_s2 + $0xc28] sm:$0xff] }
 0x26b   : > { %6532 = vmatprep.mubr.msk.f32.mxu1 %vm3336_vm2, %v10775_v58  ;;  %v3079_v17 = vxor.u32 %v2823_v61, %v2567_v16  ;;  %v2854_v62 = vshrl.u32 %v2598_v40, 16  ;;  %v1319_v22 = vshrl.u32 %v1063_v1, 16  ;;  %v836_v51 = vadd.s32 %v8592_v29, %v10736_v41  ;;  %v4486_v58 = vld [vmem:[%s12567_s2 + $0xca8] sm:$0xff]  ;;  %v4517_v25 = vld [vmem:[%s12567_s2 + $0xda0] sm:$0xff] }
 0x26c   : > { %v2597_v63 = vmul.u32 3266489909, %v2341_v33  ;;  %v2088_v14 = vshrl.u32 %v1832_v59, 13  ;;  %v10875_v21 = vadd.f32 %v520_v42, %v520_v42  ;;  %v7933_v52 = vpack.c.bf16 %v4500_v43, %v4499_v23  ;;  %v4518_v30 = vld [vmem:[%s12567_s2 + $0xda8] sm:$0xff] }
 0x26d   : > { %vm3335_vm3 = vcmp.lt.s32.totalorder %v3079_v17, 0  ;;  %v3110_v48 = vxor.u32 %v2854_v62, %v2598_v40  ;;  %7902 = vmatpush3.bf16.msra.mxu0 %v7901_v3  ;;  %v1575_v20 = vxor.u32 %v1319_v22, %v1063_v1  ;;  %v1094_v49 = vxor.u32 %v8174_v44, %v836_v51  ;;  %v296_v42 = vld [vmem:[%s8346_s6 + $0x3a8] sm:$0xff]  ;;  %v4501_v51 = vld [vmem:[%s12567_s2 + $0xd20] sm:$0xff] }
 0x26e   : > { %6533 = vmatmul.mubr.msk.f32.vlgmr.msra.gmra.mrb[80].mxu1 %vm3335_vm3, %v10795_v7  ;;  %v2853_v56 = vshrl.u32 %v2597_v63, 16  ;;  %v2344_v10 = vxor.u32 %v2088_v14, %v1832_v59  ;;  %v519_v6 = vmax.f32 %v263_v12, 0.0  ;;  %v835_v26 = vadd.s32 %v8592_v29, %v10753_v2  ;;  %v4469_v7 = vld [vmem:[%s12567_s2 + $0xc20] sm:$0xff]  ;;  %v4502_v12 = vld [vmem:[%s12567_s2 + $0xd28] sm:$0xff] }
 0x26f   : > { %vm3366_vm4 = vcmp.lt.s32.totalorder %v3110_v48, 0  ;;  %7930 = vmatpush3.bf16.msra.mxu1 %v7929_v53  ;;  %v1831_v45 = vmul.u32 2246822507, %v1575_v20  ;;  %v1350_v3 = vshrl.u32 %v1094_v49, 16  ;;  %v7903_v34 = vpack.c.bf16 %v4486_v58, %v4485_v4 }
 0x270   : > { %6518 = vmatprep.mubr.msk.f32.mxu0 %vm3366_vm4, %v10812_v46  ;;  %v3109_v35 = vxor.u32 %v2853_v56, %v2597_v63  ;;  %v2600_v54 = vmul.u32 3266489909, %v2344_v10  ;;  %7932 = vmatprep.subr.bf16.mxu1 %v7931_v50  ;;  %v1093_v9 = vxor.u32 %v8174_v44, %v835_v26  ;;  %v10899_v13 = vadd.f32 %v519_v6, %v519_v6 }
 0x271   : > { %v2087_v53 = vshrl.u32 %v1831_v45, 13  ;;  %v1606_v32 = vxor.u32 %v1350_v3, %v1094_v49  ;;  %7904 = vmatprep.subr.bf16.mxu0 %v7903_v34  ;;  %v522_v16 = vmax.f32 %v266_v39, 0.0  ;;  %v838_v11 = vadd.s32 %v8592_v29, %v10771_v37  ;;  %v295_v49 = vld [vmem:[%s8346_s6 + $0x3a0] sm:$0xff] }
 0x272   : > { %vm3365_vm5 = vcmp.lt.s32.totalorder %v3109_v35, 0  ;;  %v2856_v5 = vshrl.u32 %v2600_v54, 16  ;;  %v1349_v31 = vshrl.u32 %v1093_v9, 16  ;;  %v7905_v46 = vpack.c.bf16 %v4470_v36, %v4469_v7 }
 0x273   : > { %6519 = vmatmul.mubr.msk.f32.gmra.mrb[82].mxu0 %vm3365_vm5, %v10832_v60  ;;  %v2343_v61 = vxor.u32 %v2087_v53, %v1831_v45  ;;  %v1862_v40 = vmul.u32 2246822507, %v1606_v32  ;;  %7934 = vmatpush3.bf16.msra.mxu1 %v7933_v52  ;;  %v1096_v1 = vxor.u32 %v8174_v44, %v838_v11  ;;  %v10912_v50 = vadd.f32 %v522_v16, %v522_v16  ;;  %v298_v11 = vld [vmem:[%s8346_s6 + $0x3b8] sm:$0xff] }
 0x274   : > { %v3112_v23 = vxor.u32 %v2856_v5, %v2600_v54  ;;  %v1605_v43 = vxor.u32 %v1349_v31, %v1093_v9  ;;  %7906 = vmatpush3.bf16.msra.mxu0 %v7905_v46  ;;  %v521_v33 = vmax.f32 %v265_v55, 0.0  ;;  %v837_v59 = vadd.s32 %v8592_v29, %v10789_v19  ;;  %v4487_v54 = vld [vmem:[%s12567_s2 + $0xcb0] sm:$0xff]  ;;  %v4488_v9 = vld [vmem:[%s12567_s2 + $0xcb8] sm:$0xff] }
 0x275   : > { %v2599_v17 = vmul.u32 3266489909, %v2343_v61  ;;  %v2118_v62 = vshrl.u32 %v1862_v40, 13  ;;  %v1352_v22 = vshrl.u32 %v1096_v1, 16  ;;  %v7935_v60 = vpack.c.bf16 %v4518_v30, %v4517_v25 }
 0x276   : > { %vm3368_vm6 = vcmp.lt.s32.totalorder %v3112_v23, 0  ;;  %v1861_v63 = vmul.u32 2246822507, %v1605_v43  ;;  %v1095_v14 = vxor.u32 %v8174_v44, %v837_v59  ;;  %v10924_v52 = vadd.f32 %v521_v33, %v521_v33  ;;  %v4471_v59 = vld [vmem:[%s12567_s2 + $0xc30] sm:$0xff] }
 0x277   : > { %6534 = vmatprep.mubr.msk.f32.mxu1 %vm3368_vm6, %v10847_v24  ;;  %v2855_v4 = vshrl.u32 %v2599_v17, 16  ;;  %v2374_v58 = vxor.u32 %v2118_v62, %v1862_v40  ;;  %v1608_v48 = vxor.u32 %v1352_v22, %v1096_v1  ;;  %7936 = vmatprep.subr.bf16.mxu1 %v7935_v60  ;;  %v552_v20 = vmax.f32 %v296_v42, 0.0  ;;  %v297_v22 = vld [vmem:[%s8346_s6 + $0x3b0] sm:$0xff] }
 0x278   : > { %v2117_v56 = vshrl.u32 %v1861_v63, 13  ;;  %v1351_v10 = vshrl.u32 %v1095_v14, 16  ;;  %v868_v6 = vadd.s32 %v8632_v0, %v10736_v41  ;;  %v7937_v26 = vpack.c.bf16 %v4502_v12, %v4501_v51 }
 0x279   : > { %v3111_v39 = vxor.u32 %v2855_v4, %v2599_v17  ;;  %v2630_v45 = vmul.u32 3266489909, %v2374_v58  ;;  %v1864_v3 = vmul.u32 2246822507, %v1608_v48  ;;  %v10930_v34 = vadd.f32 %v552_v20, %v552_v20  ;;  %v4519_v20 = vld [vmem:[%s12567_s2 + $0xdb0] sm:$0xff] }
 0x27a   : > { %v2373_v7 = vxor.u32 %v2117_v56, %v1861_v63  ;;  %v1607_v24 = vxor.u32 %v1351_v10, %v1095_v14  ;;  %v1126_v36 = vxor.u32 %v8174_v44, %v868_v6  ;;  %7938 = vmatpush3.bf16.msra.mxu1 %v7937_v26  ;;  %v551_v35 = vmax.f32 %v295_v49, 0.0  ;;  %v4520_v49 = vld [vmem:[%s12567_s2 + $0xdb8] sm:$0xff] }
 0x27b   : > { %vm3367_vm7 = vcmp.lt.s32.totalorder %v3111_v39, 0  ;;  %v2886_v53 = vshrl.u32 %v2630_v45, 16  ;;  %v2120_v32 = vshrl.u32 %v1864_v3, 13  ;;  %v867_v16 = vadd.s32 %v8632_v0, %v10753_v2 }
 0x27c   : > { %6535 = vmatmul.mubr.msk.f32.gmra.mrb[82].mxu1 %vm3367_vm7, %v10859_v18  ;;  %v2629_v55 = vmul.u32 3266489909, %v2373_v7  ;;  %v1863_v5 = vmul.u32 2246822507, %v1607_v24  ;;  %v1382_v31 = vshrl.u32 %v1126_v36, 16  ;;  %v10943_v46 = vadd.f32 %v551_v35, %v551_v35  ;;  %v4472_v18 = vld [vmem:[%s12567_s2 + $0xc38] sm:$0xff] }
 0x27d   : > { %v3142_v25 = vxor.u32 %v2886_v53, %v2630_v45  ;;  %v2376_v30 = vxor.u32 %v2120_v32, %v1864_v3  ;;  %v1125_v61 = vxor.u32 %v8174_v44, %v867_v16  ;;  %v7907_v40 = vpack.c.bf16 %v4488_v9, %v4487_v54  ;;  %v328_v3 = vld [vmem:[%s8346_s6 + $0x4a8] sm:$0xff]  ;;  %v4503_v54 = vld [vmem:[%s12567_s2 + $0xd30] sm:$0xff] }
 0x27e   : > { %v2885_v1 = vshrl.u32 %v2629_v55, 16  ;;  %v2119_v23 = vshrl.u32 %v1863_v5, 13  ;;  %v1638_v43 = vxor.u32 %v1382_v31, %v1126_v36  ;;  %v554_v33 = vmax.f32 %v298_v11, 0.0  ;;  %v327_v31 = vld [vmem:[%s8346_s6 + $0x4a0] sm:$0xff] }
 0x27f   : > { %vm3398_vm8 = vcmp.lt.s32.totalorder %v3142_v25, 0  ;;  %v2632_v42 = vmul.u32 3266489909, %v2376_v30  ;;  %v1381_v17 = vshrl.u32 %v1125_v61, 16  ;;  %7908 = vmatprep.subr.bf16.mxu0 %v7907_v40  ;;  %v870_v62 = vadd.s32 %v8632_v0, %v10771_v37 }
 0x280   : > { %6520 = vmatprep.mubr.msk.f32.mxu0 %vm3398_vm8, %v10875_v21  ;;  %v3141_v60 = vxor.u32 %v2885_v1, %v2629_v55  ;;  %v2375_v51 = vxor.u32 %v2119_v23, %v1863_v5  ;;  %v1894_v12 = vmul.u32 2246822507, %v1638_v43  ;;  %v10956_v63 = vadd.f32 %v554_v33, %v554_v33  ;;  %v4489_v1 = vld [vmem:[%s12567_s2 + $0xcc0] sm:$0xff] }
 0x281   : > { %v2888_v14 = vshrl.u32 %v2632_v42, 16  ;;  %v1637_v4 = vxor.u32 %v1381_v17, %v1125_v61  ;;  %v1128_v58 = vxor.u32 %v8174_v44, %v870_v62  ;;  %v7909_v48 = vpack.c.bf16 %v4472_v18, %v4471_v59  ;;  %v330_v62 = vld [vmem:[%s8346_s6 + $0x4b8] sm:$0xff] }
 0x282   : > { %vm3397_vm9 = vcmp.lt.s32.totalorder %v3141_v60, 0  ;;  %v2631_v21 = vmul.u32 3266489909, %v2375_v51  ;;  %v2150_v56 = vshrl.u32 %v1894_v12, 13  ;;  %v553_v10 = vmax.f32 %v297_v22, 0.0 }
 0x283   : > { %6521 = vmatmul.mubr.msk.f32.gmra.mrb[84].mxu0 %vm3397_vm9, %v10899_v13  ;;  %v3144_v6 = vxor.u32 %v2888_v14, %v2632_v42  ;;  %v1893_v26 = vmul.u32 2246822507, %v1637_v4  ;;  %v1384_v39 = vshrl.u32 %v1128_v58, 16  ;;  %v869_v45 = vadd.s32 %v8632_v0, %v10789_v19  ;;  %v4504_v13 = vld [vmem:[%s12567_s2 + $0xd38] sm:$0xff] }
 0x284   : > { %v2887_v7 = vshrl.u32 %v2631_v21, 16  ;;  %v2406_v24 = vxor.u32 %v2150_v56, %v1894_v12  ;;  %7910 = vmatpush3.bf16.msra.mxu0 %v7909_v48  ;;  %v10969_v36 = vadd.f32 %v553_v10, %v553_v10  ;;  %v7939_v35 = vpack.c.bf16 %v4520_v49, %v4519_v20  ;;  %v4474_v20 = vld [vmem:[%s12567_s2 + $0xc48] sm:$0xff] }
 0x285   : > { %vm3400_vm10 = vcmp.lt.s32.totalorder %v3144_v6, 0  ;;  %v2149_v9 = vshrl.u32 %v1893_v26, 13  ;;  %v1640_v53 = vxor.u32 %v1384_v39, %v1128_v58  ;;  %v1127_v32 = vxor.u32 %v8174_v44, %v869_v45  ;;  %v329_v45 = vld [vmem:[%s8346_s6 + $0x4b0] sm:$0xff] }
 0x286   : > { %6536 = vmatprep.mubr.msk.f32.mxu1 %vm3400_vm10, %v10912_v50  ;;  %v3143_v16 = vxor.u32 %v2887_v7, %v2631_v21  ;;  %v2662_v11 = vmul.u32 3266489909, %v2406_v24  ;;  %7940 = vmatprep.subr.bf16.mxu1 %v7939_v35  ;;  %v584_v55 = vmax.f32 %v328_v3, 0.0  ;;  %v900_v5 = vadd.s32 %v8697_v47, %v10736_v41  ;;  %v4490_v50 = vld [vmem:[%s12567_s2 + $0xcc8] sm:$0xff] }
 0x287   : > { %v2405_v25 = vxor.u32 %v2149_v9, %v1893_v26  ;;  %v1896_v30 = vmul.u32 2246822507, %v1640_v53  ;;  %v1383_v61 = vshrl.u32 %v1127_v32, 16  ;;  %v7941_v40 = vpack.c.bf16 %v4504_v13, %v4503_v54  ;;  %v4521_v54 = vld [vmem:[%s12567_s2 + $0xdc0] sm:$0xff] }
 0x288   : > { %vm3399_vm11 = vcmp.lt.s32.totalorder %v3143_v16, 0  ;;  %v2918_v23 = vshrl.u32 %v2662_v11, 16  ;;  %v1158_v43 = vxor.u32 %v8174_v44, %v900_v5  ;;  %v10989_v33 = vadd.f32 %v584_v55, %v584_v55  ;;  %v360_v5 = vld [vmem:[%s8346_s6 + $0x5a8] sm:$0xff] }
 0x289   : > { %6537 = vmatmul.mubr.msk.f32.gmra.mrb[84].mxu1 %vm3399_vm11, %v10924_v52  ;;  %v2661_v59 = vmul.u32 3266489909, %v2405_v25  ;;  %v2152_v18 = vshrl.u32 %v1896_v30, 13  ;;  %v1639_v42 = vxor.u32 %v1383_v61, %v1127_v32  ;;  %v583_v17 = vmax.f32 %v327_v31, 0.0  ;;  %v4473_v52 = vld [vmem:[%s12567_s2 + $0xc40] sm:$0xff] }
 0x28a   : > { %v3174_v22 = vxor.u32 %v2918_v23, %v2662_v11  ;;  %v1414_v60 = vshrl.u32 %v1158_v43, 16  ;;  %7942 = vmatpush3.bf16.msra.mxu1 %v7941_v40  ;;  %v899_v51 = vadd.s32 %v8697_v47, %v10753_v2  ;;  %v7911_v12 = vpack.c.bf16 %v4490_v50, %v4489_v1 }
 0x28b   : > { %v2917_v14 = vshrl.u32 %v2661_v59, 16  ;;  %v2408_v4 = vxor.u32 %v2152_v18, %v1896_v30  ;;  %v1895_v58 = vmul.u32 2246822507, %v1639_v42  ;;  %v10995_v48 = vadd.f32 %v583_v17, %v583_v17 }
 0x28c   : > { %vm3430_vm12 = vcmp.lt.s32.totalorder %v3174_v22, 0  ;;  %v1670_v49 = vxor.u32 %v1414_v60, %v1158_v43  ;;  %v1157_v21 = vxor.u32 %v8174_v44, %v899_v51  ;;  %7912 = vmatprep.subr.bf16.mxu0 %v7911_v12  ;;  %v586_v56 = vmax.f32 %v330_v62, 0.0  ;;  %v4506_v43 = vld [vmem:[%s12567_s2 + $0xd48] sm:$0xff]  ;;  %v359_v51 = vld [vmem:[%s8346_s6 + $0x5a0] sm:$0xff] }
 0x28d   : > { %6522 = vmatprep.mubr.msk.f32.mxu0 %vm3430_vm12, %v10930_v34  ;;  %v3173_v10 = vxor.u32 %v2917_v14, %v2661_v59  ;;  %v2664_v6 = vmul.u32 3266489909, %v2408_v4  ;;  %v2151_v26 = vshrl.u32 %v1895_v58, 13  ;;  %v902_v39 = vadd.s32 %v8697_v47, %v10771_v37  ;;  %v4522_v34 = vld [vmem:[%s12567_s2 + $0xdc8] sm:$0xff] }
 0x28e   : > { %v1926_v3 = vmul.u32 2246822507, %v1670_v49  ;;  %v1413_v7 = vshrl.u32 %v1157_v21, 16  ;;  %v11008_v24 = vadd.f32 %v586_v56, %v586_v56  ;;  %v7913_v35 = vpack.c.bf16 %v4474_v20, %v4473_v52  ;;  %v4492_v56 = vld [vmem:[%s12567_s2 + $0xcd8] sm:$0xff] }
 0x28f   : > { %vm3429_vm13 = vcmp.lt.s32.totalorder %v3173_v10, 0  ;;  %v2920_v13 = vshrl.u32 %v2664_v6, 16  ;;  %v2407_v9 = vxor.u32 %v2151_v26, %v1895_v58  ;;  %v1160_v53 = vxor.u32 %v8174_v44, %v902_v39  ;;  %v11043_v10 = vpop.f32.mrb[0].mxu0 }
 0x290   : > { %6523 = vmatmul.mubr.msk.f32.gmra.mrb[86].mxu0 %vm3429_vm13, %v10943_v46  ;;  %v2182_v32 = vshrl.u32 %v1926_v3, 13  ;;  %v1669_v16 = vxor.u32 %v1413_v7, %v1157_v21  ;;  %v585_v11 = vmax.f32 %v329_v45, 0.0  ;;  %v901_v55 = vadd.s32 %v8697_v47, %v10789_v19  ;;  %v4505_v46 = vld [vmem:[%s12567_s2 + $0xd40] sm:$0xff] }
 0x291   : > { %v3176_v31 = vxor.u32 %v2920_v13, %v2664_v6  ;;  %v2663_v25 = vmul.u32 3266489909, %v2407_v9  ;;  %v1416_v30 = vshrl.u32 %v1160_v53, 16  ;;  %7914 = vmatpush3.bf16.msra.mxu0 %v7913_v35  ;;  %v7943_v61 = vpack.c.bf16 %v4522_v34, %v4521_v54  ;;  %v362_v54 = vld [vmem:[%s8346_s6 + $0x5b8] sm:$0xff] }
 0x292   : > { %v2438_v40 = vxor.u32 %v2182_v32, %v1926_v3  ;;  %v1925_v1 = vmul.u32 2246822507, %v1669_v16  ;;  %v1159_v50 = vxor.u32 %v8174_v44, %v901_v55  ;;  %v11022_v23 = vadd.f32 %v585_v11, %v585_v11  ;;  %v4475_v32 = vld [vmem:[%s12567_s2 + $0xc50] sm:$0xff] }
 0x293   : > { %vm3432_vm14 = vcmp.lt.s32.totalorder %v3176_v31, 0  ;;  %v2919_v59 = vshrl.u32 %v2663_v25, 16  ;;  %v1672_v18 = vxor.u32 %v1416_v30, %v1160_v53  ;;  %7944 = vmatprep.subr.bf16.mxu1 %v7943_v61  ;;  %v616_v42 = vmax.f32 %v360_v5, 0.0  ;;  %v11058_v5 = vpop.f32.mrb[1].mxu0 }
 0x294   : > { %6538 = vmatprep.mubr.msk.f32.mxu1 %vm3432_vm14, %v10956_v63  ;;  %v2694_v17 = vmul.u32 3266489909, %v2438_v40  ;;  %v2181_v62 = vshrl.u32 %v1925_v1, 13  ;;  %v1415_v22 = vshrl.u32 %v1159_v50, 16  ;;  %v932_v60 = vadd.s32 %v8753_v57, %v10736_v41  ;;  %v4491_v63 = vld [vmem:[%s12567_s2 + $0xcd0] sm:$0xff] }
 0x295   : > { %v3175_v12 = vxor.u32 %v2919_v59, %v2663_v25  ;;  %v1928_v14 = vmul.u32 2246822507, %v1672_v18  ;;  %v11034_v4 = vadd.f32 %v616_v42, %v616_v42  ;;  %v7945_v58 = vpack.c.bf16 %v4506_v43, %v4505_v46  ;;  %v361_v40 = vld [vmem:[%s8346_s6 + $0x5b0] sm:$0xff] }
 0x296   : > { %v2950_v52 = vshrl.u32 %v2694_v17, 16  ;;  %v2437_v20 = vxor.u32 %v2181_v62, %v1925_v1  ;;  %v1671_v49 = vxor.u32 %v1415_v22, %v1159_v50  ;;  %v1190_v21 = vxor.u32 %v8174_v44, %v932_v60  ;;  %v4524_v62 = vld [vmem:[%s12567_s2 + $0xdd8] sm:$0xff] }
 0x297   : > { %vm3431_vm15 = vcmp.lt.s32.totalorder %v3175_v12, 0  ;;  %v2184_v6 = vshrl.u32 %v1928_v14, 13  ;;  %7946 = vmatpush3.bf16.msra.mxu1 %v7945_v58  ;;  %v615_v26 = vmax.f32 %v359_v51, 0.0  ;;  %v931_v39 = vadd.s32 %v8753_v57, %v10753_v2 }
 0x298   : > { %6539 = vmatmul.mubr.msk.f32.gmra.mrb[86].mxu1 %vm3431_vm15, %v10969_v36  ;;  %v3206_v45 = vxor.u32 %v2950_v52, %v2694_v17  ;;  %v2693_v3 = vmul.u32 3266489909, %v2437_v20  ;;  %v1927_v7 = vmul.u32 2246822507, %v1671_v49  ;;  %v1446_v35 = vshrl.u32 %v1190_v21, 16  ;;  %v4476_v36 = vld [vmem:[%s12567_s2 + $0xc58] sm:$0xff] }
 0x299   : > { %v2440_v34 = vxor.u32 %v2184_v6, %v1928_v14  ;;  %v1189_v13 = vxor.u32 %v8174_v44, %v931_v39  ;;  %v11050_v9 = vadd.f32 %v615_v26, %v615_v26  ;;  %v7915_v53 = vpack.c.bf16 %v4492_v56, %v4491_v63  ;;  %v392_v20 = vld [vmem:[%s8346_s6 + $0x6a8] sm:$0xff]  ;;  %v11077_v49 = vpop.f32.mrb[0].mxu1  ;;  %v4507_v26 = vld [vmem:[%s12567_s2 + $0xd50] sm:$0xff] }
 0x29a   : > { %vm3462_vm0 = vcmp.lt.s32.totalorder %v3206_v45, 0  ;;  %v2949_v16 = vshrl.u32 %v2693_v3, 16  ;;  %v2183_v11 = vshrl.u32 %v1927_v7, 13  ;;  %v1702_v55 = vxor.u32 %v1446_v35, %v1190_v21 }
 0x29b   : > { %6524 = vmatprep.mubr.msk.f32.mxu0 %vm3462_vm0, %v10989_v33  ;;  %v2696_v31 = vmul.u32 3266489909, %v2440_v34  ;;  %v1445_v25 = vshrl.u32 %v1189_v13, 16  ;;  %7916 = vmatprep.subr.bf16.mxu0 %v7915_v53  ;;  %v618_v30 = vmax.f32 %v362_v54, 0.0  ;;  %v934_v61 = vadd.s32 %v8753_v57, %v10771_v37  ;;  %v4523_v33 = vld [vmem:[%s12567_s2 + $0xdd0] sm:$0xff]  ;;  %v11092_v53 = vpop.f32.mrb[1].mxu1 }
 0x29c   : > { %v3205_v1 = vxor.u32 %v2949_v16, %v2693_v3  ;;  %v2439_v50 = vxor.u32 %v2183_v11, %v1927_v7  ;;  %v1958_v46 = vmul.u32 2246822507, %v1702_v55  ;;  %v7917_v43 = vpack.c.bf16 %v4476_v36, %v4475_v32  ;;  %v4493_v55 = vld [vmem:[%s12567_s2 + $0xce0] sm:$0xff] }
 0x29d   : > { %v2952_v59 = vshrl.u32 %v2696_v31, 16  ;;  %v1701_v18 = vxor.u32 %v1445_v25, %v1189_v13  ;;  %v1192_v42 = vxor.u32 %v8174_v44, %v934_v61  ;;  %v11065_v17 = vadd.f32 %v618_v30, %v618_v30  ;;  %v391_v13 = vld [vmem:[%s8346_s6 + $0x6a0] sm:$0xff] }
 0x29e   : > { %vm3461_vm1 = vcmp.lt.s32.totalorder %v3205_v1, 0  ;;  %v2695_v22 = vmul.u32 3266489909, %v2439_v50  ;;  %v2214_v60 = vshrl.u32 %v1958_v46, 13  ;;  %7918 = vmatpush3.bf16.msra.mxu0 %v7917_v43  ;;  %v617_v51 = vmax.f32 %v361_v40, 0.0 }
 0x29f   : > { %6525 = vmatmul.mubr.msk.f32.gmra.mrb[88].mxu0 %vm3461_vm1, %v10995_v48  ;;  %v3208_v12 = vxor.u32 %v2952_v59, %v2696_v31  ;;  %v1957_v14 = vmul.u32 2246822507, %v1701_v18  ;;  %v1448_v58 = vshrl.u32 %v1192_v42, 16  ;;  %v933_v52 = vadd.s32 %v8753_v57, %v10789_v19  ;;  %v4508_v48 = vld [vmem:[%s12567_s2 + $0xd58] sm:$0xff] }
 0x2a0   : > { %v2951_v21 = vshrl.u32 %v2695_v22, 16  ;;  %v2470_v63 = vxor.u32 %v2214_v60, %v1958_v46  ;;  %v11079_v56 = vadd.f32 %v617_v51, %v617_v51  ;;  %v7947_v6 = vpack.c.bf16 %v4524_v62, %v4523_v33  ;;  %v394_v46 = vld [vmem:[%s8346_s6 + $0x6b8] sm:$0xff]  ;;  %v11107_v33 = vpop.f32.mrb[2].mxu0 }
 0x2a1   : > { %vm3464_vm2 = vcmp.lt.s32.totalorder %v3208_v12, 0  ;;  %v2213_v39 = vshrl.u32 %v1957_v14, 13  ;;  %v1704_v45 = vxor.u32 %v1448_v58, %v1192_v42  ;;  %v1191_v3 = vxor.u32 %v8174_v44, %v933_v52  ;;  %v4478_v12 = vld [vmem:[%s12567_s2 + $0xc68] sm:$0xff] }
 0x2a2   : > { %6540 = vmatprep.mubr.msk.f32.mxu1 %vm3464_vm2, %v11008_v24  ;;  %v3207_v7 = vxor.u32 %v2951_v21, %v2695_v22  ;;  %v2726_v35 = vmul.u32 3266489909, %v2470_v63  ;;  %7948 = vmatprep.subr.bf16.mxu1 %v7947_v6  ;;  %v648_v54 = vmax.f32 %v392_v20, 0.0  ;;  %v964_v34 = vadd.s32 %v8817_v27, %v10736_v41  ;;  %v4494_v24 = vld [vmem:[%s12567_s2 + $0xce8] sm:$0xff] }
 0x2a3   : > { %v2469_v32 = vxor.u32 %v2213_v39, %v1957_v14  ;;  %v1960_v36 = vmul.u32 2246822507, %v1704_v45  ;;  %v1447_v16 = vshrl.u32 %v1191_v3, 16  ;;  %v7949_v11 = vpack.c.bf16 %v4508_v48, %v4507_v26  ;;  %v393_v26 = vld [vmem:[%s8346_s6 + $0x6b0] sm:$0xff]  ;;  %v11122_v48 = vpop.f32.mrb[3].mxu0 }
 0x2a4   : > { %vm3463_vm3 = vcmp.lt.s32.totalorder %v3207_v7, 0  ;;  %v2982_v31 = vshrl.u32 %v2726_v35, 16  ;;  %v1222_v25 = vxor.u32 %v8174_v44, %v964_v34  ;;  %v11101_v30 = vadd.f32 %v648_v54, %v648_v54 }
 0x2a5   : > { %6541 = vmatmul.mubr.msk.f32.gmra.mrb[88].mxu1 %vm3463_vm3, %v11022_v23  ;;  %v2725_v61 = vmul.u32 3266489909, %v2469_v32  ;;  %v2216_v40 = vshrl.u32 %v1960_v36, 13  ;;  %v1703_v1 = vxor.u32 %v1447_v16, %v1191_v3  ;;  %v647_v50 = vmax.f32 %v391_v13, 0.0  ;;  %v4477_v23 = vld [vmem:[%s12567_s2 + $0xc60] sm:$0xff] }
 0x2a6   : > { %v3238_v43 = vxor.u32 %v2982_v31, %v2726_v35  ;;  %v1478_v59 = vshrl.u32 %v1222_v25, 16  ;;  %7950 = vmatpush3.bf16.msra.mxu1 %v7949_v11  ;;  %v963_v18 = vadd.s32 %v8817_v27, %v10753_v2  ;;  %v7919_v42 = vpack.c.bf16 %v4494_v24, %v4493_v55  ;;  %v4525_v35 = vld [vmem:[%s12567_s2 + $0xde0] sm:$0xff]  ;;  %v424_v55 = vld [vmem:[%s8346_s6 + $0x7a8] sm:$0xff] }
 0x2a7   : > { %v2981_v62 = vshrl.u32 %v2725_v61, 16  ;;  %v2472_v22 = vxor.u32 %v2216_v40, %v1960_v36  ;;  %v1959_v60 = vmul.u32 2246822507, %v1703_v1  ;;  %v11109_v51 = vadd.f32 %v647_v50, %v647_v50  ;;  %v11137_v40 = vpop.f32.mrb[2].mxu1 }
 0x2a8   : > { %vm3494_vm4 = vcmp.lt.s32.totalorder %v3238_v43, 0  ;;  %v1734_v14 = vxor.u32 %v1478_v59, %v1222_v25  ;;  %v1221_v58 = vxor.u32 %v8174_v44, %v963_v18  ;;  %7920 = vmatprep.subr.bf16.mxu0 %v7919_v42  ;;  %v650_v52 = vmax.f32 %v394_v46, 0.0  ;;  %v4509_v43 = vld [vmem:[%s12567_s2 + $0xd60] sm:$0xff]  ;;  %v4510_v59 = vld [vmem:[%s12567_s2 + $0xd68] sm:$0xff] }
 0x2a9   : > { %6526 = vmatprep.mubr.msk.f32.mxu0 %vm3494_vm4, %v11034_v4  ;;  %v3237_v20 = vxor.u32 %v2981_v62, %v2725_v61  ;;  %v2728_v21 = vmul.u32 3266489909, %v2472_v22  ;;  %v2215_v63 = vshrl.u32 %v1959_v60, 13  ;;  %v966_v6 = vadd.s32 %v8817_v27, %v10771_v37  ;;  %v4526_v4 = vld [vmem:[%s12567_s2 + $0xde8] sm:$0xff] }
 0x2aa   : > { %v1990_v39 = vmul.u32 2246822507, %v1734_v14  ;;  %v1477_v45 = vshrl.u32 %v1221_v58, 16  ;;  %v11124_v3 = vadd.f32 %v650_v52, %v650_v52  ;;  %v7921_v7 = vpack.c.bf16 %v4478_v12, %v4477_v23  ;;  %v423_v14 = vld [vmem:[%s8346_s6 + $0x7a0] sm:$0xff] }
 0x2ab   : > { %vm3493_vm5 = vcmp.lt.s32.totalorder %v3237_v20, 0  ;;  %v2984_v54 = vshrl.u32 %v2728_v21, 16  ;;  %v2471_v34 = vxor.u32 %v2215_v63, %v1959_v60  ;;  %v1224_v13 = vxor.u32 %v8174_v44, %v966_v6  ;;  %v11154_v63 = vpop.f32.mrb[3].mxu1 }
 0x2ac   : > { %6527 = vmatmul.mubr.msk.f32.gmra.mrb[90].mxu0 %vm3493_vm5, %v11050_v9  ;;  %v2246_v32 = vshrl.u32 %v1990_v39, 13  ;;  %v1733_v36 = vxor.u32 %v1477_v45, %v1221_v58  ;;  %v649_v16 = vmax.f32 %v393_v26, 0.0  ;;  %v965_v11 = vadd.s32 %v8817_v27, %v10789_v19  ;;  %v4495_v45 = vld [vmem:[%s12567_s2 + $0xcf0] sm:$0xff] }
 0x2ad   : > { %v3240_v24 = vxor.u32 %v2984_v54, %v2728_v21  ;;  %v2727_v31 = vmul.u32 3266489909, %v2471_v34  ;;  %v1480_v25 = vshrl.u32 %v1224_v13, 16  ;;  %7922 = vmatpush3.bf16.msra.mxu0 %v7921_v7  ;;  %v7951_v61 = vpack.c.bf16 %v4526_v4, %v4525_v35 }
 0x2ae   : > { %v2502_v1 = vxor.u32 %v2246_v32, %v1990_v39  ;;  %v1989_v50 = vmul.u32 2246822507, %v1733_v36  ;;  %v1223_v46 = vxor.u32 %v8174_v44, %v965_v11  ;;  %v11140_v9 = vadd.f32 %v649_v16, %v649_v16  ;;  %v426_v36 = vld [vmem:[%s8346_s6 + $0x7b8] sm:$0xff] }
 0x2af   : > { %vm3496_vm6 = vcmp.lt.s32.totalorder %v3240_v24, 0  ;;  %v2983_v18 = vshrl.u32 %v2727_v31, 16  ;;  %v1736_v42 = vxor.u32 %v1480_v25, %v1224_v13  ;;  %7952 = vmatprep.subr.bf16.mxu1 %v7951_v61  ;;  %v680_v62 = vmax.f32 %v424_v55, 0.0 }
 0x2b0   : > { %6542 = vmatprep.mubr.msk.f32.mxu1 %vm3496_vm6, %v11065_v17  ;;  %v2758_v22 = vmul.u32 3266489909, %v2502_v1  ;;  %v2245_v60 = vshrl.u32 %v1989_v50, 13  ;;  %v1479_v23 = vshrl.u32 %v1223_v46, 16  ;;  %v996_v12 = vadd.s32 %v8872_v8, %v10736_v41  ;;  %v4496_v41 = vld [vmem:[%s12567_s2 + $0xcf8] sm:$0xff] }
 0x2b1   : > { %v3239_v58 = vxor.u32 %v2983_v18, %v2727_v31  ;;  %v1992_v52 = vmul.u32 2246822507, %v1736_v42  ;;  %v11152_v20 = vadd.f32 %v680_v62, %v680_v62  ;;  %v7953_v21 = vpack.c.bf16 %v4510_v59, %v4509_v43  ;;  %v4479_v31 = vld [vmem:[%s12567_s2 + $0xc70] sm:$0xff] }
 0x2b2   : > { %v3014_v6 = vshrl.u32 %v2758_v22, 16  ;;  %v2501_v26 = vxor.u32 %v2245_v60, %v1989_v50  ;;  %v1735_v39 = vxor.u32 %v1479_v23, %v1223_v46  ;;  %v1254_v17 = vxor.u32 %v8174_v44, %v996_v12  ;;  %v425_v18 = vld [vmem:[%s8346_s6 + $0x7b0] sm:$0xff] }
 0x2b3   : > { %vm3495_vm7 = vcmp.lt.s32.totalorder %v3239_v58, 0  ;;  %v2248_v7 = vshrl.u32 %v1992_v52, 13  ;;  %7954 = vmatpush3.bf16.msra.mxu1 %v7953_v21  ;;  %v679_v35 = vmax.f32 %v423_v14, 0.0  ;;  %v995_v4 = vadd.s32 %v8872_v8, %v10753_v2  ;;  %v4480_v2 = vld [vmem:[%s12567_s2 + $0xc78] sm:$0xff] }
 0x2b4   : > { %6543 = vmatmul.mubr.msk.f32.gmra.mrb[90].mxu1 %vm3495_vm7, %v11079_v56  ;;  %v3270_v54 = vxor.u32 %v3014_v6, %v2758_v22  ;;  %v2757_v34 = vmul.u32 3266489909, %v2501_v26  ;;  %v1991_v13 = vmul.u32 2246822507, %v1735_v39  ;;  %v1510_v32 = vshrl.u32 %v1254_v17, 16  ;;  %v11176_v56 = vpop.f32.mrb[4].mxu0 }
 0x2b5   : > { %v2504_v16 = vxor.u32 %v2248_v7, %v1992_v52  ;;  %v1253_v11 = vxor.u32 %v8174_v44, %v995_v4  ;;  %v11168_v55 = vadd.f32 %v679_v35, %v679_v35  ;;  %v7923_v24 = vpack.c.bf16 %v4496_v41, %v4495_v45  ;;  %v11182_v23 = vpop.f32.mrb[5].mxu0  ;;  %v4527_v52 = vld [vmem:[%s12567_s2 + $0xdf0] sm:$0xff]  ;;  %v204_v7 = vld [vmem:[%s8346_s6 + $0xc8] sm:$0xff] }
 0x2b6   : > { %vm3526_vm8 = vcmp.lt.s32.totalorder %v3270_v54, 0  ;;  %v3013_v25 = vshrl.u32 %v2757_v34, 16  ;;  %v2247_v61 = vshrl.u32 %v1991_v13, 13  ;;  %v1766_v1 = vxor.u32 %v1510_v32, %v1254_v17  ;;  %v11205_v32 = vpop.f32.mrb[4].mxu1 }
 0x2b7   : > { %6528 = vmatprep.mubr.msk.f32.mxu0 %vm3526_vm8, %v11101_v30  ;;  %v2760_v50 = vmul.u32 3266489909, %v2504_v16  ;;  %v1509_v46 = vshrl.u32 %v1253_v11, 16  ;;  %7924 = vmatprep.subr.bf16.mxu0 %v7923_v24  ;;  %v682_v43 = vmax.f32 %v426_v36, 0.0  ;;  %v998_v59 = vadd.s32 %v8872_v8, %v10771_v37  ;;  %v4528_v37 = vld [vmem:[%s12567_s2 + $0xdf8] sm:$0xff] }
 0x2b8   : > { %v3269_v42 = vxor.u32 %v3013_v25, %v2757_v34  ;;  %v2503_v62 = vxor.u32 %v2247_v61, %v1991_v13  ;;  %v2022_v22 = vmul.u32 2246822507, %v1766_v1  ;;  %v7925_v60 = vpack.c.bf16 %v4480_v2, %v4479_v31  ;;  %v4511_v13 = vld [vmem:[%s12567_s2 + $0xd70] sm:$0xff]  ;;  %v203_v25 = vld [vmem:[%s8346_s6 + $0xc0] sm:$0xff] }
 0x2b9   : > { %v3016_v12 = vshrl.u32 %v2760_v50, 16  ;;  %v1765_v14 = vxor.u32 %v1509_v46, %v1253_v11  ;;  %v1256_v58 = vxor.u32 %v8174_v44, %v998_v59  ;;  %v11185_v30 = vadd.f32 %v682_v43, %v682_v43  ;;  %v4545_v43 = vld [vmem:[%s12567_s2 + $0xe80] sm:$0xff] }
 0x2ba   : > { %vm3525_vm9 = vcmp.lt.s32.totalorder %v3269_v42, 0  ;;  %v2759_v21 = vmul.u32 3266489909, %v2503_v62  ;;  %v2278_v6 = vshrl.u32 %v2022_v22, 13  ;;  %7926 = vmatpush3.bf16.msra.mxu0 %v7925_v60  ;;  %v681_v26 = vmax.f32 %v425_v18, 0.0  ;;  %v11223_v62 = vpop.f32.mrb[5].mxu1 }
 0x2bb   : > { %6529 = vmatmul.mubr.msk.f32.gmra.mrb[92].mxu0 %vm3525_vm9, %v11109_v51  ;;  %v3272_v39 = vxor.u32 %v3016_v12, %v2760_v50  ;;  %v2021_v17 = vmul.u32 2246822507, %v1765_v14  ;;  %v1512_v45 = vshrl.u32 %v1256_v58, 16  ;;  %v997_v41 = vadd.s32 %v8872_v8, %v10789_v19  ;;  %v4512_v51 = vld [vmem:[%s12567_s2 + $0xd78] sm:$0xff] }
 0x2bc   : > { %v3015_v35 = vshrl.u32 %v2759_v21, 16  ;;  %v2534_v4 = vxor.u32 %v2278_v6, %v2022_v22  ;;  %v11197_v54 = vadd.f32 %v681_v26, %v681_v26  ;;  %v7955_v34 = vpack.c.bf16 %v4528_v37, %v4527_v52 }
 0x2bd   : > { %vm3528_vm10 = vcmp.lt.s32.totalorder %v3272_v39, 0  ;;  %v2277_v36 = vshrl.u32 %v2021_v17, 13  ;;  %v1768_v19 = vxor.u32 %v1512_v45, %v1256_v58  ;;  %v1255_v16 = vxor.u32 %v8174_v44, %v997_v41  ;;  %v206_v58 = vld [vmem:[%s8346_s6 + $0xd8] sm:$0xff]  ;;  %v11241_v41 = vld [vmem:[%s12567_s2 + $0xe08] sm:$0xff] }
 0x2be   : > { %6544 = vmatprep.mubr.msk.f32.mxu1 %vm3528_vm10, %v11124_v3  ;;  %v3271_v11 = vxor.u32 %v3015_v35, %v2759_v21  ;;  %v2790_v24 = vmul.u32 3266489909, %v2534_v4  ;;  %7956 = vmatprep.subr.bf16.mxu1 %v7955_v34  ;;  %v460_v31 = vmax.f32 %v204_v7, 0.0  ;;  %v11210_v2 = vadd.s32 3200, %v8109_v15  ;;  %v4546_v3 = vld [vmem:[%s12567_s2 + $0xe88] sm:$0xff]  ;;  %v11245_v34 = vpop.f32.mrb[6].mxu0 }
 0x2bf   : > { %v2533_v61 = vxor.u32 %v2277_v36, %v2021_v17  ;;  %v2024_v1 = vmul.u32 2246822507, %v1768_v19  ;;  %v1511_v50 = vshrl.u32 %v1255_v16, 16  ;;  %v7957_v46 = vpack.c.bf16 %v4512_v51, %v4511_v13 }
 0x2c0   : > { %vm3527_vm11 = vcmp.lt.s32.totalorder %v3271_v11, 0  ;;  %v3046_v59 = vshrl.u32 %v2790_v24, 16  ;;  %v776_v18 = vadd.s32 %v8161_v38, %v11210_v2  ;;  %v11221_v42 = vadd.f32 %v460_v31, %v460_v31 }
 0x2c1   : > { %6545 = vmatmul.mubr.msk.f32.gmra.mrb[92].mxu1 %vm3527_vm11, %v11140_v9  ;;  %v2789_v22 = vmul.u32 3266489909, %v2533_v61  ;;  %v2280_v60 = vshrl.u32 %v2024_v1, 13  ;;  %v1767_v12 = vxor.u32 %v1511_v50, %v1255_v16  ;;  %v459_v14 = vmax.f32 %v203_v25, 0.0  ;;  %v11236_v9 = vld [vmem:[%s12567_s2 + $0xe00] sm:$0xff]  ;;  %v205_v16 = vld [vmem:[%s8346_s6 + $0xd0] sm:$0xff] }
 0x2c2   : > { %v3302_v52 = vxor.u32 %v3046_v59, %v2790_v24  ;;  %v1034_v37 = vxor.u32 %v8174_v44, %v776_v18  ;;  %7958 = vmatpush3.bf16.msra.mxu1 %v7957_v46  ;;  %v11229_v21 = vadd.s32 3072, %v8109_v15  ;;  %v7959_v6 = vpack.c.bf16 %v4546_v3, %v4545_v43  ;;  %v4578_v61 = vld [vmem:[%s12567_s2 + $0xf88] sm:$0xff] }
 0x2c3   : > { %v3045_v26 = vshrl.u32 %v2789_v22, 16  ;;  %v2536_v39 = vxor.u32 %v2280_v60, %v2024_v1  ;;  %v2023_v17 = vmul.u32 2246822507, %v1767_v12  ;;  %v11231_v45 = vadd.f32 %v459_v14, %v459_v14 }
 0x2c4   : > { %vm3558_vm12 = vcmp.lt.s32.totalorder %v3302_v52, 0  ;;  %v1290_v7 = vshrl.u32 %v1034_v37, 16  ;;  %v775_v35 = vadd.s32 %v8161_v38, %v11229_v21  ;;  %7960 = vmatprep.subr.bf16.mxu0 %v7959_v6  ;;  %v462_v4 = vmax.f32 %v206_v58, 0.0  ;;  %v11271_v52 = vpop.f32.mrb[7].mxu0 }
 0x2c5   : > { %6530 = vmatprep.mubr.msk.f32.mxu0 %vm3558_vm12, %v11152_v20  ;;  %v3301_v13 = vxor.u32 %v3045_v26, %v2789_v22  ;;  %v2792_v51 = vmul.u32 3266489909, %v2536_v39  ;;  %v2279_v36 = vshrl.u32 %v2023_v17, 13  ;;  %v11249_v19 = vadd.s32 3456, %v8109_v15  ;;  %v4577_v20 = vld [vmem:[%s12567_s2 + $0xf80] sm:$0xff]  ;;  %v236_v22 = vld [vmem:[%s8346_s6 + $0x1c8] sm:$0xff] }
 0x2c6   : > { %v1546_v11 = vxor.u32 %v1290_v7, %v1034_v37  ;;  %v1033_v24 = vxor.u32 %v8174_v44, %v775_v35  ;;  %v11253_v31 = vadd.f32 %v462_v4, %v462_v4  ;;  %v461_v59 = vmax.f32 %v205_v16, 0.0  ;;  %v11280_v39 = vld [vmem:[%s12567_s2 + $0xf00] sm:$0xff] }
 0x2c7   : > { %vm3557_vm13 = vcmp.lt.s32.totalorder %v3301_v13, 0  ;;  %v3048_v1 = vshrl.u32 %v2792_v51, 16  ;;  %v2535_v50 = vxor.u32 %v2279_v36, %v2023_v17  ;;  %v778_v46 = vadd.s32 %v8161_v38, %v11249_v19  ;;  %v11285_v17 = vld [vmem:[%s12567_s2 + $0xf08] sm:$0xff] }
 0x2c8   : > { %6531 = vmatmul.mubr.msk.f32.gmra.mrb[94].mxu0 %vm3557_vm13, %v11168_v55  ;;  %v1802_v43 = vmul.u32 2246822507, %v1546_v11  ;;  %v1289_v3 = vshrl.u32 %v1033_v24, 16  ;;  %v11267_v18 = vadd.s32 3328, %v8109_v15  ;;  %v7991_v58 = vpack.c.bf16 %v4578_v61, %v4577_v20  ;;  %v235_v11 = vld [vmem:[%s8346_s6 + $0x1c0] sm:$0xff] }
 0x2c9   : > { %v3304_v60 = vxor.u32 %v3048_v1, %v2792_v51  ;;  %v2791_v12 = vmul.u32 3266489909, %v2535_v50  ;;  %v1036_v14 = vxor.u32 %v8174_v44, %v778_v46  ;;  %v11275_v26 = vadd.f32 %v461_v59, %v461_v59  ;;  %v11296_v50 = vpop.f32.mrb[6].mxu1  ;;  %v11302_v59 = vld [vmem:[%s12567_s2 + $0xe90] sm:$0xff] }
 0x2ca   : > { %v2058_v37 = vshrl.u32 %v1802_v43, 13  ;;  %v1545_v6 = vxor.u32 %v1289_v3, %v1033_v24  ;;  %v777_v55 = vadd.s32 %v8161_v38, %v11267_v18  ;;  %7992 = vmatprep.subr.bf16.mxu1 %v7991_v58  ;;  %v492_v4 = vmax.f32 %v236_v22, 0.0  ;;  %v11307_v22 = vld [vmem:[%s12567_s2 + $0xe98] sm:$0xff] }
 0x2cb   : > { %vm3560_vm14 = vcmp.lt.s32.totalorder %v3304_v60, 0  ;;  %v3047_v7 = vshrl.u32 %v2791_v12, 16  ;;  %v1292_v35 = vshrl.u32 %v1036_v14, 16  ;;  %v808_v16 = vadd.s32 %v8269_v28, %v11210_v2 }
 0x2cc   : > { %6546 = vmatprep.mubr.msk.f32.mxu1 %vm3560_vm14, %v11185_v30  ;;  %v2314_v13 = vxor.u32 %v2058_v37, %v1802_v43  ;;  %v1801_v51 = vmul.u32 2246822507, %v1545_v6  ;;  %v1035_v36 = vxor.u32 %v8174_v44, %v777_v55  ;;  %v11292_v61 = vadd.f32 %v492_v4, %v492_v4 }
 0x2cd   : > { %v3303_v24 = vxor.u32 %v3047_v7, %v2791_v12  ;;  %v1548_v20 = vxor.u32 %v1292_v35, %v1036_v14  ;;  %v1066_v3 = vxor.u32 %v8174_v44, %v808_v16  ;;  %v491_v12 = vmax.f32 %v235_v11, 0.0  ;;  %v238_v7 = vld [vmem:[%s8346_s6 + $0x1d8] sm:$0xff]  ;;  %v11318_v11 = vpop.f32.mrb[7].mxu1 }
 0x2ce   : > { %v2570_v46 = vmul.u32 3266489909, %v2314_v13  ;;  %v2057_v30 = vshrl.u32 %v1801_v51, 13  ;;  %v1291_v43 = vshrl.u32 %v1035_v36, 16  ;;  %v807_v14 = vadd.s32 %v8269_v28, %v11229_v21  ;;  %12571 = vst [vmem:[#allocation4_spill] sm:$0xff] %v11318_v11 }
 0x2cf   : > { %vm3559_vm15 = vcmp.lt.s32.totalorder %v3303_v24, 0  ;;  %v1804_v60 = vmul.u32 2246822507, %v1548_v20  ;;  %v1322_v55 = vshrl.u32 %v1066_v3, 16  ;;  %v11314_v13 = vadd.f32 %v491_v12, %v491_v12 }
 0x2d0   : > { %6547 = vmatmul.mubr.msk.f32.gmra.mrb[94].mxu1 %vm3559_vm15, %v11197_v54  ;;  %v2826_v58 = vshrl.u32 %v2570_v46, 16  ;;  %v2313_v37 = vxor.u32 %v2057_v30, %v1801_v51  ;;  %v1547_v6 = vxor.u32 %v1291_v43, %v1035_v36  ;;  %v1065_v4 = vxor.u32 %v8174_v44, %v807_v14  ;;  %v4531_v43 = vld [vmem:[%s12567_s2 + $0xe10] sm:$0xff] }
 0x2d1   : > { %v2060_v35 = vshrl.u32 %v1804_v60, 13  ;;  %v7963_v16 = vpack.c.bf16 %v11307_v22, %v11302_v59  ;;  %v1578_v54 = vxor.u32 %v1322_v55, %v1066_v3  ;;  %v494_v36 = vmax.f32 %v238_v7, 0.0  ;;  %v4532_v59 = vld [vmem:[%s12567_s2 + $0xe18] sm:$0xff]  ;;  %v237_v22 = vld [vmem:[%s8346_s6 + $0x1d0] sm:$0xff]  ;;  %v11329_v3 = vpop.f32.mrb[8].mxu0 }
 0x2d2   : > { %v3082_v24 = vxor.u32 %v2826_v58, %v2570_v46  ;;  %v2569_v20 = vmul.u32 3266489909, %v2313_v37  ;;  %v1803_v1 = vmul.u32 2246822507, %v1547_v6  ;;  %v1321_v51 = vshrl.u32 %v1065_v4, 16  ;;  %12572 = vst [vmem:[#allocation5_spill] sm:$0xff] %v11329_v3 }
 0x2d3   : > { %v2316_v25 = vxor.u32 %v2060_v35, %v1804_v60  ;;  %v810_v30 = vadd.s32 %v8269_v28, %v11249_v19  ;;  %v1834_v14 = vmul.u32 2246822507, %v1578_v54  ;;  %v11333_v6 = vadd.f32 %v494_v36, %v494_v36  ;;  %v11335_v55 = vpop.f32.mrb[9].mxu0  ;;  %v11340_v54 = vld [vmem:[%s12567_s2 + $0xf90] sm:$0xff] }
 0x2d4   : > { %vm3338_vm0 = vcmp.lt.s32.totalorder %v3082_v24, 0  ;;  %v2825_v46 = vshrl.u32 %v2569_v20, 16  ;;  %v2059_v12 = vshrl.u32 %v1803_v1, 13  ;;  %v1577_v58 = vxor.u32 %v1321_v51, %v1065_v4  ;;  %12573 = vst [vmem:[#allocation6_spill] sm:$0xff] %v11335_v55  ;;  %v4580_v51 = vld [vmem:[%s12567_s2 + $0xf98] sm:$0xff] }
 0x2d5   : > { %6548 = vmatprep.mubr.msk.f32.mxu0 %vm3338_vm0, %v11221_v42  ;;  %v2572_v60 = vmul.u32 3266489909, %v2316_v25  ;;  %v1068_v37 = vxor.u32 %v8174_v44, %v810_v30  ;;  %v2090_v11 = vshrl.u32 %v1834_v14, 13  ;;  %v7965_v24 = vpack.c.bf16 %v4532_v59, %v4531_v43 }
 0x2d6   : > { %v3081_v7 = vxor.u32 %v2825_v46, %v2569_v20  ;;  %v2315_v35 = vxor.u32 %v2059_v12, %v1803_v1  ;;  %v1833_v42 = vmul.u32 2246822507, %v1577_v58  ;;  %v493_v4 = vmax.f32 %v237_v22, 0.0  ;;  %v268_v20 = vld [vmem:[%s8346_s6 + $0x2c8] sm:$0xff] }
 0x2d7   : > { %v2828_v3 = vshrl.u32 %v2572_v60, 16  ;;  %v1324_v25 = vshrl.u32 %v1068_v37, 16  ;;  %v2346_v30 = vxor.u32 %v2090_v11, %v1834_v14  ;;  %v809_v1 = vadd.s32 %v8269_v28, %v11267_v18 }
 0x2d8   : > { %vm3337_vm1 = vcmp.lt.s32.totalorder %v3081_v7, 0  ;;  %v2571_v36 = vmul.u32 3266489909, %v2315_v35  ;;  %v2089_v59 = vshrl.u32 %v1833_v42, 13  ;;  %v11349_v12 = vadd.f32 %v493_v4, %v493_v4  ;;  %v267_v4 = vld [vmem:[%s8346_s6 + $0x2c0] sm:$0xff] }
 0x2d9   : > { %6549 = vmatmul.mubr.msk.f32.vlgmr.msra.gmra.mrb[96].mxu0 %vm3337_vm1, %v11231_v45  ;;  %v3084_v43 = vxor.u32 %v2828_v3, %v2572_v60  ;;  %v1580_v46 = vxor.u32 %v1324_v25, %v1068_v37  ;;  %v12574_v22 = vpack.c.bf16 %v11241_v41, %v11236_v9  ;;  %v2602_v55 = vmul.u32 3266489909, %v2346_v30  ;;  %v4563_v45 = vld [vmem:[%s12567_s2 + $0xf10] sm:$0xff]  ;;  %v4564_v3 = vld [vmem:[%s12567_s2 + $0xf18] sm:$0xff]  ;;  %v11362_v60 = vpop.f32.mrb[8].mxu1 }
 0x2da   : > { %v2827_v58 = vshrl.u32 %v2571_v36, 16  ;;  %v1067_v11 = vxor.u32 %v8174_v44, %v809_v1  ;;  %v7995_v14 = vpack.c.bf16 %v4580_v51, %v11340_v54  ;;  %v2345_v9 = vxor.u32 %v2089_v59, %v1833_v42  ;;  %v11368_v51 = vpop.f32.mrb[9].mxu1 }
 0x2db   : > { %7962 = vmatpush3.bf16.msra.mxu0 %v12574_v22  ;;  %vm3340_vm2 = vcmp.lt.s32.totalorder %v3084_v43, 0  ;;  %v1836_v41 = vmul.u32 2246822507, %v1580_v46  ;;  %v524_v37 = vmax.f32 %v268_v20, 0.0  ;;  %v2858_v35 = vshrl.u32 %v2602_v55, 16 }
 0x2dc   : > { %7964 = vmatprep.subr.bf16.mxu0 %v7963_v16  ;;  %6564 = vmatprep.mubr.msk.f32.mxu1 %vm3340_vm2, %v11253_v31  ;;  %v3083_v7 = vxor.u32 %v2827_v58, %v2571_v36  ;;  %v1323_v54 = vshrl.u32 %v1067_v11, 16  ;;  %v840_v25 = vadd.s32 %v8592_v29, %v11210_v2  ;;  %v2601_v30 = vmul.u32 3266489909, %v2345_v9  ;;  %v4549_v16 = vld [vmem:[%s12567_s2 + $0xea0] sm:$0xff]  ;;  %v4550_v31 = vld [vmem:[%s12567_s2 + $0xea8] sm:$0xff] }
 0x2dd   : > { %v2092_v1 = vshrl.u32 %v1836_v41, 13  ;;  %v11370_v22 = vadd.f32 %v524_v37, %v524_v37  ;;  %v7997_v42 = vpack.c.bf16 %v4564_v3, %v4563_v45  ;;  %v3114_v36 = vxor.u32 %v2858_v35, %v2602_v55  ;;  %v270_v3 = vld [vmem:[%s8346_s6 + $0x2d8] sm:$0xff]  ;;  %v11396_v35 = vpop.f32.mrb[10].mxu0 }
 0x2de   : > { %vm3339_vm3 = vcmp.lt.s32.totalorder %v3083_v7, 0  ;;  %v1579_v20 = vxor.u32 %v1323_v54, %v1067_v11  ;;  %v1098_v43 = vxor.u32 %v8174_v44, %v840_v25  ;;  %v2857_v59 = vshrl.u32 %v2601_v30, 16  ;;  %v4534_v11 = vld [vmem:[%s12567_s2 + $0xe28] sm:$0xff] }
 0x2df   : > { %7966 = vmatpush3.bf16.msra.mxu0 %v7965_v24  ;;  %6565 = vmatmul.mubr.msk.f32.vlgmr.msra.gmra.mrb[96].mxu1 %vm3339_vm3, %v11275_v26  ;;  %v2348_v46 = vxor.u32 %v2092_v1, %v1836_v41  ;;  %v523_v58 = vmax.f32 %v267_v4, 0.0  ;;  %v839_v45 = vadd.s32 %v8592_v29, %v11229_v21  ;;  %vm3370_vm4 = vcmp.lt.s32.totalorder %v3114_v36, 0  ;;  %v4533_v26 = vld [vmem:[%s12567_s2 + $0xe20] sm:$0xff]  ;;  %v4582_v36 = vld [vmem:[%s12567_s2 + $0xfa8] sm:$0xff] }
 0x2e0   : > { %v12575_v9 = vpack.c.bf16 %v11285_v17, %v11280_v39  ;;  %v1835_v37 = vmul.u32 2246822507, %v1579_v20  ;;  %v1354_v55 = vshrl.u32 %v1098_v43, 16  ;;  %v7967_v24 = vpack.c.bf16 %v4550_v31, %v4549_v16  ;;  %6550 = vmatprep.mubr.msk.f32.mxu0 %vm3370_vm4, %v11292_v61  ;;  %v269_v16 = vld [vmem:[%s8346_s6 + $0x2d0] sm:$0xff] }
 0x2e1   : > { %v3113_v41 = vxor.u32 %v2857_v59, %v2601_v30  ;;  %v2604_v7 = vmul.u32 3266489909, %v2348_v46  ;;  %v1097_v39 = vxor.u32 %v8174_v44, %v839_v45  ;;  %v11394_v17 = vadd.f32 %v523_v58, %v523_v58  ;;  %v11411_v58 = vpop.f32.mrb[11].mxu0 }
 0x2e2   : > { %7994 = vmatpush3.bf16.msra.mxu1 %v12575_v9  ;;  %v2091_v54 = vshrl.u32 %v1835_v37, 13  ;;  %v1610_v25 = vxor.u32 %v1354_v55, %v1098_v43  ;;  %7968 = vmatprep.subr.bf16.mxu0 %v7967_v24  ;;  %v526_v4 = vmax.f32 %v270_v3, 0.0  ;;  %v842_v1 = vadd.s32 %v8592_v29, %v11249_v19  ;;  %v300_v24 = vld [vmem:[%s8346_s6 + $0x3c8] sm:$0xff] }
 0x2e3   : > { %7996 = vmatprep.subr.bf16.mxu1 %v7995_v14  ;;  %vm3369_vm5 = vcmp.lt.s32.totalorder %v3113_v41, 0  ;;  %v2860_v31 = vshrl.u32 %v2604_v7, 16  ;;  %v1353_v61 = vshrl.u32 %v1097_v39, 16  ;;  %v7969_v30 = vpack.c.bf16 %v4534_v11, %v4533_v26  ;;  %v4581_v14 = vld [vmem:[%s12567_s2 + $0xfa0] sm:$0xff]  ;;  %v4566_v41 = vld [vmem:[%s12567_s2 + $0xf28] sm:$0xff] }
 0x2e4   : > { %6551 = vmatmul.mubr.msk.f32.gmra.mrb[98].mxu0 %vm3369_vm5, %v11314_v13  ;;  %v2347_v20 = vxor.u32 %v2091_v54, %v1835_v37  ;;  %v1866_v43 = vmul.u32 2246822507, %v1610_v25  ;;  %v1100_v59 = vxor.u32 %v8174_v44, %v842_v1  ;;  %v11409_v46 = vadd.f32 %v526_v4, %v526_v4 }
 0x2e5   : > { %v3116_v45 = vxor.u32 %v2860_v31, %v2604_v7  ;;  %v1609_v3 = vxor.u32 %v1353_v61, %v1097_v39  ;;  %7970 = vmatpush3.bf16.msra.mxu0 %v7969_v30  ;;  %v525_v9 = vmax.f32 %v269_v16, 0.0  ;;  %v841_v55 = vadd.s32 %v8592_v29, %v11267_v18  ;;  %v299_v31 = vld [vmem:[%s8346_s6 + $0x3c0] sm:$0xff] }
 0x2e6   : > { %7998 = vmatpush3.bf16.msra.mxu1 %v7997_v42  ;;  %v2603_v26 = vmul.u32 3266489909, %v2347_v20  ;;  %v2122_v13 = vshrl.u32 %v1866_v43, 13  ;;  %v1356_v37 = vshrl.u32 %v1100_v59, 16  ;;  %v7999_v11 = vpack.c.bf16 %v4582_v36, %v4581_v14  ;;  %v4565_v42 = vld [vmem:[%s12567_s2 + $0xf20] sm:$0xff]  ;;  %v11429_v20 = vpop.f32.mrb[10].mxu1 }
 0x2e7   : > { %vm3372_vm6 = vcmp.lt.s32.totalorder %v3116_v45, 0  ;;  %v1865_v7 = vmul.u32 2246822507, %v1609_v3  ;;  %v1099_v39 = vxor.u32 %v8174_v44, %v841_v55  ;;  %v11423_v54 = vadd.f32 %v525_v9, %v525_v9  ;;  %12576 = vst [vmem:[#allocation7_spill] sm:$0xff] %v11429_v20  ;;  %v4535_v20 = vld [vmem:[%s12567_s2 + $0xe30] sm:$0xff] }
 0x2e8   : > { %6566 = vmatprep.mubr.msk.f32.mxu1 %vm3372_vm6, %v11333_v6  ;;  %v2859_v25 = vshrl.u32 %v2603_v26, 16  ;;  %v2378_v4 = vxor.u32 %v2122_v13, %v1866_v43  ;;  %v1612_v1 = vxor.u32 %v1356_v37, %v1100_v59  ;;  %8000 = vmatprep.subr.bf16.mxu1 %v7999_v11  ;;  %v556_v16 = vmax.f32 %v300_v24, 0.0  ;;  %v4551_v13 = vld [vmem:[%s12567_s2 + $0xeb0] sm:$0xff]  ;;  %v4552_v37 = vld [vmem:[%s12567_s2 + $0xeb8] sm:$0xff] }
 0x2e9   : > { %v2121_v61 = vshrl.u32 %v1865_v7, 13  ;;  %v1355_v30 = vshrl.u32 %v1099_v39, 16  ;;  %v872_v14 = vadd.s32 %v8632_v0, %v11210_v2  ;;  %v8001_v36 = vpack.c.bf16 %v4566_v41, %v4565_v42 }
 0x2ea   : > { %v3115_v45 = vxor.u32 %v2859_v25, %v2603_v26  ;;  %v2634_v3 = vmul.u32 3266489909, %v2378_v4  ;;  %v1868_v9 = vmul.u32 2246822507, %v1612_v1  ;;  %v11431_v55 = vadd.f32 %v556_v16, %v556_v16  ;;  %v11440_v26 = vpop.f32.mrb[11].mxu1 }
 0x2eb   : > { %v2377_v6 = vxor.u32 %v2121_v61, %v1865_v7  ;;  %v1611_v43 = vxor.u32 %v1355_v30, %v1099_v39  ;;  %v1130_v59 = vxor.u32 %v8174_v44, %v872_v14  ;;  %8002 = vmatpush3.bf16.msra.mxu1 %v8001_v36  ;;  %v555_v24 = vmax.f32 %v299_v31, 0.0  ;;  %12577 = vst [vmem:[#allocation8_spill] sm:$0xff] %v11440_v26  ;;  %v302_v7 = vld [vmem:[%s8346_s6 + $0x3d8] sm:$0xff] }
 0x2ec   : > { %vm3371_vm7 = vcmp.lt.s32.totalorder %v3115_v45, 0  ;;  %v2890_v11 = vshrl.u32 %v2634_v3, 16  ;;  %v2124_v42 = vshrl.u32 %v1868_v9, 13  ;;  %v871_v41 = vadd.s32 %v8632_v0, %v11229_v21 }
 0x2ed   : > { %6567 = vmatmul.mubr.msk.f32.gmra.mrb[98].mxu1 %vm3371_vm7, %v11349_v12  ;;  %v2633_v39 = vmul.u32 3266489909, %v2377_v6  ;;  %v1867_v25 = vmul.u32 2246822507, %v1611_v43  ;;  %v1386_v4 = vshrl.u32 %v1130_v59, 16  ;;  %v11446_v1 = vadd.f32 %v555_v24, %v555_v24  ;;  %v4536_v12 = vld [vmem:[%s12567_s2 + $0xe38] sm:$0xff] }
 0x2ee   : > { %v3146_v16 = vxor.u32 %v2890_v11, %v2634_v3  ;;  %v2380_v31 = vxor.u32 %v2124_v42, %v1868_v9  ;;  %v1129_v61 = vxor.u32 %v8174_v44, %v871_v41  ;;  %v7971_v30 = vpack.c.bf16 %v4552_v37, %v4551_v13  ;;  %v301_v9 = vld [vmem:[%s8346_s6 + $0x3d0] sm:$0xff]  ;;  %v11458_v24 = vpop.f32.mrb[12].mxu0 }
 0x2ef   : > { %v2889_v14 = vshrl.u32 %v2633_v39, 16  ;;  %v2123_v36 = vshrl.u32 %v1867_v25, 13  ;;  %v1642_v45 = vxor.u32 %v1386_v4, %v1130_v59  ;;  %v558_v26 = vmax.f32 %v302_v7, 0.0  ;;  %12578 = vst [vmem:[#allocation9_spill] sm:$0xff] %v11458_v24 }
 0x2f0   : > { %vm3402_vm8 = vcmp.lt.s32.totalorder %v3146_v16, 0  ;;  %v2636_v6 = vmul.u32 3266489909, %v2380_v31  ;;  %v1385_v43 = vshrl.u32 %v1129_v61, 16  ;;  %7972 = vmatprep.subr.bf16.mxu0 %v7971_v30  ;;  %v874_v3 = vadd.s32 %v8632_v0, %v11249_v19  ;;  %v4583_v16 = vld [vmem:[%s12567_s2 + $0xfb0] sm:$0xff]  ;;  %v4584_v31 = vld [vmem:[%s12567_s2 + $0xfb8] sm:$0xff] }
 0x2f1   : > { %6552 = vmatprep.mubr.msk.f32.mxu0 %vm3402_vm8, %v11370_v22  ;;  %v3145_v59 = vxor.u32 %v2889_v14, %v2633_v39  ;;  %v2379_v13 = vxor.u32 %v2123_v36, %v1867_v25  ;;  %v1898_v37 = vmul.u32 2246822507, %v1642_v45  ;;  %v11461_v11 = vadd.f32 %v558_v26, %v558_v26  ;;  %v11470_v22 = vpop.f32.mrb[13].mxu0  ;;  %v332_v36 = vld [vmem:[%s8346_s6 + $0x4c8] sm:$0xff] }
 0x2f2   : > { %v2892_v42 = vshrl.u32 %v2636_v6, 16  ;;  %v1641_v41 = vxor.u32 %v1385_v43, %v1129_v61  ;;  %v1132_v7 = vxor.u32 %v8174_v44, %v874_v3  ;;  %v7973_v4 = vpack.c.bf16 %v4536_v12, %v4535_v20  ;;  %12579 = vst [vmem:[#allocation10_spill] sm:$0xff] %v11470_v22 }
 0x2f3   : > { %vm3401_vm9 = vcmp.lt.s32.totalorder %v3145_v59, 0  ;;  %v2635_v39 = vmul.u32 3266489909, %v2379_v13  ;;  %v2154_v26 = vshrl.u32 %v1898_v37, 13  ;;  %v557_v25 = vmax.f32 %v301_v9, 0.0  ;;  %v4567_v9 = vld [vmem:[%s12567_s2 + $0xf30] sm:$0xff] }
 0x2f4   : > { %6553 = vmatmul.mubr.msk.f32.gmra.mrb[100].mxu0 %vm3401_vm9, %v11394_v17  ;;  %v3148_v61 = vxor.u32 %v2892_v42, %v2636_v6  ;;  %v1897_v30 = vmul.u32 2246822507, %v1641_v41  ;;  %v1388_v14 = vshrl.u32 %v1132_v7, 16  ;;  %v873_v20 = vadd.s32 %v8632_v0, %v11267_v18  ;;  %v4568_v17 = vld [vmem:[%s12567_s2 + $0xf38] sm:$0xff]  ;;  %v11485_v42 = vpop.f32.mrb[12].mxu1 }
 0x2f5   : > { %v2891_v45 = vshrl.u32 %v2635_v39, 16  ;;  %v2410_v12 = vxor.u32 %v2154_v26, %v1898_v37  ;;  %7974 = vmatpush3.bf16.msra.mxu0 %v7973_v4  ;;  %v11476_v43 = vadd.f32 %v557_v25, %v557_v25  ;;  %v8003_v3 = vpack.c.bf16 %v4584_v31, %v4583_v16  ;;  %12580 = vst [vmem:[#allocation11_spill] sm:$0xff] %v11485_v42  ;;  %v331_v31 = vld [vmem:[%s8346_s6 + $0x4c0] sm:$0xff] }
 0x2f6   : > { %vm3404_vm10 = vcmp.lt.s32.totalorder %v3148_v61, 0  ;;  %v2153_v6 = vshrl.u32 %v1897_v30, 13  ;;  %v1644_v59 = vxor.u32 %v1388_v14, %v1132_v7  ;;  %v1131_v13 = vxor.u32 %v8174_v44, %v873_v20  ;;  %v4553_v7 = vld [vmem:[%s12567_s2 + $0xec0] sm:$0xff] }
 0x2f7   : > { %6568 = vmatprep.mubr.msk.f32.mxu1 %vm3404_vm10, %v11409_v46  ;;  %v3147_v37 = vxor.u32 %v2891_v45, %v2635_v39  ;;  %v2666_v41 = vmul.u32 3266489909, %v2410_v12  ;;  %8004 = vmatprep.subr.bf16.mxu1 %v8003_v3  ;;  %v588_v4 = vmax.f32 %v332_v36, 0.0  ;;  %v904_v16 = vadd.s32 %v8697_v47, %v11210_v2  ;;  %v4554_v46 = vld [vmem:[%s12567_s2 + $0xec8] sm:$0xff]  ;;  %v11500_v36 = vpop.f32.mrb[13].mxu1 }
 0x2f8   : > { %v2409_v26 = vxor.u32 %v2153_v6, %v1897_v30  ;;  %v1900_v25 = vmul.u32 2246822507, %v1644_v59  ;;  %v1387_v61 = vshrl.u32 %v1131_v13, 16  ;;  %v8005_v22 = vpack.c.bf16 %v4568_v17, %v4567_v9  ;;  %12581 = vst [vmem:[#allocation12_spill] sm:$0xff] %v11500_v36  ;;  %v334_v9 = vld [vmem:[%s8346_s6 + $0x4d8] sm:$0xff] }
 0x2f9   : > { %vm3403_vm11 = vcmp.lt.s32.totalorder %v3147_v37, 0  ;;  %v2922_v39 = vshrl.u32 %v2666_v41, 16  ;;  %v1162_v14 = vxor.u32 %v8174_v44, %v904_v16  ;;  %v11498_v20 = vadd.f32 %v588_v4, %v588_v4 }
 0x2fa   : > { %6569 = vmatmul.mubr.msk.f32.gmra.mrb[100].mxu1 %vm3403_vm11, %v11423_v54  ;;  %v2665_v30 = vmul.u32 3266489909, %v2409_v26  ;;  %v2156_v45 = vshrl.u32 %v1900_v25, 13  ;;  %v1643_v12 = vxor.u32 %v1387_v61, %v1131_v13  ;;  %v587_v3 = vmax.f32 %v331_v31, 0.0  ;;  %v4537_v54 = vld [vmem:[%s12567_s2 + $0xe40] sm:$0xff]  ;;  %v4538_v13 = vld [vmem:[%s12567_s2 + $0xe48] sm:$0xff] }
 0x2fb   : > { %v3178_v17 = vxor.u32 %v2922_v39, %v2666_v41  ;;  %v1418_v6 = vshrl.u32 %v1162_v14, 16  ;;  %8006 = vmatpush3.bf16.msra.mxu1 %v8005_v22  ;;  %v903_v59 = vadd.s32 %v8697_v47, %v11229_v21  ;;  %v7975_v37 = vpack.c.bf16 %v4554_v46, %v4553_v7  ;;  %v11515_v26 = vpop.f32.mrb[14].mxu0  ;;  %v333_v39 = vld [vmem:[%s8346_s6 + $0x4d0] sm:$0xff] }
 0x2fc   : > { %v2921_v42 = vshrl.u32 %v2665_v30, 16  ;;  %v2412_v16 = vxor.u32 %v2156_v45, %v1900_v25  ;;  %v1899_v4 = vmul.u32 2246822507, %v1643_v12  ;;  %v11506_v24 = vadd.f32 %v587_v3, %v587_v3  ;;  %12582 = vst [vmem:[#allocation13_spill] sm:$0xff] %v11515_v26 }
 0x2fd   : > { %vm3434_vm12 = vcmp.lt.s32.totalorder %v3178_v17, 0  ;;  %v1674_v22 = vxor.u32 %v1418_v6, %v1162_v14  ;;  %v1161_v41 = vxor.u32 %v8174_v44, %v903_v59  ;;  %7976 = vmatprep.subr.bf16.mxu0 %v7975_v37  ;;  %v590_v31 = vmax.f32 %v334_v9, 0.0  ;;  %v4585_v9 = vld [vmem:[%s12567_s2 + $0xfc0] sm:$0xff]  ;;  %v11530_v6 = vpop.f32.mrb[15].mxu0 }
 0x2fe   : > { %6554 = vmatprep.mubr.msk.f32.mxu0 %vm3434_vm12, %v11431_v55  ;;  %v3177_v25 = vxor.u32 %v2921_v42, %v2665_v30  ;;  %v2668_v61 = vmul.u32 3266489909, %v2412_v16  ;;  %v2155_v7 = vshrl.u32 %v1899_v4, 13  ;;  %v906_v46 = vadd.s32 %v8697_v47, %v11249_v19  ;;  %v4586_v55 = vld [vmem:[%s12567_s2 + $0xfc8] sm:$0xff]  ;;  %12583 = vst [vmem:[#allocation14_spill] sm:$0xff] %v11530_v6 }
 0x2ff   : > { %v1930_v45 = vmul.u32 2246822507, %v1674_v22  ;;  %v1417_v12 = vshrl.u32 %v1161_v41, 16  ;;  %v11521_v3 = vadd.f32 %v590_v31, %v590_v31  ;;  %v7977_v14 = vpack.c.bf16 %v4538_v13, %v4537_v54  ;;  %v364_v13 = vld [vmem:[%s8346_s6 + $0x5c8] sm:$0xff] }
 0x300   : > { %vm3433_vm13 = vcmp.lt.s32.totalorder %v3177_v25, 0  ;;  %v2924_v42 = vshrl.u32 %v2668_v61, 16  ;;  %v2411_v30 = vxor.u32 %v2155_v7, %v1899_v4  ;;  %v1164_v17 = vxor.u32 %v8174_v44, %v906_v46 }
 0x301   : > { %6555 = vmatmul.mubr.msk.f32.gmra.mrb[102].mxu0 %vm3433_vm13, %v11446_v1  ;;  %v2186_v59 = vshrl.u32 %v1930_v45, 13  ;;  %v1673_v37 = vxor.u32 %v1417_v12, %v1161_v41  ;;  %v589_v16 = vmax.f32 %v333_v39, 0.0  ;;  %v905_v54 = vadd.s32 %v8697_v47, %v11267_v18  ;;  %v4569_v1 = vld [vmem:[%s12567_s2 + $0xf40] sm:$0xff]  ;;  %v4570_v41 = vld [vmem:[%s12567_s2 + $0xf48] sm:$0xff] }
 0x302   : > { %v3180_v22 = vxor.u32 %v2924_v42, %v2668_v61  ;;  %v2667_v31 = vmul.u32 3266489909, %v2411_v30  ;;  %v1420_v26 = vshrl.u32 %v1164_v17, 16  ;;  %7978 = vmatpush3.bf16.msra.mxu0 %v7977_v14  ;;  %v8007_v25 = vpack.c.bf16 %v4586_v55, %v4585_v9  ;;  %v363_v42 = vld [vmem:[%s8346_s6 + $0x5c0] sm:$0xff]  ;;  %v11549_v30 = vpop.f32.mrb[14].mxu1 }
 0x303   : > { %v2442_v36 = vxor.u32 %v2186_v59, %v1930_v45  ;;  %v1929_v4 = vmul.u32 2246822507, %v1673_v37  ;;  %v1163_v7 = vxor.u32 %v8174_v44, %v905_v54  ;;  %v11537_v46 = vadd.f32 %v589_v16, %v589_v16  ;;  %12584 = vst [vmem:[#allocation15_spill] sm:$0xff] %v11549_v30 }
 0x304   : > { %vm3436_vm14 = vcmp.lt.s32.totalorder %v3180_v22, 0  ;;  %v2923_v61 = vshrl.u32 %v2667_v31, 16  ;;  %v1676_v39 = vxor.u32 %v1420_v26, %v1164_v17  ;;  %8008 = vmatprep.subr.bf16.mxu1 %v8007_v25  ;;  %v620_v12 = vmax.f32 %v364_v13, 0.0  ;;  %v11559_v22 = vpop.f32.mrb[15].mxu1 }
 0x305   : > { %6570 = vmatprep.mubr.msk.f32.mxu1 %vm3436_vm14, %v11461_v11  ;;  %v2698_v45 = vmul.u32 3266489909, %v2442_v36  ;;  %v2185_v14 = vshrl.u32 %v1929_v4, 13  ;;  %v1419_v9 = vshrl.u32 %v1163_v7, 16  ;;  %v936_v55 = vadd.s32 %v8753_v57, %v11210_v2  ;;  %v11557_v36 = vld [vmem:[%s12568_s3] ss:$0 sm:$0xff] }
 0x306   : > { %v3179_v59 = vxor.u32 %v2923_v61, %v2667_v31  ;;  %v1932_v37 = vmul.u32 2246822507, %v1676_v39  ;;  %v11551_v16 = vadd.f32 %v620_v12, %v620_v12  ;;  %v8009_v54 = vpack.c.bf16 %v4570_v41, %v4569_v1  ;;  %12585 = vst [vmem:[#allocation16_spill] sm:$0xff] %v11559_v22 }
 0x307   : > { %v2954_v26 = vshrl.u32 %v2698_v45, 16  ;;  %v2441_v17 = vxor.u32 %v2185_v14, %v1929_v4  ;;  %v1675_v13 = vxor.u32 %v1419_v9, %v1163_v7  ;;  %v1194_v11 = vxor.u32 %v8174_v44, %v936_v55  ;;  %v4555_v4 = vld [vmem:[%s12567_s2 + $0xed0] sm:$0xff]  ;;  %v366_v7 = vld [vmem:[%s8346_s6 + $0x5d8] sm:$0xff] }
 0x308   : > { %vm3435_vm15 = vcmp.lt.s32.totalorder %v3179_v59, 0  ;;  %v2188_v25 = vshrl.u32 %v1932_v37, 13  ;;  %8010 = vmatpush3.bf16.msra.mxu1 %v8009_v54  ;;  %v6649_v31 = vadd.f32 %v11058_v5, %v11043_v10  ;;  %v619_v61 = vmax.f32 %v363_v42, 0.0  ;;  %v4556_v14 = vld [vmem:[%s12567_s2 + $0xed8] sm:$0xff]  ;;  %v4539_v59 = vld [vmem:[%s12567_s2 + $0xe50] sm:$0xff] }
 0x309   : > { %6571 = vmatmul.mubr.msk.f32.gmra.mrb[102].mxu1 %vm3435_vm15, %v11476_v43  ;;  %v3210_v1 = vxor.u32 %v2954_v26, %v2698_v45  ;;  %v2697_v41 = vmul.u32 3266489909, %v2441_v17  ;;  %v1931_v39 = vmul.u32 2246822507, %v1675_v13  ;;  %v1450_v12 = vshrl.u32 %v1194_v11, 16 }
 0x30a   : > { %v2444_v9 = vxor.u32 %v2188_v25, %v1932_v37  ;;  %v4667_v55 = vadd.f32 %v6649_v31, %v11557_v36  ;;  %v935_v10 = vadd.s32 %v8753_v57, %v11229_v21  ;;  %v11574_v5 = vadd.f32 %v619_v61, %v619_v61  ;;  %v4540_v37 = vld [vmem:[%s12567_s2 + $0xe58] sm:$0xff]  ;;  %v11584_v25 = vpop.f32.mrb[16].mxu0 }
 0x30b   : > { %vm3466_vm0 = vcmp.lt.s32.totalorder %v3210_v1, 0  ;;  %v2953_v42 = vshrl.u32 %v2697_v41, 16  ;;  %v2187_v43 = vshrl.u32 %v1931_v39, 13  ;;  %v1706_v45 = vxor.u32 %v1450_v12, %v1194_v11  ;;  %v365_v12 = vld [vmem:[%s8346_s6 + $0x5d0] sm:$0xff] }
 0x30c   : > { %6556 = vmatprep.mubr.msk.f32.mxu0 %vm3466_vm0, %v11498_v20  ;;  %v2700_v54 = vmul.u32 3266489909, %v2444_v9  ;;  %v1193_v26 = vxor.u32 %v8174_v44, %v935_v10  ;;  %v7979_v17 = vpack.c.bf16 %v4556_v14, %v4555_v4  ;;  %v622_v13 = vmax.f32 %v366_v7, 0.0  ;;  %v11591_v9 = vpop.f32.mrb[17].mxu0 }
 0x30d   : > { %v3209_v31 = vxor.u32 %v2953_v42, %v2697_v41  ;;  %v2443_v61 = vxor.u32 %v2187_v43, %v1931_v39  ;;  %v1962_v11 = vmul.u32 2246822507, %v1706_v45  ;;  %v938_v1 = vadd.s32 %v8753_v57, %v11249_v19 }
 0x30e   : > { %v2956_v22 = vshrl.u32 %v2700_v54, 16  ;;  %v1449_v30 = vshrl.u32 %v1193_v26, 16  ;;  %7980 = vmatprep.subr.bf16.mxu0 %v7979_v17  ;;  %v11589_v6 = vadd.f32 %v622_v13, %v622_v13  ;;  %v7981_v20 = vpack.c.bf16 %v4540_v37, %v4539_v59  ;;  %v4587_v37 = vld [vmem:[%s12567_s2 + $0xfd0] sm:$0xff] }
 0x30f   : > { %vm3465_vm1 = vcmp.lt.s32.totalorder %v3209_v31, 0  ;;  %v2699_v4 = vmul.u32 3266489909, %v2443_v61  ;;  %v2218_v7 = vshrl.u32 %v1962_v11, 13  ;;  %v1196_v41 = vxor.u32 %v8174_v44, %v938_v1 }
 0x310   : > { %6557 = vmatmul.mubr.msk.f32.gmra.mrb[104].mxu0 %vm3465_vm1, %v11506_v24  ;;  %v3212_v39 = vxor.u32 %v2956_v22, %v2700_v54  ;;  %v1705_v14 = vxor.u32 %v1449_v30, %v1193_v26  ;;  %v6705_v10 = vadd.f32 %v11092_v53, %v11077_v49  ;;  %v621_v42 = vmax.f32 %v365_v12, 0.0  ;;  %v4588_v24 = vld [vmem:[%s12567_s2 + $0xfd8] sm:$0xff]  ;;  %v396_v30 = vld [vmem:[%s8346_s6 + $0x6c8] sm:$0xff]  ;;  %v11610_v54 = vpop.f32.mrb[16].mxu1 }
 0x311   : > { %v2955_v43 = vshrl.u32 %v2699_v4, 16  ;;  %v2474_v45 = vxor.u32 %v2218_v7, %v1962_v11  ;;  %v1452_v17 = vshrl.u32 %v1196_v41, 16  ;;  %7982 = vmatpush3.bf16.msra.mxu0 %v7981_v20  ;;  %v937_v59 = vadd.s32 %v8753_v57, %v11267_v18  ;;  %v395_v11 = vld [vmem:[%s8346_s6 + $0x6c0] sm:$0xff] }
 0x312   : > { %vm3468_vm2 = vcmp.lt.s32.totalorder %v3212_v39, 0  ;;  %v1961_v49 = vmul.u32 2246822507, %v1705_v14  ;;  %v11606_v53 = vadd.f32 %v6705_v10, %v4667_v55  ;;  %v11608_v22 = vadd.f32 %v621_v42, %v621_v42  ;;  %v4571_v55 = vld [vmem:[%s12567_s2 + $0xf50] sm:$0xff]  ;;  %v11623_v14 = vpop.f32.mrb[17].mxu1 }
 0x313   : > { %6572 = vmatprep.mubr.msk.f32.mxu1 %vm3468_vm2, %v11521_v3  ;;  %v3211_v26 = vxor.u32 %v2955_v43, %v2699_v4  ;;  %v2730_v13 = vmul.u32 3266489909, %v2474_v45  ;;  %v1708_v31 = vxor.u32 %v1452_v17, %v1196_v41  ;;  %v1195_v61 = vxor.u32 %v8174_v44, %v937_v59  ;;  %v4572_v3 = vld [vmem:[%s12567_s2 + $0xf58] sm:$0xff] }
 0x314   : > { %v2217_v1 = vshrl.u32 %v1961_v49, 13  ;;  %v8011_v12 = vpack.c.bf16 %v4588_v24, %v4587_v37  ;;  %v652_v20 = vmax.f32 %v396_v30, 0.0  ;;  %v968_v7 = vadd.s32 %v8817_v27, %v11210_v2 }
 0x315   : > { %vm3467_vm3 = vcmp.lt.s32.totalorder %v3211_v26, 0  ;;  %v2986_v4 = vshrl.u32 %v2730_v13, 16  ;;  %v1964_v41 = vmul.u32 2246822507, %v1708_v31  ;;  %v1451_v39 = vshrl.u32 %v1195_v61, 16 }
 0x316   : > { %6573 = vmatmul.mubr.msk.f32.gmra.mrb[104].mxu1 %vm3467_vm3, %v11537_v46  ;;  %v2473_v10 = vxor.u32 %v2217_v1, %v1961_v49  ;;  %8012 = vmatprep.subr.bf16.mxu1 %v8011_v12  ;;  %v1226_v42 = vxor.u32 %v8174_v44, %v968_v7  ;;  %v11627_v43 = vadd.f32 %v652_v20, %v652_v20  ;;  %v651_v45 = vmax.f32 %v395_v11, 0.0  ;;  %v4557_v49 = vld [vmem:[%s12567_s2 + $0xee0] sm:$0xff]  ;;  %v4558_v11 = vld [vmem:[%s12567_s2 + $0xee8] sm:$0xff]  ;;  %v11642_v20 = vpop.f32.mrb[18].mxu0 }
 0x317   : > { %v3242_v17 = vxor.u32 %v2986_v4, %v2730_v13  ;;  %v2220_v59 = vshrl.u32 %v1964_v41, 13  ;;  %v1707_v37 = vxor.u32 %v1451_v39, %v1195_v61  ;;  %v8013_v24 = vpack.c.bf16 %v4572_v3, %v4571_v55  ;;  %v398_v13 = vld [vmem:[%s8346_s6 + $0x6d8] sm:$0xff]  ;;  %12586 = vst [vmem:[#allocation17_spill] sm:$0xff] %v11642_v20  ;;  %v4541_v3 = vld [vmem:[%s12567_s2 + $0xe60] sm:$0xff]  ;;  %v4542_v4 = vld [vmem:[%s12567_s2 + $0xe68] sm:$0xff] }
 0x318   : > { %v2729_v30 = vmul.u32 3266489909, %v2473_v10  ;;  %v1482_v26 = vshrl.u32 %v1226_v42, 16  ;;  %v6652_v31 = vadd.f32 %v11122_v48, %v11107_v33  ;;  %v967_v46 = vadd.s32 %v8817_v27, %v11229_v21 }
 0x319   : > { %vm3498_vm4 = vcmp.lt.s32.totalorder %v3242_v17, 0  ;;  %v2476_v61 = vxor.u32 %v2220_v59, %v1964_v41  ;;  %v1963_v1 = vmul.u32 2246822507, %v1707_v37  ;;  %8014 = vmatpush3.bf16.msra.mxu1 %v8013_v24  ;;  %v11640_v12 = vadd.f32 %v651_v45, %v651_v45  ;;  %v397_v37 = vld [vmem:[%s8346_s6 + $0x6d0] sm:$0xff]  ;;  %v11656_v24 = vpop.f32.mrb[19].mxu0 }
 0x31a   : > { %6558 = vmatprep.mubr.msk.f32.mxu0 %vm3498_vm4, %v11551_v16  ;;  %v2985_v33 = vshrl.u32 %v2729_v30, 16  ;;  %v1738_v48 = vxor.u32 %v1482_v26, %v1226_v42  ;;  %v4672_v7 = vadd.f32 %v6652_v31, %v11557_v36  ;;  %v1225_v55 = vxor.u32 %v8174_v44, %v967_v46  ;;  %12587 = vst [vmem:[#allocation18_spill] sm:$0xff] %v11656_v24 }
 0x31b   : > { %v2732_v41 = vmul.u32 3266489909, %v2476_v61  ;;  %v2219_v39 = vshrl.u32 %v1963_v1, 13  ;;  %v7983_v10 = vpack.c.bf16 %v4558_v11, %v4557_v49  ;;  %v654_v45 = vmax.f32 %v398_v13, 0.0 }
 0x31c   : > { %v3241_v17 = vxor.u32 %v2985_v33, %v2729_v30  ;;  %v1994_v16 = vmul.u32 2246822507, %v1738_v48  ;;  %v1481_v59 = vshrl.u32 %v1225_v55, 16  ;;  %v970_v42 = vadd.s32 %v8817_v27, %v11249_v19 }
 0x31d   : > { %v2988_v26 = vshrl.u32 %v2732_v41, 16  ;;  %v2475_v31 = vxor.u32 %v2219_v39, %v1963_v1  ;;  %7984 = vmatprep.subr.bf16.mxu0 %v7983_v10  ;;  %v11658_v46 = vadd.f32 %v654_v45, %v654_v45  ;;  %v7985_v20 = vpack.c.bf16 %v4542_v4, %v4541_v3  ;;  %v428_v4 = vld [vmem:[%s8346_s6 + $0x7c8] sm:$0xff]  ;;  %v11677_v10 = vpop.f32.mrb[18].mxu1 }
 0x31e   : > { %vm3497_vm5 = vcmp.lt.s32.totalorder %v3241_v17, 0  ;;  %v2250_v61 = vshrl.u32 %v1994_v16, 13  ;;  %v1737_v49 = vxor.u32 %v1481_v59, %v1225_v55  ;;  %v1228_v30 = vxor.u32 %v8174_v44, %v970_v42  ;;  %v4589_v55 = vld [vmem:[%s12567_s2 + $0xfe0] sm:$0xff] }
 0x31f   : > { %6559 = vmatmul.mubr.msk.f32.gmra.mrb[106].mxu0 %vm3497_vm5, %v11574_v5  ;;  %v3244_v11 = vxor.u32 %v2988_v26, %v2732_v41  ;;  %v2731_v13 = vmul.u32 3266489909, %v2475_v31  ;;  %v6708_v33 = vadd.f32 %v11154_v63, %v11137_v40  ;;  %v653_v48 = vmax.f32 %v397_v37, 0.0  ;;  %v4590_v5 = vld [vmem:[%s12567_s2 + $0xfe8] sm:$0xff]  ;;  %v4573_v59 = vld [vmem:[%s12567_s2 + $0xf60] sm:$0xff]  ;;  %v11689_v31 = vpop.f32.mrb[19].mxu1 }
 0x320   : > { %v2506_v24 = vxor.u32 %v2250_v61, %v1994_v16  ;;  %v1993_v1 = vmul.u32 2246822507, %v1737_v49  ;;  %v1484_v39 = vshrl.u32 %v1228_v30, 16  ;;  %7986 = vmatpush3.bf16.msra.mxu0 %v7985_v20  ;;  %v969_v3 = vadd.s32 %v8817_v27, %v11267_v18 }
 0x321   : > { %vm3500_vm6 = vcmp.lt.s32.totalorder %v3244_v11, 0  ;;  %v2987_v41 = vshrl.u32 %v2731_v13, 16  ;;  %v11673_v40 = vadd.f32 %v6708_v33, %v4672_v7  ;;  %v11675_v63 = vadd.f32 %v653_v48, %v653_v48  ;;  %v4574_v7 = vld [vmem:[%s12567_s2 + $0xf68] sm:$0xff]  ;;  %v427_v11 = vld [vmem:[%s8346_s6 + $0x7c0] sm:$0xff] }
 0x322   : > { %6574 = vmatprep.mubr.msk.f32.mxu1 %vm3500_vm6, %v11589_v6  ;;  %v2762_v20 = vmul.u32 3266489909, %v2506_v24  ;;  %v2249_v45 = vshrl.u32 %v1993_v1, 13  ;;  %v1740_v17 = vxor.u32 %v1484_v39, %v1228_v30  ;;  %v1227_v16 = vxor.u32 %v8174_v44, %v969_v3 }
 0x323   : > { %v3243_v42 = vxor.u32 %v2987_v41, %v2731_v13  ;;  %v8015_v37 = vpack.c.bf16 %v4590_v5, %v4589_v55  ;;  %v684_v26 = vmax.f32 %v428_v4, 0.0  ;;  %v1000_v6 = vadd.s32 %v8872_v8, %v11210_v2 }
 0x324   : > { %v3018_v24 = vshrl.u32 %v2762_v20, 16  ;;  %v2505_v61 = vxor.u32 %v2249_v45, %v1993_v1  ;;  %v1996_v49 = vmul.u32 2246822507, %v1740_v17  ;;  %v1483_v30 = vshrl.u32 %v1227_v16, 16  ;;  %v4559_v45 = vld [vmem:[%s12567_s2 + $0xef0] sm:$0xff] }
 0x325   : > { %vm3499_vm7 = vcmp.lt.s32.totalorder %v3243_v42, 0  ;;  %8016 = vmatprep.subr.bf16.mxu1 %v8015_v37  ;;  %v1258_v33 = vxor.u32 %v8174_v44, %v1000_v6  ;;  %v11693_v48 = vadd.f32 %v684_v26, %v684_v26  ;;  %v8017_v39 = vpack.c.bf16 %v4574_v7, %v4573_v59  ;;  %v430_v59 = vld [vmem:[%s8346_s6 + $0x7d8] sm:$0xff]  ;;  %v11707_v7 = vpop.f32.mrb[20].mxu0  ;;  %v4543_v37 = vld [vmem:[%s12567_s2 + $0xe70] sm:$0xff] }
 0x326   : > { %6575 = vmatmul.mubr.msk.f32.gmra.mrb[106].mxu1 %vm3499_vm7, %v11608_v22  ;;  %v3274_v13 = vxor.u32 %v3018_v24, %v2762_v20  ;;  %v2761_v3 = vmul.u32 3266489909, %v2505_v61  ;;  %v2252_v2 = vshrl.u32 %v1996_v49, 13  ;;  %v1739_v55 = vxor.u32 %v1483_v30, %v1227_v16  ;;  %v4560_v22 = vld [vmem:[%s12567_s2 + $0xef8] sm:$0xff] }
 0x327   : > { %v1514_v5 = vshrl.u32 %v1258_v33, 16  ;;  %8018 = vmatpush3.bf16.msra.mxu1 %v8017_v39  ;;  %v6655_v1 = vadd.f32 %v11182_v23, %v11176_v56  ;;  %v683_v4 = vmax.f32 %v427_v11, 0.0  ;;  %v999_v41 = vadd.s32 %v8872_v8, %v11229_v21  ;;  %v4544_v26 = vld [vmem:[%s12567_s2 + $0xe78] sm:$0xff] }
 0x328   : > { %vm3530_vm8 = vcmp.lt.s32.totalorder %v3274_v13, 0  ;;  %v3017_v20 = vshrl.u32 %v2761_v3, 16  ;;  %v2508_v17 = vxor.u32 %v2252_v2, %v1996_v49  ;;  %v1995_v16 = vmul.u32 2246822507, %v1739_v55  ;;  %v11720_v49 = vpop.f32.mrb[21].mxu0  ;;  %v429_v13 = vld [vmem:[%s8346_s6 + $0x7d0] sm:$0xff] }
 0x329   : > { %6560 = vmatprep.mubr.msk.f32.mxu0 %vm3530_vm8, %v11627_v43  ;;  %v1770_v56 = vxor.u32 %v1514_v5, %v1258_v33  ;;  %v4677_v23 = vadd.f32 %v6655_v1, %v11557_v36  ;;  %v1257_v21 = vxor.u32 %v8174_v44, %v999_v41  ;;  %v11712_v42 = vadd.f32 %v683_v4, %v683_v4 }
 0x32a   : > { %v3273_v6 = vxor.u32 %v3017_v20, %v2761_v3  ;;  %v2764_v24 = vmul.u32 3266489909, %v2508_v17  ;;  %v2251_v61 = vshrl.u32 %v1995_v16, 13  ;;  %v7987_v43 = vpack.c.bf16 %v4560_v22, %v4559_v45  ;;  %v11731_v17 = vpop.f32.mrb[20].mxu1 }
 0x32b   : > { %v2026_v30 = vmul.u32 2246822507, %v1770_v56  ;;  %v1513_v11 = vshrl.u32 %v1257_v21, 16  ;;  %v686_v33 = vmax.f32 %v430_v59, 0.0  ;;  %v1002_v39 = vadd.s32 %v8872_v8, %v11249_v19 }
 0x32c   : > { %vm3529_vm9 = vcmp.lt.s32.totalorder %v3273_v6, 0  ;;  %v3020_v2 = vshrl.u32 %v2764_v24, 16  ;;  %v2507_v55 = vxor.u32 %v2251_v61, %v1995_v16  ;;  %7988 = vmatprep.subr.bf16.mxu0 %v7987_v43  ;;  %v7989_v5 = vpack.c.bf16 %v4544_v26, %v4543_v37  ;;  %v4592_v37 = vld [vmem:[%s12567_s2 + $0xff8] sm:$0xff]  ;;  %v208_v26 = vld [vmem:[%s8346_s6 + $0xe8] sm:$0xff] }
 0x32d   : > { %6561 = vmatmul.mubr.msk.f32.gmra.mrb[108].mxu0 %vm3529_vm9, %v11640_v12  ;;  %v2282_v3 = vshrl.u32 %v2026_v30, 13  ;;  %v1769_v1 = vxor.u32 %v1513_v11, %v1257_v21  ;;  %v1260_v4 = vxor.u32 %v8174_v44, %v1002_v39  ;;  %v11727_v41 = vadd.f32 %v686_v33, %v686_v33  ;;  %v4591_v21 = vld [vmem:[%s12567_s2 + $0xff0] sm:$0xff]  ;;  %v4576_v11 = vld [vmem:[%s12567_s2 + $0xf78] sm:$0xff] }
 0x32e   : > { %v3276_v45 = vxor.u32 %v3020_v2, %v2764_v24  ;;  %v2763_v22 = vmul.u32 3266489909, %v2507_v55  ;;  %7990 = vmatpush3.bf16.msra.mxu0 %v7989_v5  ;;  %v6711_v19 = vadd.f32 %v11223_v62, %v11205_v32  ;;  %v685_v20 = vmax.f32 %v429_v13, 0.0 }
 0x32f   : > { %v2538_v16 = vxor.u32 %v2282_v3, %v2026_v30  ;;  %v2025_v59 = vmul.u32 2246822507, %v1769_v1  ;;  %v1516_v56 = vshrl.u32 %v1260_v4, 16  ;;  %v1001_v12 = vadd.s32 %v8872_v8, %v11267_v18  ;;  %v4575_v30 = vld [vmem:[%s12567_s2 + $0xf70] sm:$0xff]  ;;  %v207_v1 = vld [vmem:[%s8346_s6 + $0xe0] sm:$0xff] }
 0x330   : > { %vm3532_vm10 = vcmp.lt.s32.totalorder %v3276_v45, 0  ;;  %v3019_v32 = vshrl.u32 %v2763_v22, 16  ;;  %v11742_v62 = vadd.f32 %v6711_v19, %v4677_v23  ;;  %v11744_v6 = vadd.f32 %v685_v20, %v685_v20  ;;  %v11754_v23 = vpop.f32.mrb[21].mxu1 }
 0x331   : > { %6576 = vmatprep.mubr.msk.f32.mxu1 %vm3532_vm10, %v11658_v46  ;;  %v2794_v24 = vmul.u32 3266489909, %v2538_v16  ;;  %v2281_v18 = vshrl.u32 %v2025_v59, 13  ;;  %v1772_v61 = vxor.u32 %v1516_v56, %v1260_v4  ;;  %v1259_v43 = vxor.u32 %v8174_v44, %v1001_v12  ;;  %v11765_v12 = vpop.f32.mrb[22].mxu0 }
 0x332   : > { %v3275_v33 = vxor.u32 %v3019_v32, %v2763_v22  ;;  %v8019_v39 = vpack.c.bf16 %v4592_v37, %v4591_v21  ;;  %v464_v13 = vmax.f32 %v208_v26, 0.0  ;;  %v11757_v46 = vadd.s32 3712, %v8109_v15 }
 0x333   : > { %v3050_v2 = vshrl.u32 %v2794_v24, 16  ;;  %v2537_v55 = vxor.u32 %v2281_v18, %v2025_v59  ;;  %v2028_v5 = vmul.u32 2246822507, %v1772_v61  ;;  %v1515_v3 = vshrl.u32 %v1259_v43, 16  ;;  %v11767_v59 = vpop.f32.mrb[22].mxu1  ;;  %v210_v18 = vld [vmem:[%s8346_s6 + $0xf8] sm:$0xff] }
 0x334   : > { %vm3531_vm11 = vcmp.lt.s32.totalorder %v3275_v33, 0  ;;  %8020 = vmatprep.subr.bf16.mxu1 %v8019_v39  ;;  %v780_v4 = vadd.s32 %v8161_v38, %v11757_v46  ;;  %v11762_v45 = vadd.f32 %v464_v13, %v464_v13  ;;  %v8021_v19 = vpack.c.bf16 %v4576_v11, %v4575_v30  ;;  %12588 = vst [vmem:[#allocation19_spill] sm:$0xff] %v11767_v59 }
 0x335   : > { %6577 = vmatmul.mubr.msk.f32.gmra.mrb[108].mxu1 %vm3531_vm11, %v11675_v63  ;;  %v3306_v22 = vxor.u32 %v3050_v2, %v2794_v24  ;;  %v2793_v20 = vmul.u32 3266489909, %v2537_v55  ;;  %v2284_v16 = vshrl.u32 %v2028_v5, 13  ;;  %v1771_v56 = vxor.u32 %v1515_v3, %v1259_v43  ;;  %v11776_v63 = vpop.f32.mrb[23].mxu0  ;;  %v11778_v24 = vpop.f32.mrb[23].mxu1 }
 0x336   : > { %v1038_v21 = vxor.u32 %v8174_v44, %v780_v4  ;;  %8022 = vmatpush3.bf16.msra.mxu1 %v8021_v19  ;;  %v6658_v37 = vadd.f32 %v11271_v52, %v11245_v34  ;;  %v463_v26 = vmax.f32 %v207_v1, 0.0  ;;  %v11773_v32 = vadd.s32 3584, %v8109_v15  ;;  %12589 = vst [vmem:[#allocation20_spill] sm:$0xff] %v11778_v24  ;;  %v11780_v11 = vpop.f32.mrb[24].mxu0  ;;  %v11782_v33 = vpop.f32.mrb[24].mxu1 }
 0x337   : > { %vm3562_vm12 = vcmp.lt.s32.totalorder %v3306_v22, 0  ;;  %v3049_v61 = vshrl.u32 %v2793_v20, 16  ;;  %v2540_v43 = vxor.u32 %v2284_v16, %v2028_v5  ;;  %v2027_v30 = vmul.u32 2246822507, %v1771_v56  ;;  %12590 = vst [vmem:[#allocation21_spill] sm:$0xff] %v11780_v11  ;;  %12591 = vst [vmem:[#allocation22_spill] sm:$0xff] %v11782_v33 }
 0x338   : > { %6562 = vmatprep.mubr.msk.f32.mxu0 %vm3562_vm12, %v11693_v48  ;;  %v1294_v34 = vshrl.u32 %v1038_v21, 16  ;;  %v4682_v52 = vadd.f32 %v6658_v37, %v11557_v36  ;;  %v779_v39 = vadd.s32 %v8161_v38, %v11773_v32  ;;  %v11788_v13 = vadd.f32 %v463_v26, %v463_v26  ;;  %v11790_v2 = vpop.f32.mrb[25].mxu0  ;;  %v11792_v55 = vpop.f32.mrb[25].mxu1  ;;  %v12596_v37 = vld [vmem:[#allocation4_spill] sm:$0xff]  ;;  %v209_v33 = vld [vmem:[%s8346_s6 + $0xf0] sm:$0xff] }
 0x339   : > { %12592 = vst [vmem:[#allocation23_spill] sm:$0xff] %v11790_v2  ;;  %12593 = vst [vmem:[#allocation24_spill] sm:$0xff] %v11792_v55  ;;  %v3305_v5 = vxor.u32 %v3049_v61, %v2793_v20  ;;  %v2796_v3 = vmul.u32 3266489909, %v2540_v43  ;;  %v2283_v1 = vshrl.u32 %v2027_v30, 13  ;;  %v466_v4 = vmax.f32 %v210_v18, 0.0 }
 0x33a   : > { %v11794_v19 = vpop.f32.mrb[26].mxu0  ;;  %v11796_v48 = vpop.f32.mrb[26].mxu1  ;;  %v1550_v22 = vxor.u32 %v1294_v34, %v1038_v21  ;;  %v1037_v16 = vxor.u32 %v8174_v44, %v779_v39  ;;  %v11800_v56 = vadd.s32 3968, %v8109_v15  ;;  %v6714_v26 = vadd.f32 %v12596_v37, %v11296_v50 }
 0x33b   : > { %12594 = vst [vmem:[#allocation25_spill] sm:$0xff] %v11794_v19  ;;  %12595 = vst [vmem:[#allocation26_spill] sm:$0xff] %v11796_v48  ;;  %v11805_v55 = vpop.f32.mrb[27].mxu0  ;;  %v11807_v20 = vpop.f32.mrb[27].mxu1  ;;  %vm3561_vm13 = vcmp.lt.s32.totalorder %v3305_v5, 0  ;;  %v3052_v18 = vshrl.u32 %v2796_v3, 16  ;;  %v2539_v61 = vxor.u32 %v2283_v1, %v2027_v30  ;;  %v11809_v43 = vadd.f32 %v466_v4, %v466_v4 }
 0x33c   : > { %12597 = vst [vmem:[#allocation4_spill] sm:$0xff] %v11805_v55  ;;  %12598 = vst [vmem:[#allocation27_spill] sm:$0xff] %v11807_v20  ;;  %v240_v48 = vld [vmem:[%s8346_s6 + $0x1e8] sm:$0xff]  ;;  %v11812_v21 = vpop.f32.mrb[28].mxu0  ;;  %v11814_v34 = vpop.f32.mrb[28].mxu1  ;;  %6563 = vmatmul.mubr.msk.f32.gmra.mrb[110].mxu0 %vm3561_vm13, %v11712_v42  ;;  %v1293_v19 = vshrl.u32 %v1037_v16, 16  ;;  %v782_v50 = vadd.s32 %v8161_v38, %v11800_v56  ;;  %v11819_v37 = vadd.f32 %v6714_v26, %v4682_v52 }
 0x33d   : > { %12599 = vst [vmem:[#allocation28_spill] sm:$0xff] %v11812_v21  ;;  %12600 = vst [vmem:[#allocation29_spill] sm:$0xff] %v11814_v34  ;;  %v1806_v39 = vmul.u32 2246822507, %v1550_v22  ;;  %v11821_v20 = vpop.f32.mrb[29].mxu0  ;;  %v11823_v5 = vpop.f32.mrb[29].mxu1  ;;  %v3308_v30 = vxor.u32 %v3052_v18, %v2796_v3 }
 0x33e   : > { %12601 = vst [vmem:[#allocation30_spill] sm:$0xff] %v11819_v37  ;;  %12602 = vst [vmem:[#allocation31_spill] sm:$0xff] %v11821_v20  ;;  %v2795_v1 = vmul.u32 3266489909, %v2539_v61  ;;  %v465_v4 = vmax.f32 %v209_v33, 0.0  ;;  %v11826_v21 = vadd.s32 3840, %v8109_v15  ;;  %v1549_v55 = vxor.u32 %v1293_v19, %v1037_v16 }
 0x33f   : > { %12603 = vst [vmem:[#allocation32_spill] sm:$0xff] %v11823_v5  ;;  %v11828_v34 = vpop.f32.mrb[30].mxu0  ;;  %v11830_v42 = vpop.f32.mrb[30].mxu1  ;;  %v2062_v22 = vshrl.u32 %v1806_v39, 13  ;;  %v1040_v52 = vxor.u32 %v8174_v44, %v782_v50  ;;  %v496_v26 = vmax.f32 %v240_v48, 0.0  ;;  %vm3564_vm14 = vcmp.lt.s32.totalorder %v3308_v30, 0 }
 0x340   : > { %12604 = vst [vmem:[#allocation33_spill] sm:$0xff] %v11828_v34  ;;  %12605 = vst [vmem:[#allocation34_spill] sm:$0xff] %v11830_v42  ;;  %v11833_v2 = vpop.f32.mrb[31].mxu0  ;;  %v11835_v20 = vpop.f32.mrb[31].mxu1  ;;  %v3051_v3 = vshrl.u32 %v2795_v1, 16  ;;  %v781_v15 = vadd.s32 %v8161_v38, %v11826_v21  ;;  %v11839_v33 = vadd.f32 %v465_v4, %v465_v4  ;;  %6578 = vmatprep.mubr.msk.f32.mxu1 %vm3564_vm14, %v11727_v41  ;;  %v239_v30 = vld [vmem:[%s8346_s6 + $0x1e0] sm:$0xff] }
 0x341   : > { %12606 = vst [vmem:[#allocation35_spill] sm:$0xff] %v11833_v2  ;;  %12607 = vst [vmem:[#allocation36_spill] sm:$0xff] %v11835_v20  ;;  %v11841_v18 = vpop.f32.mrb[32].mxu0  ;;  %v11843_v61 = vpop.f32.mrb[32].mxu1  ;;  %v2318_v19 = vxor.u32 %v2062_v22, %v1806_v39  ;;  %v1805_v16 = vmul.u32 2246822507, %v1549_v55  ;;  %v812_v50 = vadd.s32 %v8269_v28, %v11757_v46 }
 0x342   : > { %12608 = vst [vmem:[#allocation37_spill] sm:$0xff] %v11841_v18  ;;  %12609 = vst [vmem:[#allocation38_spill] sm:$0xff] %v11843_v61  ;;  %v1296_v48 = vshrl.u32 %v1040_v52, 16  ;;  %v11849_v20 = vpop.f32.mrb[33].mxu0  ;;  %v11851_v42 = vpop.f32.mrb[33].mxu1  ;;  %v3307_v38 = vxor.u32 %v3051_v3, %v2795_v1  ;;  %v1039_v4 = vxor.u32 %v8174_v44, %v781_v15  ;;  %v11854_v18 = vadd.f32 %v496_v26, %v496_v26  ;;  %v12612_v61 = vld [vmem:[#allocation5_spill] sm:$0xff] }
 0x343   : > { %12610 = vst [vmem:[#allocation39_spill] sm:$0xff] %v11849_v20  ;;  %12611 = vst [vmem:[#allocation40_spill] sm:$0xff] %v11851_v42  ;;  %v12613_v2 = vld [vmem:[#allocation6_spill] sm:$0xff]  ;;  %v11858_v39 = vpop.f32.mrb[34].mxu0  ;;  %v11860_v55 = vpop.f32.mrb[34].mxu1  ;;  %v2061_v34 = vshrl.u32 %v1805_v16, 13  ;;  %v1070_v11 = vxor.u32 %v8174_v44, %v812_v50 }
 0x344   : > { %v6661_v41 = vadd.f32 %v12613_v2, %v12612_v61  ;;  %12614 = vst [vmem:[#allocation5_spill] sm:$0xff] %v11858_v39  ;;  %12615 = vst [vmem:[#allocation6_spill] sm:$0xff] %v11860_v55  ;;  %v2574_v22 = vmul.u32 3266489909, %v2318_v19  ;;  %v1552_v5 = vxor.u32 %v1296_v48, %v1040_v52  ;;  %v242_v20 = vld [vmem:[%s8346_s6 + $0x1f8] sm:$0xff]  ;;  %v11864_v37 = vpop.f32.mrb[35].mxu0 }
 0x345   : > { %12616 = vst [vmem:[#allocation41_spill] sm:$0xff] %v11864_v37  ;;  %v11866_v1 = vpop.f32.mrb[35].mxu1  ;;  %vm3563_vm15 = vcmp.lt.s32.totalorder %v3307_v38, 0  ;;  %v1295_v26 = vshrl.u32 %v1039_v4, 16  ;;  %v495_v15 = vmax.f32 %v239_v30, 0.0  ;;  %v11869_v2 = vpop.f32.mrb[36].mxu0  ;;  %v2317_v52 = vxor.u32 %v2061_v34, %v1805_v16 }
 0x346   : > { %12617 = vst [vmem:[#allocation42_spill] sm:$0xff] %v11866_v1  ;;  %v4687_v3 = vadd.f32 %v6661_v41, %v11557_v36  ;;  %12618 = vst [vmem:[#allocation43_spill] sm:$0xff] %v11869_v2  ;;  %v11871_v61 = vpop.f32.mrb[36].mxu1  ;;  %6579 = vmatmul.mubr.msk.f32.gmra.mrb[110].mxu1 %vm3563_vm15, %v11744_v6  ;;  %v2830_v19 = vshrl.u32 %v2574_v22, 16  ;;  %v1808_v48 = vmul.u32 2246822507, %v1552_v5  ;;  %v811_v38 = vadd.s32 %v8269_v28, %v11773_v32 }
 0x347   : > { %12619 = vst [vmem:[#allocation44_spill] sm:$0xff] %v11871_v61  ;;  %v1326_v50 = vshrl.u32 %v1070_v11, 16  ;;  %v11874_v55 = vpop.f32.mrb[37].mxu0  ;;  %v11876_v37 = vpop.f32.mrb[37].mxu1  ;;  %v1551_v1 = vxor.u32 %v1295_v26, %v1039_v4  ;;  %v11880_v30 = vadd.f32 %v495_v15, %v495_v15  ;;  %v498_v41 = vmax.f32 %v242_v20, 0.0  ;;  %v241_v20 = vld [vmem:[%s8346_s6 + $0x1f0] sm:$0xff] }
 0x348   : > { %12620 = vst [vmem:[#allocation45_spill] sm:$0xff] %v11874_v55  ;;  %12621 = vst [vmem:[#allocation46_spill] sm:$0xff] %v11876_v37  ;;  %v11882_v2 = vpop.f32.mrb[38].mxu0  ;;  %v11884_v61 = vpop.f32.mrb[38].mxu1  ;;  %v3086_v6 = vxor.u32 %v2830_v19, %v2574_v22  ;;  %v2573_v34 = vmul.u32 3266489909, %v2317_v52  ;;  %v1069_v26 = vxor.u32 %v8174_v44, %v811_v38  ;;  %v814_v15 = vadd.s32 %v8269_v28, %v11800_v56 }
 0x349   : > { %12622 = vst [vmem:[#allocation47_spill] sm:$0xff] %v11882_v2  ;;  %12623 = vst [vmem:[#allocation48_spill] sm:$0xff] %v11884_v61  ;;  %v2064_v5 = vshrl.u32 %v1808_v48, 13  ;;  %v1582_v16 = vxor.u32 %v1326_v50, %v1070_v11  ;;  %v11886_v39 = vpop.f32.mrb[39].mxu0  ;;  %v11888_v55 = vpop.f32.mrb[39].mxu1  ;;  %v11893_v37 = vadd.f32 %v498_v41, %v498_v41 }
 0x34a   : > { %12624 = vst [vmem:[#allocation49_spill] sm:$0xff] %v11886_v39  ;;  %12625 = vst [vmem:[#allocation50_spill] sm:$0xff] %v11888_v55  ;;  %v1807_v4 = vmul.u32 2246822507, %v1551_v1  ;;  %v11896_v2 = vpop.f32.mrb[40].mxu0  ;;  %v11898_v61 = vpop.f32.mrb[40].mxu1  ;;  %v1072_v41 = vxor.u32 %v8174_v44, %v814_v15 }
 0x34b   : > { %12626 = vst [vmem:[#allocation51_spill] sm:$0xff] %v11896_v2  ;;  %12627 = vst [vmem:[#allocation52_spill] sm:$0xff] %v11898_v61  ;;  %vm3342_vm0 = vcmp.lt.s32.totalorder %v3086_v6, 0  ;;  %v2829_v22 = vshrl.u32 %v2573_v34, 16  ;;  %v2320_v11 = vxor.u32 %v2064_v5, %v1808_v48  ;;  %v1838_v19 = vmul.u32 2246822507, %v1582_v16 }
 0x34c   : > { %v11900_v52 = vpop.f32.mrb[41].mxu0  ;;  %v11902_v50 = vpop.f32.mrb[41].mxu1  ;;  %6580 = vmatprep.mubr.msk.f32.mxu0 %vm3342_vm0, %v11762_v45  ;;  %v2063_v1 = vshrl.u32 %v1807_v4, 13  ;;  %v1325_v38 = vshrl.u32 %v1069_v26, 16  ;;  %v6717_v2 = vadd.f32 %v11368_v51, %v11362_v60  ;;  %v497_v61 = vmax.f32 %v241_v20, 0.0  ;;  %v272_v15 = vld [vmem:[%s8346_s6 + $0x2e8] sm:$0xff] }
 0x34d   : > { %12628 = vst [vmem:[#allocation53_spill] sm:$0xff] %v11900_v52  ;;  %12629 = vst [vmem:[#allocation54_spill] sm:$0xff] %v11902_v50  ;;  %v11908_v55 = vpop.f32.mrb[42].mxu0  ;;  %v11910_v6 = vpop.f32.mrb[42].mxu1  ;;  %v3085_v48 = vxor.u32 %v2829_v22, %v2573_v34  ;;  %v2576_v5 = vmul.u32 3266489909, %v2320_v11  ;;  %v813_v20 = vadd.s32 %v8269_v28, %v11826_v21 }
 0x34e   : > { %v2094_v16 = vshrl.u32 %v1838_v19, 13  ;;  %v11912_v52 = vpop.f32.mrb[43].mxu0  ;;  %v11914_v50 = vpop.f32.mrb[43].mxu1  ;;  %v2319_v45 = vxor.u32 %v2063_v1, %v1807_v4  ;;  %v1581_v39 = vxor.u32 %v1325_v38, %v1069_v26  ;;  %v1328_v42 = vshrl.u32 %v1072_v41, 16 }
 0x34f   : > { %12630 = vst [vmem:[#allocation55_spill] sm:$0xff] %v11914_v50  ;;  %v11916_v24 = vadd.f32 %v6717_v2, %v4687_v3  ;;  %v11919_v59 = vpop.f32.mrb[44].mxu0  ;;  %v11921_v60 = vpop.f32.mrb[44].mxu1  ;;  %vm3341_vm1 = vcmp.lt.s32.totalorder %v3085_v48, 0  ;;  %v2832_v51 = vshrl.u32 %v2576_v5, 16  ;;  %v11930_v26 = vadd.f32 %v497_v61, %v497_v61 }
 0x350   : > { %12631 = vst [vmem:[#allocation56_spill] sm:$0xff] %v11919_v59  ;;  %12632 = vst [vmem:[#allocation57_spill] sm:$0xff] %v11921_v60  ;;  %v2350_v34 = vxor.u32 %v2094_v16, %v1838_v19  ;;  %v11925_v22 = vpop.f32.mrb[45].mxu0  ;;  %v11927_v11 = vpop.f32.mrb[45].mxu1  ;;  %6581 = vmatmul.mubr.msk.f32.vlgmr.msra.gmra.mrb[112].mxu0 %vm3341_vm1, %v11788_v13  ;;  %v2575_v3 = vmul.u32 3266489909, %v2319_v45  ;;  %v1584_v4 = vxor.u32 %v1328_v42, %v1072_v41 }
 0x351   : > { %12633 = vst [vmem:[#allocation58_spill] sm:$0xff] %v11925_v22  ;;  %12634 = vst [vmem:[#allocation59_spill] sm:$0xff] %v11927_v11  ;;  %v1837_v2 = vmul.u32 2246822507, %v1581_v39  ;;  %v11932_v1 = vpop.f32.mrb[46].mxu0  ;;  %v11934_v38 = vpop.f32.mrb[46].mxu1  ;;  %v3088_v48 = vxor.u32 %v2832_v51, %v2576_v5  ;;  %v1071_v16 = vxor.u32 %v8174_v44, %v813_v20  ;;  %v844_v42 = vadd.s32 %v8592_v29, %v11757_v46 }
 0x352   : > { %12635 = vst [vmem:[#allocation60_spill] sm:$0xff] %v11932_v1  ;;  %12636 = vst [vmem:[#allocation61_spill] sm:$0xff] %v11934_v38  ;;  %v2606_v19 = vmul.u32 3266489909, %v2350_v34  ;;  %v528_v28 = vmax.f32 %v272_v15, 0.0  ;;  %v271_v60 = vld [vmem:[%s8346_s6 + $0x2e0] sm:$0xff] }
 0x353   : > { %v11938_v22 = vpop.f32.mrb[47].mxu0  ;;  %v11940_v11 = vpop.f32.mrb[47].mxu1  ;;  %v2831_v13 = vshrl.u32 %v2575_v3, 16  ;;  %v2093_v45 = vshrl.u32 %v1837_v2, 13  ;;  %v1840_v39 = vmul.u32 2246822507, %v1584_v4 }
 0x354   : > { %12637 = vst [vmem:[#allocation62_spill] sm:$0xff] %v11938_v22  ;;  %12638 = vst [vmem:[#allocation63_spill] sm:$0xff] %v11940_v11  ;;  %v11944_v61 = vpop.f32.mrb[48].mxu0  ;;  %v11946_v41 = vpop.f32.mrb[48].mxu1  ;;  %vm3344_vm2 = vcmp.lt.s32.totalorder %v3088_v48, 0  ;;  %v2862_v5 = vshrl.u32 %v2606_v19, 16  ;;  %v11948_v15 = vadd.f32 %v528_v28, %v528_v28  ;;  %v1102_v22 = vxor.u32 %v8174_v44, %v844_v42 }
 0x355   : > { %12639 = vst [vmem:[#allocation64_spill] sm:$0xff] %v11944_v61  ;;  %12640 = vst [vmem:[#allocation65_spill] sm:$0xff] %v11946_v41  ;;  %v1327_v51 = vshrl.u32 %v1071_v16, 16  ;;  %v11950_v34 = vpop.f32.mrb[49].mxu0  ;;  %v11952_v20 = vpop.f32.mrb[49].mxu1  ;;  %6596 = vmatprep.mubr.msk.f32.mxu1 %vm3344_vm2, %v11809_v43  ;;  %v3087_v4 = vxor.u32 %v2831_v13, %v2575_v3  ;;  %v2349_v11 = vxor.u32 %v2093_v45, %v1837_v2  ;;  %v2096_v38 = vshrl.u32 %v1840_v39, 13 }
 0x356   : > { %12641 = vst [vmem:[#allocation66_spill] sm:$0xff] %v11950_v34  ;;  %12642 = vst [vmem:[#allocation67_spill] sm:$0xff] %v11952_v20  ;;  %v11956_v61 = vpop.f32.mrb[50].mxu0  ;;  %v11958_v41 = vpop.f32.mrb[50].mxu1  ;;  %v3118_v48 = vxor.u32 %v2862_v5, %v2606_v19  ;;  %v6664_v28 = vadd.f32 %v11411_v58, %v11396_v35  ;;  %v527_v59 = vmax.f32 %v271_v60, 0.0  ;;  %v274_v34 = vld [vmem:[%s8346_s6 + $0x2f8] sm:$0xff]  ;;  %v843_v58 = vadd.s32 %v8592_v29, %v11773_v32 }
 0x357   : > { %12643 = vst [vmem:[#allocation68_spill] sm:$0xff] %v11956_v61  ;;  %12644 = vst [vmem:[#allocation69_spill] sm:$0xff] %v11958_v41  ;;  %v1583_v1 = vxor.u32 %v1327_v51, %v1071_v16  ;;  %v11963_v50 = vpop.f32.mrb[51].mxu0  ;;  %v11965_v20 = vpop.f32.mrb[51].mxu1  ;;  %vm3343_vm3 = vcmp.lt.s32.totalorder %v3087_v4, 0  ;;  %v2352_v3 = vxor.u32 %v2096_v38, %v1840_v39  ;;  %v1358_v2 = vshrl.u32 %v1102_v22, 16 }
 0x358   : > { %12645 = vst [vmem:[#allocation70_spill] sm:$0xff] %v11963_v50  ;;  %12646 = vst [vmem:[#allocation71_spill] sm:$0xff] %v11965_v20  ;;  %v2605_v43 = vmul.u32 3266489909, %v2349_v11  ;;  %v11967_v13 = vpop.f32.mrb[52].mxu0  ;;  %v11969_v45 = vpop.f32.mrb[52].mxu1  ;;  %6597 = vmatmul.mubr.msk.f32.vlgmr.msra.gmra.mrb[112].mxu1 %vm3343_vm3, %v11839_v33  ;;  %v4692_v35 = vadd.f32 %v6664_v28, %v11557_v36  ;;  %v11980_v42 = vadd.f32 %v527_v59, %v527_v59 }
 0x359   : > { %12647 = vst [vmem:[#allocation72_spill] sm:$0xff] %v11967_v13  ;;  %12648 = vst [vmem:[#allocation73_spill] sm:$0xff] %v11969_v45  ;;  %vm3374_vm4 = vcmp.lt.s32.totalorder %v3118_v48, 0  ;;  %v1839_v19 = vmul.u32 2246822507, %v1583_v1  ;;  %v11975_v60 = vpop.f32.mrb[53].mxu0  ;;  %v1614_v39 = vxor.u32 %v1358_v2, %v1102_v22  ;;  %v1101_v5 = vxor.u32 %v8174_v44, %v843_v58 }
 0x35a   : > { %12649 = vst [vmem:[#allocation74_spill] sm:$0xff] %v11975_v60  ;;  %v11977_v16 = vpop.f32.mrb[53].mxu1  ;;  %6582 = vmatprep.mubr.msk.f32.mxu0 %vm3374_vm4, %v11854_v18  ;;  %v2861_v11 = vshrl.u32 %v2605_v43, 16  ;;  %v2608_v38 = vmul.u32 3266489909, %v2352_v3  ;;  %v11982_v33 = vpop.f32.mrb[54].mxu0  ;;  %v846_v4 = vadd.s32 %v8592_v29, %v11800_v56 }
 0x35b   : > { %12650 = vst [vmem:[#allocation75_spill] sm:$0xff] %v11977_v16  ;;  %12651 = vst [vmem:[#allocation76_spill] sm:$0xff] %v11982_v33  ;;  %v11984_v1 = vpop.f32.mrb[54].mxu1  ;;  %v2095_v36 = vshrl.u32 %v1839_v19, 13  ;;  %v530_v51 = vmax.f32 %v274_v34, 0.0  ;;  %v11989_v48 = vpop.f32.mrb[55].mxu0 }
 0x35c   : > { %12652 = vst [vmem:[#allocation77_spill] sm:$0xff] %v11984_v1  ;;  %12653 = vst [vmem:[#allocation78_spill] sm:$0xff] %v11989_v48  ;;  %v11991_v18 = vpop.f32.mrb[55].mxu1  ;;  %v3117_v28 = vxor.u32 %v2861_v11, %v2605_v43  ;;  %v2864_v22 = vshrl.u32 %v2608_v38, 16  ;;  %v1870_v59 = vmul.u32 2246822507, %v1614_v39  ;;  %v1104_v60 = vxor.u32 %v8174_v44, %v846_v4 }
 0x35d   : > { %12654 = vst [vmem:[#allocation79_spill] sm:$0xff] %v11991_v18  ;;  %v12655_v3 = vld [vmem:[#allocation7_spill] sm:$0xff]  ;;  %v12656_v2 = vld [vmem:[#allocation8_spill] sm:$0xff]  ;;  %v273_v16 = vld [vmem:[%s8346_s6 + $0x2f0] sm:$0xff]  ;;  %v11996_v1 = vpop.f32.mrb[56].mxu0  ;;  %v11998_v45 = vpop.f32.mrb[56].mxu1  ;;  %v2351_v58 = vxor.u32 %v2095_v36, %v1839_v19  ;;  %v12001_v13 = vadd.f32 %v530_v51, %v530_v51 }
 0x35e   : > { %v6720_v33 = vadd.f32 %v12656_v2, %v12655_v3  ;;  %12657 = vst [vmem:[#allocation7_spill] sm:$0xff] %v11996_v1  ;;  %12658 = vst [vmem:[#allocation8_spill] sm:$0xff] %v11998_v45  ;;  %v1357_v34 = vshrl.u32 %v1101_v5, 16  ;;  %v304_v48 = vld [vmem:[%s8346_s6 + $0x3e8] sm:$0xff]  ;;  %v12004_v20 = vpop.f32.mrb[57].mxu0  ;;  %v12006_v43 = vpop.f32.mrb[57].mxu1  ;;  %v3120_v11 = vxor.u32 %v2864_v22, %v2608_v38 }
 0x35f   : > { %12659 = vst [vmem:[#allocation80_spill] sm:$0xff] %v12004_v20  ;;  %12660 = vst [vmem:[#allocation81_spill] sm:$0xff] %v12006_v43  ;;  %vm3373_vm5 = vcmp.lt.s32.totalorder %v3117_v28, 0  ;;  %v2126_v39 = vshrl.u32 %v1870_v59, 13  ;;  %v12010_v2 = vpop.f32.mrb[58].mxu0  ;;  %v12012_v1 = vpop.f32.mrb[58].mxu1 }
 0x360   : > { %v12008_v3 = vadd.f32 %v6720_v33, %v4692_v35  ;;  %12661 = vst [vmem:[#allocation82_spill] sm:$0xff] %v12010_v2  ;;  %12662 = vst [vmem:[#allocation83_spill] sm:$0xff] %v12012_v1  ;;  %6583 = vmatmul.mubr.msk.f32.gmra.mrb[114].mxu0 %vm3373_vm5, %v11880_v30  ;;  %v2607_v19 = vmul.u32 3266489909, %v2351_v58  ;;  %v1613_v36 = vxor.u32 %v1357_v34, %v1101_v5  ;;  %v1360_v51 = vshrl.u32 %v1104_v60, 16  ;;  %v12015_v45 = vpop.f32.mrb[59].mxu0 }
 0x361   : > { %v529_v4 = vmax.f32 %v273_v16, 0.0  ;;  %12663 = vst [vmem:[#allocation84_spill] sm:$0xff] %v12015_v45  ;;  %v12017_v20 = vpop.f32.mrb[59].mxu1  ;;  %vm3376_vm6 = vcmp.lt.s32.totalorder %v3120_v11, 0  ;;  %v2382_v38 = vxor.u32 %v2126_v39, %v1870_v59  ;;  %v845_v35 = vadd.s32 %v8592_v29, %v11826_v21  ;;  %v12021_v28 = vpop.f32.mrb[60].mxu0  ;;  %v303_v34 = vld [vmem:[%s8346_s6 + $0x3e0] sm:$0xff] }
 0x362   : > { %12664 = vst [vmem:[#allocation85_spill] sm:$0xff] %v12017_v20  ;;  %v560_v33 = vmax.f32 %v304_v48, 0.0  ;;  %12665 = vst [vmem:[#allocation86_spill] sm:$0xff] %v12021_v28  ;;  %v12023_v22 = vpop.f32.mrb[60].mxu1  ;;  %6598 = vmatprep.mubr.msk.f32.mxu1 %vm3376_vm6, %v11893_v37  ;;  %v2863_v30 = vshrl.u32 %v2607_v19, 16  ;;  %v1616_v58 = vxor.u32 %v1360_v51, %v1104_v60  ;;  %v12029_v1 = vpop.f32.mrb[61].mxu0  ;;  %v876_v48 = vadd.s32 %v8632_v0, %v11757_v46 }
 0x363   : > { %12666 = vst [vmem:[#allocation87_spill] sm:$0xff] %v12023_v22  ;;  %v1869_v5 = vmul.u32 2246822507, %v1613_v36  ;;  %v12026_v16 = vadd.f32 %v529_v4, %v529_v4  ;;  %12667 = vst [vmem:[#allocation88_spill] sm:$0xff] %v12029_v1  ;;  %v12031_v11 = vpop.f32.mrb[61].mxu1  ;;  %v1103_v29 = vxor.u32 %v8174_v44, %v845_v35  ;;  %v12038_v37 = vpop.f32.mrb[62].mxu0 }
 0x364   : > { %12668 = vst [vmem:[#allocation89_spill] sm:$0xff] %v12031_v11  ;;  %v2638_v59 = vmul.u32 3266489909, %v2382_v38  ;;  %v12036_v39 = vadd.f32 %v560_v33, %v560_v33  ;;  %12669 = vst [vmem:[#allocation90_spill] sm:$0xff] %v12038_v37  ;;  %v12040_v36 = vpop.f32.mrb[62].mxu1  ;;  %v3119_v60 = vxor.u32 %v2863_v30, %v2607_v19  ;;  %v12671_v22 = vld [vmem:[#allocation9_spill] sm:$0xff]  ;;  %v1134_v45 = vxor.u32 %v8174_v44, %v876_v48 }
 0x365   : > { %12670 = vst [vmem:[#allocation91_spill] sm:$0xff] %v12040_v36  ;;  %v2125_v51 = vshrl.u32 %v1869_v5, 13  ;;  %v1872_v4 = vmul.u32 2246822507, %v1616_v58  ;;  %v12672_v1 = vld [vmem:[#allocation10_spill] sm:$0xff]  ;;  %v12044_v11 = vpop.f32.mrb[63].mxu0 }
 0x366   : > { %v6667_v28 = vadd.f32 %v12672_v1, %v12671_v22  ;;  %12673 = vst [vmem:[#allocation9_spill] sm:$0xff] %v12044_v11  ;;  %v12046_v38 = vpop.f32.mrb[63].mxu1  ;;  %v2894_v35 = vshrl.u32 %v2638_v59, 16  ;;  %v1359_v20 = vshrl.u32 %v1103_v29, 16  ;;  %v559_v33 = vmax.f32 %v303_v34, 0.0  ;;  %v306_v2 = vld [vmem:[%s8346_s6 + $0x3f8] sm:$0xff] }
 0x367   : > { %12674 = vst [vmem:[#allocation10_spill] sm:$0xff] %v12046_v38  ;;  %v12050_v43 = vpop.f32.mrb[64].mxu0  ;;  %v12052_v37 = vpop.f32.mrb[64].mxu1  ;;  %vm3375_vm7 = vcmp.lt.s32.totalorder %v3119_v60, 0  ;;  %v2381_v19 = vxor.u32 %v2125_v51, %v1869_v5  ;;  %v2128_v30 = vshrl.u32 %v1872_v4, 13  ;;  %v875_v5 = vadd.s32 %v8632_v0, %v11773_v32  ;;  %v336_v61 = vld [vmem:[%s8346_s6 + $0x4e8] sm:$0xff] }
 0x368   : > { %12675 = vst [vmem:[#allocation92_spill] sm:$0xff] %v12050_v43  ;;  %12676 = vst [vmem:[#allocation93_spill] sm:$0xff] %v12052_v37  ;;  %v12057_v1 = vld [vmem:[%s12568_s3] ss:$0 sm:$0xff]  ;;  %v12060_v58 = vpop.f32.mrb[65].mxu0  ;;  %v12062_v38 = vpop.f32.mrb[65].mxu1  ;;  %6599 = vmatmul.mubr.msk.f32.gmra.mrb[114].mxu1 %vm3375_vm7, %v11930_v26  ;;  %v3150_v34 = vxor.u32 %v2894_v35, %v2638_v59  ;;  %v1615_v48 = vxor.u32 %v1359_v20, %v1103_v29 }
 0x369   : > { %v4697_v22 = vadd.f32 %v12057_v1, %v6667_v28  ;;  %12677 = vst [vmem:[#allocation94_spill] sm:$0xff] %v12060_v58  ;;  %12678 = vst [vmem:[#allocation95_spill] sm:$0xff] %v12062_v38  ;;  %v1390_v37 = vshrl.u32 %v1134_v45, 16  ;;  %v12067_v60 = vpop.f32.mrb[66].mxu0  ;;  %v12069_v51 = vpop.f32.mrb[66].mxu1  ;;  %v2384_v36 = vxor.u32 %v2128_v30, %v1872_v4  ;;  %v12071_v28 = vadd.f32 %v559_v33, %v559_v33  ;;  %v305_v29 = vld [vmem:[%s8346_s6 + $0x3f0] sm:$0xff] }
 0x36a   : > { %12679 = vst [vmem:[#allocation96_spill] sm:$0xff] %v12067_v60  ;;  %12680 = vst [vmem:[#allocation97_spill] sm:$0xff] %v12069_v51  ;;  %v2637_v43 = vmul.u32 3266489909, %v2381_v19  ;;  %v562_v58 = vmax.f32 %v306_v2, 0.0  ;;  %v12073_v11 = vpop.f32.mrb[67].mxu0  ;;  %v1133_v59 = vxor.u32 %v8174_v44, %v875_v5  ;;  %v878_v2 = vadd.s32 %v8632_v0, %v11800_v56 }
 0x36b   : > { %12681 = vst [vmem:[#allocation98_spill] sm:$0xff] %v12073_v11  ;;  %v12075_v38 = vpop.f32.mrb[67].mxu1  ;;  %vm3406_vm8 = vcmp.lt.s32.totalorder %v3150_v34, 0  ;;  %v1871_v26 = vmul.u32 2246822507, %v1615_v48  ;;  %v1646_v20 = vxor.u32 %v1390_v37, %v1134_v45  ;;  %v12079_v35 = vpop.f32.mrb[68].mxu0 }
 0x36c   : > { %12682 = vst [vmem:[#allocation99_spill] sm:$0xff] %v12075_v38  ;;  %12683 = vst [vmem:[#allocation100_spill] sm:$0xff] %v12079_v35  ;;  %v12081_v60 = vpop.f32.mrb[68].mxu1  ;;  %6584 = vmatprep.mubr.msk.f32.mxu0 %vm3406_vm8, %v11948_v15  ;;  %v2893_v4 = vshrl.u32 %v2637_v43, 16  ;;  %v2640_v33 = vmul.u32 3266489909, %v2384_v36  ;;  %v12086_v19 = vadd.f32 %v562_v58, %v562_v58  ;;  %v1136_v58 = vxor.u32 %v8174_v44, %v878_v2 }
 0x36d   : > { %12684 = vst [vmem:[#allocation101_spill] sm:$0xff] %v12081_v60  ;;  %v12088_v30 = vpop.f32.mrb[69].mxu0  ;;  %v12090_v34 = vpop.f32.mrb[69].mxu1  ;;  %v2127_v45 = vshrl.u32 %v1871_v26, 13  ;;  %v1902_v37 = vmul.u32 2246822507, %v1646_v20 }
 0x36e   : > { %12685 = vst [vmem:[#allocation102_spill] sm:$0xff] %v12088_v30  ;;  %12686 = vst [vmem:[#allocation103_spill] sm:$0xff] %v12090_v34  ;;  %v1389_v48 = vshrl.u32 %v1133_v59, 16  ;;  %v12687_v5 = vld [vmem:[#allocation11_spill] sm:$0xff]  ;;  %v12688_v35 = vld [vmem:[#allocation12_spill] sm:$0xff]  ;;  %v12094_v38 = vpop.f32.mrb[70].mxu0  ;;  %v3149_v36 = vxor.u32 %v2893_v4, %v2637_v43 }
 0x36f   : > { %v6723_v60 = vadd.f32 %v12688_v35, %v12687_v5  ;;  %v12096_v15 = vpop.f32.mrb[70].mxu1  ;;  %v2896_v51 = vshrl.u32 %v2640_v33, 16  ;;  %v561_v11 = vmax.f32 %v305_v29, 0.0  ;;  %v12099_v18 = vpop.f32.mrb[71].mxu0  ;;  %v2383_v34 = vxor.u32 %v2127_v45, %v1871_v26 }
 0x370   : > { %12689 = vst [vmem:[#allocation11_spill] sm:$0xff] %v12096_v15  ;;  %12690 = vst [vmem:[#allocation12_spill] sm:$0xff] %v12099_v18  ;;  %v12101_v30 = vpop.f32.mrb[71].mxu1  ;;  %v2158_v41 = vshrl.u32 %v1902_v37, 13  ;;  %v1645_v20 = vxor.u32 %v1389_v48, %v1133_v59  ;;  %v12106_v35 = vpop.f32.mrb[72].mxu0  ;;  %vm3405_vm9 = vcmp.lt.s32.totalorder %v3149_v36, 0  ;;  %v877_v29 = vadd.s32 %v8632_v0, %v11826_v21 }
 0x371   : > { %12691 = vst [vmem:[#allocation104_spill] sm:$0xff] %v12101_v30  ;;  %v12103_v50 = vadd.f32 %v6723_v60, %v4697_v22  ;;  %12692 = vst [vmem:[#allocation105_spill] sm:$0xff] %v12106_v35  ;;  %v12108_v5 = vpop.f32.mrb[72].mxu1  ;;  %v3152_v43 = vxor.u32 %v2896_v51, %v2640_v33  ;;  %v1392_v4 = vshrl.u32 %v1136_v58, 16  ;;  %v12112_v2 = vpop.f32.mrb[73].mxu0  ;;  %6585 = vmatmul.mubr.msk.f32.gmra.mrb[116].mxu0 %vm3405_vm9, %v11980_v42  ;;  %v592_v0 = vmax.f32 %v336_v61, 0.0 }
 0x372   : > { %12693 = vst [vmem:[#allocation106_spill] sm:$0xff] %v12108_v5  ;;  %12694 = vst [vmem:[#allocation107_spill] sm:$0xff] %v12112_v2  ;;  %v12114_v30 = vpop.f32.mrb[73].mxu1  ;;  %v2639_v22 = vmul.u32 3266489909, %v2383_v34  ;;  %v2414_v60 = vxor.u32 %v2158_v41, %v1902_v37  ;;  %v12117_v59 = vadd.f32 %v561_v11, %v561_v11  ;;  %v12119_v45 = vpop.f32.mrb[74].mxu0  ;;  %v1135_v33 = vxor.u32 %v8174_v44, %v877_v29 }
 0x373   : > { %12695 = vst [vmem:[#allocation108_spill] sm:$0xff] %v12114_v30  ;;  %v1901_v26 = vmul.u32 2246822507, %v1645_v20  ;;  %12696 = vst [vmem:[#allocation109_spill] sm:$0xff] %v12119_v45  ;;  %v12121_v48 = vpop.f32.mrb[74].mxu1  ;;  %vm3408_vm10 = vcmp.lt.s32.totalorder %v3152_v43, 0  ;;  %v1648_v51 = vxor.u32 %v1392_v4, %v1136_v58  ;;  %v908_v34 = vadd.s32 %v8697_v47, %v11757_v46 }
 0x374   : > { %12697 = vst [vmem:[#allocation110_spill] sm:$0xff] %v12121_v48  ;;  %v335_v36 = vld [vmem:[%s8346_s6 + $0x4e0] sm:$0xff]  ;;  %v12125_v5 = vpop.f32.mrb[75].mxu0  ;;  %v12127_v30 = vpop.f32.mrb[75].mxu1  ;;  %6600 = vmatprep.mubr.msk.f32.mxu1 %vm3408_vm10, %v12001_v13  ;;  %v2895_v41 = vshrl.u32 %v2639_v22, 16  ;;  %v1391_v61 = vshrl.u32 %v1135_v33, 16  ;;  %v12136_v43 = vadd.f32 %v592_v0, %v592_v0 }
 0x375   : > { %12698 = vst [vmem:[#allocation111_spill] sm:$0xff] %v12125_v5  ;;  %12699 = vst [vmem:[#allocation112_spill] sm:$0xff] %v12127_v30  ;;  %v2670_v42 = vmul.u32 3266489909, %v2414_v60  ;;  %v2157_v11 = vshrl.u32 %v1901_v26, 13  ;;  %v12132_v37 = vpop.f32.mrb[76].mxu0  ;;  %v1166_v2 = vxor.u32 %v8174_v44, %v908_v34 }
 0x376   : > { %12700 = vst [vmem:[#allocation113_spill] sm:$0xff] %v12132_v37  ;;  %v12134_v20 = vpop.f32.mrb[76].mxu1  ;;  %v1904_v58 = vmul.u32 2246822507, %v1648_v51  ;;  %v12702_v4 = vld [vmem:[#allocation13_spill] sm:$0xff]  ;;  %v12703_v29 = vld [vmem:[#allocation14_spill] sm:$0xff]  ;;  %v3151_v60 = vxor.u32 %v2895_v41, %v2639_v22  ;;  %v1647_v35 = vxor.u32 %v1391_v61, %v1135_v33 }
 0x377   : > { %12701 = vst [vmem:[#allocation114_spill] sm:$0xff] %v12134_v20  ;;  %v6670_v30 = vadd.f32 %v12703_v29, %v12702_v4  ;;  %v12140_v48 = vpop.f32.mrb[77].mxu0  ;;  %v12142_v13 = vpop.f32.mrb[77].mxu1  ;;  %v2926_v5 = vshrl.u32 %v2670_v42, 16  ;;  %v2413_v45 = vxor.u32 %v2157_v11, %v1901_v26  ;;  %v591_v15 = vmax.f32 %v335_v36, 0.0  ;;  %v338_v18 = vld [vmem:[%s8346_s6 + $0x4f8] sm:$0xff] }
 0x378   : > { %v12145_v37 = vpop.f32.mrb[78].mxu0  ;;  %v12147_v20 = vpop.f32.mrb[78].mxu1  ;;  %v2160_v51 = vshrl.u32 %v1904_v58, 13  ;;  %vm3407_vm11 = vcmp.lt.s32.totalorder %v3151_v60, 0  ;;  %v1422_v26 = vshrl.u32 %v1166_v2, 16 }
 0x379   : > { %12704 = vst [vmem:[#allocation13_spill] sm:$0xff] %v12145_v37  ;;  %12705 = vst [vmem:[#allocation14_spill] sm:$0xff] %v12147_v20  ;;  %v4702_v0 = vadd.f32 %v12057_v1, %v6670_v30  ;;  %v12151_v4 = vpop.f32.mrb[79].mxu0  ;;  %v12153_v29 = vpop.f32.mrb[79].mxu1  ;;  %v3182_v22 = vxor.u32 %v2926_v5, %v2670_v42  ;;  %v2669_v41 = vmul.u32 3266489909, %v2413_v45  ;;  %6601 = vmatmul.mubr.msk.f32.gmra.mrb[116].mxu1 %vm3407_vm11, %v12026_v16 }
 0x37a   : > { %12706 = vst [vmem:[#allocation115_spill] sm:$0xff] %v12151_v4  ;;  %12707 = vst [vmem:[#allocation116_spill] sm:$0xff] %v12153_v29  ;;  %v12155_v11 = vpop.f32.mrb[80].mxu0  ;;  %v12157_v34 = vpop.f32.mrb[80].mxu1  ;;  %v2416_v20 = vxor.u32 %v2160_v51, %v1904_v58  ;;  %v1903_v33 = vmul.u32 2246822507, %v1647_v35  ;;  %v907_v1 = vadd.s32 %v8697_v47, %v11773_v32  ;;  %v12162_v30 = vadd.f32 %v591_v15, %v591_v15 }
 0x37b   : > { %12708 = vst [vmem:[#allocation117_spill] sm:$0xff] %v12155_v11  ;;  %12709 = vst [vmem:[#allocation118_spill] sm:$0xff] %v12157_v34  ;;  %v12164_v36 = vpop.f32.mrb[81].mxu0  ;;  %v12166_v61 = vpop.f32.mrb[81].mxu1  ;;  %vm3438_vm12 = vcmp.lt.s32.totalorder %v3182_v22, 0  ;;  %v2925_v5 = vshrl.u32 %v2669_v41, 16  ;;  %v1678_v45 = vxor.u32 %v1422_v26, %v1166_v2  ;;  %v910_v58 = vadd.s32 %v8697_v47, %v11800_v56 }
 0x37c   : > { %12710 = vst [vmem:[#allocation119_spill] sm:$0xff] %v12164_v36  ;;  %12711 = vst [vmem:[#allocation120_spill] sm:$0xff] %v12166_v61  ;;  %v594_v42 = vmax.f32 %v338_v18, 0.0  ;;  %v12168_v60 = vpop.f32.mrb[82].mxu0  ;;  %v12170_v34 = vpop.f32.mrb[82].mxu1  ;;  %6586 = vmatprep.mubr.msk.f32.mxu0 %vm3438_vm12, %v12036_v39  ;;  %v2159_v35 = vshrl.u32 %v1903_v33, 13  ;;  %v1165_v15 = vxor.u32 %v8174_v44, %v907_v1 }
 0x37d   : > { %12712 = vst [vmem:[#allocation121_spill] sm:$0xff] %v12168_v60  ;;  %12713 = vst [vmem:[#allocation122_spill] sm:$0xff] %v12170_v34  ;;  %v2672_v16 = vmul.u32 3266489909, %v2416_v20  ;;  %v337_v51 = vld [vmem:[%s8346_s6 + $0x4f0] sm:$0xff]  ;;  %v12177_v61 = vpop.f32.mrb[83].mxu0  ;;  %v3181_v18 = vxor.u32 %v2925_v5, %v2669_v41  ;;  %v1168_v4 = vxor.u32 %v8174_v44, %v910_v58 }
 0x37e   : > { %12714 = vst [vmem:[#allocation123_spill] sm:$0xff] %v12177_v61  ;;  %v12179_v22 = vpop.f32.mrb[83].mxu1  ;;  %v1934_v2 = vmul.u32 2246822507, %v1678_v45  ;;  %v12181_v26 = vadd.f32 %v594_v42, %v594_v42  ;;  %v12716_v34 = vld [vmem:[#allocation15_spill] sm:$0xff]  ;;  %v12717_v60 = vld [vmem:[#allocation16_spill] sm:$0xff]  ;;  %v2415_v11 = vxor.u32 %v2159_v35, %v1903_v33 }
 0x37f   : > { %12715 = vst [vmem:[#allocation124_spill] sm:$0xff] %v12179_v22  ;;  %v6726_v39 = vadd.f32 %v12717_v60, %v12716_v34  ;;  %v12185_v20 = vpop.f32.mrb[84].mxu0  ;;  %v12187_v36 = vpop.f32.mrb[84].mxu1  ;;  %v2928_v1 = vshrl.u32 %v2672_v16, 16  ;;  %v1421_v29 = vshrl.u32 %v1165_v15, 16  ;;  %v368_v37 = vld [vmem:[%s8346_s6 + $0x5e8] sm:$0xff] }
 0x380   : > { %12718 = vst [vmem:[#allocation15_spill] sm:$0xff] %v12187_v36  ;;  %v12191_v61 = vpop.f32.mrb[85].mxu0  ;;  %v12193_v22 = vpop.f32.mrb[85].mxu1  ;;  %vm3437_vm13 = vcmp.lt.s32.totalorder %v3181_v18, 0  ;;  %v2190_v41 = vshrl.u32 %v1934_v2, 13  ;;  %v593_v34 = vmax.f32 %v337_v51, 0.0 }
 0x381   : > { %12719 = vst [vmem:[#allocation16_spill] sm:$0xff] %v12191_v61  ;;  %12720 = vst [vmem:[#allocation125_spill] sm:$0xff] %v12193_v22  ;;  %v12195_v5 = vadd.f32 %v6726_v39, %v4702_v0  ;;  %v12197_v45 = vpop.f32.mrb[86].mxu0  ;;  %v12199_v42 = vpop.f32.mrb[86].mxu1  ;;  %6587 = vmatmul.mubr.msk.f32.gmra.mrb[118].mxu0 %vm3437_vm13, %v12071_v28  ;;  %v3184_v33 = vxor.u32 %v2928_v1, %v2672_v16  ;;  %v2671_v60 = vmul.u32 3266489909, %v2415_v11 }
 0x382   : > { %12721 = vst [vmem:[#allocation126_spill] sm:$0xff] %v12197_v45  ;;  %v1677_v35 = vxor.u32 %v1421_v29, %v1165_v15  ;;  %v1424_v58 = vshrl.u32 %v1168_v4, 16  ;;  %v12202_v36 = vpop.f32.mrb[87].mxu0  ;;  %v12204_v61 = vpop.f32.mrb[87].mxu1  ;;  %v2446_v18 = vxor.u32 %v2190_v41, %v1934_v2  ;;  %v909_v0 = vadd.s32 %v8697_v47, %v11826_v21  ;;  %v367_v45 = vld [vmem:[%s8346_s6 + $0x5e0] sm:$0xff] }
 0x383   : > { %12722 = vst [vmem:[#allocation127_spill] sm:$0xff] %v12204_v61  ;;  %v12208_v39 = vadd.f32 %v593_v34, %v593_v34  ;;  %v624_v51 = vmax.f32 %v368_v37, 0.0  ;;  %v12211_v22 = vpop.f32.mrb[88].mxu0  ;;  %vm3440_vm14 = vcmp.lt.s32.totalorder %v3184_v33, 0  ;;  %v2927_v28 = vshrl.u32 %v2671_v60, 16  ;;  %v12215_v15 = vpop.f32.mrb[88].mxu1 }
 0x384   : > { %12723 = vst [vmem:[#allocation128_spill] sm:$0xff] %v12211_v22  ;;  %v1933_v16 = vmul.u32 2246822507, %v1677_v35  ;;  %v1680_v11 = vxor.u32 %v1424_v58, %v1168_v4  ;;  %v12213_v29 = vpop.f32.mrb[89].mxu0  ;;  %12725 = vst [vmem:[#allocation130_spill] sm:$0xff] %v12215_v15  ;;  %6602 = vmatprep.mubr.msk.f32.mxu1 %vm3440_vm14, %v12086_v19  ;;  %v1167_v47 = vxor.u32 %v8174_v44, %v909_v0  ;;  %v12223_v41 = vpop.f32.mrb[89].mxu1 }
 0x385   : > { %12724 = vst [vmem:[#allocation129_spill] sm:$0xff] %v12213_v29  ;;  %v2702_v2 = vmul.u32 3266489909, %v2446_v18  ;;  %v940_v37 = vadd.s32 %v8753_v57, %v11757_v46  ;;  %v12221_v1 = vadd.f32 %v624_v51, %v624_v51  ;;  %12726 = vst [vmem:[#allocation131_spill] sm:$0xff] %v12223_v41  ;;  %v3183_v34 = vxor.u32 %v2927_v28, %v2671_v60  ;;  %v370_v29 = vld [vmem:[%s8346_s6 + $0x5f8] sm:$0xff] }
 0x386   : > { %v2189_v33 = vshrl.u32 %v1933_v16, 13  ;;  %v1936_v4 = vmul.u32 2246822507, %v1680_v11  ;;  %v6761_v35 = vadd.f32 %v11591_v9, %v11584_v25  ;;  %v1423_v15 = vshrl.u32 %v1167_v47, 16 }
 0x387   : > { %v2958_v58 = vshrl.u32 %v2702_v2, 16  ;;  %v1198_v19 = vxor.u32 %v8174_v44, %v940_v37  ;;  %v623_v18 = vmax.f32 %v367_v45, 0.0  ;;  %vm3439_vm15 = vcmp.lt.s32.totalorder %v3183_v34, 0 }
 0x388   : > { %v2445_v0 = vxor.u32 %v2189_v33, %v1933_v16  ;;  %v2192_v22 = vshrl.u32 %v1936_v4, 13  ;;  %v4877_v51 = vadd.f32 %v6761_v35, %v11606_v53  ;;  %6603 = vmatmul.mubr.msk.f32.gmra.mrb[118].mxu1 %vm3439_vm15, %v12117_v59  ;;  %v1679_v28 = vxor.u32 %v1423_v15, %v1167_v47  ;;  %v369_v33 = vld [vmem:[%s8346_s6 + $0x5f0] sm:$0xff]  ;;  %v12237_v53 = vpop.f32.mrb[90].mxu0 }
 0x389   : > { %v3214_v60 = vxor.u32 %v2958_v58, %v2702_v2  ;;  %v1454_v11 = vshrl.u32 %v1198_v19, 16  ;;  %v939_v25 = vadd.s32 %v8753_v57, %v11773_v32  ;;  %v12233_v61 = vadd.f32 %v623_v18, %v623_v18  ;;  %v12244_v47 = vpop.f32.mrb[91].mxu0 }
 0x38a   : > { %v2701_v9 = vmul.u32 3266489909, %v2445_v0  ;;  %v2448_v41 = vxor.u32 %v2192_v22, %v1936_v4  ;;  %v626_v45 = vmax.f32 %v370_v29, 0.0  ;;  %v1935_v37 = vmul.u32 2246822507, %v1679_v28  ;;  %12727 = vst [vmem:[#allocation132_spill] sm:$0xff] %v12244_v47 }
 0x38b   : > { %vm3470_vm0 = vcmp.lt.s32.totalorder %v3214_v60, 0  ;;  %v1710_v16 = vxor.u32 %v1454_v11, %v1198_v19  ;;  %v1197_v34 = vxor.u32 %v8174_v44, %v939_v25  ;;  %v942_v2 = vadd.s32 %v8753_v57, %v11800_v56  ;;  %v400_v25 = vld [vmem:[%s8346_s6 + $0x6e8] sm:$0xff] }
 0x38c   : > { %6588 = vmatprep.mubr.msk.f32.mxu0 %vm3470_vm0, %v12136_v43  ;;  %v2957_v59 = vshrl.u32 %v2701_v9, 16  ;;  %v2704_v15 = vmul.u32 3266489909, %v2448_v41  ;;  %v12242_v22 = vadd.f32 %v626_v45, %v626_v45  ;;  %v2191_v29 = vshrl.u32 %v1935_v37, 13 }
 0x38d   : > { %v1966_v4 = vmul.u32 2246822507, %v1710_v16  ;;  %v1453_v35 = vshrl.u32 %v1197_v34, 16  ;;  %v6817_v58 = vadd.f32 %v11623_v14, %v11610_v54  ;;  %v1200_v43 = vxor.u32 %v8174_v44, %v942_v2 }
 0x38e   : > { %v3213_v19 = vxor.u32 %v2957_v59, %v2701_v9  ;;  %v2960_v18 = vshrl.u32 %v2704_v15, 16  ;;  %v625_v0 = vmax.f32 %v369_v33, 0.0  ;;  %v2447_v41 = vxor.u32 %v2191_v29, %v1935_v37  ;;  %v12262_v29 = vpop.f32.mrb[90].mxu1 }
 0x38f   : > { %v2222_v60 = vshrl.u32 %v1966_v4, 13  ;;  %v1709_v28 = vxor.u32 %v1453_v35, %v1197_v34  ;;  %v12249_v11 = vadd.f32 %v6817_v58, %v4877_v51  ;;  %v1456_v47 = vshrl.u32 %v1200_v43, 16  ;;  %12728 = vst [vmem:[#allocation133_spill] sm:$0xff] %v12262_v29 }
 0x390   : > { %vm3469_vm1 = vcmp.lt.s32.totalorder %v3213_v19, 0  ;;  %v3216_v45 = vxor.u32 %v2960_v18, %v2704_v15  ;;  %v941_v16 = vadd.s32 %v8753_v57, %v11826_v21  ;;  %v2703_v54 = vmul.u32 3266489909, %v2447_v41  ;;  %v12730_v19 = vld [vmem:[#allocation18_spill] sm:$0xff] }
 0x391   : > { %6589 = vmatmul.mubr.msk.f32.gmra.mrb[120].mxu0 %vm3469_vm1, %v12162_v30  ;;  %v2478_v14 = vxor.u32 %v2222_v60, %v1966_v4  ;;  %v1965_v9 = vmul.u32 2246822507, %v1709_v28  ;;  %v12255_v59 = vadd.f32 %v625_v0, %v625_v0  ;;  %v1712_v37 = vxor.u32 %v1456_v47, %v1200_v43  ;;  %v399_v30 = vld [vmem:[%s8346_s6 + $0x6e0] sm:$0xff]  ;;  %v12729_v47 = vld [vmem:[#allocation17_spill] sm:$0xff]  ;;  %v12268_v43 = vpop.f32.mrb[91].mxu1 }
 0x392   : > { %vm3472_vm2 = vcmp.lt.s32.totalorder %v3216_v45, 0  ;;  %v1199_v51 = vxor.u32 %v8174_v44, %v941_v16  ;;  %v656_v34 = vmax.f32 %v400_v25, 0.0  ;;  %v2959_v33 = vshrl.u32 %v2703_v54, 16 }
 0x393   : > { %6604 = vmatprep.mubr.msk.f32.mxu1 %vm3472_vm2, %v12181_v26  ;;  %v2734_v15 = vmul.u32 3266489909, %v2478_v14  ;;  %v2221_v2 = vshrl.u32 %v1965_v9, 13  ;;  %v972_v57 = vadd.s32 %v8817_v27, %v11757_v46  ;;  %v1968_v4 = vmul.u32 2246822507, %v1712_v37  ;;  %v402_v14 = vld [vmem:[%s8346_s6 + $0x6f8] sm:$0xff] }
 0x394   : > { %v1455_v35 = vshrl.u32 %v1199_v51, 16  ;;  %v12264_v58 = vadd.f32 %v656_v34, %v656_v34  ;;  %v6764_v18 = vadd.f32 %v12730_v19, %v12729_v47  ;;  %v3215_v26 = vxor.u32 %v2959_v33, %v2703_v54 }
 0x395   : > { %v2990_v0 = vshrl.u32 %v2734_v15, 16  ;;  %v2477_v41 = vxor.u32 %v2221_v2, %v1965_v9  ;;  %v1230_v60 = vxor.u32 %v8174_v44, %v972_v57  ;;  %v2224_v28 = vshrl.u32 %v1968_v4, 13 }
 0x396   : > { %v1711_v25 = vxor.u32 %v1455_v35, %v1199_v51  ;;  %v4882_v45 = vadd.f32 %v6764_v18, %v11673_v40  ;;  %v655_v16 = vmax.f32 %v399_v30, 0.0  ;;  %vm3471_vm3 = vcmp.lt.s32.totalorder %v3215_v26, 0  ;;  %v401_v30 = vld [vmem:[%s8346_s6 + $0x6f0] sm:$0xff] }
 0x397   : > { %v3246_v37 = vxor.u32 %v2990_v0, %v2734_v15  ;;  %v2733_v34 = vmul.u32 3266489909, %v2477_v41  ;;  %v1486_v29 = vshrl.u32 %v1230_v60, 16  ;;  %6605 = vmatmul.mubr.msk.f32.gmra.mrb[120].mxu1 %vm3471_vm3, %v12208_v39  ;;  %v2480_v47 = vxor.u32 %v2224_v28, %v1968_v4  ;;  %v12283_v4 = vpop.f32.mrb[92].mxu0 }
 0x398   : > { %v1967_v19 = vmul.u32 2246822507, %v1711_v25  ;;  %v971_v54 = vadd.s32 %v8817_v27, %v11773_v32  ;;  %v12276_v9 = vadd.f32 %v655_v16, %v655_v16  ;;  %v658_v40 = vmax.f32 %v402_v14, 0.0  ;;  %v12289_v0 = vpop.f32.mrb[93].mxu0  ;;  %v432_v25 = vld [vmem:[%s8346_s6 + $0x7e8] sm:$0xff] }
 0x399   : > { %vm3502_vm4 = vcmp.lt.s32.totalorder %v3246_v37, 0  ;;  %v2989_v51 = vshrl.u32 %v2733_v34, 16  ;;  %v1742_v33 = vxor.u32 %v1486_v29, %v1230_v60  ;;  %v2736_v15 = vmul.u32 3266489909, %v2480_v47 }
 0x39a   : > { %6590 = vmatprep.mubr.msk.f32.mxu0 %vm3502_vm4, %v12221_v1  ;;  %v2223_v2 = vshrl.u32 %v1967_v19, 13  ;;  %v1229_v57 = vxor.u32 %v8174_v44, %v971_v54  ;;  %v974_v39 = vadd.s32 %v8817_v27, %v11800_v56  ;;  %v12285_v26 = vadd.f32 %v658_v40, %v658_v40 }
 0x39b   : > { %v3245_v35 = vxor.u32 %v2989_v51, %v2733_v34  ;;  %v1998_v18 = vmul.u32 2246822507, %v1742_v33  ;;  %v6820_v29 = vadd.f32 %v11689_v31, %v11677_v10  ;;  %v2992_v1 = vshrl.u32 %v2736_v15, 16 }
 0x39c   : > { %v2479_v41 = vxor.u32 %v2223_v2, %v1967_v19  ;;  %v1485_v60 = vshrl.u32 %v1229_v57, 16  ;;  %v1232_v28 = vxor.u32 %v8174_v44, %v974_v39  ;;  %v657_v37 = vmax.f32 %v401_v30, 0.0  ;;  %v12301_v30 = vpop.f32.mrb[92].mxu1 }
 0x39d   : > { %vm3501_vm5 = vcmp.lt.s32.totalorder %v3245_v35, 0  ;;  %v2254_v16 = vshrl.u32 %v1998_v18, 13  ;;  %v12293_v14 = vadd.f32 %v6820_v29, %v4882_v45  ;;  %v3248_v34 = vxor.u32 %v2992_v1, %v2736_v15  ;;  %v431_v45 = vld [vmem:[%s8346_s6 + $0x7e0] sm:$0xff]  ;;  %v12309_v35 = vpop.f32.mrb[93].mxu1 }
 0x39e   : > { %6591 = vmatmul.mubr.msk.f32.gmra.mrb[122].mxu0 %vm3501_vm5, %v12233_v61  ;;  %v2735_v47 = vmul.u32 3266489909, %v2479_v41  ;;  %v1741_v54 = vxor.u32 %v1485_v60, %v1229_v57  ;;  %v1488_v10 = vshrl.u32 %v1232_v28, 16  ;;  %v973_v19 = vadd.s32 %v8817_v27, %v11826_v21 }
 0x39f   : > { %v2510_v31 = vxor.u32 %v2254_v16, %v1998_v18  ;;  %v12298_v51 = vadd.f32 %v657_v37, %v657_v37  ;;  %v688_v33 = vmax.f32 %v432_v25, 0.0  ;;  %vm3504_vm6 = vcmp.lt.s32.totalorder %v3248_v34, 0  ;;  %v434_v16 = vld [vmem:[%s8346_s6 + $0x7f8] sm:$0xff] }
 0x3a0   : > { %v2991_v40 = vshrl.u32 %v2735_v47, 16  ;;  %v1997_v2 = vmul.u32 2246822507, %v1741_v54  ;;  %v1744_v39 = vxor.u32 %v1488_v10, %v1232_v28  ;;  %6606 = vmatprep.mubr.msk.f32.mxu1 %vm3504_vm6, %v12242_v22  ;;  %v1231_v15 = vxor.u32 %v8174_v44, %v973_v19 }
 0x3a1   : > { %v2766_v61 = vmul.u32 3266489909, %v2510_v31  ;;  %v1004_v57 = vadd.s32 %v8872_v8, %v11757_v46  ;;  %v12307_v27 = vadd.f32 %v688_v33, %v688_v33  ;;  %v6767_v41 = vadd.f32 %v11720_v49, %v11707_v7 }
 0x3a2   : > { %v3247_v18 = vxor.u32 %v2991_v40, %v2735_v47  ;;  %v2253_v29 = vshrl.u32 %v1997_v2, 13  ;;  %v2000_v1 = vmul.u32 2246822507, %v1744_v39  ;;  %v1487_v28 = vshrl.u32 %v1231_v15, 16 }
 0x3a3   : > { %v3022_v60 = vshrl.u32 %v2766_v61, 16  ;;  %v1262_v22 = vxor.u32 %v8174_v44, %v1004_v57  ;;  %v687_v25 = vmax.f32 %v431_v45, 0.0  ;;  %v4887_v34 = vadd.f32 %v6767_v41, %v11742_v62  ;;  %v433_v45 = vld [vmem:[%s8346_s6 + $0x7f0] sm:$0xff]  ;;  %v12323_v62 = vpop.f32.mrb[94].mxu0  ;;  %s6353_s6 = sshll.u32 %s12860_s20, 3 }
 0x3a4   : > { %vm3503_vm7 = vcmp.lt.s32.totalorder %v3247_v18, 0  ;;  %v2509_v37 = vxor.u32 %v2253_v29, %v1997_v2  ;;  %v2256_v46 = vshrl.u32 %v2000_v1, 13  ;;  %v1743_v54 = vxor.u32 %v1487_v28, %v1231_v15  ;;  %v12330_v57 = vpop.f32.mrb[95].mxu0  ;;  %s12546_s19 = scalar_lea.vmem %s12569_s4, %s6353_s6 }
 0x3a5   : > { %6607 = vmatmul.mubr.msk.f32.gmra.mrb[122].mxu1 %vm3503_vm7, %v12255_v59  ;;  %v3278_v47 = vxor.u32 %v3022_v60, %v2766_v61  ;;  %v1518_v10 = vshrl.u32 %v1262_v22, 16  ;;  %v1003_v7 = vadd.s32 %v8872_v8, %v11773_v32  ;;  %v12319_v19 = vadd.f32 %v687_v25, %v687_v25 }
 0x3a6   : > { %v2765_v49 = vmul.u32 3266489909, %v2509_v37  ;;  %v2512_v31 = vxor.u32 %v2256_v46, %v2000_v1  ;;  %v690_v33 = vmax.f32 %v434_v16, 0.0  ;;  %v1999_v40 = vmul.u32 2246822507, %v1743_v54 }
 0x3a7   : > { %vm3534_vm8 = vcmp.lt.s32.totalorder %v3278_v47, 0  ;;  %v1774_v2 = vxor.u32 %v1518_v10, %v1262_v22  ;;  %v1261_v39 = vxor.u32 %v8174_v44, %v1003_v7  ;;  %v1006_v32 = vadd.s32 %v8872_v8, %v11800_v56 }
 0x3a8   : > { %6592 = vmatprep.mubr.msk.f32.mxu0 %vm3534_vm8, %v12264_v58  ;;  %v3021_v59 = vshrl.u32 %v2765_v49, 16  ;;  %v2768_v61 = vmul.u32 3266489909, %v2512_v31  ;;  %v12328_v15 = vadd.f32 %v690_v33, %v690_v33  ;;  %v2255_v18 = vshrl.u32 %v1999_v40, 13 }
 0x3a9   : > { %v2030_v29 = vmul.u32 2246822507, %v1774_v2  ;;  %v1517_v1 = vshrl.u32 %v1261_v39, 16  ;;  %v6823_v41 = vadd.f32 %v11754_v23, %v11731_v17  ;;  %v1264_v22 = vxor.u32 %v8174_v44, %v1006_v32 }
 0x3aa   : > { %v3277_v60 = vxor.u32 %v3021_v59, %v2765_v49  ;;  %v3024_v28 = vshrl.u32 %v2768_v61, 16  ;;  %v689_v58 = vmax.f32 %v433_v45, 0.0  ;;  %v2511_v25 = vxor.u32 %v2255_v18, %v1999_v40  ;;  %v12734_v18 = vld [vmem:[#allocation21_spill] sm:$0xff] }
 0x3ab   : > { %v2286_v16 = vshrl.u32 %v2030_v29, 13  ;;  %v1773_v37 = vxor.u32 %v1517_v1, %v1261_v39  ;;  %v12335_v46 = vadd.f32 %v6823_v41, %v4887_v34  ;;  %v1520_v47 = vshrl.u32 %v1264_v22, 16  ;;  %v12348_v39 = vpop.f32.mrb[94].mxu1  ;;  %v12736_v41 = vld [vmem:[#allocation22_spill] sm:$0xff] }
 0x3ac   : > { %vm3533_vm9 = vcmp.lt.s32.totalorder %v3277_v60, 0  ;;  %v3280_v56 = vxor.u32 %v3024_v28, %v2768_v61  ;;  %v1005_v54 = vadd.s32 %v8872_v8, %v11826_v21  ;;  %v2767_v10 = vmul.u32 3266489909, %v2511_v25  ;;  %v12731_v8 = vld [vmem:[#allocation19_spill] sm:$0xff]  ;;  %v12732_v21 = vld [vmem:[#allocation20_spill] sm:$0xff]  ;;  %v12733_v61 = vld [vmem:[#allocation30_spill] sm:$0xff] }
 0x3ad   : > { %6593 = vmatmul.mubr.msk.f32.gmra.mrb[124].mxu0 %vm3533_vm9, %v12276_v9  ;;  %v2542_v17 = vxor.u32 %v2286_v16, %v2030_v29  ;;  %v2029_v23 = vmul.u32 2246822507, %v1773_v37  ;;  %v12340_v7 = vadd.f32 %v689_v58, %v689_v58  ;;  %v1776_v49 = vxor.u32 %v1520_v47, %v1264_v22  ;;  %v12735_v29 = vld [vmem:[#allocation23_spill] sm:$0xff]  ;;  %v12353_v1 = vpop.f32.mrb[95].mxu1  ;;  %v12737_v60 = vld [vmem:[#allocation24_spill] sm:$0xff]  ;;  %v12738_v47 = vld [vmem:[#allocation25_spill] sm:$0xff] }
 0x3ae   : > { %vm3536_vm10 = vcmp.lt.s32.totalorder %v3280_v56, 0  ;;  %v1263_v31 = vxor.u32 %v8174_v44, %v1005_v54  ;;  %v6770_v34 = vadd.f32 %v11776_v63, %v11765_v12  ;;  %v3023_v33 = vshrl.u32 %v2767_v10, 16  ;;  %v12739_v54 = vld [vmem:[#allocation4_spill] sm:$0xff] }
 0x3af   : > { %6608 = vmatprep.mubr.msk.f32.mxu1 %vm3536_vm10, %v12285_v26  ;;  %v2798_v40 = vmul.u32 3266489909, %v2542_v17  ;;  %v2285_v2 = vshrl.u32 %v2029_v23, 13  ;;  %v6826_v9 = vadd.f32 %v12732_v21, %v12731_v8  ;;  %v2032_v45 = vmul.u32 2246822507, %v1776_v49  ;;  %v12742_v21 = vld [vmem:[#allocation28_spill] sm:$0xff] }
 0x3b0   : > { %v1519_v59 = vshrl.u32 %v1263_v31, 16  ;;  %v4892_v32 = vadd.f32 %v6770_v34, %v12733_v61  ;;  %v6773_v44 = vadd.f32 %v12735_v29, %v12734_v18  ;;  %v3279_v12 = vxor.u32 %v3023_v33, %v2767_v10  ;;  %v12741_v33 = vld [vmem:[#allocation27_spill] sm:$0xff]  ;;  %v12744_v61 = vld [vmem:[#allocation29_spill] sm:$0xff] }
 0x3b1   : > { %v3054_v63 = vshrl.u32 %v2798_v40, 16  ;;  %v2541_v26 = vxor.u32 %v2285_v2, %v2029_v23  ;;  %v6829_v28 = vadd.f32 %v12737_v60, %v12736_v41  ;;  %v2288_v22 = vshrl.u32 %v2032_v45, 13  ;;  %v12740_v23 = vld [vmem:[#allocation26_spill] sm:$0xff]  ;;  %v12747_v18 = vld [vmem:[#allocation35_spill] sm:$0xff]  ;;  %v12749_v41 = vld [vmem:[#allocation36_spill] sm:$0xff] }
 0x3b2   : > { %v1775_v58 = vxor.u32 %v1519_v59, %v1263_v31  ;;  %v4997_v25 = vadd.f32 %v6826_v9, %v4892_v32  ;;  %v4897_v16 = vadd.f32 %v6773_v44, %v11916_v24  ;;  %vm3535_vm11 = vcmp.lt.s32.totalorder %v3279_v12, 0  ;;  %v12743_v24 = vld [vmem:[#allocation31_spill] sm:$0xff]  ;;  %v12745_v32 = vld [vmem:[#allocation32_spill] sm:$0xff] }
 0x3b3   : > { %v3310_v37 = vxor.u32 %v3054_v63, %v2798_v40  ;;  %v2797_v56 = vmul.u32 3266489909, %v2541_v26  ;;  %v6776_v17 = vadd.f32 %v12739_v54, %v12738_v47  ;;  %6609 = vmatmul.mubr.msk.f32.gmra.mrb[124].mxu1 %vm3535_vm11, %v12298_v51  ;;  %v2544_v49 = vxor.u32 %v2288_v22, %v2032_v45  ;;  %v12746_v45 = vld [vmem:[#allocation33_spill] sm:$0xff]  ;;  %v12748_v26 = vld [vmem:[#allocation34_spill] sm:$0xff] }
 0x3b4   : > { %v2031_v10 = vmul.u32 2246822507, %v1775_v58  ;;  %v5002_v34 = vadd.f32 %v6829_v28, %v4897_v16  ;;  %v6832_v2 = vadd.f32 %v12741_v33, %v12740_v23  ;;  %v6779_v9 = vadd.f32 %v12743_v24, %v12742_v21  ;;  %v12751_v58 = vld [vmem:[#allocation39_spill] sm:$0xff]  ;;  %v12752_v54 = vld [vmem:[#allocation38_spill] sm:$0xff]  ;;  %v12755_v23 = vld [vmem:[#allocation41_spill] sm:$0xff] }
 0x3b5   : > { %vm3566_vm12 = vcmp.lt.s32.totalorder %v3310_v37, 0  ;;  %v3053_v8 = vshrl.u32 %v2797_v56, 16  ;;  %v4902_v31 = vadd.f32 %v6776_v17, %v12008_v3  ;;  %v2800_v40 = vmul.u32 3266489909, %v2544_v49  ;;  %v12377_v37 = vpop.f32.mrb[96].mxu0  ;;  %v12753_v17 = vld [vmem:[#allocation40_spill] sm:$0xff] }
 0x3b6   : > { %6594 = vmatprep.mubr.msk.f32.mxu0 %vm3566_vm12, %v12307_v27  ;;  %v2287_v59 = vshrl.u32 %v2031_v10, 13  ;;  %v6835_v51 = vadd.f32 %v12745_v32, %v12744_v61  ;;  %v6782_v29 = vadd.f32 %v12747_v18, %v12746_v45  ;;  %v4907_v63 = vadd.f32 %v6779_v9, %v12103_v50  ;;  %v12750_v27 = vld [vmem:[#allocation37_spill] sm:$0xff]  ;;  %v12383_v33 = vpop.f32.mrb[97].mxu0  ;;  %v12756_v21 = vld [vmem:[#allocation6_spill] sm:$0xff] }
 0x3b7   : > { %v3309_v44 = vxor.u32 %v3053_v8, %v2797_v56  ;;  %v5007_v12 = vadd.f32 %v6832_v2, %v4902_v31  ;;  %v6838_v3 = vadd.f32 %v12749_v41, %v12748_v26  ;;  %v3056_v60 = vshrl.u32 %v2800_v40, 16  ;;  %v12754_v49 = vld [vmem:[#allocation5_spill] sm:$0xff]  ;;  %v12757_v24 = vld [vmem:[#allocation42_spill] sm:$0xff]  ;;  %v12764_v26 = vld [vmem:[#allocation48_spill] sm:$0xff] }
 0x3b8   : > { %v2543_v28 = vxor.u32 %v2287_v59, %v2031_v10  ;;  %v4912_v22 = vadd.f32 %v6782_v29, %v12195_v5  ;;  %v6873_v16 = vadd.f32 %v12751_v58, %v12750_v27  ;;  %v5012_v47 = vadd.f32 %v6835_v51, %v4907_v63  ;;  %v12758_v59 = vld [vmem:[#allocation43_spill] sm:$0xff]  ;;  %v12759_v61 = vld [vmem:[#allocation45_spill] sm:$0xff]  ;;  %v12760_v51 = vld [vmem:[#allocation44_spill] sm:$0xff] }
 0x3b9   : > { %vm3565_vm13 = vcmp.lt.s32.totalorder %v3309_v44, 0  ;;  %v6929_v56 = vadd.f32 %v12753_v17, %v12752_v54  ;;  %v6876_v50 = vadd.f32 %v12755_v23, %v12754_v49  ;;  %v3312_v10 = vxor.u32 %v3056_v60, %v2800_v40  ;;  %v12761_v45 = vld [vmem:[#allocation46_spill] sm:$0xff]  ;;  %v12763_v40 = vld [vmem:[#allocation49_spill] sm:$0xff]  ;;  %v12766_v60 = vld [vmem:[#allocation51_spill] sm:$0xff]  ;;  %v12406_v49 = vpop.f32.mrb[96].mxu1 }
 0x3ba   : > { %6595 = vmatmul.mubr.msk.f32.gmra.mrb[126].mxu0 %vm3565_vm13, %v12319_v19  ;;  %v2799_v2 = vmul.u32 3266489909, %v2543_v28  ;;  %v5017_v5 = vadd.f32 %v6838_v3, %v4912_v22  ;;  %v5087_v8 = vadd.f32 %v6873_v16, %v12249_v11  ;;  %v6932_v9 = vadd.f32 %v12757_v24, %v12756_v21  ;;  %v12762_v19 = vld [vmem:[#allocation47_spill] sm:$0xff]  ;;  %v12765_v41 = vld [vmem:[#allocation50_spill] sm:$0xff]  ;;  %v12767_v28 = vld [vmem:[#allocation53_spill] sm:$0xff]  ;;  %v12412_v21 = vpop.f32.mrb[97].mxu1 }
 0x3bb   : > { %v5092_v31 = vadd.f32 %v6876_v50, %v12293_v14  ;;  %v6879_v32 = vadd.f32 %v12759_v61, %v12758_v59  ;;  %v6935_v18 = vadd.f32 %v12761_v45, %v12760_v51  ;;  %vm3568_vm14 = vcmp.lt.s32.totalorder %v3312_v10, 0  ;;  %v12768_v16 = vld [vmem:[#allocation52_spill] sm:$0xff]  ;;  %v12769_v54 = vld [vmem:[#allocation54_spill] sm:$0xff]  ;;  %v12773_v24 = vld [vmem:[#allocation57_spill] sm:$0xff] }
 0x3bc   : > { %v3055_v29 = vshrl.u32 %v2799_v2, 16  ;;  %v5192_v44 = vadd.f32 %v6929_v56, %v5087_v8  ;;  %v6882_v63 = vadd.f32 %v12763_v40, %v12762_v19  ;;  %6610 = vmatprep.mubr.msk.f32.mxu1 %vm3568_vm14, %v12328_v15  ;;  %v6938_v3 = vadd.f32 %v12765_v41, %v12764_v26  ;;  %v12771_v10 = vld [vmem:[#allocation56_spill] sm:$0xff]  ;;  %v12772_v8 = vld [vmem:[#allocation58_spill] sm:$0xff]  ;;  %v12777_v51 = vld [vmem:[#allocation61_spill] sm:$0xff] }
 0x3bd   : > { %v5197_v11 = vadd.f32 %v6932_v9, %v5092_v31  ;;  %v5097_v14 = vadd.f32 %v6879_v32, %v12335_v46  ;;  %v6885_v22 = vadd.f32 %v12767_v28, %v12766_v60  ;;  %v6941_v17 = vadd.f32 %v12769_v54, %v12768_v16  ;;  %v12770_v46 = vld [vmem:[#allocation55_spill] sm:$0xff]  ;;  %v12775_v61 = vld [vmem:[#allocation60_spill] sm:$0xff]  ;;  %v12780_v19 = vld [vmem:[#allocation66_spill] sm:$0xff]  ;;  %v12431_v54 = vpop.f32.mrb[98].mxu0 }
 0x3be   : > { %v3311_v27 = vxor.u32 %v3055_v29, %v2799_v2  ;;  %v5102_v58 = vadd.f32 %v6882_v63, %v4997_v25  ;;  %v6888_v56 = vadd.f32 %v11912_v52, %v11908_v55  ;;  %v6944_v50 = vadd.f32 %v12770_v46, %v11910_v6  ;;  %v12774_v9 = vld [vmem:[#allocation59_spill] sm:$0xff]  ;;  %v12779_v29 = vld [vmem:[#allocation64_spill] sm:$0xff]  ;;  %v12781_v63 = vld [vmem:[#allocation65_spill] sm:$0xff] }
 0x3bf   : > { %v5202_v15 = vadd.f32 %v6935_v18, %v5097_v14  ;;  %v5107_v23 = vadd.f32 %v6885_v22, %v5002_v34  ;;  %v6891_v31 = vadd.f32 %v12772_v8, %v12771_v10  ;;  %v6947_v59 = vadd.f32 %v12774_v9, %v12773_v24  ;;  %v12776_v34 = vld [vmem:[#allocation62_spill] sm:$0xff]  ;;  %v12778_v6 = vld [vmem:[#allocation63_spill] sm:$0xff]  ;;  %v12783_v26 = vld [vmem:[#allocation68_spill] sm:$0xff] }
 0x3c0   : > { %vm3567_vm15 = vcmp.lt.s32.totalorder %v3311_v27, 0  ;;  %v5207_v25 = vadd.f32 %v6938_v3, %v5102_v58  ;;  %v5112_v2 = vadd.f32 %v6888_v56, %v5007_v12  ;;  %v6894_v32 = vadd.f32 %v12776_v34, %v12775_v61  ;;  %v12782_v14 = vld [vmem:[#allocation67_spill] sm:$0xff]  ;;  %v12784_v41 = vld [vmem:[#allocation70_spill] sm:$0xff]  ;;  %v12785_v28 = vld [vmem:[#allocation69_spill] sm:$0xff] }
 0x3c1   : > { %6611 = vmatmul.mubr.msk.f32.gmra.mrb[126].mxu1 %vm3567_vm15, %v12340_v7  ;;  %v5212_v55 = vadd.f32 %v6941_v17, %v5107_v23  ;;  %v5117_v52 = vadd.f32 %v6891_v31, %v5012_v47  ;;  %v6950_v45 = vadd.f32 %v12778_v6, %v12777_v51  ;;  %v6985_v40 = vadd.f32 %v12780_v19, %v12779_v29  ;;  %v12786_v47 = vld [vmem:[#allocation71_spill] sm:$0xff]  ;;  %v12787_v27 = vld [vmem:[#allocation72_spill] sm:$0xff]  ;;  %v12788_v58 = vld [vmem:[#allocation74_spill] sm:$0xff] }
 0x3c2   : > { %v5217_v18 = vadd.f32 %v6944_v50, %v5112_v2  ;;  %v7041_v12 = vadd.f32 %v12782_v14, %v12781_v63  ;;  %v6988_v3 = vadd.f32 %v12784_v41, %v12783_v26  ;;  %v5122_v7 = vadd.f32 %v6894_v32, %v5017_v5  ;;  %v12789_v23 = vld [vmem:[#allocation73_spill] sm:$0xff]  ;;  %v12790_v46 = vld [vmem:[#allocation75_spill] sm:$0xff]  ;;  %v12791_v10 = vld [vmem:[#allocation76_spill] sm:$0xff]  ;;  %v12437_v2 = vpop.f32.mrb[99].mxu0 }
 0x3c3   : > { %v5222_v60 = vadd.f32 %v6947_v59, %v5117_v52  ;;  %v7044_v22 = vadd.f32 %v12786_v47, %v12785_v28  ;;  %v6991_v16 = vadd.f32 %v12788_v58, %v12787_v27  ;;  %v5297_v17 = vadd.f32 %v6985_v40, %v5192_v44  ;;  %v12792_v8 = vld [vmem:[#allocation78_spill] sm:$0xff]  ;;  %v12793_v9 = vld [vmem:[#allocation77_spill] sm:$0xff]  ;;  %v12794_v59 = vld [vmem:[#allocation79_spill] sm:$0xff] }
 0x3c4   : > { %v5302_v56 = vadd.f32 %v6988_v3, %v5197_v11  ;;  %v7047_v50 = vadd.f32 %v12790_v46, %v12789_v23  ;;  %v6994_v31 = vadd.f32 %v12792_v8, %v12791_v10  ;;  %v5227_v24 = vadd.f32 %v6950_v45, %v5122_v7  ;;  %v12795_v61 = vld [vmem:[#allocation7_spill] sm:$0xff]  ;;  %v12796_v34 = vld [vmem:[#allocation80_spill] sm:$0xff]  ;;  %v12798_v29 = vld [vmem:[#allocation81_spill] sm:$0xff] }
 0x3c5   : > { %v5307_v5 = vadd.f32 %v6991_v16, %v5202_v15  ;;  %v7050_v52 = vadd.f32 %v12794_v59, %v12793_v9  ;;  %v6997_v32 = vadd.f32 %v12796_v34, %v12795_v61  ;;  %v5402_v51 = vadd.f32 %v7041_v12, %v5297_v17  ;;  %v12797_v11 = vld [vmem:[#allocation8_spill] sm:$0xff]  ;;  %v12799_v14 = vld [vmem:[#allocation82_spill] sm:$0xff]  ;;  %v12801_v3 = vld [vmem:[#allocation83_spill] sm:$0xff] }
 0x3c6   : > { %v5407_v6 = vadd.f32 %v7044_v22, %v5302_v56  ;;  %v5312_v44 = vadd.f32 %v6994_v31, %v5207_v25  ;;  %v7053_v19 = vadd.f32 %v12798_v29, %v12797_v11  ;;  %v12800_v26 = vld [vmem:[#allocation84_spill] sm:$0xff]  ;;  %v12802_v45 = vld [vmem:[#allocation85_spill] sm:$0xff]  ;;  %v12803_v28 = vld [vmem:[#allocation86_spill] sm:$0xff] }
 0x3c7   : > { %v5412_v40 = vadd.f32 %v7047_v50, %v5307_v5  ;;  %v5317_v63 = vadd.f32 %v6997_v32, %v5212_v55  ;;  %v7000_v41 = vadd.f32 %v12800_v26, %v12799_v14  ;;  %v7056_v15 = vadd.f32 %v12802_v45, %v12801_v3  ;;  %v12804_v47 = vld [vmem:[#allocation88_spill] sm:$0xff]  ;;  %v12805_v58 = vld [vmem:[#allocation87_spill] sm:$0xff]  ;;  %v12806_v16 = vld [vmem:[#allocation89_spill] sm:$0xff] }
 0x3c8   : > { %v5417_v7 = vadd.f32 %v7050_v52, %v5312_v44  ;;  %v7003_v27 = vadd.f32 %v12804_v47, %v12803_v28  ;;  %v7059_v12 = vadd.f32 %v12806_v16, %v12805_v58  ;;  %v12807_v22 = vld [vmem:[#allocation90_spill] sm:$0xff]  ;;  %v12808_v25 = vld [vmem:[#allocation9_spill] sm:$0xff]  ;;  %v12809_v46 = vld [vmem:[#allocation91_spill] sm:$0xff] }
 0x3c9   : > { %v7006_v17 = vadd.f32 %v12808_v25, %v12807_v22  ;;  %v5422_v56 = vadd.f32 %v7053_v19, %v5317_v63  ;;  %v5322_v23 = vadd.f32 %v7000_v41, %v5217_v18  ;;  %v12810_v55 = vld [vmem:[#allocation10_spill] sm:$0xff]  ;;  %v12811_v10 = vld [vmem:[#allocation92_spill] sm:$0xff]  ;;  %v12813_v59 = vld [vmem:[#allocation93_spill] sm:$0xff] }
 0x3ca   : > { %v7062_v50 = vadd.f32 %v12810_v55, %v12809_v46  ;;  %v12812_v8 = vld [vmem:[#allocation94_spill] sm:$0xff]  ;;  %v5327_v5 = vadd.f32 %v7003_v27, %v5222_v60  ;;  %v12814_v52 = vld [vmem:[#allocation95_spill] sm:$0xff]  ;;  %v12815_v34 = vld [vmem:[#allocation96_spill] sm:$0xff]  ;;  %v12469_v27 = vpop.f32.mrb[98].mxu1 }
 0x3cb   : > { %v7097_v31 = vadd.f32 %v12812_v8, %v12811_v10  ;;  %v5332_v9 = vadd.f32 %v7006_v17, %v5227_v24  ;;  %v7153_v61 = vadd.f32 %v12814_v52, %v12813_v59  ;;  %v12816_v32 = vld [vmem:[#allocation98_spill] sm:$0xff]  ;;  %v5427_v11 = vadd.f32 %v7056_v15, %v5322_v23  ;;  %v12817_v14 = vld [vmem:[#allocation97_spill] sm:$0xff]  ;;  %v12818_v26 = vld [vmem:[#allocation99_spill] sm:$0xff]  ;;  %v7379_v23 = vpop.f32.mrb[99].mxu1 }
 0x3cc   : > { %v7100_v44 = vadd.f32 %v12816_v32, %v12815_v34  ;;  %v7156_v19 = vadd.f32 %v12818_v26, %v12817_v14  ;;  %v12819_v18 = vld [vmem:[#allocation100_spill] sm:$0xff]  ;;  %v12820_v63 = vld [vmem:[#allocation102_spill] sm:$0xff]  ;;  %v5432_v3 = vadd.f32 %v7059_v12, %v5327_v5  ;;  %v12821_v47 = vld [vmem:[#allocation101_spill] sm:$0xff] }
 0x3cd   : > { %v5507_v29 = vadd.f32 %v7097_v31, %v5402_v51  ;;  %v7103_v41 = vadd.f32 %v12820_v63, %v12819_v18  ;;  %v5437_v45 = vadd.f32 %v7062_v50, %v5332_v9  ;;  %v12822_v60 = vld [vmem:[#allocation103_spill] sm:$0xff]  ;;  %v12823_v22 = vld [vmem:[#allocation12_spill] sm:$0xff]  ;;  %v12826_v55 = vld [vmem:[#allocation105_spill] sm:$0xff] }
 0x3ce   : > { %v5512_v28 = vadd.f32 %v7100_v44, %v5407_v6  ;;  %v7159_v24 = vadd.f32 %v12822_v60, %v12821_v47  ;;  %v7106_v15 = vadd.f32 %v12823_v22, %v12094_v38  ;;  %v12824_v51 = vld [vmem:[#allocation11_spill] sm:$0xff]  ;;  %v12825_v25 = vld [vmem:[#allocation104_spill] sm:$0xff]  ;;  %v12828_v50 = vld [vmem:[#allocation106_spill] sm:$0xff] }
 0x3cf   : > { %v5612_v58 = vadd.f32 %v7153_v61, %v5507_v29  ;;  %v5517_v16 = vadd.f32 %v7103_v41, %v5412_v40  ;;  %v7162_v17 = vadd.f32 %v12825_v25, %v12824_v51  ;;  %v12827_v10 = vld [vmem:[#allocation107_spill] sm:$0xff]  ;;  %v12829_v6 = vld [vmem:[#allocation108_spill] sm:$0xff]  ;;  %v12830_v31 = vld [vmem:[#allocation109_spill] sm:$0xff] }
 0x3d0   : > { %v5617_v46 = vadd.f32 %v7156_v19, %v5512_v28  ;;  %v7109_v12 = vadd.f32 %v12827_v10, %v12826_v55  ;;  %v7165_v8 = vadd.f32 %v12829_v6, %v12828_v50  ;;  %v12831_v5 = vld [vmem:[#allocation111_spill] sm:$0xff]  ;;  %v5522_v52 = vadd.f32 %v7106_v15, %v5417_v7  ;;  %v12832_v40 = vld [vmem:[#allocation110_spill] sm:$0xff]  ;;  %v12833_v61 = vld [vmem:[#allocation112_spill] sm:$0xff] }
 0x3d1   : > { %v7112_v9 = vadd.f32 %v12831_v5, %v12830_v31  ;;  %v5622_v59 = vadd.f32 %v7159_v24, %v5517_v16  ;;  %v7168_v34 = vadd.f32 %v12833_v61, %v12832_v40  ;;  %v12834_v38 = vld [vmem:[#allocation113_spill] sm:$0xff]  ;;  %v12835_v14 = vld [vmem:[#allocation114_spill] sm:$0xff]  ;;  %v12837_v18 = vld [vmem:[#allocation115_spill] sm:$0xff]  ;;  %v7325_v31 = vpop.f32.mrb[100].mxu0 }
 0x3d2   : > { %v7115_v32 = vadd.f32 %v12140_v48, %v12834_v38  ;;  %v5527_v44 = vadd.f32 %v7109_v12, %v5422_v56  ;;  %v7171_v26 = vadd.f32 %v12142_v13, %v12835_v14  ;;  %v12836_v19 = vld [vmem:[#allocation13_spill] sm:$0xff]  ;;  %v5627_v41 = vadd.f32 %v7162_v17, %v5522_v52  ;;  %v12838_v47 = vld [vmem:[#allocation14_spill] sm:$0xff]  ;;  %v12839_v60 = vld [vmem:[#allocation116_spill] sm:$0xff]  ;;  %v7326_v38 = vpop.f32.mrb[101].mxu0 }
 0x3d3   : > { %v5532_v29 = vadd.f32 %v7112_v9, %v5427_v11  ;;  %v7118_v63 = vadd.f32 %v12837_v18, %v12836_v19  ;;  %v7174_v24 = vadd.f32 %v12839_v60, %v12838_v47  ;;  %v12840_v7 = vld [vmem:[#allocation117_spill] sm:$0xff]  ;;  %v12841_v16 = vld [vmem:[#allocation119_spill] sm:$0xff]  ;;  %v12842_v48 = vld [vmem:[#allocation118_spill] sm:$0xff] }
 0x3d4   : > { %v5537_v28 = vadd.f32 %v7115_v32, %v5432_v3  ;;  %v7209_v22 = vadd.f32 %v12841_v16, %v12840_v7  ;;  %v5632_v15 = vadd.f32 %v7165_v8, %v5527_v44  ;;  %v12843_v56 = vld [vmem:[#allocation120_spill] sm:$0xff]  ;;  %v12844_v13 = vld [vmem:[#allocation121_spill] sm:$0xff]  ;;  %v12845_v12 = vld [vmem:[#allocation123_spill] sm:$0xff] }
 0x3d5   : > { %v5637_v51 = vadd.f32 %v7168_v34, %v5532_v29  ;;  %v5542_v25 = vadd.f32 %v7118_v63, %v5437_v45  ;;  %v7265_v11 = vadd.f32 %v12843_v56, %v12842_v48  ;;  %v7212_v50 = vadd.f32 %v12845_v12, %v12844_v13  ;;  %v12846_v6 = vld [vmem:[#allocation122_spill] sm:$0xff]  ;;  %v12847_v17 = vld [vmem:[#allocation124_spill] sm:$0xff]  ;;  %v12849_v40 = vld [vmem:[#allocation15_spill] sm:$0xff] }
 0x3d6   : > { %v5642_v55 = vadd.f32 %v7171_v26, %v5537_v28  ;;  %v5717_v10 = vadd.f32 %v7209_v22, %v5612_v58  ;;  %v7268_v3 = vadd.f32 %v12847_v17, %v12846_v6  ;;  %v12848_v9 = vld [vmem:[#allocation16_spill] sm:$0xff]  ;;  %v12850_v8 = vld [vmem:[#allocation125_spill] sm:$0xff]  ;;  %v12851_v45 = vld [vmem:[#allocation126_spill] sm:$0xff] }
 0x3d7   : > { %v5647_v5 = vadd.f32 %v7174_v24, %v5542_v25  ;;  %v7215_v52 = vadd.f32 %v12848_v9, %v12185_v20  ;;  %v7271_v61 = vadd.f32 %v12850_v8, %v12849_v40  ;;  %v7218_v34 = vadd.f32 %v12202_v36, %v12851_v45  ;;  %v12852_v44 = vld [vmem:[#allocation127_spill] sm:$0xff]  ;;  %v12853_v14 = vld [vmem:[#allocation128_spill] sm:$0xff]  ;;  %v12854_v26 = vld [vmem:[#allocation129_spill] sm:$0xff] }
 0x3d8   : > { %v5822_v32 = vadd.f32 %v7265_v11, %v5717_v10  ;;  %v5722_v58 = vadd.f32 %v7212_v50, %v5617_v46  ;;  %v7274_v29 = vadd.f32 %v12852_v44, %v12199_v42  ;;  %v7221_v19 = vadd.f32 %v12854_v26, %v12853_v14  ;;  %v12855_v28 = vld [vmem:[#allocation130_spill] sm:$0xff]  ;;  %v12856_v47 = vld [vmem:[#allocation131_spill] sm:$0xff]  ;;  %v12857_v60 = vld [vmem:[#allocation132_spill] sm:$0xff] }
 0x3d9   : > { %v5727_v18 = vadd.f32 %v7215_v52, %v5622_v59  ;;  %v5732_v63 = vadd.f32 %v7218_v34, %v5627_v41  ;;  %v7277_v20 = vadd.f32 %v12856_v47, %v12855_v28  ;;  %v7224_v24 = vadd.f32 %v12857_v60, %v12237_v53  ;;  %v12858_v36 = vld [vmem:[#allocation133_spill] sm:$0xff] }
 0x3da   : > { %v5827_v7 = vadd.f32 %v7268_v3, %v5722_v58  ;;  %v5737_v16 = vadd.f32 %v7221_v19, %v5632_v15  ;;  %v7280_v22 = vadd.f32 %v12268_v43, %v12858_v36  ;;  %v7227_v46 = vadd.f32 %v12289_v0, %v12283_v4  ;;  %v7381_v15 = vpop.f32.mrb[100].mxu1 }
 0x3db   : > { %v5832_v42 = vadd.f32 %v7271_v61, %v5727_v18  ;;  %v5837_v25 = vadd.f32 %v7274_v29, %v5732_v63  ;;  %v5742_v48 = vadd.f32 %v7224_v24, %v5637_v51  ;;  %v7283_v59 = vadd.f32 %v12309_v35, %v12301_v30  ;;  %v7382_v30 = vpop.f32.mrb[101].mxu1 }
 0x3dc   : > { %v5842_v41 = vadd.f32 %v7277_v20, %v5737_v16  ;;  %v5747_v56 = vadd.f32 %v7227_v46, %v5642_v55  ;;  %v7230_v11 = vadd.f32 %v12330_v57, %v12323_v62  ;;  %v7286_v53 = vadd.f32 %v12353_v1, %v12348_v39 }
 0x3dd   : > { %v5847_v10 = vadd.f32 %v7280_v22, %v5742_v48  ;;  %v7321_v43 = vadd.f32 %v12383_v33, %v12377_v37  ;;  %v7377_v4 = vadd.f32 %v12412_v21, %v12406_v49  ;;  %v7324_v0 = vadd.f32 %v12437_v2, %v12431_v54  ;;  %v7328_v33 = vpop.f32.mrb[102].mxu0  ;;  %v7384_v54 = vpop.f32.mrb[102].mxu1 }
 0x3de   : > { %v5852_v35 = vadd.f32 %v7283_v59, %v5747_v56  ;;  %v5752_v51 = vadd.f32 %v7230_v11, %v5647_v5  ;;  %v7380_v55 = vadd.f32 %v7379_v23, %v12469_v27  ;;  %v7327_v62 = vadd.f32 %v7326_v38, %v7325_v31  ;;  %v7329_v49 = vpop.f32.mrb[103].mxu0  ;;  %v7385_v2 = vpop.f32.mrb[103].mxu1 }
 0x3df   : > { %v5927_v57 = vadd.f32 %v7321_v43, %v5822_v32  ;;  %v5932_v13 = vadd.f32 %v7324_v0, %v5827_v7  ;;  %v7383_v39 = vadd.f32 %v7382_v30, %v7381_v15  ;;  %v7330_v21 = vadd.f32 %v7329_v49, %v7328_v33 }
 0x3e0   : > { %v5857_v1 = vadd.f32 %v7286_v53, %v5752_v51  ;;  %v5937_v12 = vadd.f32 %v7327_v62, %v5832_v42  ;;  %v7386_v3 = vadd.f32 %v7385_v2, %v7384_v54 }
 0x3e1   : > { %v6032_v50 = vadd.f32 %v7377_v4, %v5927_v57  ;;  %v6037_v6 = vadd.f32 %v7380_v55, %v5932_v13  ;;  %v5942_v17 = vadd.f32 %v7330_v21, %v5837_v25 }
 0x3e2   : > { %v12530_v37 = vadd.f32 %v7383_v39, %v5937_v12 }
 0x3e3   : > { %v12532_v5 = vadd.f32 %v7386_v3, %v5942_v17  ;;  %v7331_v27 = vpop.f32.mrb[104].mxu0 }
 0x3e4   : > { %v7332_v23 = vpop.f32.mrb[105].mxu0 }
 0x3e5   : > { %v7333_v31 = vadd.f32 %v7332_v23, %v7331_v27 }
 0x3e7   : > { %v5947_v9 = vadd.f32 %v7333_v31, %v5842_v41 }
 0x3e9   : > { %v7387_v52 = vpop.f32.mrb[104].mxu1 }
 0x3ea   : > { %v7388_v40 = vpop.f32.mrb[105].mxu1 }
 0x3eb   : > { %v7389_v8 = vadd.f32 %v7388_v40, %v7387_v52 }
 0x3ed   : > { %v12534_v61 = vadd.f32 %v7389_v8, %v5947_v9 }
 0x3f2   : > { %v7334_v45 = vpop.f32.mrb[106].mxu0 }
 0x3f3   : > { %v7335_v34 = vpop.f32.mrb[107].mxu0 }
 0x3f4   : > { %v7336_v38 = vadd.f32 %v7335_v34, %v7334_v45 }
 0x3f6   : > { %v5952_v32 = vadd.f32 %v7336_v38, %v5847_v10 }
 0x3f9   : > { %v7390_v58 = vpop.f32.mrb[106].mxu1 }
 0x3fa   : > { %v7391_v44 = vpop.f32.mrb[107].mxu1 }
 0x3fb   : > { %v7392_v29 = vadd.f32 %v7391_v44, %v7390_v58 }
 0x3fd   : > { %v12536_v14 = vadd.f32 %v7392_v29, %v5952_v32 }
 0x400   : > { %v7337_v26 = vpop.f32.mrb[108].mxu0 }
 0x401   : > { %v7338_v19 = vpop.f32.mrb[109].mxu0 }
 0x402   : > { %v7339_v18 = vadd.f32 %v7338_v19, %v7337_v26 }
 0x404   : > { %v5957_v63 = vadd.f32 %v7339_v18, %v5852_v35 }
 0x408   : > { %v7393_v28 = vpop.f32.mrb[108].mxu1 }
 0x409   : > { %v7394_v47 = vpop.f32.mrb[109].mxu1 }
 0x40a   : > { %v7395_v20 = vadd.f32 %v7394_v47, %v7393_v28 }
 0x40c   : > { %v12538_v60 = vadd.f32 %v7395_v20, %v5957_v63 }
 0x40f   : > { %v7340_v24 = vpop.f32.mrb[110].mxu0 }
 0x410   : > { %v7341_v7 = vpop.f32.mrb[111].mxu0 }
 0x411   : > { %v7342_v16 = vadd.f32 %v7341_v7, %v7340_v24 }
 0x413   : > { %v5962_v36 = vadd.f32 %v7342_v16, %v5857_v1 }
 0x419   : > { %v7396_v22 = vpop.f32.mrb[110].mxu1 }
 0x41a   : > { %v7397_v46 = vpop.f32.mrb[111].mxu1 }
 0x41b   : > { %v7398_v42 = vadd.f32 %v7397_v46, %v7396_v22 }
 0x41d   : > { %v12540_v25 = vadd.f32 %v7398_v42, %v5962_v36 }
 0x423   : > { %v7431_v48 = vpop.f32.mrb[112].mxu0 }
 0x424   : > { %v7432_v59 = vpop.f32.mrb[113].mxu0 }
 0x425   : > { %v7433_v41 = vadd.f32 %v7432_v59, %v7431_v48 }
 0x427   : > { %v6137_v56 = vadd.f32 %v7433_v41, %v6032_v50 }
 0x42b   : > { %v7487_v11 = vpop.f32.mrb[112].mxu1 }
 0x42c   : > { %v7488_v53 = vpop.f32.mrb[113].mxu1 }
 0x42d   : > { %v7489_v15 = vadd.f32 %v7488_v53, %v7487_v11 }
 0x42f   : > { %v6242_v10 = vadd.f32 %v7489_v15, %v6137_v56 }
 0x431   : > { %6280 = vst [vmem:[%s12546_s19] sm:$0xff] %v6242_v10 }
 0x433   : > { %v7434_v43 = vpop.f32.mrb[114].mxu0 }
 0x434   : > { %v7435_v4 = vpop.f32.mrb[115].mxu0 }
 0x435   : > { %v7436_v0 = vadd.f32 %v7435_v4, %v7434_v43 }
 0x437   : > { %v6142_v30 = vadd.f32 %v7436_v0, %v6037_v6 }
 0x43b   : > { %v7490_v35 = vpop.f32.mrb[114].mxu1 }
 0x43c   : > { %v7491_v51 = vpop.f32.mrb[115].mxu1 }
 0x43d   : > { %v7492_v55 = vadd.f32 %v7491_v51, %v7490_v35 }
 0x43f   : > { %v6247_v62 = vadd.f32 %v7492_v55, %v6142_v30 }
 0x441   : > { %6281 = vst [vmem:[%s12546_s19 + $0x8] sm:$0xff] %v6247_v62 }
 0x444   : > { %v7437_v57 = vpop.f32.mrb[116].mxu0 }
 0x445   : > { %v7438_v13 = vpop.f32.mrb[117].mxu0 }
 0x446   : > { %v7439_v39 = vadd.f32 %v7438_v13, %v7437_v57 }
 0x448   : > { %v6147_v1 = vadd.f32 %v7439_v39, %v12530_v37 }
 0x44c   : > { %v7493_v12 = vpop.f32.mrb[116].mxu1 }
 0x44d   : > { %v7494_v50 = vpop.f32.mrb[117].mxu1 }
 0x44e   : > { %v7495_v33 = vadd.f32 %v7494_v50, %v7493_v12 }
 0x450   : > { %v6252_v49 = vadd.f32 %v7495_v33, %v6147_v1 }
 0x452   : > { %6282 = vst [vmem:[%s12546_s19 + $0x10] sm:$0xff] %v6252_v49 }
 0x454   : > { %v7440_v21 = vpop.f32.mrb[118].mxu0 }
 0x455   : > { %v7441_v17 = vpop.f32.mrb[119].mxu0 }
 0x456   : > { %v7442_v6 = vadd.f32 %v7441_v17, %v7440_v21 }
 0x458   : > { %v6152_v54 = vadd.f32 %v7442_v6, %v12532_v5 }
 0x45b   : > { %v7496_v2 = vpop.f32.mrb[118].mxu1 }
 0x45c   : > { %v7497_v3 = vpop.f32.mrb[119].mxu1 }
 0x45d   : > { %v7498_v27 = vadd.f32 %v7497_v3, %v7496_v2 }
 0x45f   : > { %v6257_v23 = vadd.f32 %v7498_v27, %v6152_v54 }
 0x461   : > { %6283 = vst [vmem:[%s12546_s19 + $0x18] sm:$0xff] %v6257_v23 }
 0x464   : > { %v7443_v31 = vpop.f32.mrb[120].mxu0 }
 0x465   : > { %v7444_v9 = vpop.f32.mrb[121].mxu0 }
 0x466   : > { %v7445_v37 = vadd.f32 %v7444_v9, %v7443_v31 }
 0x468   : > { %v6157_v52 = vadd.f32 %v7445_v37, %v12534_v61 }
 0x46a   : > { %v7499_v40 = vpop.f32.mrb[120].mxu1 }
 0x46b   : > { %v7500_v8 = vpop.f32.mrb[121].mxu1 }
 0x46c   : > { %v7501_v45 = vadd.f32 %v7500_v8, %v7499_v40 }
 0x46e   : > { %v6262_v34 = vadd.f32 %v7501_v45, %v6157_v52 }
 0x470   : > { %6284 = vst [vmem:[%s12546_s19 + $0x20] sm:$0xff] %v6262_v34 }
 0x471   : > { %v7446_v38 = vpop.f32.mrb[122].mxu0 }
 0x472   : > { %v7447_v32 = vpop.f32.mrb[123].mxu0 }
 0x473   : > { %v7448_v5 = vadd.f32 %v7447_v32, %v7446_v38 }
 0x475   : > { %v6162_v58 = vadd.f32 %v7448_v5, %v12536_v14 }
 0x478   : > { %v7502_v44 = vpop.f32.mrb[122].mxu1 }
 0x479   : > { %v7503_v29 = vpop.f32.mrb[123].mxu1 }
 0x47a   : > { %v7504_v26 = vadd.f32 %v7503_v29, %v7502_v44 }
 0x47c   : > { %v6267_v19 = vadd.f32 %v7504_v26, %v6162_v58 }
 0x47e   : > { %6285 = vst [vmem:[%s12546_s19 + $0x28] sm:$0xff] %v6267_v19 }
 0x480   : > { %v7449_v18 = vpop.f32.mrb[124].mxu0 }
 0x481   : > { %v7450_v63 = vpop.f32.mrb[125].mxu0 }
 0x482   : > { %v7451_v61 = vadd.f32 %v7450_v63, %v7449_v18 }
 0x484   : > { %v6167_v28 = vadd.f32 %v7451_v61, %v12538_v60 }
 0x486   : > { %v7505_v47 = vpop.f32.mrb[124].mxu1 }
 0x487   : > { %v7506_v20 = vpop.f32.mrb[125].mxu1 }
 0x488   : > { %v7507_v24 = vadd.f32 %v7506_v20, %v7505_v47 }
 0x48a   : > { %v6272_v7 = vadd.f32 %v7507_v24, %v6167_v28 }
 0x48c   : > { %6286 = vst [vmem:[%s12546_s19 + $0x30] sm:$0xff] %v6272_v7 }
 0x48d   : > { %v7452_v16 = vpop.f32.mrb[126].mxu0 }
 0x48e   : > { %v7453_v36 = vpop.f32.mrb[127].mxu0 }
 0x48f   : > { %v7454_v22 = vadd.f32 %v7453_v36, %v7452_v16 }
 0x491   : > { %v6172_v14 = vadd.f32 %v7454_v22, %v12540_v25 }
 0x494   : > { %v7508_v46 = vpop.f32.mrb[126].mxu1 }
 0x495   : > { %v7509_v42 = vpop.f32.mrb[127].mxu1 }
 0x496   : > { %v7510_v48 = vadd.f32 %v7509_v42, %v7508_v46 }
 0x498   : > { %v6277_v59 = vadd.f32 %v7510_v48, %v6172_v14 }
 0x49a   : > { %6287 = vst [vmem:[%s12546_s19 + $0x38] sm:$0xff] %v6277_v59 }
 0x49b PF: > { %s15_s17 = sadd.s32 1, %s8038_s17  }
 0x49c   : > { %p12_p4 = scmp.ge.s32.totalorder %s15_s17, 4  }
 0x49e   :  { %14 = sbr.rel (!%p12_p4) target bundleno = 2 (0x2), region = 62 }

</bundles_post_ra>
